<compile_context>
chip_gen: v6e
topology: v6e:2x2x1
jax: 0.10.0
libtpu: 0.0.40
codegen_flags: <defaults>
</compile_context>

<pallas_src>
import jax
import jax.numpy as jnp
from jax import lax
from jax.experimental import pallas as pl
from jax.experimental.pallas import tpu as pltpu

N_EMBD = 384
BLOCK_SIZE = 64
N_HEAD = 6
HEAD_SIZE = N_EMBD // N_HEAD          # 64
N_LAYER = 6
FFN_DIM = 4 * N_EMBD                  # 1536
VOCAB_SIZE = 512                      # data-dependent in the original; small, lane-dense value here
LN_EPS = 1e-5
NEG_INF = -1e30                       # large-negative (not -inf) so the kernel is padding-mask safe


def _layer_norm(x, gamma, beta):
    """nn.LayerNorm over the last dim (biased variance, eps=1e-5), f32 math."""
    mu = jnp.mean(x, axis=-1, keepdims=True)
    var = jnp.mean(jnp.square(x - mu), axis=-1, keepdims=True)
    return (x - mu) * lax.rsqrt(var + LN_EPS) * gamma + beta


# --------------------------------------------------------------------------
# Fully fused model kernel: grid = (B, N_LAYER); one batch element per
# "parallel" step, layers iterated on the "arbitrary" axis with the residual
# stream held in VMEM scratch.  LM head runs on the last layer step.
# --------------------------------------------------------------------------
def _fused_model_kernel(x_ref, mask_ref,
                        ln1g_ref, ln1b_ref, wqkv_ref, wproj_ref, bproj_ref,
                        ln2g_ref, ln2b_ref, w1_ref, b1_ref, w2_ref, b2_ref,
                        lmw_ref, lmb_ref,
                        o_ref, x_sc):
    layer = pl.program_id(1)

    # ---- init residual stream from the embedding at layer 0 ----
    @pl.when(layer == 0)
    def _():
        x_sc[...] = x_ref[0]

    x = x_sc[...]                                            # (T, C) f32
    T, C = x.shape

    # ---- LayerNorm 1 (f32) ----
    ln1 = _layer_norm(x, ln1g_ref[0], ln1b_ref[0])

    # ---- Fused QKV projection for ALL heads (single bf16 cast of ln1) ----
    # w_qkv columns: [0:C]=Q (pre-scaled by n_embd**-0.5), [C:2C]=K, [2C:3C]=V.
    qkv = jnp.dot(ln1.astype(jnp.bfloat16), wqkv_ref[0],
                  preferred_element_type=jnp.float32)        # (T, 3C) f32
    qkv_b = qkv.astype(jnp.bfloat16)                         # single cast for all heads

    mask = mask_ref[...]                                     # (T, T) additive causal mask
    wproj = wproj_ref[0]                                     # (C, C) bf16

    # ---- Per-head attention; W_proj folded into the head loop (no concat) ----
    proj = jnp.zeros((T, C), jnp.float32)
    for h in range(N_HEAD):
        lo = h * HEAD_SIZE
        hi = lo + HEAD_SIZE
        qh = qkv_b[:, lo:hi]                                 # scale already folded into W_q
        kh = qkv_b[:, C + lo:C + hi]
        vh = qkv_b[:, 2 * C + lo:2 * C + hi]
        # q @ k^T without materializing a transpose (contract dim 1 with dim 1)
        s = lax.dot_general(qh, kh, (((1,), (1,)), ((), ())),
                            preferred_element_type=jnp.float32) + mask
        m = jnp.max(s, axis=-1, keepdims=True)               # f32 softmax math
        e = jnp.exp(s - m)
        p = e * pl.reciprocal(jnp.sum(e, axis=-1, keepdims=True), approx=True)
        # TODO(synk): nn.Dropout(0.2) on attention weights is identity at
        # inference and is omitted.
        out_h = jnp.dot(p.astype(jnp.bfloat16), vh,
                        preferred_element_type=jnp.float32)  # (T, HEAD_SIZE)
        proj = proj + jnp.dot(out_h.astype(jnp.bfloat16), wproj[lo:hi, :],
                              preferred_element_type=jnp.float32)

    # ---- Output projection bias + residual ----
    x = x + proj + bproj_ref[0]

    # ---- LayerNorm 2 + FeedForward (ReLU MLP) + residual ----
    ln2 = _layer_norm(x, ln2g_ref[0], ln2b_ref[0])
    h1 = jnp.dot(ln2.astype(jnp.bfloat16), w1_ref[0],
                 preferred_element_type=jnp.float32) + b1_ref[0]
    h1 = jnp.maximum(h1, 0.0)
    h2 = jnp.dot(h1.astype(jnp.bfloat16), w2_ref[0],
                 preferred_element_type=jnp.float32) + b2_ref[0]
    x = x + h2
    x_sc[...] = x

    # ---- LM head on the final layer step ----
    # NOTE: the PyTorch forward never applies layer_norm_final; reproduced.
    @pl.when(layer == N_LAYER - 1)
    def _():
        o_ref[0] = jnp.dot(x.astype(jnp.bfloat16), lmw_ref[...],
                           preferred_element_type=jnp.float32) + lmb_ref[...]


def _fused_forward(x_emb, mask, fp):
    B, T, C = x_emb.shape
    V = fp["lm_w"].shape[-1]

    def lyr(shape):
        # per-layer-stacked array: stream block `l` each layer step
        nz = len(shape)
        return pl.BlockSpec((1,) + shape, lambda b, l, _n=nz: (l,) + (0,) * _n)

    def cst(shape):
        # grid-invariant array: constant block, stays VMEM-resident
        nz = len(shape)
        return pl.BlockSpec(shape, lambda b, l, _n=nz: (0,) * _n)

    return pl.pallas_call(
        _fused_model_kernel,
        out_shape=jax.ShapeDtypeStruct((B, T, V), jnp.float32),
        grid_spec=pltpu.PrefetchScalarGridSpec(
            num_scalar_prefetch=0,
            grid=(B, N_LAYER),
            in_specs=[
                pl.BlockSpec((1, T, C), lambda b, l: (b, 0, 0)),   # x (tok+pos emb)
                cst((T, T)),                                       # additive causal mask
                lyr((1, C)),                                       # ln1 gamma
                lyr((1, C)),                                       # ln1 beta
                lyr((C, 3 * C)),                                   # W_qkv (bf16, Q pre-scaled)
                lyr((C, C)),                                       # W_proj (bf16)
                lyr((1, C)),                                       # b_proj
                lyr((1, C)),                                       # ln2 gamma
                lyr((1, C)),                                       # ln2 beta
                lyr((C, FFN_DIM)),                                 # W1 (bf16)
                lyr((1, FFN_DIM)),                                 # b1
                lyr((FFN_DIM, C)),                                 # W2 (bf16)
                lyr((1, C)),                                       # b2
                cst((C, V)),                                       # lm_w (bf16)
                cst((1, V)),                                       # lm_b
            ],
            out_specs=pl.BlockSpec((1, T, V), lambda b, l: (b, 0, 0)),
            scratch_shapes=[pltpu.VMEM((T, C), jnp.float32)],       # residual stream
        ),
        compiler_params=pltpu.CompilerParams(
            # batch-parallel (2 TCs on v7x), layers iterated serially per core
            dimension_semantics=("parallel", "arbitrary"),
            # ~2 layers of streamed weights + activations fit easily in 32 MiB
            vmem_limit_bytes=32 * 1024 * 1024,
        ),
    )(x_emb, mask, fp["ln1_g"], fp["ln1_b"], fp["w_qkv"], fp["w_proj"],
      fp["b_proj"], fp["ln2_g"], fp["ln2_b"], fp["w1"], fp["b1"], fp["w2"],
      fp["b2"], fp["lm_w"], fp["lm_b"])


# --------------------------------------------------------------------------
# Full model forward (targets=None path -> logits only)
# --------------------------------------------------------------------------
@jax.jit
def bigram_lm_forward(idx, fused_params):
    # TODO(synk): token/position embedding lookups are plain-JAX gathers (XLA);
    # a Pallas DMA-gather adds nothing at these sizes.
    T = idx.shape[1]
    x = jnp.take(fused_params["tok_emb"], idx, axis=0) + fused_params["pos_emb"][:T]
    row = lax.broadcasted_iota(jnp.int32, (T, T), 0)
    col = lax.broadcasted_iota(jnp.int32, (T, T), 1)
    mask = jnp.where(col <= row, 0.0, NEG_INF).astype(jnp.float32)
    return _fused_forward(x, mask, fused_params)


# --------------------------------------------------------------------------
# Parameters (canonical, PyTorch-layout) and fused/stacked kernel parameters
# --------------------------------------------------------------------------
def init_params(key):
    w_std = 0.02

    def dense(k, shape):
        return jax.random.normal(k, shape, jnp.float32) * w_std

    ks = jax.random.split(key, 4 + N_LAYER)
    blocks = []
    for i in range(N_LAYER):
        kk = jax.random.split(ks[4 + i], 11)
        blocks.append({
            "ln1_g": 1.0 + 0.1 * jax.random.normal(kk[0], (1, N_EMBD), jnp.float32),
            "ln1_b": 0.1 * jax.random.normal(kk[1], (1, N_EMBD), jnp.float32),
            "w_qkv": dense(kk[2], (N_EMBD, 3 * N_EMBD)).astype(jnp.bfloat16),
            "w_proj": dense(kk[3], (N_EMBD, N_EMBD)).astype(jnp.bfloat16),
            "b_proj": dense(kk[4], (1, N_EMBD)),
            "ln2_g": 1.0 + 0.1 * jax.random.normal(kk[5], (1, N_EMBD), jnp.float32),
            "ln2_b": 0.1 * jax.random.normal(kk[6], (1, N_EMBD), jnp.float32),
            "w1": dense(kk[7], (N_EMBD, FFN_DIM)).astype(jnp.bfloat16),
            "b1": dense(kk[8], (1, FFN_DIM)),
            "w2": dense(kk[9], (FFN_DIM, N_EMBD)).astype(jnp.bfloat16),
            "b2": dense(kk[10], (1, N_EMBD)),
        })
    return {
        "tok_emb": jax.random.normal(ks[0], (VOCAB_SIZE, N_EMBD), jnp.float32),
        "pos_emb": jax.random.normal(ks[1], (BLOCK_SIZE, N_EMBD), jnp.float32),
        "lm_w": dense(ks[2], (N_EMBD, VOCAB_SIZE)).astype(jnp.bfloat16),
        "lm_b": dense(ks[3], (1, VOCAB_SIZE)),
        "blocks": blocks,
    }


def prepare_fused_params(params):
    """Stack per-layer weights with a leading N_LAYER axis and pre-fold the
    attention score scale (n_embd**-0.5) into the Q columns of W_qkv.
    One-time transform; model semantics unchanged."""
    C = N_EMBD
    scale = jnp.float32(C) ** -0.5

    def stack(name):
        return jnp.stack([blk[name] for blk in params["blocks"]], axis=0)

    w_qkv = stack("w_qkv").astype(jnp.float32)
    w_qkv = w_qkv.at[:, :, :C].multiply(scale)
    return {
        "ln1_g": stack("ln1_g"), "ln1_b": stack("ln1_b"),
        "w_qkv": w_qkv.astype(jnp.bfloat16),
        "w_proj": stack("w_proj"),
        "b_proj": stack("b_proj"),
        "ln2_g": stack("ln2_g"), "ln2_b": stack("ln2_b"),
        "w1": stack("w1"), "b1": stack("b1"),
        "w2": stack("w2"), "b2": stack("b2"),
        "lm_w": params["lm_w"], "lm_b": params["lm_b"],
        "tok_emb": params["tok_emb"], "pos_emb": params["pos_emb"],
    }


# --------------------------------------------------------------------------
# Pure-JAX reference (canonical params; same bf16-matmul discipline)
# --------------------------------------------------------------------------
def _mm(a, b):
    return jnp.matmul(a.astype(jnp.bfloat16), b.astype(jnp.bfloat16),
                      preferred_element_type=jnp.float32)


def _reference_forward(idx, params):
    T = idx.shape[1]
    C = N_EMBD
    x = jnp.take(params["tok_emb"], idx, axis=0) + params["pos_emb"][:T]
    causal = jnp.tril(jnp.ones((T, T), dtype=bool))
    for p in params["blocks"]:
        ln1 = _layer_norm(x, p["ln1_g"], p["ln1_b"])
        qkv = _mm(ln1, p["w_qkv"])
        q, k, v = qkv[..., :C], qkv[..., C:2 * C], qkv[..., 2 * C:]
        outs = []
        for h in range(N_HEAD):
            sl = slice(h * HEAD_SIZE, (h + 1) * HEAD_SIZE)
            s = _mm(q[..., sl], jnp.swapaxes(k[..., sl], -2, -1)) * (C ** -0.5)
            s = jnp.where(causal, s, -jnp.inf)
            outs.append(_mm(jax.nn.softmax(s, axis=-1), v[..., sl]))
        attn = jnp.concatenate(outs, axis=-1)
        x = x + _mm(attn, p["w_proj"]) + p["b_proj"]
        ln2 = _layer_norm(x, p["ln2_g"], p["ln2_b"])
        h1 = jax.nn.relu(_mm(ln2, p["w1"]) + p["b1"])
        x = x + _mm(h1, p["w2"]) + p["b2"]
    return _mm(x, params["lm_w"]) + params["lm_b"]


if __name__ == "__main__":
    B, T = 2, BLOCK_SIZE

    key = jax.random.PRNGKey(0)
    k_idx, k_params = jax.random.split(key)
    idx = jax.random.randint(k_idx, (B, T), 0, VOCAB_SIZE, dtype=jnp.int32)
    params = init_params(k_params)
    fused_params = prepare_fused_params(params)

    logits = bigram_lm_forward(idx, fused_params)
    logits = jax.block_until_ready(logits)

    ref = _reference_forward(idx, params)
    assert logits.shape == (B, T, VOCAB_SIZE)
    assert jnp.allclose(logits, ref, atol=2e-2, rtol=2e-2), (
        "mismatch vs reference; max abs err = "
        + str(float(jnp.max(jnp.abs(logits - ref)))))

    print("KERNEL_OK")
</pallas_src>

<mosaic_0001>
module attributes {stable_mosaic.version = 11 : i64} {
  func.func @_fused_model_kernel(%arg0: i32, %arg1: i32, %arg2: memref<1x64x384xf32, #tpu.memory_space<vmem>>, %arg3: memref<64x64xf32, #tpu.memory_space<vmem>>, %arg4: memref<1x1x384xf32, #tpu.memory_space<vmem>>, %arg5: memref<1x1x384xf32, #tpu.memory_space<vmem>>, %arg6: memref<1x384x1152xbf16, #tpu.memory_space<vmem>>, %arg7: memref<1x384x384xbf16, #tpu.memory_space<vmem>>, %arg8: memref<1x1x384xf32, #tpu.memory_space<vmem>>, %arg9: memref<1x1x384xf32, #tpu.memory_space<vmem>>, %arg10: memref<1x1x384xf32, #tpu.memory_space<vmem>>, %arg11: memref<1x384x1536xbf16, #tpu.memory_space<vmem>>, %arg12: memref<1x1x1536xf32, #tpu.memory_space<vmem>>, %arg13: memref<1x1536x384xbf16, #tpu.memory_space<vmem>>, %arg14: memref<1x1x384xf32, #tpu.memory_space<vmem>>, %arg15: memref<384x512xbf16, #tpu.memory_space<vmem>>, %arg16: memref<1x512xf32, #tpu.memory_space<vmem>>, %arg17: memref<1x64x512xf32, #tpu.memory_space<vmem>>, %arg18: memref<64x384xf32, #tpu.memory_space<vmem>>) attributes {dimension_semantics = [#tpu.dimension_semantics<parallel>, #tpu.dimension_semantics<arbitrary>], iteration_bounds = array<i64: 2, 6>, scalar_prefetch = 0 : i64, scratch_operands = 1 : i64, tpu.core_type = #tpu.core_type<tc>, window_params = [{transform_indices = @transform_0, window_bounds = array<i64: 1, 64, 384>}, {pipeline_mode = #tpu.pipeline_mode<synchronous>, transform_indices = @transform_1, window_bounds = array<i64: 64, 64>}, {transform_indices = @transform_2, window_bounds = array<i64: 1, 1, 384>}, {transform_indices = @transform_3, window_bounds = array<i64: 1, 1, 384>}, {transform_indices = @transform_4, window_bounds = array<i64: 1, 384, 1152>}, {transform_indices = @transform_5, window_bounds = array<i64: 1, 384, 384>}, {transform_indices = @transform_6, window_bounds = array<i64: 1, 1, 384>}, {transform_indices = @transform_7, window_bounds = array<i64: 1, 1, 384>}, {transform_indices = @transform_8, window_bounds = array<i64: 1, 1, 384>}, {transform_indices = @transform_9, window_bounds = array<i64: 1, 384, 1536>}, {transform_indices = @transform_10, window_bounds = array<i64: 1, 1, 1536>}, {transform_indices = @transform_11, window_bounds = array<i64: 1, 1536, 384>}, {transform_indices = @transform_12, window_bounds = array<i64: 1, 1, 384>}, {pipeline_mode = #tpu.pipeline_mode<synchronous>, transform_indices = @transform_13, window_bounds = array<i64: 384, 512>}, {pipeline_mode = #tpu.pipeline_mode<synchronous>, transform_indices = @transform_14, window_bounds = array<i64: 1, 512>}, {transform_indices = @transform_15, window_bounds = array<i64: 1, 64, 512>}]} {
    %c0_i32 = arith.constant 0 : i32
    %0 = arith.cmpi eq, %arg1, %c0_i32 : i32
    %1 = arith.extui %0 : i1 to i32
    %c0_i32_0 = arith.constant 0 : i32
    %2 = arith.cmpi ne, %1, %c0_i32_0 : i32
    scf.if %2 {
      %c0_84 = arith.constant 0 : index
      %c0_85 = arith.constant 0 : index
      %c0_86 = arith.constant 0 : index
      %219 = vector.load %arg2[%c0_84, %c0_85, %c0_86] : memref<1x64x384xf32, #tpu.memory_space<vmem>>, vector<1x64x384xf32>
      %220 = vector.shape_cast %219 : vector<1x64x384xf32> to vector<64x384xf32>
      %c0_87 = arith.constant 0 : index
      %c0_88 = arith.constant 0 : index
      %221 = vector.load %arg18[%c0_87, %c0_88] : memref<64x384xf32, #tpu.memory_space<vmem>>, vector<64x384xf32>
      tpu.vector_store %arg18[%c0_87, %c0_88], %220 {strides = array<i32>} : memref<64x384xf32, #tpu.memory_space<vmem>>, vector<64x384xf32>,
    } else {
    }
    %c0 = arith.constant 0 : index
    %c0_1 = arith.constant 0 : index
    %3 = vector.load %arg18[%c0, %c0_1] : memref<64x384xf32, #tpu.memory_space<vmem>>, vector<64x384xf32>
    %c0_2 = arith.constant 0 : index
    %c0_3 = arith.constant 0 : index
    %c0_4 = arith.constant 0 : index
    %4 = vector.load %arg4[%c0_2, %c0_3, %c0_4] : memref<1x1x384xf32, #tpu.memory_space<vmem>>, vector<1x1x384xf32>
    %5 = vector.shape_cast %4 : vector<1x1x384xf32> to vector<1x384xf32>
    %c0_5 = arith.constant 0 : index
    %c0_6 = arith.constant 0 : index
    %c0_7 = arith.constant 0 : index
    %6 = vector.load %arg5[%c0_5, %c0_6, %c0_7] : memref<1x1x384xf32, #tpu.memory_space<vmem>>, vector<1x1x384xf32>
    %7 = vector.shape_cast %6 : vector<1x1x384xf32> to vector<1x384xf32>
    %cst = arith.constant dense<0.000000e+00> : vector<64xf32>
    %8 = vector.multi_reduction <add>, %3, %cst [1] : vector<64x384xf32> to vector<64xf32>
    %9 = vector.shape_cast %8 : vector<64xf32> to vector<64x1xf32>
    %cst_8 = arith.constant 3.840000e+02 : f32
    %10 = vector.broadcast %cst_8 : f32 to vector<64x1xf32>
    %11 = arith.divf %9, %10 : vector<64x1xf32>
    %12 = vector.broadcast %11 : vector<64x1xf32> to vector<64x384xf32>
    %13 = arith.subf %3, %12 : vector<64x384xf32>
    %14 = arith.mulf %13, %13 : vector<64x384xf32>
    %cst_9 = arith.constant dense<0.000000e+00> : vector<64xf32>
    %15 = vector.multi_reduction <add>, %14, %cst_9 [1] : vector<64x384xf32> to vector<64xf32>
    %16 = vector.shape_cast %15 : vector<64xf32> to vector<64x1xf32>
    %cst_10 = arith.constant 3.840000e+02 : f32
    %17 = vector.broadcast %cst_10 : f32 to vector<64x1xf32>
    %18 = arith.divf %16, %17 : vector<64x1xf32>
    %19 = vector.broadcast %11 : vector<64x1xf32> to vector<64x384xf32>
    %20 = arith.subf %3, %19 : vector<64x384xf32>
    %cst_11 = arith.constant 9.99999974E-6 : f32
    %21 = vector.broadcast %cst_11 : f32 to vector<64x1xf32>
    %22 = arith.addf %18, %21 : vector<64x1xf32>
    %23 = math.rsqrt %22 : vector<64x1xf32>
    %24 = vector.broadcast %23 : vector<64x1xf32> to vector<64x384xf32>
    %25 = arith.mulf %20, %24 : vector<64x384xf32>
    %26 = vector.broadcast %5 : vector<1x384xf32> to vector<64x384xf32>
    %27 = arith.mulf %25, %26 : vector<64x384xf32>
    %28 = vector.broadcast %7 : vector<1x384xf32> to vector<64x384xf32>
    %29 = arith.addf %27, %28 : vector<64x384xf32>
    %30 = arith.truncf %29 : vector<64x384xf32> to vector<64x384xbf16>
    %c0_12 = arith.constant 0 : index
    %c0_13 = arith.constant 0 : index
    %c0_14 = arith.constant 0 : index
    %31 = vector.load %arg6[%c0_12, %c0_13, %c0_14] : memref<1x384x1152xbf16, #tpu.memory_space<vmem>>, vector<1x384x1152xbf16>
    %32 = vector.shape_cast %31 : vector<1x384x1152xbf16> to vector<384x1152xbf16>
    %cst_15 = arith.constant dense<0.000000e+00> : vector<64x1152xf32>
    %33 = tpu.matmul %30, %32, %cst_15 {dimension_numbers = #tpu.dot_dimension_numbers<[1], [0], [0], [1], [0, 0, 1, 1], [], []>} : vector<64x384xbf16>, vector<384x1152xbf16>, vector<64x1152xf32> -> vector<64x1152xf32>
    %34 = arith.truncf %33 : vector<64x1152xf32> to vector<64x1152xbf16>
    %c0_16 = arith.constant 0 : index
    %c0_17 = arith.constant 0 : index
    %35 = vector.load %arg3[%c0_16, %c0_17] : memref<64x64xf32, #tpu.memory_space<vmem>>, vector<64x64xf32>
    %c0_18 = arith.constant 0 : index
    %c0_19 = arith.constant 0 : index
    %c0_20 = arith.constant 0 : index
    %36 = vector.load %arg7[%c0_18, %c0_19, %c0_20] : memref<1x384x384xbf16, #tpu.memory_space<vmem>>, vector<1x384x384xbf16>
    %37 = vector.shape_cast %36 : vector<1x384x384xbf16> to vector<384x384xbf16>
    %cst_21 = arith.constant 0.000000e+00 : f32
    %38 = vector.broadcast %cst_21 : f32 to vector<64x384xf32>
    %39 = vector.extract_strided_slice %34 {offsets = [0, 0], sizes = [64, 64], strides = [1, 1]} : vector<64x1152xbf16> to vector<64x64xbf16>
    %40 = vector.extract_strided_slice %34 {offsets = [0, 384], sizes = [64, 64], strides = [1, 1]} : vector<64x1152xbf16> to vector<64x64xbf16>
    %41 = vector.extract_strided_slice %34 {offsets = [0, 768], sizes = [64, 64], strides = [1, 1]} : vector<64x1152xbf16> to vector<64x64xbf16>
    %cst_22 = arith.constant dense<0.000000e+00> : vector<64x64xf32>
    %42 = tpu.matmul %39, %40, %cst_22 {dimension_numbers = #tpu.dot_dimension_numbers<[1], [1], [0], [0], [0, 0, 1, 0], [], []>} : vector<64x64xbf16>, vector<64x64xbf16>, vector<64x64xf32> -> vector<64x64xf32>
    %43 = arith.addf %42, %35 : vector<64x64xf32>
    %cst_23 = arith.constant dense<0xFF800000> : vector<64xf32>
    %44 = vector.multi_reduction <maximumf>, %43, %cst_23 [1] : vector<64x64xf32> to vector<64xf32>
    %45 = vector.shape_cast %44 : vector<64xf32> to vector<64x1xf32>
    %46 = vector.broadcast %45 : vector<64x1xf32> to vector<64x64xf32>
    %47 = arith.subf %43, %46 : vector<64x64xf32>
    %48 = math.exp %47 : vector<64x64xf32>
    %cst_24 = arith.constant dense<0.000000e+00> : vector<64xf32>
    %49 = vector.multi_reduction <add>, %48, %cst_24 [1] : vector<64x64xf32> to vector<64xf32>
    %50 = vector.shape_cast %49 : vector<64xf32> to vector<64x1xf32>
    %51 = tpu.reciprocal %50 {approx = true} : vector<64x1xf32> -> vector<64x1xf32>
    %52 = vector.broadcast %51 : vector<64x1xf32> to vector<64x64xf32>
    %53 = arith.mulf %48, %52 : vector<64x64xf32>
    %54 = arith.truncf %53 : vector<64x64xf32> to vector<64x64xbf16>
    %cst_25 = arith.constant dense<0.000000e+00> : vector<64x64xf32>
    %55 = tpu.matmul %54, %41, %cst_25 {dimension_numbers = #tpu.dot_dimension_numbers<[1], [0], [0], [1], [0, 0, 1, 1], [], []>} : vector<64x64xbf16>, vector<64x64xbf16>, vector<64x64xf32> -> vector<64x64xf32>
    %56 = arith.truncf %55 : vector<64x64xf32> to vector<64x64xbf16>
    %57 = vector.extract_strided_slice %37 {offsets = [0, 0], sizes = [64, 384], strides = [1, 1]} : vector<384x384xbf16> to vector<64x384xbf16>
    %cst_26 = arith.constant dense<0.000000e+00> : vector<64x384xf32>
    %58 = tpu.matmul %56, %57, %cst_26 {dimension_numbers = #tpu.dot_dimension_numbers<[1], [0], [0], [1], [0, 0, 1, 1], [], []>} : vector<64x64xbf16>, vector<64x384xbf16>, vector<64x384xf32> -> vector<64x384xf32>
    %59 = arith.addf %38, %58 : vector<64x384xf32>
    %60 = vector.extract_strided_slice %34 {offsets = [0, 64], sizes = [64, 64], strides = [1, 1]} : vector<64x1152xbf16> to vector<64x64xbf16>
    %61 = vector.extract_strided_slice %34 {offsets = [0, 448], sizes = [64, 64], strides = [1, 1]} : vector<64x1152xbf16> to vector<64x64xbf16>
    %62 = vector.extract_strided_slice %34 {offsets = [0, 832], sizes = [64, 64], strides = [1, 1]} : vector<64x1152xbf16> to vector<64x64xbf16>
    %cst_27 = arith.constant dense<0.000000e+00> : vector<64x64xf32>
    %63 = tpu.matmul %60, %61, %cst_27 {dimension_numbers = #tpu.dot_dimension_numbers<[1], [1], [0], [0], [0, 0, 1, 0], [], []>} : vector<64x64xbf16>, vector<64x64xbf16>, vector<64x64xf32> -> vector<64x64xf32>
    %64 = arith.addf %63, %35 : vector<64x64xf32>
    %cst_28 = arith.constant dense<0xFF800000> : vector<64xf32>
    %65 = vector.multi_reduction <maximumf>, %64, %cst_28 [1] : vector<64x64xf32> to vector<64xf32>
    %66 = vector.shape_cast %65 : vector<64xf32> to vector<64x1xf32>
    %67 = vector.broadcast %66 : vector<64x1xf32> to vector<64x64xf32>
    %68 = arith.subf %64, %67 : vector<64x64xf32>
    %69 = math.exp %68 : vector<64x64xf32>
    %cst_29 = arith.constant dense<0.000000e+00> : vector<64xf32>
    %70 = vector.multi_reduction <add>, %69, %cst_29 [1] : vector<64x64xf32> to vector<64xf32>
    %71 = vector.shape_cast %70 : vector<64xf32> to vector<64x1xf32>
    %72 = tpu.reciprocal %71 {approx = true} : vector<64x1xf32> -> vector<64x1xf32>
    %73 = vector.broadcast %72 : vector<64x1xf32> to vector<64x64xf32>
    %74 = arith.mulf %69, %73 : vector<64x64xf32>
    %75 = arith.truncf %74 : vector<64x64xf32> to vector<64x64xbf16>
    %cst_30 = arith.constant dense<0.000000e+00> : vector<64x64xf32>
    %76 = tpu.matmul %75, %62, %cst_30 {dimension_numbers = #tpu.dot_dimension_numbers<[1], [0], [0], [1], [0, 0, 1, 1], [], []>} : vector<64x64xbf16>, vector<64x64xbf16>, vector<64x64xf32> -> vector<64x64xf32>
    %77 = arith.truncf %76 : vector<64x64xf32> to vector<64x64xbf16>
    %78 = vector.extract_strided_slice %37 {offsets = [64, 0], sizes = [64, 384], strides = [1, 1]} : vector<384x384xbf16> to vector<64x384xbf16>
    %cst_31 = arith.constant dense<0.000000e+00> : vector<64x384xf32>
    %79 = tpu.matmul %77, %78, %cst_31 {dimension_numbers = #tpu.dot_dimension_numbers<[1], [0], [0], [1], [0, 0, 1, 1], [], []>} : vector<64x64xbf16>, vector<64x384xbf16>, vector<64x384xf32> -> vector<64x384xf32>
    %80 = arith.addf %59, %79 : vector<64x384xf32>
    %81 = vector.extract_strided_slice %34 {offsets = [0, 128], sizes = [64, 64], strides = [1, 1]} : vector<64x1152xbf16> to vector<64x64xbf16>
    %82 = vector.extract_strided_slice %34 {offsets = [0, 512], sizes = [64, 64], strides = [1, 1]} : vector<64x1152xbf16> to vector<64x64xbf16>
    %83 = vector.extract_strided_slice %34 {offsets = [0, 896], sizes = [64, 64], strides = [1, 1]} : vector<64x1152xbf16> to vector<64x64xbf16>
    %cst_32 = arith.constant dense<0.000000e+00> : vector<64x64xf32>
    %84 = tpu.matmul %81, %82, %cst_32 {dimension_numbers = #tpu.dot_dimension_numbers<[1], [1], [0], [0], [0, 0, 1, 0], [], []>} : vector<64x64xbf16>, vector<64x64xbf16>, vector<64x64xf32> -> vector<64x64xf32>
    %85 = arith.addf %84, %35 : vector<64x64xf32>
    %cst_33 = arith.constant dense<0xFF800000> : vector<64xf32>
    %86 = vector.multi_reduction <maximumf>, %85, %cst_33 [1] : vector<64x64xf32> to vector<64xf32>
    %87 = vector.shape_cast %86 : vector<64xf32> to vector<64x1xf32>
    %88 = vector.broadcast %87 : vector<64x1xf32> to vector<64x64xf32>
    %89 = arith.subf %85, %88 : vector<64x64xf32>
    %90 = math.exp %89 : vector<64x64xf32>
    %cst_34 = arith.constant dense<0.000000e+00> : vector<64xf32>
    %91 = vector.multi_reduction <add>, %90, %cst_34 [1] : vector<64x64xf32> to vector<64xf32>
    %92 = vector.shape_cast %91 : vector<64xf32> to vector<64x1xf32>
    %93 = tpu.reciprocal %92 {approx = true} : vector<64x1xf32> -> vector<64x1xf32>
    %94 = vector.broadcast %93 : vector<64x1xf32> to vector<64x64xf32>
    %95 = arith.mulf %90, %94 : vector<64x64xf32>
    %96 = arith.truncf %95 : vector<64x64xf32> to vector<64x64xbf16>
    %cst_35 = arith.constant dense<0.000000e+00> : vector<64x64xf32>
    %97 = tpu.matmul %96, %83, %cst_35 {dimension_numbers = #tpu.dot_dimension_numbers<[1], [0], [0], [1], [0, 0, 1, 1], [], []>} : vector<64x64xbf16>, vector<64x64xbf16>, vector<64x64xf32> -> vector<64x64xf32>
    %98 = arith.truncf %97 : vector<64x64xf32> to vector<64x64xbf16>
    %99 = vector.extract_strided_slice %37 {offsets = [128, 0], sizes = [64, 384], strides = [1, 1]} : vector<384x384xbf16> to vector<64x384xbf16>
    %cst_36 = arith.constant dense<0.000000e+00> : vector<64x384xf32>
    %100 = tpu.matmul %98, %99, %cst_36 {dimension_numbers = #tpu.dot_dimension_numbers<[1], [0], [0], [1], [0, 0, 1, 1], [], []>} : vector<64x64xbf16>, vector<64x384xbf16>, vector<64x384xf32> -> vector<64x384xf32>
    %101 = arith.addf %80, %100 : vector<64x384xf32>
    %102 = vector.extract_strided_slice %34 {offsets = [0, 192], sizes = [64, 64], strides = [1, 1]} : vector<64x1152xbf16> to vector<64x64xbf16>
    %103 = vector.extract_strided_slice %34 {offsets = [0, 576], sizes = [64, 64], strides = [1, 1]} : vector<64x1152xbf16> to vector<64x64xbf16>
    %104 = vector.extract_strided_slice %34 {offsets = [0, 960], sizes = [64, 64], strides = [1, 1]} : vector<64x1152xbf16> to vector<64x64xbf16>
    %cst_37 = arith.constant dense<0.000000e+00> : vector<64x64xf32>
    %105 = tpu.matmul %102, %103, %cst_37 {dimension_numbers = #tpu.dot_dimension_numbers<[1], [1], [0], [0], [0, 0, 1, 0], [], []>} : vector<64x64xbf16>, vector<64x64xbf16>, vector<64x64xf32> -> vector<64x64xf32>
    %106 = arith.addf %105, %35 : vector<64x64xf32>
    %cst_38 = arith.constant dense<0xFF800000> : vector<64xf32>
    %107 = vector.multi_reduction <maximumf>, %106, %cst_38 [1] : vector<64x64xf32> to vector<64xf32>
    %108 = vector.shape_cast %107 : vector<64xf32> to vector<64x1xf32>
    %109 = vector.broadcast %108 : vector<64x1xf32> to vector<64x64xf32>
    %110 = arith.subf %106, %109 : vector<64x64xf32>
    %111 = math.exp %110 : vector<64x64xf32>
    %cst_39 = arith.constant dense<0.000000e+00> : vector<64xf32>
    %112 = vector.multi_reduction <add>, %111, %cst_39 [1] : vector<64x64xf32> to vector<64xf32>
    %113 = vector.shape_cast %112 : vector<64xf32> to vector<64x1xf32>
    %114 = tpu.reciprocal %113 {approx = true} : vector<64x1xf32> -> vector<64x1xf32>
    %115 = vector.broadcast %114 : vector<64x1xf32> to vector<64x64xf32>
    %116 = arith.mulf %111, %115 : vector<64x64xf32>
    %117 = arith.truncf %116 : vector<64x64xf32> to vector<64x64xbf16>
    %cst_40 = arith.constant dense<0.000000e+00> : vector<64x64xf32>
    %118 = tpu.matmul %117, %104, %cst_40 {dimension_numbers = #tpu.dot_dimension_numbers<[1], [0], [0], [1], [0, 0, 1, 1], [], []>} : vector<64x64xbf16>, vector<64x64xbf16>, vector<64x64xf32> -> vector<64x64xf32>
    %119 = arith.truncf %118 : vector<64x64xf32> to vector<64x64xbf16>
    %120 = vector.extract_strided_slice %37 {offsets = [192, 0], sizes = [64, 384], strides = [1, 1]} : vector<384x384xbf16> to vector<64x384xbf16>
    %cst_41 = arith.constant dense<0.000000e+00> : vector<64x384xf32>
    %121 = tpu.matmul %119, %120, %cst_41 {dimension_numbers = #tpu.dot_dimension_numbers<[1], [0], [0], [1], [0, 0, 1, 1], [], []>} : vector<64x64xbf16>, vector<64x384xbf16>, vector<64x384xf32> -> vector<64x384xf32>
    %122 = arith.addf %101, %121 : vector<64x384xf32>
    %123 = vector.extract_strided_slice %34 {offsets = [0, 256], sizes = [64, 64], strides = [1, 1]} : vector<64x1152xbf16> to vector<64x64xbf16>
    %124 = vector.extract_strided_slice %34 {offsets = [0, 640], sizes = [64, 64], strides = [1, 1]} : vector<64x1152xbf16> to vector<64x64xbf16>
    %125 = vector.extract_strided_slice %34 {offsets = [0, 1024], sizes = [64, 64], strides = [1, 1]} : vector<64x1152xbf16> to vector<64x64xbf16>
    %cst_42 = arith.constant dense<0.000000e+00> : vector<64x64xf32>
    %126 = tpu.matmul %123, %124, %cst_42 {dimension_numbers = #tpu.dot_dimension_numbers<[1], [1], [0], [0], [0, 0, 1, 0], [], []>} : vector<64x64xbf16>, vector<64x64xbf16>, vector<64x64xf32> -> vector<64x64xf32>
    %127 = arith.addf %126, %35 : vector<64x64xf32>
    %cst_43 = arith.constant dense<0xFF800000> : vector<64xf32>
    %128 = vector.multi_reduction <maximumf>, %127, %cst_43 [1] : vector<64x64xf32> to vector<64xf32>
    %129 = vector.shape_cast %128 : vector<64xf32> to vector<64x1xf32>
    %130 = vector.broadcast %129 : vector<64x1xf32> to vector<64x64xf32>
    %131 = arith.subf %127, %130 : vector<64x64xf32>
    %132 = math.exp %131 : vector<64x64xf32>
    %cst_44 = arith.constant dense<0.000000e+00> : vector<64xf32>
    %133 = vector.multi_reduction <add>, %132, %cst_44 [1] : vector<64x64xf32> to vector<64xf32>
    %134 = vector.shape_cast %133 : vector<64xf32> to vector<64x1xf32>
    %135 = tpu.reciprocal %134 {approx = true} : vector<64x1xf32> -> vector<64x1xf32>
    %136 = vector.broadcast %135 : vector<64x1xf32> to vector<64x64xf32>
    %137 = arith.mulf %132, %136 : vector<64x64xf32>
    %138 = arith.truncf %137 : vector<64x64xf32> to vector<64x64xbf16>
    %cst_45 = arith.constant dense<0.000000e+00> : vector<64x64xf32>
    %139 = tpu.matmul %138, %125, %cst_45 {dimension_numbers = #tpu.dot_dimension_numbers<[1], [0], [0], [1], [0, 0, 1, 1], [], []>} : vector<64x64xbf16>, vector<64x64xbf16>, vector<64x64xf32> -> vector<64x64xf32>
    %140 = arith.truncf %139 : vector<64x64xf32> to vector<64x64xbf16>
    %141 = vector.extract_strided_slice %37 {offsets = [256, 0], sizes = [64, 384], strides = [1, 1]} : vector<384x384xbf16> to vector<64x384xbf16>
    %cst_46 = arith.constant dense<0.000000e+00> : vector<64x384xf32>
    %142 = tpu.matmul %140, %141, %cst_46 {dimension_numbers = #tpu.dot_dimension_numbers<[1], [0], [0], [1], [0, 0, 1, 1], [], []>} : vector<64x64xbf16>, vector<64x384xbf16>, vector<64x384xf32> -> vector<64x384xf32>
    %143 = arith.addf %122, %142 : vector<64x384xf32>
    %144 = vector.extract_strided_slice %34 {offsets = [0, 320], sizes = [64, 64], strides = [1, 1]} : vector<64x1152xbf16> to vector<64x64xbf16>
    %145 = vector.extract_strided_slice %34 {offsets = [0, 704], sizes = [64, 64], strides = [1, 1]} : vector<64x1152xbf16> to vector<64x64xbf16>
    %146 = vector.extract_strided_slice %34 {offsets = [0, 1088], sizes = [64, 64], strides = [1, 1]} : vector<64x1152xbf16> to vector<64x64xbf16>
    %cst_47 = arith.constant dense<0.000000e+00> : vector<64x64xf32>
    %147 = tpu.matmul %144, %145, %cst_47 {dimension_numbers = #tpu.dot_dimension_numbers<[1], [1], [0], [0], [0, 0, 1, 0], [], []>} : vector<64x64xbf16>, vector<64x64xbf16>, vector<64x64xf32> -> vector<64x64xf32>
    %148 = arith.addf %147, %35 : vector<64x64xf32>
    %cst_48 = arith.constant dense<0xFF800000> : vector<64xf32>
    %149 = vector.multi_reduction <maximumf>, %148, %cst_48 [1] : vector<64x64xf32> to vector<64xf32>
    %150 = vector.shape_cast %149 : vector<64xf32> to vector<64x1xf32>
    %151 = vector.broadcast %150 : vector<64x1xf32> to vector<64x64xf32>
    %152 = arith.subf %148, %151 : vector<64x64xf32>
    %153 = math.exp %152 : vector<64x64xf32>
    %cst_49 = arith.constant dense<0.000000e+00> : vector<64xf32>
    %154 = vector.multi_reduction <add>, %153, %cst_49 [1] : vector<64x64xf32> to vector<64xf32>
    %155 = vector.shape_cast %154 : vector<64xf32> to vector<64x1xf32>
    %156 = tpu.reciprocal %155 {approx = true} : vector<64x1xf32> -> vector<64x1xf32>
    %157 = vector.broadcast %156 : vector<64x1xf32> to vector<64x64xf32>
    %158 = arith.mulf %153, %157 : vector<64x64xf32>
    %159 = arith.truncf %158 : vector<64x64xf32> to vector<64x64xbf16>
    %cst_50 = arith.constant dense<0.000000e+00> : vector<64x64xf32>
    %160 = tpu.matmul %159, %146, %cst_50 {dimension_numbers = #tpu.dot_dimension_numbers<[1], [0], [0], [1], [0, 0, 1, 1], [], []>} : vector<64x64xbf16>, vector<64x64xbf16>, vector<64x64xf32> -> vector<64x64xf32>
    %161 = arith.truncf %160 : vector<64x64xf32> to vector<64x64xbf16>
    %162 = vector.extract_strided_slice %37 {offsets = [320, 0], sizes = [64, 384], strides = [1, 1]} : vector<384x384xbf16> to vector<64x384xbf16>
    %cst_51 = arith.constant dense<0.000000e+00> : vector<64x384xf32>
    %163 = tpu.matmul %161, %162, %cst_51 {dimension_numbers = #tpu.dot_dimension_numbers<[1], [0], [0], [1], [0, 0, 1, 1], [], []>} : vector<64x64xbf16>, vector<64x384xbf16>, vector<64x384xf32> -> vector<64x384xf32>
    %164 = arith.addf %143, %163 : vector<64x384xf32>
    %165 = arith.addf %3, %164 : vector<64x384xf32>
    %c0_52 = arith.constant 0 : index
    %c0_53 = arith.constant 0 : index
    %c0_54 = arith.constant 0 : index
    %166 = vector.load %arg8[%c0_52, %c0_53, %c0_54] : memref<1x1x384xf32, #tpu.memory_space<vmem>>, vector<1x1x384xf32>
    %167 = vector.shape_cast %166 : vector<1x1x384xf32> to vector<1x384xf32>
    %168 = vector.broadcast %167 : vector<1x384xf32> to vector<64x384xf32>
    %169 = arith.addf %165, %168 : vector<64x384xf32>
    %c0_55 = arith.constant 0 : index
    %c0_56 = arith.constant 0 : index
    %c0_57 = arith.constant 0 : index
    %170 = vector.load %arg9[%c0_55, %c0_56, %c0_57] : memref<1x1x384xf32, #tpu.memory_space<vmem>>, vector<1x1x384xf32>
    %171 = vector.shape_cast %170 : vector<1x1x384xf32> to vector<1x384xf32>
    %c0_58 = arith.constant 0 : index
    %c0_59 = arith.constant 0 : index
    %c0_60 = arith.constant 0 : index
    %172 = vector.load %arg10[%c0_58, %c0_59, %c0_60] : memref<1x1x384xf32, #tpu.memory_space<vmem>>, vector<1x1x384xf32>
    %173 = vector.shape_cast %172 : vector<1x1x384xf32> to vector<1x384xf32>
    %cst_61 = arith.constant dense<0.000000e+00> : vector<64xf32>
    %174 = vector.multi_reduction <add>, %169, %cst_61 [1] : vector<64x384xf32> to vector<64xf32>
    %175 = vector.shape_cast %174 : vector<64xf32> to vector<64x1xf32>
    %cst_62 = arith.constant 3.840000e+02 : f32
    %176 = vector.broadcast %cst_62 : f32 to vector<64x1xf32>
    %177 = arith.divf %175, %176 : vector<64x1xf32>
    %178 = vector.broadcast %177 : vector<64x1xf32> to vector<64x384xf32>
    %179 = arith.subf %169, %178 : vector<64x384xf32>
    %180 = arith.mulf %179, %179 : vector<64x384xf32>
    %cst_63 = arith.constant dense<0.000000e+00> : vector<64xf32>
    %181 = vector.multi_reduction <add>, %180, %cst_63 [1] : vector<64x384xf32> to vector<64xf32>
    %182 = vector.shape_cast %181 : vector<64xf32> to vector<64x1xf32>
    %cst_64 = arith.constant 3.840000e+02 : f32
    %183 = vector.broadcast %cst_64 : f32 to vector<64x1xf32>
    %184 = arith.divf %182, %183 : vector<64x1xf32>
    %185 = vector.broadcast %177 : vector<64x1xf32> to vector<64x384xf32>
    %186 = arith.subf %169, %185 : vector<64x384xf32>
    %cst_65 = arith.constant 9.99999974E-6 : f32
    %187 = vector.broadcast %cst_65 : f32 to vector<64x1xf32>
    %188 = arith.addf %184, %187 : vector<64x1xf32>
    %189 = math.rsqrt %188 : vector<64x1xf32>
    %190 = vector.broadcast %189 : vector<64x1xf32> to vector<64x384xf32>
    %191 = arith.mulf %186, %190 : vector<64x384xf32>
    %192 = vector.broadcast %171 : vector<1x384xf32> to vector<64x384xf32>
    %193 = arith.mulf %191, %192 : vector<64x384xf32>
    %194 = vector.broadcast %173 : vector<1x384xf32> to vector<64x384xf32>
    %195 = arith.addf %193, %194 : vector<64x384xf32>
    %196 = arith.truncf %195 : vector<64x384xf32> to vector<64x384xbf16>
    %c0_66 = arith.constant 0 : index
    %c0_67 = arith.constant 0 : index
    %c0_68 = arith.constant 0 : index
    %197 = vector.load %arg11[%c0_66, %c0_67, %c0_68] : memref<1x384x1536xbf16, #tpu.memory_space<vmem>>, vector<1x384x1536xbf16>
    %198 = vector.shape_cast %197 : vector<1x384x1536xbf16> to vector<384x1536xbf16>
    %cst_69 = arith.constant dense<0.000000e+00> : vector<64x1536xf32>
    %199 = tpu.matmul %196, %198, %cst_69 {dimension_numbers = #tpu.dot_dimension_numbers<[1], [0], [0], [1], [0, 0, 1, 1], [], []>} : vector<64x384xbf16>, vector<384x1536xbf16>, vector<64x1536xf32> -> vector<64x1536xf32>
    %c0_70 = arith.constant 0 : index
    %c0_71 = arith.constant 0 : index
    %c0_72 = arith.constant 0 : index
    %200 = vector.load %arg12[%c0_70, %c0_71, %c0_72] : memref<1x1x1536xf32, #tpu.memory_space<vmem>>, vector<1x1x1536xf32>
    %201 = vector.shape_cast %200 : vector<1x1x1536xf32> to vector<1x1536xf32>
    %202 = vector.broadcast %201 : vector<1x1536xf32> to vector<64x1536xf32>
    %203 = arith.addf %199, %202 : vector<64x1536xf32>
    %cst_73 = arith.constant 0.000000e+00 : f32
    %204 = vector.broadcast %cst_73 : f32 to vector<64x1536xf32>
    %205 = arith.maximumf %203, %204 : vector<64x1536xf32>
    %206 = arith.truncf %205 : vector<64x1536xf32> to vector<64x1536xbf16>
    %c0_74 = arith.constant 0 : index
    %c0_75 = arith.constant 0 : index
    %c0_76 = arith.constant 0 : index
    %207 = vector.load %arg13[%c0_74, %c0_75, %c0_76] : memref<1x1536x384xbf16, #tpu.memory_space<vmem>>, vector<1x1536x384xbf16>
    %208 = vector.shape_cast %207 : vector<1x1536x384xbf16> to vector<1536x384xbf16>
    %cst_77 = arith.constant dense<0.000000e+00> : vector<64x384xf32>
    %209 = tpu.matmul %206, %208, %cst_77 {dimension_numbers = #tpu.dot_dimension_numbers<[1], [0], [0], [1], [0, 0, 1, 1], [], []>} : vector<64x1536xbf16>, vector<1536x384xbf16>, vector<64x384xf32> -> vector<64x384xf32>
    %c0_78 = arith.constant 0 : index
    %c0_79 = arith.constant 0 : index
    %c0_80 = arith.constant 0 : index
    %210 = vector.load %arg14[%c0_78, %c0_79, %c0_80] : memref<1x1x384xf32, #tpu.memory_space<vmem>>, vector<1x1x384xf32>
    %211 = vector.shape_cast %210 : vector<1x1x384xf32> to vector<1x384xf32>
    %212 = vector.broadcast %211 : vector<1x384xf32> to vector<64x384xf32>
    %213 = arith.addf %209, %212 : vector<64x384xf32>
    %214 = arith.addf %169, %213 : vector<64x384xf32>
    %c0_81 = arith.constant 0 : index
    %c0_82 = arith.constant 0 : index
    %215 = vector.load %arg18[%c0_81, %c0_82] : memref<64x384xf32, #tpu.memory_space<vmem>>, vector<64x384xf32>
    tpu.vector_store %arg18[%c0_81, %c0_82], %214 {strides = array<i32>} : memref<64x384xf32, #tpu.memory_space<vmem>>, vector<64x384xf32>,
    %c5_i32 = arith.constant 5 : i32
    %216 = arith.cmpi eq, %arg1, %c5_i32 : i32
    %217 = arith.extui %216 : i1 to i32
    %c0_i32_83 = arith.constant 0 : i32
    %218 = arith.cmpi ne, %217, %c0_i32_83 : i32
    scf.if %218 {
      %219 = arith.truncf %214 : vector<64x384xf32> to vector<64x384xbf16>
      %c0_84 = arith.constant 0 : index
      %c0_85 = arith.constant 0 : index
      %220 = vector.load %arg15[%c0_84, %c0_85] : memref<384x512xbf16, #tpu.memory_space<vmem>>, vector<384x512xbf16>
      %cst_86 = arith.constant dense<0.000000e+00> : vector<64x512xf32>
      %221 = tpu.matmul %219, %220, %cst_86 {dimension_numbers = #tpu.dot_dimension_numbers<[1], [0], [0], [1], [0, 0, 1, 1], [], []>} : vector<64x384xbf16>, vector<384x512xbf16>, vector<64x512xf32> -> vector<64x512xf32>
      %c0_87 = arith.constant 0 : index
      %c0_88 = arith.constant 0 : index
      %222 = vector.load %arg16[%c0_87, %c0_88] : memref<1x512xf32, #tpu.memory_space<vmem>>, vector<1x512xf32>
      %223 = vector.broadcast %222 : vector<1x512xf32> to vector<64x512xf32>
      %224 = arith.addf %221, %223 : vector<64x512xf32>
      %c0_89 = arith.constant 0 : index
      %c0_90 = arith.constant 0 : index
      %c0_91 = arith.constant 0 : index
      %225 = vector.load %arg17[%c0_89, %c0_90, %c0_91] : memref<1x64x512xf32, #tpu.memory_space<vmem>>, vector<1x64x512xf32>
      %226 = vector.shape_cast %225 : vector<1x64x512xf32> to vector<64x512xf32>
      %227 = vector.shape_cast %224 : vector<64x512xf32> to vector<1x64x512xf32>
      tpu.vector_store %arg17[%c0_89, %c0_90, %c0_91], %227 {strides = array<i32>} : memref<1x64x512xf32, #tpu.memory_space<vmem>>, vector<1x64x512xf32>,
    } else {
    }
    return
  }
  func.func @transform_0(%arg0: i32, %arg1: i32) -> (i32, i32, i32) {
    %c0_i32 = arith.constant 0 : i32
    %c0_i32_0 = arith.constant 0 : i32
    %c0_i32_1 = arith.constant 0 : i32
    return %arg0, %c0_i32, %c0_i32_0 : i32, i32, i32
  }
  func.func @transform_1(%arg0: i32, %arg1: i32) -> (i32, i32) {
    %c0_i32 = arith.constant 0 : i32
    %c0_i32_0 = arith.constant 0 : i32
    %c0_i32_1 = arith.constant 0 : i32
    return %c0_i32, %c0_i32_0 : i32, i32
  }
  func.func @transform_2(%arg0: i32, %arg1: i32) -> (i32, i32, i32) {
    %c0_i32 = arith.constant 0 : i32
    %c0_i32_0 = arith.constant 0 : i32
    %c0_i32_1 = arith.constant 0 : i32
    return %arg1, %c0_i32, %c0_i32_0 : i32, i32, i32
  }
  func.func @transform_3(%arg0: i32, %arg1: i32) -> (i32, i32, i32) {
    %c0_i32 = arith.constant 0 : i32
    %c0_i32_0 = arith.constant 0 : i32
    %c0_i32_1 = arith.constant 0 : i32
    return %arg1, %c0_i32, %c0_i32_0 : i32, i32, i32
  }
  func.func @transform_4(%arg0: i32, %arg1: i32) -> (i32, i32, i32) {
    %c0_i32 = arith.constant 0 : i32
    %c0_i32_0 = arith.constant 0 : i32
    %c0_i32_1 = arith.constant 0 : i32
    return %arg1, %c0_i32, %c0_i32_0 : i32, i32, i32
  }
  func.func @transform_5(%arg0: i32, %arg1: i32) -> (i32, i32, i32) {
    %c0_i32 = arith.constant 0 : i32
    %c0_i32_0 = arith.constant 0 : i32
    %c0_i32_1 = arith.constant 0 : i32
    return %arg1, %c0_i32, %c0_i32_0 : i32, i32, i32
  }
  func.func @transform_6(%arg0: i32, %arg1: i32) -> (i32, i32, i32) {
    %c0_i32 = arith.constant 0 : i32
    %c0_i32_0 = arith.constant 0 : i32
    %c0_i32_1 = arith.constant 0 : i32
    return %arg1, %c0_i32, %c0_i32_0 : i32, i32, i32
  }
  func.func @transform_7(%arg0: i32, %arg1: i32) -> (i32, i32, i32) {
    %c0_i32 = arith.constant 0 : i32
    %c0_i32_0 = arith.constant 0 : i32
    %c0_i32_1 = arith.constant 0 : i32
    return %arg1, %c0_i32, %c0_i32_0 : i32, i32, i32
  }
  func.func @transform_8(%arg0: i32, %arg1: i32) -> (i32, i32, i32) {
    %c0_i32 = arith.constant 0 : i32
    %c0_i32_0 = arith.constant 0 : i32
    %c0_i32_1 = arith.constant 0 : i32
    return %arg1, %c0_i32, %c0_i32_0 : i32, i32, i32
  }
  func.func @transform_9(%arg0: i32, %arg1: i32) -> (i32, i32, i32) {
    %c0_i32 = arith.constant 0 : i32
    %c0_i32_0 = arith.constant 0 : i32
    %c0_i32_1 = arith.constant 0 : i32
    return %arg1, %c0_i32, %c0_i32_0 : i32, i32, i32
  }
  func.func @transform_10(%arg0: i32, %arg1: i32) -> (i32, i32, i32) {
    %c0_i32 = arith.constant 0 : i32
    %c0_i32_0 = arith.constant 0 : i32
    %c0_i32_1 = arith.constant 0 : i32
    return %arg1, %c0_i32, %c0_i32_0 : i32, i32, i32
  }
  func.func @transform_11(%arg0: i32, %arg1: i32) -> (i32, i32, i32) {
    %c0_i32 = arith.constant 0 : i32
    %c0_i32_0 = arith.constant 0 : i32
    %c0_i32_1 = arith.constant 0 : i32
    return %arg1, %c0_i32, %c0_i32_0 : i32, i32, i32
  }
  func.func @transform_12(%arg0: i32, %arg1: i32) -> (i32, i32, i32) {
    %c0_i32 = arith.constant 0 : i32
    %c0_i32_0 = arith.constant 0 : i32
    %c0_i32_1 = arith.constant 0 : i32
    return %arg1, %c0_i32, %c0_i32_0 : i32, i32, i32
  }
  func.func @transform_13(%arg0: i32, %arg1: i32) -> (i32, i32) {
    %c0_i32 = arith.constant 0 : i32
    %c0_i32_0 = arith.constant 0 : i32
    %c0_i32_1 = arith.constant 0 : i32
    return %c0_i32, %c0_i32_0 : i32, i32
  }
  func.func @transform_14(%arg0: i32, %arg1: i32) -> (i32, i32) {
    %c0_i32 = arith.constant 0 : i32
    %c0_i32_0 = arith.constant 0 : i32
    %c0_i32_1 = arith.constant 0 : i32
    return %c0_i32, %c0_i32_0 : i32, i32
  }
  func.func @transform_15(%arg0: i32, %arg1: i32) -> (i32, i32, i32) {
    %c0_i32 = arith.constant 0 : i32
    %c0_i32_0 = arith.constant 0 : i32
    %c0_i32_1 = arith.constant 0 : i32
    return %arg0, %c0_i32, %c0_i32_0 : i32, i32, i32
  }
}

</mosaic_0001>

<bundles_post_ra>
// kernel: bigram_lm_forward.1
= control target key start
LH: loop header
LB: loop body
LE: loop exit
PB: predicated region body
PF: predicated region fallthrough
CT: control target
= control target key end

     0   :  { %s22687_s0 = inlined_call_operand.vmem [shape: f32[2,64,384], index: 0, kind: input, shape index: {}]   ;;  %s22688_s1 = inlined_call_operand.vmem [shape: f32[64,64], index: 1, kind: input, shape index: {}]   ;;  %s22689_s2 = inlined_call_operand.hbm [shape: f32[6,1,384], index: 2, kind: input, shape index: {}]   ;;  %s22690_s3 = inlined_call_operand.hbm [shape: f32[6,1,384], index: 3, kind: input, shape index: {}]   ;;  %s22691_s4 = inlined_call_operand.hbm [shape: bf16[6,384,1152], index: 4, kind: input, shape index: {}]   ;;  %s22692_s5 = inlined_call_operand.hbm [shape: bf16[6,384,384], index: 5, kind: input, shape index: {}]   ;;  %s22693_s6 = inlined_call_operand.hbm [shape: f32[6,1,384], index: 6, kind: input, shape index: {}]   ;;  %s22694_s7 = inlined_call_operand.hbm [shape: f32[6,1,384], index: 7, kind: input, shape index: {}]   ;;  %s22695_s8 = inlined_call_operand.hbm [shape: f32[6,1,384], index: 8, kind: input, shape index: {}]   ;;  %s22696_s9 = inlined_call_operand.hbm [shape: bf16[6,384,1536], index: 9, kind: input, shape index: {}]   ;;  %s22697_s10 = inlined_call_operand.hbm [shape: f32[6,1,1536], index: 10, kind: input, shape index: {}]   ;;  %s22698_s11 = inlined_call_operand.hbm [shape: bf16[6,1536,384], index: 11, kind: input, shape index: {}]   ;;  %s22699_s12 = inlined_call_operand.hbm [shape: f32[6,1,384], index: 12, kind: input, shape index: {}]   ;;  %s22700_s13 = inlined_call_operand.hbm [shape: bf16[384,512], index: 13, kind: input, shape index: {}]   ;;  %s22701_s14 = inlined_call_operand.hbm [shape: f32[1,512], index: 14, kind: input, shape index: {}]   ;;  %s22702_s15 = inlined_call_operand.hbm [shape: f32[2,64,512], index: 15, kind: output, shape index: {}]  }
   0x1   :  { %22813 = sst [smem:[#allocation98_spill]] %s22687_s0 }
   0x2   :  { %22814 = sst [smem:[#allocation99_spill]] %s22688_s1 }
   0x3   :  { %22815 = sst [smem:[#allocation100_spill]] %s22690_s3 }
   0x4   :  { %22816 = sst [smem:[#allocation101_spill]] %s22692_s5 }
   0x5   :  { %22817 = sst [smem:[#allocation102_spill]] %s22694_s7 }
   0x6   :  { %22818 = sst [smem:[#allocation103_spill]] %s22695_s8 }
   0x7   :  { %22819 = sst [smem:[#allocation104_spill]] %s22697_s10 }
   0x8   :  { %22820 = sst [smem:[#allocation105_spill]] %s22699_s12 }
   0x9   :  { %22821 = sst [smem:[#allocation106_spill]] %s22700_s13 }
   0xa   :  { %22822 = sst [smem:[#allocation107_spill]] %s22702_s15 }
   0xb   :  { %20 = vsyncpa [#allocation4], 0 }
   0xc   :  { %22 = vsyncpa [#allocation4 + $0x1], 0 }
   0xd   :  { %23 = vsyncpa [#allocation7], 0 }
   0xe   :  { %25 = vsyncpa [#allocation7 + $0x1], 0 }
   0xf   :  { %26 = vsyncpa [#allocation10], 0 }
  0x10   :  { %28 = vsyncpa [#allocation10 + $0x1], 0 }
  0x11   :  { %29 = vsyncpa [#allocation13], 0 }
  0x12   :  { %31 = vsyncpa [#allocation13 + $0x1], 0 }
  0x13   :  { %32 = vsyncpa [#allocation16], 0 }
  0x14   :  { %34 = vsyncpa [#allocation16 + $0x1], 0 }
  0x15   :  { %35 = vsyncpa [#allocation19], 0 }
  0x16   :  { %37 = vsyncpa [#allocation19 + $0x1], 0 }
  0x17   :  { %38 = vsyncpa [#allocation22], 0 }
  0x18   :  { %39 = vsyncpa [#allocation5], 0 }
  0x19   :  { %41 = vsyncpa [#allocation5 + $0x1], 0  ;;  %s18134_s18 = smov 0   ;;  %s18136_s19 = smov 0  }
  0x1a   :  { %s18138_s20 = smov 0   ;;  %s18140_s21 = smov 0  }
  0x1b   :  { %s18142_s22 = smov 0   ;;  %s18144_s23 = smov 0  }
  0x1c   :  { %s18146_s24 = smov 0   ;;  %s18148_s25 = smov 0  }
  0x1d   :  { %s18150_s26 = smov 0   ;;  %s18152_s27 = smov 0  }
  0x1e   :  { %s18154_s28 = smov 0  }
  0x1f LB: > { %22823 = sst [smem:[#allocation33_spill]] %s17985_s18  ;;  %s18188_s29 = sadd.s32 4294967295, %s18025_s28   ;;  %s18025_s28 = sphi %s18154_s28, %s47_s28   ;;  %s18021_s27 = sphi %s18152_s27, %s23193_s27   ;;  %s18017_s26 = sphi %s18150_s26, %s23195_s26   ;;  %s18013_s25 = sphi %s18148_s25, %s23191_s25   ;;  %s18009_s24 = sphi %s18146_s24, %s23194_s24   ;;  %s18005_s23 = sphi %s18144_s23, %s23190_s23   ;;  %s18001_s22 = sphi %s18142_s22, %s23189_s22   ;;  %s17997_s21 = sphi %s18140_s21, %s23188_s21   ;;  %s17993_s20 = sphi %s18138_s20, %s23187_s20   ;;  %s17989_s19 = sphi %s18136_s19, %s23186_s19   ;;  %s17985_s18 = sphi %s18134_s18, %s23185_s18  }
  0x20   : > { %22824 = sst [smem:[#allocation34_spill]] %s17989_s19  ;;  %s13789_s30 = sadd.s32 4294967294, %s18025_s28  }
  0x21   : > { %22825 = sst [smem:[#allocation35_spill]] %s17993_s20  ;;  %s56_s16 = sadd.s32 1, %s18017_s26 }
  0x22   : > { %22826 = sst [smem:[#allocation36_spill]] %s18001_s22  ;;  %s59_s17 = sadd.s32 1, %s18021_s27 }
  0x23   : > { %22827 = sst [smem:[#allocation37_spill]] %s18005_s23  ;;  %p57_p0 = scmp.ge.s32.totalorder %s56_s16, 6 }
  0x24   : > { %22828 = sst [smem:[#allocation38_spill]] %s18009_s24  ;;  %s113_s15 = sadd.s32 1, %s18005_s23 }
  0x25   : > { %22829 = sst [smem:[#allocation39_spill]] %s18013_s25  ;;  %p120_p1 = scmp.ne.s32.totalorder %s18005_s23, %s18001_s22 }
  0x26   : > { %22830 = sst [smem:[#allocation40_spill]] %s18021_s27  ;;  %p121_p2 = scmp.eq.s32.totalorder %s18025_s28, 0 }
  0x27   : > { %22831 = sst [smem:[#allocation41_spill]] %s18025_s28  ;;  %s23197_s16 = smov (%p57_p0, %s56_s16), 0 }
  0x28   : > { %22832 = sst [smem:[#allocation42_spill]] %s18188_s29  ;;  %s23199_s17 = smov (!%p57_p0, %s59_s17), %s18021_s27 }
  0x29   : > { %22833 = sst [smem:[#allocation43_spill]] %s23197_s16  ;;  %s110_s1 = ssub.s32 %s18017_s26, %s23197_s16 }
  0x2a   : > { %p18202_p3 = por %p121_p2, %p120_p1  ;;  %p61_p4 = scmp.ge.s32.totalorder %s23199_s17, 2 }
  0x2b   : > { %p111_p5 = scmp.eq.s32.totalorder %s110_s1, 0  ;;  %p126_p6 = scmp.ne.s32.totalorder %s18001_s22, %s17997_s21 }
  0x2c   : > { %p22710_p7 = scmp.eq.s32.totalorder %s18188_s29, 0  ;;  %s23201_s17 = smov (%p61_p4, %s23199_s17), 0 }
  0x2d   : > { %22835 = sst [smem:[#allocation44_spill]] %s23201_s17  ;;  %s438_s25 = ssub.s32 %s18021_s27, %s23201_s17 }
  0x2e   : > { %s18211_s0 = scalar_select %p111_p5, %s18005_s23, %s113_s15  }
  0x2f   : > { %p18215_p8 = por %p22710_p7, %p126_p6  ;;  %p439_p9 = scmp.eq.s32.totalorder %s438_s25, 0 }
  0x30   : > { %22836 = sst [smem:[#allocation45_spill]] %s18211_s0  ;;  %s441_s12 = sadd.s32 1, %s17993_s20 }
  0x31   : > { %s22837_s16 = scalar_select %p18215_p8, 1, 0 }
  0x32   : > { %p451_p10 = scmp.ne.s32.totalorder %s17993_s20, %s17989_s19  ;;  %p452_p11 = scmp.eq.s32.totalorder %s18188_s29, 11 }
  0x33   : > { %22838 = sst [smem:[#allocation46_spill]] %s22837_s16  ;;  %p457_p13 = scmp.ne.s32.totalorder %s17989_s19, %s17985_s18 }
  0x34   : > { %s18226_s1 = scalar_select %p439_p9, %s17993_s20, %s441_s12  }
  0x35   : > { %p18228_p12 = por %p452_p11, %p451_p10  ;;  %p458_p0 = scmp.eq.s32.totalorder %s13789_s30, 11 }
  0x36   : > { %22839 = sst [smem:[#allocation47_spill]] %s18226_s1  ;;  %p13790_p1 = scmp.ge.s32.totalorder %s18025_s28, 1 }
  0x37   : > { %s22840_s21 = scalar_select %p18228_p12, 1, 0 }
  0x38   : > { %p465_p2 = scmp.lt.s32.totalorder %s18025_s28, 13  ;;  %p18236_p4 = por %p458_p0, %p457_p13 }
  0x39   : > { %22841 = sst [smem:[#allocation48_spill]] %s22840_s21  ;;  %s18027_s12 = smov [#allocation21]  }
  0x3a   : > { %s22842_s15 = scalar_select %p18236_p4, 1, 0 }
  0x3b   : > { %p18240_p5 = pnand %p13790_p1, %p465_p2  ;;  %s480_s17 = sshll.u32 %s18027_s12, 4  ;;  %s481_s17 = int_to_ptr.vmem [resolvable:$true] %s480_s17 }
  0x3c   : > { %22843 = sst [smem:[#allocation49_spill]] %s22842_s15  ;;  %p15769_p9 = scmp.lt.s32.totalorder %s18025_s28, 12 }
  0x3d   : > { %s22844_s25 = scalar_select %p18240_p5, 1, 0 }
  0x3e   : > { %p15722_p6 = pneg %p18240_p5  ;;  %s18254_s27 = sand.u32 1, %s18005_s23  }
  0x3f   : > { %22845 = sst [smem:[#allocation50_spill]] %s22844_s25  ;;  %p18258_p11 = pnand %p15769_p9, %p18202_p3 }
  0x40   : > { %p18249_p10 = pnand %p15722_p6, %p22710_p7  ;;  %s18263_s12 = smul.u32 3, %s18254_s27 }
  0x41   : > { %s18266_s1 = smul.u32 48, %s18017_s26  ;;  %s17532_s20 = scalar_lea.vmem %s481_s17, 12288 }
  0x42   : > { %p17523_p13 = pneg %p18249_p10  ;;  %p17533_p0 = scmp.ne.s32.totalorder %s481_s17, %s17532_s20 }
  0x43   : > { %p17540_p6 = scmp.lt.s32.totalorder %s481_s17, %s481_s17  ;;  %p17541_p7 = scmp.lt.s32.totalorder %s17532_s20, %s17532_s20 }
  0x44   : > { %p17535_p1 = pnand %p17533_p0, %p17523_p13 }
  0x45   : > { %p17542_p4 = por %p17541_p7, %p17540_p6 }
  0x46   : > { %p17536_p2 = pneg %p17535_p1 }
  0x48   : > { %p17543_p12 = pnand %p17542_p4, %p17536_p2 }
  0x4a   : > { %17546 = shalt.err (!%p17543_p12)
}
  0x4b   : > { %s18028_s24 = smov 256   ;;  %s18029_s23 = smov 16  }
  0x4c   : > { %s22848_s13 = sld [smem:[#allocation106_spill]]  ;;  %s18279_s21 = sand.u32 1, %s18025_s28  }
  0x4d   : > { %s22849_s3 = sld [smem:[#allocation100_spill]]  ;;  %s536_s16 = scalar_lea.vmem [#allocation6], %s18263_s12 }
  0x4e   : > { %s544_s22 = sshll.u32 %s536_s16, 4  ;;  %s22727_s25 = scalar_lea.sflag [#allocation7], %s18279_s21  ;;  %s545_s22 = int_to_ptr.vmem [resolvable:$true] %s544_s22 }
  0x4f   : > { %p18289_p3 = pneg %p18258_p11  ;;  %s17560_s8 = scalar_lea.vmem %s545_s22, 48 }
  0x50   : > { %p17561_p7 = scmp.ne.s32.totalorder %s545_s22, %s17560_s8  ;;  %s18030_s18 = smov [#allocation6]  }
  0x52   : > { %15725 = dma.hbm_to_vmem [thread:$0]  (!%p18249_p10), %s22848_s13, 12288, %s481_s17, [#allocation22], %s18028_s24, %s18028_s24, %s18029_s23  }
  0x53   : > { %s542_s20 = scalar_lea.hbm %s22849_s3, %s18266_s1  ;;  %p17563_p12 = pnand %p17561_p7, %p18289_p3 }
  0x54   : > { %s17565_s23 = sshll.u32 %s18030_s18, 4  ;;  %s17566_s23 = int_to_ptr.vmem [resolvable:$false] %s17565_s23 }
  0x55   : > { %p17564_p4 = pneg %p17563_p12  ;;  %s17567_s19 = scalar_lea.vmem %s17566_s23, 96 }
  0x56   : > { %p17568_p9 = scmp.lt.s32.totalorder %s545_s22, %s17566_s23  ;;  %p17569_p0 = scmp.lt.s32.totalorder %s17567_s19, %s17560_s8 }
  0x58   : > { %p17570_p1 = por %p17569_p0, %p17568_p9 }
  0x5a   : > { %p17571_p2 = pnand %p17570_p1, %p17564_p4 }
  0x5c   : > { %17574 = shalt.err (!%p17571_p2)
}
  0x5d   : > { %15735 = dma.hbm_to_vmem [thread:$0]  (!%p18258_p11), %s542_s20, 48, %s545_s22, %s22727_s25  }
  0x5e   : > { %s15668_s29 = smul.u32 576, %s18254_s27  ;;  %s22851_s5 = sld [smem:[#allocation101_spill]] }
  0x5f   : > { %s15669_s16 = smul.u32 9216, %s18017_s26  ;;  %s22728_s23 = scalar_lea.sflag [#allocation10], %s18279_s21 }
  0x60   : > { %s576_s18 = scalar_lea.vmem [#allocation9], %s15668_s29  ;;  %s18031_s3 = smov [#allocation9]  }
  0x61   : > { %s583_s8 = sshll.u32 %s576_s18, 4  ;;  %s17593_s13 = sshll.u32 %s18031_s3, 4  ;;  %s584_s8 = int_to_ptr.vmem [resolvable:$true] %s583_s8  ;;  %s17594_s13 = int_to_ptr.vmem [resolvable:$false] %s17593_s13 }
  0x62   : > { %s17588_s19 = scalar_lea.vmem %s584_s8, 9216  ;;  %s17595_s28 = scalar_lea.vmem %s17594_s13, 18432 }
  0x63   : > { %p17589_p6 = scmp.ne.s32.totalorder %s584_s8, %s17588_s19  ;;  %p17596_p4 = scmp.lt.s32.totalorder %s584_s8, %s17594_s13 }
  0x64   : > { %s582_s24 = scalar_lea.hbm %s22851_s5, %s15669_s16  ;;  %p17597_p9 = scmp.lt.s32.totalorder %s17595_s28, %s17588_s19 }
  0x65   : > { %p17591_p7 = pnand %p17589_p6, %p18289_p3 }
  0x66   : > { %p17598_p0 = por %p17597_p9, %p17596_p4 }
  0x67   : > { %p17592_p12 = pneg %p17591_p7 }
  0x69   : > { %p17599_p1 = pnand %p17598_p0, %p17592_p12 }
  0x6b   : > { %17602 = shalt.err (!%p17599_p1)
}
  0x6c   : > { %s22729_s22 = smov 192   ;;  %s22730_s20 = smov 12  }
  0x6d   : > { %15741 = dma.hbm_to_vmem [thread:$0]  (!%p18258_p11), %s582_s24, 9216, %s584_s8, %s22728_s23, %s22729_s22, %s22729_s22, %s22730_s20  }
  0x6e   : > { %s22852_s7 = sld [smem:[#allocation102_spill]]  ;;  %s616_s29 = scalar_lea.vmem [#allocation12], %s18263_s12 }
  0x6f   : > { %s624_s16 = sshll.u32 %s616_s29, 4  ;;  %s22731_s17 = scalar_lea.sflag [#allocation13], %s18279_s21  ;;  %s625_s16 = int_to_ptr.vmem [resolvable:$true] %s624_s16 }
  0x70   : > { %s17616_s15 = scalar_lea.vmem %s625_s16, 48  ;;  %s18034_s18 = smov [#allocation12]  }
  0x71   : > { %p17617_p2 = scmp.ne.s32.totalorder %s625_s16, %s17616_s15  ;;  %s17621_s19 = sshll.u32 %s18034_s18, 4  ;;  %s17622_s19 = int_to_ptr.vmem [resolvable:$false] %s17621_s19 }
  0x72   : > { %s17623_s25 = scalar_lea.vmem %s17622_s19, 96  ;;  %p17624_p12 = scmp.lt.s32.totalorder %s625_s16, %s17622_s19 }
  0x73   : > { %p17619_p6 = pnand %p17617_p2, %p18289_p3  ;;  %p17625_p4 = scmp.lt.s32.totalorder %s17623_s25, %s17616_s15 }
  0x74   : > { %s622_s28 = scalar_lea.hbm %s22852_s7, %s18266_s1 }
  0x75   : > { %p17620_p7 = pneg %p17619_p6  ;;  %p17626_p9 = por %p17625_p4, %p17624_p12 }
  0x77   : > { %p17627_p0 = pnand %p17626_p9, %p17620_p7 }
  0x79   : > { %17630 = shalt.err (!%p17627_p0)
}
  0x7a   : > { %15747 = dma.hbm_to_vmem [thread:$0]  (!%p18258_p11), %s622_s28, 48, %s625_s16, %s22731_s17  }
  0x7b   : > { %s15676_s24 = smul.u32 2304, %s18254_s27  ;;  %s651_s15 = scalar_lea.sflag [#allocation16], %s18279_s21 }
  0x7c   : > { %s15677_s8 = smul.u32 36864, %s18017_s26  ;;  %s18035_s23 = smov [#allocation15]  }
  0x7d   : > { %s654_s18 = scalar_lea.vmem [#allocation15], %s15676_s24  ;;  %s17649_s22 = sshll.u32 %s18035_s23, 4  ;;  %s17650_s22 = int_to_ptr.vmem [resolvable:$false] %s17649_s22 }
  0x7e   : > { %s660_s29 = scalar_lea.hbm %s22696_s9, %s15677_s8  ;;  %s661_s25 = sshll.u32 %s654_s18, 4  ;;  %s662_s25 = int_to_ptr.vmem [resolvable:$true] %s661_s25 }
  0x7f   : > { %s17644_s19 = scalar_lea.vmem %s662_s25, 36864  ;;  %s17651_s20 = scalar_lea.vmem %s17650_s22, 73728 }
  0x80   : > { %p17645_p1 = scmp.ne.s32.totalorder %s662_s25, %s17644_s19  ;;  %p17652_p7 = scmp.lt.s32.totalorder %s662_s25, %s17650_s22 }
  0x81   : > { %p17653_p12 = scmp.lt.s32.totalorder %s17651_s20, %s17644_s19 }
  0x82   : > { %p17647_p2 = pnand %p17645_p1, %p18289_p3 }
  0x83   : > { %p17654_p4 = por %p17653_p12, %p17652_p7 }
  0x84   : > { %p17648_p6 = pneg %p17647_p2 }
  0x86   : > { %p17655_p9 = pnand %p17654_p4, %p17648_p6 }
  0x88   : > { %17658 = shalt.err (!%p17655_p9)
}
  0x89   : > { %s18036_s28 = smov 768   ;;  %s18037_s16 = smov 48  }
  0x8a   : > { %15753 = dma.hbm_to_vmem [thread:$0]  (!%p18258_p11), %s660_s29, 36864, %s662_s25, %s651_s15, %s18036_s28, %s18036_s28, %s18037_s16  }
  0x8b   : > { %s700_s23 = scalar_lea.hbm %s22698_s11, %s15677_s8  ;;  %s694_s18 = scalar_lea.vmem [#allocation18], %s15676_s24 }
  0x8c   : > { %s701_s17 = sshll.u32 %s694_s18, 4  ;;  %s691_s22 = scalar_lea.sflag [#allocation19], %s18279_s21  ;;  %s702_s17 = int_to_ptr.vmem [resolvable:$true] %s701_s17 }
  0x8d   : > { %s17672_s20 = scalar_lea.vmem %s702_s17, 36864  ;;  %s18038_s19 = smov [#allocation18]  }
  0x8e   : > { %p17673_p0 = scmp.ne.s32.totalorder %s702_s17, %s17672_s20  ;;  %s17677_s5 = sshll.u32 %s18038_s19, 4  ;;  %s17678_s5 = int_to_ptr.vmem [resolvable:$false] %s17677_s5 }
  0x8f   : > { %s17679_s7 = scalar_lea.vmem %s17678_s5, 73728  ;;  %p17680_p6 = scmp.lt.s32.totalorder %s702_s17, %s17678_s5 }
  0x90   : > { %p17675_p1 = pnand %p17673_p0, %p18289_p3  ;;  %p17681_p7 = scmp.lt.s32.totalorder %s17679_s7, %s17672_s20 }
  0x92   : > { %p17676_p2 = pneg %p17675_p1  ;;  %p17682_p12 = por %p17681_p7, %p17680_p6 }
  0x94   : > { %p17683_p4 = pnand %p17682_p12, %p17676_p2 }
  0x96   : > { %17686 = shalt.err (!%p17683_p4)
}
  0x97   : > { %s22853_s24 = smov 12   ;;  %s22854_s8 = smov 192  }
  0x98   : > { %15759 = dma.hbm_to_vmem [thread:$0]  (!%p18258_p11), %s700_s23, 36864, %s702_s17, %s691_s22, %s22854_s8, %s22854_s8, %s22853_s24  }
  0x99   : > { %s18039_s29 = smov [#allocation23]  }
  0x9a   : > { %s494_s25 = sshll.u32 %s18039_s29, 4  ;;  %s495_s25 = int_to_ptr.vmem [resolvable:$true] %s494_s25 }
  0x9b   : > { %s17698_s28 = scalar_lea.vmem %s495_s25, 64  ;;  %p17706_p2 = scmp.lt.s32.totalorder %s495_s25, %s495_s25 }
  0x9c   : > { %p17699_p9 = scmp.ne.s32.totalorder %s495_s25, %s17698_s28  ;;  %p17707_p6 = scmp.lt.s32.totalorder %s17698_s28, %s17698_s28 }
  0x9e   : > { %p17701_p0 = pnand %p17699_p9, %p17523_p13  ;;  %p17708_p7 = por %p17707_p6, %p17706_p2 }
  0xa0   : > { %p17702_p1 = pneg %p17701_p0 }
  0xa2   : > { %p17709_p12 = pnand %p17708_p7, %p17702_p1 }
  0xa4   : > { %17712 = shalt.err (!%p17709_p12)
}
  0xa5   : > { %15728 = dma.hbm_to_vmem [thread:$0]  (!%p18249_p10), %s22701_s14, 64, %s495_s25, [#allocation22]  }
  0xa6   : > { %s523_s3 = scalar_lea.hbm %s22689_s2, %s18266_s1  ;;  %s517_s13 = scalar_lea.vmem [#allocation3], %s18263_s12 }
  0xa7   : > { %s525_s23 = sshll.u32 %s517_s13, 4  ;;  %s15666_s18 = smul.u32 1728, %s18254_s27  ;;  %s526_s23 = int_to_ptr.vmem [resolvable:$true] %s525_s23 }
  0xa8   : > { %s514_s20 = scalar_lea.sflag [#allocation4], %s18254_s27  ;;  %s17726_s19 = scalar_lea.vmem %s526_s23, 48 }
  0xa9   : > { %p17727_p13 = scmp.ne.s32.totalorder %s526_s23, %s17726_s19  ;;  %s18040_s30 = smov [#allocation3]  }
  0xaa   : > { %s17731_s24 = sshll.u32 %s18040_s30, 4  ;;  %s17732_s24 = int_to_ptr.vmem [resolvable:$false] %s17731_s24 }
  0xab   : > { %p17729_p4 = pnand %p17727_p13, %p18289_p3  ;;  %s17733_s8 = scalar_lea.vmem %s17732_s24, 96 }
  0xac   : > { %p17734_p0 = scmp.lt.s32.totalorder %s526_s23, %s17732_s24  ;;  %p17735_p10 = scmp.lt.s32.totalorder %s17733_s8, %s17726_s19 }
  0xad   : > { %p17730_p9 = pneg %p17729_p4 }
  0xae   : > { %p17736_p1 = por %p17735_p10, %p17734_p0 }
  0xb0   : > { %p17737_p2 = pnand %p17736_p1, %p17730_p9 }
  0xb2   : > { %17740 = shalt.err (!%p17737_p2)
}
  0xb3   : > { %15732 = dma.hbm_to_vmem [thread:$0]  (!%p18258_p11), %s523_s3, 48, %s526_s23, %s514_s20  }
  0xb4   : > { %s15667_s29 = smul.u32 27648, %s18017_s26  ;;  %s555_s25 = scalar_lea.vmem [#allocation8], %s15666_s18 }
  0xb5   : > { %s562_s28 = sshll.u32 %s555_s25, 4  ;;  %s18041_s13 = smov [#allocation8]   ;;  %s563_s28 = int_to_ptr.vmem [resolvable:$true] %s562_s28 }
  0xb6   : > { %s561_s17 = scalar_lea.hbm %s22691_s4, %s15667_s29  ;;  %s17754_s16 = scalar_lea.vmem %s563_s28, 27648 }
  0xb7   : > { %p17755_p6 = scmp.ne.s32.totalorder %s563_s28, %s17754_s16  ;;  %s17759_s19 = sshll.u32 %s18041_s13, 4  ;;  %s17760_s19 = int_to_ptr.vmem [resolvable:$false] %s17759_s19 }
  0xb8   : > { %s17761_s30 = scalar_lea.vmem %s17760_s19, 55296  ;;  %p17762_p13 = scmp.lt.s32.totalorder %s563_s28, %s17760_s19 }
  0xb9   : > { %p17757_p7 = pnand %p17755_p6, %p18289_p3  ;;  %p17763_p4 = scmp.lt.s32.totalorder %s17761_s30, %s17754_s16 }
  0xbb   : > { %p17758_p12 = pneg %p17757_p7  ;;  %p17764_p9 = por %p17763_p4, %p17762_p13 }
  0xbd   : > { %p17765_p0 = pnand %p17764_p9, %p17758_p12 }
  0xbf   : > { %17768 = shalt.err (!%p17765_p0)
}
  0xc0   : > { %s18042_s3 = smov 576   ;;  %s18043_s23 = smov 36  }
  0xc1   : > { %s22855_s18 = scalar_lea.sflag [#allocation7], %s18279_s21  ;;  %s603_s8 = scalar_lea.hbm %s22693_s6, %s18266_s1 }
  0xc2   : > { %15738 = dma.hbm_to_vmem [thread:$0]  (!%p18258_p11), %s561_s17, 27648, %s563_s28, %s22855_s18, %s18042_s3, %s18042_s3, %s18043_s23  }
  0xc3   : > { %s597_s29 = scalar_lea.vmem [#allocation11], %s18263_s12  ;;  %s18044_s7 = smov [#allocation11]  }
  0xc4   : > { %s605_s25 = sshll.u32 %s597_s29, 4  ;;  %s17787_s16 = sshll.u32 %s18044_s7, 4  ;;  %s606_s25 = int_to_ptr.vmem [resolvable:$true] %s605_s25  ;;  %s17788_s16 = int_to_ptr.vmem [resolvable:$false] %s17787_s16 }
  0xc5   : > { %s17782_s5 = scalar_lea.vmem %s606_s25, 48  ;;  %s17789_s13 = scalar_lea.vmem %s17788_s16, 96 }
  0xc6   : > { %p17783_p10 = scmp.ne.s32.totalorder %s606_s25, %s17782_s5  ;;  %p17790_p6 = scmp.lt.s32.totalorder %s606_s25, %s17788_s16 }
  0xc7   : > { %p17791_p7 = scmp.lt.s32.totalorder %s17789_s13, %s17782_s5 }
  0xc8   : > { %p17785_p1 = pnand %p17783_p10, %p18289_p3 }
  0xc9   : > { %p17792_p12 = por %p17791_p7, %p17790_p6 }
  0xca   : > { %p17786_p2 = pneg %p17785_p1 }
  0xcc   : > { %p17793_p13 = pnand %p17792_p12, %p17786_p2 }
  0xce   : > { %17796 = shalt.err (!%p17793_p13)
}
  0xcf   : > { %s22856_s28 = scalar_lea.sflag [#allocation10], %s18279_s21  ;;  %s22857_s30 = sld [smem:[#allocation103_spill]] }
  0xd0   : > { %15744 = dma.hbm_to_vmem [thread:$0]  (!%p18258_p11), %s603_s8, 48, %s606_s25, %s22856_s28  }
  0xd1   : > { %s635_s23 = scalar_lea.vmem [#allocation14], %s18263_s12  ;;  %s15678_s20 = smul.u32 12, %s18254_s27 }
  0xd2   : > { %s643_s18 = sshll.u32 %s635_s23, 4  ;;  %s18045_s29 = smov [#allocation14]   ;;  %s644_s18 = int_to_ptr.vmem [resolvable:$true] %s643_s18 }
  0xd3   : > { %s17810_s24 = scalar_lea.vmem %s644_s18, 48  ;;  %s17815_s5 = sshll.u32 %s18045_s29, 4  ;;  %s17816_s5 = int_to_ptr.vmem [resolvable:$false] %s17815_s5 }
  0xd4   : > { %p17811_p4 = scmp.ne.s32.totalorder %s644_s18, %s17810_s24  ;;  %s17817_s7 = scalar_lea.vmem %s17816_s5, 96 }
  0xd5   : > { %s641_s3 = scalar_lea.hbm %s22857_s30, %s18266_s1  ;;  %p17818_p10 = scmp.lt.s32.totalorder %s644_s18, %s17816_s5 }
  0xd6   : > { %p17813_p9 = pnand %p17811_p4, %p18289_p3  ;;  %p17819_p1 = scmp.lt.s32.totalorder %s17817_s7, %s17810_s24 }
  0xd8   : > { %p17814_p0 = pneg %p17813_p9  ;;  %p17820_p2 = por %p17819_p1, %p17818_p10 }
  0xda   : > { %p17821_p6 = pnand %p17820_p2, %p17814_p0 }
  0xdc   : > { %17824 = shalt.err (!%p17821_p6)
}
  0xdd   : > { %s22858_s8 = scalar_lea.sflag [#allocation13], %s18279_s21  ;;  %s15679_s27 = smul.u32 192, %s18017_s26 }
  0xde   : > { %15750 = dma.hbm_to_vmem [thread:$0]  (!%p18258_p11), %s641_s3, 48, %s644_s18, %s22858_s8  }
  0xdf   : > { %s675_s25 = scalar_lea.vmem [#allocation17], %s15678_s20  ;;  %s22859_s17 = sld [smem:[#allocation104_spill]] }
  0xe0   : > { %s683_s16 = sshll.u32 %s675_s25, 4  ;;  %s18046_s23 = smov [#allocation17]   ;;  %s684_s16 = int_to_ptr.vmem [resolvable:$true] %s683_s16 }
  0xe1   : > { %s17838_s30 = scalar_lea.vmem %s684_s16, 192  ;;  %s17843_s24 = sshll.u32 %s18046_s23, 4  ;;  %s17844_s24 = int_to_ptr.vmem [resolvable:$false] %s17843_s24 }
  0xe2   : > { %p17839_p7 = scmp.ne.s32.totalorder %s684_s16, %s17838_s30  ;;  %s17845_s29 = scalar_lea.vmem %s17844_s24, 384 }
  0xe3   : > { %p17846_p4 = scmp.lt.s32.totalorder %s684_s16, %s17844_s24  ;;  %p17847_p9 = scmp.lt.s32.totalorder %s17845_s29, %s17838_s30 }
  0xe4   : > { %p17841_p12 = pnand %p17839_p7, %p18289_p3 }
  0xe5   : > { %s681_s19 = scalar_lea.hbm %s22859_s17, %s15679_s27  ;;  %p17848_p0 = por %p17847_p9, %p17846_p4 }
  0xe6   : > { %p17842_p13 = pneg %p17841_p12 }
  0xe8   : > { %p17849_p10 = pnand %p17848_p0, %p17842_p13 }
  0xea   : > { %17852 = shalt.err (!%p17849_p10)
}
  0xeb   : > { %15756 = dma.hbm_to_vmem [thread:$0]  (!%p18258_p11), %s681_s19, 192, %s684_s16, %s651_s15  }
  0xec   : > { %s22860_s20 = sld [smem:[#allocation105_spill]]  ;;  %s715_s7 = scalar_lea.vmem [#allocation20], %s18263_s12 }
  0xed   : > { %s723_s8 = sshll.u32 %s715_s7, 4  ;;  %s18047_s25 = smov [#allocation20]   ;;  %s724_s8 = int_to_ptr.vmem [resolvable:$true] %s723_s8 }
  0xee   : > { %s17866_s27 = scalar_lea.vmem %s724_s8, 48  ;;  %s17871_s13 = sshll.u32 %s18047_s25, 4  ;;  %s17872_s13 = int_to_ptr.vmem [resolvable:$false] %s17871_s13 }
  0xef   : > { %p17867_p1 = scmp.ne.s32.totalorder %s724_s8, %s17866_s27  ;;  %s17873_s28 = scalar_lea.vmem %s17872_s13, 96 }
  0xf0   : > { %p17874_p7 = scmp.lt.s32.totalorder %s724_s8, %s17872_s13  ;;  %p17875_p12 = scmp.lt.s32.totalorder %s17873_s28, %s17866_s27 }
  0xf1   : > { %p17869_p2 = pnand %p17867_p1, %p18289_p3 }
  0xf2   : > { %s721_s5 = scalar_lea.hbm %s22860_s20, %s18266_s1  ;;  %p17876_p13 = por %p17875_p12, %p17874_p7 }
  0xf3   : > { %p17870_p6 = pneg %p17869_p2 }
  0xf5   : > { %p17877_p4 = pnand %p17876_p13, %p17870_p6 }
  0xf7   : > { %17880 = shalt.err (!%p17877_p4)
}
  0xf8   : > { %15762 = dma.hbm_to_vmem [thread:$0]  (!%p18258_p11), %s721_s5, 48, %s724_s8, %s691_s22  }
  0xf9   : > { %732 = sbr.rel (%p18240_p5) target bundleno = 7054 (0x1b8e), region = 80 }
  0xfe   : > { %s22862_s10 = sld [smem:[#allocation36_spill]] }
 0x104   : > { %s18427_s15 = sand.u32 1, %s22862_s10  }
 0x105   : > { %s18430_s16 = smul.u32 3, %s18427_s15  ;;  %s735_s17 = scalar_lea.sflag [#allocation4], %s18427_s15 }
 0x107   : > { %s738_s19 = scalar_lea.vmem [#allocation3], %s18430_s16 }
 0x108   : > { %17952 = dma.done.wait (%p18215_p8), %s735_s17, 48  }
 0x109   : > { %17954 = vsyncadd (%p18215_p8), %s735_s17, 4294967248  ;;  %s22864_s0 = sld [smem:[#allocation42_spill]]  ;;  %s747_s30 = scalar_lea.vmem [#allocation6], %s18430_s16 }
 0x10f   : > { %s743_s21 = sand.u32 1, %s22864_s0  }
 0x110   : > { %s744_s22 = scalar_lea.sflag [#allocation7], %s743_s21 }
 0x111   : > { %17956 = dma.done.wait (%p18215_p8), %s744_s22, 27696  }
 0x112   : > { %17958 = vsyncadd (%p18215_p8), %s744_s22, 4294939600  ;;  %s15685_s23 = smul.u32 1728, %s18427_s15  ;;  %s762_s3 = scalar_lea.sflag [#allocation10], %s743_s21 }
 0x113   : > { %s15686_s24 = smul.u32 576, %s18427_s15 }
 0x114   : > { %s18446_s29 = scalar_lea.vmem [#allocation8], %s15685_s23 }
 0x115   : > { %s18448_s18 = scalar_lea.vmem [#allocation9], %s15686_s24 }
 0x116   : > { %17960 = dma.done.wait (%p18215_p8), %s762_s3, 9264  }
 0x117   : > { %17962 = vsyncadd (%p18215_p8), %s762_s3, 4294958032  ;;  %s774_s20 = scalar_lea.vmem [#allocation11], %s18430_s16  ;;  %s780_s5 = scalar_lea.sflag [#allocation13], %s743_s21 }
 0x118   : > { %s783_s7 = scalar_lea.vmem [#allocation12], %s18430_s16 }
 0x119   : > { %17964 = dma.done.wait (%p18215_p8), %s780_s5, 96  }
 0x11a   : > { %17966 = vsyncadd (%p18215_p8), %s780_s5, 4294967200  ;;  %s15687_s8 = smul.u32 2304, %s18427_s15  ;;  %s792_s27 = scalar_lea.vmem [#allocation14], %s18430_s16 }
 0x11b   : > { %s798_s25 = scalar_lea.sflag [#allocation16], %s743_s21 }
 0x11c   : > { %s18462_s13 = scalar_lea.vmem [#allocation15], %s15687_s8 }
 0x11d   : > { %17968 = dma.done.wait (%p18215_p8), %s798_s25, 37056  }
 0x11e   : > { %17970 = vsyncadd (%p18215_p8), %s798_s25, 4294930240  ;;  %s15688_s28 = smul.u32 12, %s18427_s15  ;;  %s816_s10 = scalar_lea.sflag [#allocation19], %s743_s21 }
 0x11f   : > { %s18471_s17 = scalar_lea.vmem [#allocation18], %s15687_s8 }
 0x120   : > { %s18469_s1 = scalar_lea.vmem [#allocation17], %s15688_s28 }
 0x121   : > { %17972 = dma.done.wait (%p18215_p8), %s816_s10, 36912  }
 0x122   : > { %17974 = vsyncadd (%p18215_p8), %s816_s10, 4294930384  ;;  %s828_s22 = scalar_lea.vmem [#allocation20], %s18430_s16  ;;  %p22865_p5 = scmp.eq.s32.totalorder %s22864_s0, 0 }
 0x124   : > { %17976 = dma.done.wait (%p22865_p5), [#allocation22], 12352   ;;  %p22866_p11 = pmov %p22865_p5 }
 0x125   : > { %s22867_s23 = sld [smem:[#allocation34_spill]] }
 0x126   : > { %17978 = vsyncadd (%p22866_p11), [#allocation22], 4294954944  ;;  %s22868_s15 = sld [smem:[#allocation39_spill]] }
 0x127   : > { %s22869_s8 = sld [smem:[#allocation98_spill]] }
 0x128   : > { %s22870_s10 = sld [smem:[#allocation38_spill]] }
 0x12b   : > { %s935_s21 = sand.u32 1, %s22867_s23  }
 0x12c   : > { %p938_p3 = scmp.lt.s32.totalorder %s22868_s15, 1  ;;  %s13808_s24 = sshll.u32 %s935_s21, 8 }
 0x12d   : > { %s18492_s28 = scalar_lea.vmem [#allocation24], %s13808_s24 }
 0x12e   : > { %s23203_s15 = smov (!%p938_p3, %s22868_s15), 1  ;;  %p13810_p8 = scmp.ne.s32.totalorder %s22870_s10, 0 }
 0x12f   : > { %s15689_s3 = smul.u32 192, %s23203_s15 }
 0x130   : > { %947 = sbr.rel (%p13810_p8) target bundleno = 322 (0x142), region = 136 }
 0x131   : > { %s18490_s25 = scalar_lea.vmem %s22869_s8, %s15689_s3 }
 0x135   : > { %v948_v0 = vld [vmem:[%s18490_s25] sm:$0xff]  ;;  %v949_v1 = vld [vmem:[%s18490_s25 + $0x8] sm:$0xff]  ;;  %v950_v2 = vld [vmem:[%s18490_s25 + $0x10] sm:$0xff] }
 0x136   : > { %972 = vst [vmem:[#allocation2 + $0xb0] sm:$0xff] %v948_v0  ;;  %973 = vst [vmem:[#allocation2] sm:$0xff] %v949_v1  ;;  %v951_v3 = vld [vmem:[%s18490_s25 + $0x18] sm:$0xff]  ;;  %v952_v4 = vld [vmem:[%s18490_s25 + $0x20] sm:$0xff] }
 0x137   : > { %974 = vst [vmem:[#allocation2 + $0x10] sm:$0xff] %v950_v2  ;;  %v953_v5 = vld [vmem:[%s18490_s25 + $0x28] sm:$0xff]  ;;  %975 = vst [vmem:[#allocation2 + $0x48] sm:$0xff] %v951_v3  ;;  %v954_v6 = vld [vmem:[%s18490_s25 + $0x30] sm:$0xff] }
 0x138   : > { %976 = vst [vmem:[#allocation2 + $0x60] sm:$0xff] %v952_v4  ;;  %977 = vst [vmem:[#allocation2 + $0x28] sm:$0xff] %v953_v5  ;;  %v955_v7 = vld [vmem:[%s18490_s25 + $0x38] sm:$0xff]  ;;  %v956_v8 = vld [vmem:[%s18490_s25 + $0x40] sm:$0xff] }
 0x139   : > { %978 = vst [vmem:[#allocation2 + $0x40] sm:$0xff] %v954_v6  ;;  %979 = vst [vmem:[#allocation2 + $0x78] sm:$0xff] %v955_v7  ;;  %v957_v9 = vld [vmem:[%s18490_s25 + $0x48] sm:$0xff]  ;;  %v958_v10 = vld [vmem:[%s18490_s25 + $0x50] sm:$0xff] }
 0x13a   : > { %980 = vst [vmem:[#allocation2 + $0x88] sm:$0xff] %v956_v8  ;;  %v959_v11 = vld [vmem:[%s18490_s25 + $0x58] sm:$0xff]  ;;  %981 = vst [vmem:[#allocation2 + $0x90] sm:$0xff] %v957_v9  ;;  %v960_v12 = vld [vmem:[%s18490_s25 + $0x60] sm:$0xff] }
 0x13b   : > { %982 = vst [vmem:[#allocation2 + $0x18] sm:$0xff] %v958_v10  ;;  %983 = vst [vmem:[#allocation2 + $0x98] sm:$0xff] %v959_v11  ;;  %v961_v13 = vld [vmem:[%s18490_s25 + $0x68] sm:$0xff]  ;;  %v962_v14 = vld [vmem:[%s18490_s25 + $0x70] sm:$0xff] }
 0x13c   : > { %984 = vst [vmem:[#allocation2 + $0x38] sm:$0xff] %v960_v12  ;;  %985 = vst [vmem:[#allocation2 + $0x50] sm:$0xff] %v961_v13  ;;  %v963_v15 = vld [vmem:[%s18490_s25 + $0x78] sm:$0xff]  ;;  %v964_v16 = vld [vmem:[%s18490_s25 + $0x80] sm:$0xff] }
 0x13d   : > { %986 = vst [vmem:[#allocation2 + $0x70] sm:$0xff] %v962_v14  ;;  %v965_v17 = vld [vmem:[%s18490_s25 + $0x88] sm:$0xff]  ;;  %987 = vst [vmem:[#allocation2 + $0xa0] sm:$0xff] %v963_v15  ;;  %v966_v18 = vld [vmem:[%s18490_s25 + $0x90] sm:$0xff] }
 0x13e   : > { %988 = vst [vmem:[#allocation2 + $0xa8] sm:$0xff] %v964_v16  ;;  %989 = vst [vmem:[#allocation2 + $0x68] sm:$0xff] %v965_v17  ;;  %v967_v19 = vld [vmem:[%s18490_s25 + $0x98] sm:$0xff]  ;;  %v968_v20 = vld [vmem:[%s18490_s25 + $0xa0] sm:$0xff] }
 0x13f   : > { %990 = vst [vmem:[#allocation2 + $0x30] sm:$0xff] %v966_v18  ;;  %991 = vst [vmem:[#allocation2 + $0x58] sm:$0xff] %v967_v19  ;;  %v969_v21 = vld [vmem:[%s18490_s25 + $0xa8] sm:$0xff]  ;;  %v970_v22 = vld [vmem:[%s18490_s25 + $0xb0] sm:$0xff] }
 0x140   : > { %992 = vst [vmem:[#allocation2 + $0x80] sm:$0xff] %v968_v20  ;;  %v971_v23 = vld [vmem:[%s18490_s25 + $0xb8] sm:$0xff]  ;;  %993 = vst [vmem:[#allocation2 + $0xb8] sm:$0xff] %v969_v21 }
 0x141   : > { %994 = vst [vmem:[#allocation2 + $0x20] sm:$0xff] %v970_v22  ;;  %995 = vst [vmem:[#allocation2 + $0x8] sm:$0xff] %v971_v23 }
 0x142 PF: > { %v18519_v24 = vld [vmem:[#allocation2 + $0xb0] sm:$0xff]  ;;  %v18521_v25 = vld [vmem:[#allocation2] sm:$0xff]  ;;  %v18529_v29 = vld [vmem:[#allocation2 + $0x78] sm:$0xff]  ;;  %vm3481_vm0 = vcmask 523264   ;;  %s18049_s15 = smov 64   ;;  %s23155_s16 = sld [smem:[#allocation38_spill]] }
 0x143   : > { %v18523_v26 = vld [vmem:[#allocation2 + $0x10] sm:$0xff]  ;;  %v1022_v27 = vadd.f32 %v18521_v25, %v18519_v24  ;;  %v18527_v28 = vld [vmem:[#allocation2 + $0x40] sm:$0xff]  ;;  %v18531_v30 = vld [vmem:[#allocation2 + $0x88] sm:$0xff] }
 0x144   : > { %v1030_v31 = vadd.f32 %v18529_v29, %v18527_v28  ;;  %v18535_v32 = vld [vmem:[#allocation2 + $0x48] sm:$0xff]  ;;  %v18537_v33 = vld [vmem:[#allocation2 + $0x60] sm:$0xff]  ;;  %v18544_v37 = vld [vmem:[#allocation2 + $0x90] sm:$0xff] }
 0x145   : > { %v18539_v34 = vld [vmem:[#allocation2 + $0x28] sm:$0xff]  ;;  %v1023_v35 = vadd.f32 %v1022_v27, %v18523_v26  ;;  %v1026_v36 = vadd.f32 %v18537_v33, %v18535_v32  ;;  %v18546_v38 = vld [vmem:[#allocation2 + $0x18] sm:$0xff]  ;;  %v1009_v43 = vld [vmem:[#allocation2 + $0x50] sm:$0xff] }
 0x146   : > { %v18548_v39 = vld [vmem:[#allocation2 + $0x98] sm:$0xff]  ;;  %v1031_v40 = vadd.f32 %v1030_v31, %v18531_v30  ;;  %v1034_v41 = vadd.f32 %v18546_v38, %v18544_v37  ;;  %v1011_v46 = vld [vmem:[#allocation2 + $0xa0] sm:$0xff]  ;;  %v1012_v47 = vld [vmem:[#allocation2 + $0xa8] sm:$0xff] }
 0x147   : > { %v1008_v42 = vld [vmem:[#allocation2 + $0x38] sm:$0xff]  ;;  %1024 = vadd.xlane.f32.xlu0 %v1023_v35  ;;  %v1027_v44 = vadd.f32 %v1026_v36, %v18539_v34  ;;  %v1010_v49 = vld [vmem:[#allocation2 + $0x70] sm:$0xff]  ;;  %v1042_v50 = vadd.f32 %v1012_v47, %v1011_v46  ;;  %v1013_v53 = vld [vmem:[#allocation2 + $0x68] sm:$0xff] }
 0x148   : > { %v1038_v45 = vadd.f32 %v1009_v43, %v1008_v42  ;;  %1032 = vadd.xlane.f32.xlu1 %v1031_v40  ;;  %v1035_v48 = vadd.f32 %v1034_v41, %v18548_v39  ;;  %v1014_v51 = vld [vmem:[#allocation2 + $0x30] sm:$0xff]  ;;  %v1015_v52 = vld [vmem:[#allocation2 + $0x58] sm:$0xff]  ;;  %v1018_v55 = vld [vmem:[#allocation2 + $0x20] sm:$0xff]  ;;  %p14771_p9 = scmp.ne.s32.totalorder %s23155_s16, 5 }
 0x149   : > { %v1017_v54 = vld [vmem:[#allocation2 + $0xb8] sm:$0xff]  ;;  %v1016_v56 = vld [vmem:[#allocation2 + $0x80] sm:$0xff]  ;;  %v1046_v58 = vadd.f32 %v1015_v52, %v1014_v51  ;;  %v1019_v59 = vld [vmem:[#allocation2 + $0x8] sm:$0xff]  ;;  %v1043_v60 = vadd.f32 %v1042_v50, %v1013_v53 }
 0x14a   : > { %v1039_v57 = vadd.f32 %v1038_v45, %v1010_v49  ;;  %v1050_v61 = vadd.f32 %v1018_v55, %v1017_v54  ;;  %v15876_v0 = vld [vmem:[%s18446_s29 + $0x1fc] ss:$36 sps:$4 sm:$0xff]   ;;  %v15879_v2 = vld [vmem:[%s18446_s29 + $0x1b4] ss:$36 sps:$4 sm:$0xff]   ;;  %v15882_v4 = vld [vmem:[%s18446_s29 + $0x16c] ss:$36 sps:$4 sm:$0xff]  }
 0x14b   : > { %1028 = vadd.xlane.f32.xlu0 %v1027_v44  ;;  %v1047_v62 = vadd.f32 %v1046_v58, %v1016_v56  ;;  %v15878_v1 = vld [vmem:[%s18446_s29 + $0x1f8] ss:$36 sps:$4 sm:$0xff]   ;;  %2627 = vmatprep.subr.bf16.mxu0 %v15876_v0  ;;  %v15881_v3 = vld [vmem:[%s18446_s29 + $0x1b0] ss:$36 sps:$4 sm:$0xff]   ;;  %v15884_v5 = vld [vmem:[%s18446_s29 + $0x168] ss:$36 sps:$4 sm:$0xff]  }
 0x14c   : > { %1036 = vadd.xlane.f32.xlu1 %v1035_v48  ;;  %v1051_v63 = vadd.f32 %v1050_v61, %v1019_v59  ;;  %2628 = vmatpush1.bf16.msra.mxu0 %v15878_v1  ;;  %v15900_v6 = vld [vmem:[%s18446_s29 + $0x67c] ss:$36 sps:$4 sm:$0xff]   ;;  %v15885_v7 = vld [vmem:[%s18446_s29 + $0x124] ss:$36 sps:$4 sm:$0xff]   ;;  %v15891_v12 = vld [vmem:[%s18446_s29 + $0x94] ss:$36 sps:$4 sm:$0xff]  }
 0x14d   : > { %2629 = vmatprep.subr.bf16.mxu0 %v15879_v2  ;;  %v15904_v8 = vld [vmem:[%s18446_s29 + $0x678] ss:$36 sps:$4 sm:$0xff]   ;;  %2700 = vmatprep.subr.bf16.mxu1 %v15900_v6  ;;  %v15887_v9 = vld [vmem:[%s18446_s29 + $0x120] ss:$36 sps:$4 sm:$0xff]   ;;  %v15893_v13 = vld [vmem:[%s18446_s29 + $0x90] ss:$36 sps:$4 sm:$0xff]  }
 0x14e   : > { %2701 = vmatpush1.bf16.msra.mxu1 %v15904_v8  ;;  %v15888_v10 = vld [vmem:[%s18446_s29 + $0xdc] ss:$36 sps:$4 sm:$0xff]   ;;  %v15894_v14 = vld [vmem:[%s18446_s29 + $0x4c] ss:$36 sps:$4 sm:$0xff]   ;;  %v15897_v16 = vld [vmem:[%s18446_s29 + $0x4] ss:$36 sps:$4 sm:$0xff]  }
 0x14f   : > { %1040 = vadd.xlane.f32.xlu0 %v1039_v57  ;;  %v15890_v11 = vld [vmem:[%s18446_s29 + $0xd8] ss:$36 sps:$4 sm:$0xff]   ;;  %v15896_v15 = vld [vmem:[%s18446_s29 + $0x48] ss:$36 sps:$4 sm:$0xff]   ;;  %v15899_v17 = vld [vmem:[%s18446_s29] ss:$36 sps:$4 sm:$0xff]  }
 0x150   : > { %1044 = vadd.xlane.f32.xlu1 %v1043_v60  ;;  %2630 = vmatpush1.bf16.msra.mxu0 %v15881_v3  ;;  %v15902_v18 = vld [vmem:[%s18446_s29 + $0x43c] ss:$36 sps:$4 sm:$0xff]   ;;  %v17324_v59 = vld [vmem:[#allocation2 + $0x38] sm:$0xff]  ;;  %v17325_v60 = vld [vmem:[#allocation2 + $0x50] sm:$0xff] }
 0x151   : > { %2631 = vmatprep.subr.bf16.mxu0 %v15882_v4  ;;  %v15905_v19 = vld [vmem:[%s18446_s29 + $0x438] ss:$36 sps:$4 sm:$0xff]   ;;  %v17328_v6 = vld [vmem:[#allocation2 + $0x70] sm:$0xff] }
 0x152   : > { %v17326_v0 = vld [vmem:[#allocation2 + $0xa0] sm:$0xff]  ;;  %v17327_v2 = vld [vmem:[#allocation2 + $0xa8] sm:$0xff] }
 0x153   : > { %1048 = vadd.xlane.f32.xlu0 %v1047_v62 }
 0x154   : > { %1052 = vadd.xlane.f32.xlu1 %v1051_v63  ;;  %2632 = vmatpush1.bf16.msra.mxu0 %v15884_v5 }
 0x155   : > { %2633 = vmatprep.subr.bf16.mxu0 %v15885_v7 }
 0x158   : > { %2634 = vmatpush1.bf16.msra.mxu0 %v15887_v9 }
 0x159   : > { %2635 = vmatprep.subr.bf16.mxu0 %v15888_v10 }
 0x15c   : > { %2636 = vmatpush1.bf16.msra.mxu0 %v15890_v11 }
 0x15d   : > { %2637 = vmatprep.subr.bf16.mxu0 %v15891_v12 }
 0x160   : > { %2638 = vmatpush1.bf16.msra.mxu0 %v15893_v13 }
 0x161   : > { %2639 = vmatprep.subr.bf16.mxu0 %v15894_v14 }
 0x164   : > { %2640 = vmatpush1.bf16.msra.mxu0 %v15896_v15 }
 0x165   : > { %2641 = vmatprep.subr.bf16.mxu0 %v15897_v16  ;;  %v17329_v16 = vld [vmem:[#allocation2 + $0x68] sm:$0xff] }
 0x168   : > { %2642 = vmatpush1.bf16.msra.mxu0 %v15899_v17 }
 0x169   : > { %2643 = vmatprep.subr.bf16.mxu0 %v15902_v18  ;;  %v17330_v18 = vld [vmem:[#allocation2 + $0x30] sm:$0xff] }
 0x16c   : > { %2644 = vmatpush2.bf16.msra.mxu0 %v15905_v19 }
 0x1d0   : > { %v1025_v20 = vpop.xlane.xlu0 %1024 }
 0x1d1   : > { %v1055_v21 = vmul.f32 0.0026041667, %v1025_v20  ;;  %v1033_v22 = vpop.xlane.xlu1 %1032  ;;  %v17331_v20 = vld [vmem:[#allocation2 + $0x58] sm:$0xff] }
 0x1d2   : > { %v1057_v23 = vmul.f32 0.0026041667, %v1033_v22 }
 0x1d3   : > { %v18576_v27 = vsub.f32 %v18519_v24, %v1055_v21  ;;  %v18579_v31 = vsub.f32 %v18521_v25, %v1055_v21  ;;  %v18582_v35 = vsub.f32 %v18523_v26, %v1055_v21 }
 0x1d4   : > { %v18585_v36 = vsub.f32 %v18527_v28, %v1057_v23  ;;  %v18588_v40 = vsub.f32 %v18529_v29, %v1057_v23  ;;  %v1029_v41 = vpop.xlane.xlu0 %1028  ;;  %v18591_v42 = vsub.f32 %v18531_v30, %v1057_v23  ;;  %v17332_v23 = vld [vmem:[#allocation2 + $0xb8] sm:$0xff] }
 0x1d5   : > { %v1056_v43 = vmul.f32 0.0026041667, %v1029_v41  ;;  %v1037_v44 = vpop.xlane.xlu1 %1036  ;;  %v1087_v24 = vmul.f32 %v18576_v27, %v18576_v27  ;;  %v1088_v25 = vmul.f32 %v18579_v31, %v18579_v31  ;;  %v1089_v26 = vmul.f32 %v18582_v35, %v18582_v35 }
 0x1d6   : > { %v1058_v28 = vmul.f32 0.0026041667, %v1037_v44  ;;  %v1093_v29 = vmul.f32 %v18585_v36, %v18585_v36  ;;  %v1094_v45 = vmul.f32 %v18588_v40, %v18588_v40  ;;  %v1095_v30 = vmul.f32 %v18591_v42, %v18591_v42 }
 0x1d7   : > { %v18606_v46 = vsub.f32 %v18535_v32, %v1056_v43  ;;  %v18609_v47 = vsub.f32 %v18537_v33, %v1056_v43  ;;  %v1111_v48 = vadd.f32 %v1088_v25, %v1087_v24  ;;  %v18612_v49 = vsub.f32 %v18539_v34, %v1056_v43  ;;  %v17333_v43 = vld [vmem:[#allocation2 + $0x20] sm:$0xff] }
 0x1d8   : > { %v18615_v50 = vsub.f32 %v18544_v37, %v1058_v28  ;;  %v18618_v51 = vsub.f32 %v18546_v38, %v1058_v28  ;;  %v1041_v52 = vpop.xlane.xlu0 %1040  ;;  %v1119_v53 = vadd.f32 %v1094_v45, %v1093_v29  ;;  %v18621_v54 = vsub.f32 %v18548_v39, %v1058_v28  ;;  %v17334_v29 = vld [vmem:[#allocation2 + $0x80] sm:$0xff] }
 0x1d9   : > { %v1059_v32 = vmul.f32 0.0026041667, %v1041_v52  ;;  %v1112_v55 = vadd.f32 %v1111_v48, %v1089_v26  ;;  %v1045_v56 = vpop.xlane.xlu1 %1044  ;;  %v1090_v33 = vmul.f32 %v18606_v46, %v18606_v46  ;;  %v1091_v34 = vmul.f32 %v18609_v47, %v18609_v47 }
 0x1da   : > { %v1060_v57 = vmul.f32 0.0026041667, %v1045_v56  ;;  %v1120_v37 = vadd.f32 %v1119_v53, %v1095_v30  ;;  %v1092_v38 = vmul.f32 %v18612_v49, %v18612_v49  ;;  %v1096_v58 = vmul.f32 %v18615_v50, %v18615_v50  ;;  %v17335_v53 = vld [vmem:[#allocation2 + $0x8] sm:$0xff] }
 0x1db   : > { %v18631_v39 = vsub.f32 %v17324_v59, %v1059_v32  ;;  %v18633_v61 = vsub.f32 %v17325_v60, %v1059_v32  ;;  %1113 = vadd.xlane.f32.xlu0 %v1112_v55  ;;  %v1115_v62 = vadd.f32 %v1091_v34, %v1090_v33  ;;  %v1097_v63 = vmul.f32 %v18618_v51, %v18618_v51  ;;  %v15906_v59 = vld [vmem:[%s18446_s29 + $0x634] ss:$36 sps:$4 sm:$0xff]  }
 0x1dc   : > { %v18637_v1 = vsub.f32 %v17326_v0, %v1060_v57  ;;  %v18639_v3 = vsub.f32 %v17327_v2, %v1060_v57  ;;  %v1049_v4 = vpop.xlane.xlu0 %1048  ;;  %v1098_v5 = vmul.f32 %v18621_v54, %v18621_v54  ;;  %v18643_v7 = vsub.f32 %v17328_v6, %v1059_v32  ;;  %2702 = vmatprep.subr.bf16.mxu1 %v15906_v59  ;;  %v15911_v2 = vld [vmem:[%s18446_s29 + $0x3f0] ss:$36 sps:$4 sm:$0xff]   ;;  %v15916_v6 = vld [vmem:[%s18446_s29 + $0x5e8] ss:$36 sps:$4 sm:$0xff]  }
 0x1dd   : > { %v1061_v8 = vmul.f32 0.0026041667, %v1049_v4  ;;  %v1116_v9 = vadd.f32 %v1115_v62, %v1092_v38  ;;  %v1053_v10 = vpop.xlane.xlu1 %1052  ;;  %v1123_v11 = vadd.f32 %v1097_v63, %v1096_v58  ;;  %v1099_v12 = vmul.f32 %v18631_v39, %v18631_v39  ;;  %v15908_v62 = vld [vmem:[%s18446_s29 + $0x3f4] ss:$36 sps:$4 sm:$0xff]   ;;  %v15912_v4 = vld [vmem:[%s18446_s29 + $0x5ec] ss:$36 sps:$4 sm:$0xff]  }
 0x1de   : > { %v1062_v13 = vmul.f32 0.0026041667, %v1053_v10  ;;  %v1100_v14 = vmul.f32 %v18633_v61, %v18633_v61  ;;  %v1101_v15 = vmul.f32 %v18643_v7, %v18643_v7  ;;  %v18651_v17 = vsub.f32 %v17329_v16, %v1060_v57  ;;  %v15910_v63 = vld [vmem:[%s18446_s29 + $0x630] ss:$36 sps:$4 sm:$0xff]   ;;  %2645 = vmatprep.subr.bf16.mxu0 %v15908_v62  ;;  %v15920_v10 = vld [vmem:[%s18446_s29 + $0x364] ss:$36 sps:$4 sm:$0xff]  }
 0x1df   : > { %v18653_v19 = vsub.f32 %v17330_v18, %v1061_v8  ;;  %v18655_v21 = vsub.f32 %v17331_v20, %v1061_v8  ;;  %1121 = vadd.xlane.f32.xlu0 %v1120_v37  ;;  %1117 = vadd.xlane.f32.xlu1 %v1116_v9  ;;  %v1124_v22 = vadd.f32 %v1123_v11, %v1098_v5  ;;  %v15914_v5 = vld [vmem:[%s18446_s29 + $0x3ac] ss:$36 sps:$4 sm:$0xff]   ;;  %v15918_v9 = vld [vmem:[%s18446_s29 + $0x5a4] ss:$36 sps:$4 sm:$0xff]   ;;  %v15929_v16 = vld [vmem:[%s18446_s29 + $0x318] ss:$36 sps:$4 sm:$0xff]   ;;  %v1192_v59 = vlaneseq }
 0x1e0   : > { %v18657_v41 = vsub.f32 %v17332_v23, %v1062_v13  ;;  %v18659_v44 = vsub.f32 %v17333_v43, %v1062_v13  ;;  %v1127_v24 = vadd.f32 %v1100_v14, %v1099_v12  ;;  %v1102_v25 = vmul.f32 %v18637_v1, %v18637_v1  ;;  %2703 = vmatpush1.bf16.msra.mxu1 %v15910_v63  ;;  %v15922_v11 = vld [vmem:[%s18446_s29 + $0x5a0] ss:$36 sps:$4 sm:$0xff]   ;;  %v15930_v18 = vld [vmem:[%s18446_s29 + $0x514] ss:$36 sps:$4 sm:$0xff]   ;;  %v15936_v43 = vld [vmem:[%s18446_s29 + $0x4cc] ss:$36 sps:$4 sm:$0xff]  }
 0x1e1   : > { %v1103_v26 = vmul.f32 %v18639_v3, %v18639_v3  ;;  %v1104_v28 = vmul.f32 %v18651_v17, %v18651_v17  ;;  %v18667_v45 = vsub.f32 %v17334_v29, %v1061_v8  ;;  %v1105_v30 = vmul.f32 %v18653_v19, %v18653_v19  ;;  %2646 = vmatpush2.bf16.msra.mxu0 %v15911_v2  ;;  %v15917_v8 = vld [vmem:[%s18446_s29 + $0x3a8] ss:$36 sps:$4 sm:$0xff]   ;;  %v15923_v12 = vld [vmem:[%s18446_s29 + $0x360] ss:$36 sps:$4 sm:$0xff]   ;;  %v15932_v20 = vld [vmem:[%s18446_s29 + $0x2d4] ss:$36 sps:$4 sm:$0xff]  }
 0x1e2   : > { %v1128_v48 = vadd.f32 %v1127_v24, %v1101_v15  ;;  %v1106_v52 = vmul.f32 %v18655_v21, %v18655_v21  ;;  %v18673_v32 = vsub.f32 %v17335_v53, %v1062_v13  ;;  %v1108_v55 = vmul.f32 %v18657_v41, %v18657_v41  ;;  %2704 = vmatprep.subr.bf16.mxu1 %v15912_v4  ;;  %v15924_v13 = vld [vmem:[%s18446_s29 + $0x55c] ss:$36 sps:$4 sm:$0xff]   ;;  %v15935_v23 = vld [vmem:[%s18446_s29 + $0x2d0] ss:$36 sps:$4 sm:$0xff]   ;;  %v15944_v29 = vld [vmem:[%s18446_s29 + $0x244] ss:$36 sps:$4 sm:$0xff]  }
 0x1e3   : > { %1125 = vadd.xlane.f32.xlu1 %v1124_v22  ;;  %v1131_v56 = vadd.f32 %v1103_v26, %v1102_v25  ;;  %v1107_v33 = vmul.f32 %v18667_v45, %v18667_v45  ;;  %v1109_v34 = vmul.f32 %v18659_v44, %v18659_v44  ;;  %2647 = vmatprep.subr.bf16.mxu0 %v15914_v5  ;;  %v15926_v14 = vld [vmem:[%s18446_s29 + $0x31c] ss:$36 sps:$4 sm:$0xff]   ;;  %v15934_v22 = vld [vmem:[%s18446_s29 + $0x510] ss:$36 sps:$4 sm:$0xff]   ;;  %v15940_v25 = vld [vmem:[%s18446_s29 + $0x4c8] ss:$36 sps:$4 sm:$0xff]  }
 0x1e4   : > { %1129 = vadd.xlane.f32.xlu0 %v1128_v48  ;;  %v1135_v57 = vadd.f32 %v1106_v52, %v1105_v30  ;;  %v1110_v37 = vmul.f32 %v18673_v32, %v18673_v32  ;;  %2705 = vmatpush1.bf16.msra.mxu1 %v15916_v6  ;;  %v15928_v15 = vld [vmem:[%s18446_s29 + $0x558] ss:$36 sps:$4 sm:$0xff]   ;;  %v15938_v24 = vld [vmem:[%s18446_s29 + $0x28c] ss:$36 sps:$4 sm:$0xff]   ;;  %v15946_v30 = vld [vmem:[%s18446_s29 + $0x480] ss:$36 sps:$4 sm:$0xff]  }
 0x1e5   : > { %v1132_v38 = vadd.f32 %v1131_v56, %v1104_v28  ;;  %v1139_v58 = vadd.f32 %v1109_v34, %v1108_v55  ;;  %2648 = vmatpush2.bf16.msra.mxu0 %v15917_v8  ;;  %2706 = vmatprep.subr.bf16.mxu1 %v15918_v9  ;;  %v15941_v26 = vld [vmem:[%s18446_s29 + $0x288] ss:$36 sps:$4 sm:$0xff]   ;;  %v15947_v48 = vld [vmem:[%s18446_s29 + $0x240] ss:$36 sps:$4 sm:$0xff]   ;;  %v22732_v52 = vmov 0   ;;  %v18714_v4 = vshrl.u32 %v1192_v59, 7 }
 0x1e6   : > { %v1136_v60 = vadd.f32 %v1135_v57, %v1107_v33  ;;  %2649 = vmatprep.subr.bf16.mxu0 %v15920_v10  ;;  %v15942_v28 = vld [vmem:[%s18446_s29 + $0x484] ss:$36 sps:$4 sm:$0xff]   ;;  %2732 = vmatprep.mubr.bf16.mxu1 %v22732_v52  ;;  %v1020_v10 = vld [vmem:[%s738_s19] sm:$0x7] }
 0x1e7   : > { %1133 = vadd.xlane.f32.xlu1 %v1132_v38  ;;  %v1140_v0 = vadd.f32 %v1139_v58, %v1110_v37  ;;  %v15950_v53 = vld [vmem:[%s18446_s29 + $0x204] ss:$36 sps:$4 sm:$0xff]   ;;  %22871 = vst [vmem:[#allocation51_spill] sm:$0xff] %v18714_v4 }
 0x1e8   : > { %1137 = vadd.xlane.f32.xlu0 %v1136_v60  ;;  %2707 = vmatpush1.bf16.msra.mxu1 %v15922_v11  ;;  %v15953_v55 = vld [vmem:[%s18446_s29 + $0x684] ss:$36 sps:$4 sm:$0xff]  }
 0x1e9   : > { %2650 = vmatpush2.bf16.msra.mxu0 %v15923_v12  ;;  %2708 = vmatprep.subr.bf16.mxu1 %v15924_v13  ;;  %v18719_v13 = vsub.s32 1, %v18714_v4 }
 0x1ea   : > { %2651 = vmatprep.subr.bf16.mxu0 %v15926_v14 }
 0x1eb   : > { %1141 = vadd.xlane.f32.xlu1 %v1140_v0  ;;  %22872 = vst [vmem:[#allocation52_spill] sm:$0xff] %v18719_v13 }
 0x1ec   : > { %2709 = vmatpush1.bf16.msra.mxu1 %v15928_v15  ;;  %v18722_v15 = vsub.s32 2, %v18714_v4 }
 0x1ed   : > { %2652 = vmatpush2.bf16.msra.mxu0 %v15929_v16  ;;  %2710 = vmatprep.subr.bf16.mxu1 %v15930_v18 }
 0x1ee   : > { %2653 = vmatprep.subr.bf16.mxu0 %v15932_v20  ;;  %22873 = vst [vmem:[#allocation53_spill] sm:$0xff] %v18722_v15 }
 0x1f0   : > { %2711 = vmatpush1.bf16.msra.mxu1 %v15934_v22  ;;  %v18725_v22 = vsub.s32 0, %v18714_v4 }
 0x1f1   : > { %2654 = vmatpush2.bf16.msra.mxu0 %v15935_v23  ;;  %2712 = vmatprep.subr.bf16.mxu1 %v15936_v43  ;;  %v1021_v43 = vld [vmem:[%s747_s30] sm:$0x7]  ;;  %s22905_s30 = sld [smem:[#allocation99_spill]] }
 0x1f2   : > { %2655 = vmatprep.subr.bf16.mxu0 %v15938_v24  ;;  %22874 = vst [vmem:[#allocation54_spill] sm:$0xff] %v18725_v22  ;;  %v18730_v24 = vrot.slane %v1020_v10, %v18719_v13 }
 0x1f4   : > { %2713 = vmatpush1.bf16.msra.mxu1 %v15940_v25 }
 0x1f5   : > { %2656 = vmatpush2.bf16.msra.mxu0 %v15941_v26  ;;  %2714 = vmatprep.subr.bf16.mxu1 %v15942_v28  ;;  %v18733_v26 = vrot.slane %v1020_v10, %v18722_v15 }
 0x1f6   : > { %2657 = vmatprep.subr.bf16.mxu0 %v15944_v29 }
 0x1f8   : > { %2715 = vmatpush1.bf16.msra.mxu1 %v15946_v30 }
 0x1f9   : > { %2658 = vmatpush2.bf16.msra.mxu0 %v15947_v48  ;;  %2773 = vmatprep.subr.bf16.mxu1 %v15950_v53  ;;  %v18739_v53 = vrot.slane %v1020_v10, %v18725_v22  ;;  %v15948_v10 = vld [vmem:[%s18446_s29 + $0x200] ss:$36 sps:$4 sm:$0xff]  }
 0x1fa   : > { %2846 = vmatprep.subr.bf16.mxu0 %v15953_v55 }
 0x264   : > { %v1114_v56 = vpop.xlane.xlu0 %1113 }
 0x265   : > { %v1143_v33 = vmul.f32 0.0026041667, %v1114_v56  ;;  %v18743_v56 = vrot.slane %v1021_v43, %v18719_v13 }
 0x267   : > { %v1151_v34 = vadd.f32 1e-05, %v1143_v33 }
 0x268   : > { %v1118_v57 = vpop.xlane.xlu1 %1117  ;;  %v1122_v37 = vpop.xlane.xlu0 %1121 }
 0x269   : > { %17100 = vrsqrt.f32 %v1151_v34  ;;  %v1144_v38 = vmul.f32 0.0026041667, %v1118_v57  ;;  %v1145_v58 = vmul.f32 0.0026041667, %v1122_v37  ;;  %v18747_v57 = vrot.slane %v1021_v43, %v18722_v15 }
 0x26b   : > { %v1152_v60 = vadd.f32 1e-05, %v1144_v38  ;;  %v1153_v62 = vadd.f32 1e-05, %v1145_v58  ;;  %v18754_v58 = vrot.slane %v1021_v43, %v18725_v22 }
 0x26c   : > { %v1126_v63 = vpop.xlane.xlu1 %1125 }
 0x26d   : > { %17102 = vrsqrt.f32 %v1152_v60  ;;  %v1146_v0 = vmul.f32 0.0026041667, %v1126_v63  ;;  %v1130_v2 = vpop.xlane.xlu0 %1129 }
 0x26e   : > { %17104 = vrsqrt.f32 %v1153_v62  ;;  %v1147_v5 = vmul.f32 0.0026041667, %v1130_v2 }
 0x26f   : > { %v1154_v6 = vadd.f32 1e-05, %v1146_v0 }
 0x270   : > { %v1155_v8 = vadd.f32 1e-05, %v1147_v5  ;;  %v1134_v9 = vpop.xlane.xlu1 %1133 }
 0x271   : > { %17106 = vrsqrt.f32 %v1154_v6  ;;  %v1148_v11 = vmul.f32 0.0026041667, %v1134_v9  ;;  %v1138_v12 = vpop.xlane.xlu0 %1137 }
 0x272   : > { %17108 = vrsqrt.f32 %v1155_v8  ;;  %v1149_v14 = vmul.f32 0.0026041667, %v1138_v12 }
 0x273   : > { %v1156_v16 = vadd.f32 1e-05, %v1148_v11  ;;  %v15951_v11 = vld [vmem:[%s18446_s29 + $0x680] ss:$36 sps:$4 sm:$0xff]  }
 0x274   : > { %v1157_v18 = vadd.f32 1e-05, %v1149_v14  ;;  %v1142_v20 = vpop.xlane.xlu1 %1141 }
 0x275   : > { %17110 = vrsqrt.f32 %v1156_v16  ;;  %v1150_v23 = vmul.f32 0.0026041667, %v1142_v20 }
 0x276   : > { %v17101_v25 = vpop.eup %17100  ;;  %17112 = vrsqrt.f32 %v1157_v18 }
 0x277   : > { %v1158_v28 = vadd.f32 1e-05, %v1150_v23  ;;  %v1168_v29 = vmul.f32 %v17101_v25, %v18579_v31  ;;  %v1169_v30 = vmul.f32 %v17101_v25, %v18582_v35  ;;  %v1167_v48 = vmul.f32 %v17101_v25, %v18576_v27  ;;  %v15956_v23 = vld [vmem:[%s18446_s29 + $0x1bc] ss:$36 sps:$4 sm:$0xff]  }
 0x279   : > { %17114 = vrsqrt.f32 %v1158_v28  ;;  %v1208_v55 = vmul.f32 %v18730_v24, %v1168_v29  ;;  %v1209_v34 = vmul.f32 %v18733_v26, %v1169_v30  ;;  %v1207_v38 = vmul.f32 %v18739_v53, %v1167_v48 }
 0x27a   : > { %v17103_v33 = vpop.eup %17102 }
 0x27b   : > { %v17105_v31 = vpop.eup %17104  ;;  %v1171_v35 = vmul.f32 %v17103_v33, %v18609_v47  ;;  %v1172_v27 = vmul.f32 %v17103_v33, %v18612_v49  ;;  %v1170_v37 = vmul.f32 %v17103_v33, %v18606_v46  ;;  %v1248_v62 = vadd.f32 %v18743_v56, %v1208_v55  ;;  %v15954_v33 = vld [vmem:[%s18446_s29 + $0x1b8] ss:$36 sps:$4 sm:$0xff]  }
 0x27c   : > { %v1174_v59 = vmul.f32 %v17105_v31, %v18588_v40  ;;  %v1249_v49 = vadd.f32 %v18747_v57, %v1209_v34  ;;  %v1175_v2 = vmul.f32 %v17105_v31, %v18591_v42  ;;  %v1247_v12 = vadd.f32 %v18754_v58, %v1207_v38  ;;  %v15957_v34 = vld [vmem:[%s18446_s29 + $0x638] ss:$36 sps:$4 sm:$0xff]  }
 0x27d   : > { %v1211_v60 = vmul.f32 %v18730_v24, %v1171_v35  ;;  %v1212_v63 = vmul.f32 %v18733_v26, %v1172_v27  ;;  %v1210_v46 = vmul.f32 %v18739_v53, %v1170_v37  ;;  %v1173_v16 = vmul.f32 %v17105_v31, %v18585_v36  ;;  %v15962_v37 = vld [vmem:[%s18446_s29 + $0x174] ss:$36 sps:$4 sm:$0xff]  }
 0x27e   : > { %v17107_v47 = vpop.eup %17106  ;;  %v1214_v0 = vmul.f32 %v18730_v24, %v1174_v59  ;;  %v1215_v29 = vmul.f32 %v18733_v26, %v1175_v2  ;;  %v15965_v38 = vld [vmem:[%s18446_s29 + $0x5f4] ss:$36 sps:$4 sm:$0xff]  }
 0x27f   : > { %v17109_v5 = vpop.eup %17108  ;;  %v1251_v40 = vadd.f32 %v18743_v56, %v1211_v60  ;;  %v1252_v6 = vadd.f32 %v18747_v57, %v1212_v63  ;;  %v1177_v8 = vmul.f32 %v17107_v47, %v18618_v51  ;;  %v1178_v9 = vmul.f32 %v17107_v47, %v18621_v54  ;;  %v15959_v54 = vld [vmem:[%s18446_s29 + $0x63c] ss:$36 sps:$4 sm:$0xff]   ;;  %v15960_v2 = vld [vmem:[%s18446_s29 + $0x170] ss:$36 sps:$4 sm:$0xff]  }
 0x280   : > { %v1250_v14 = vadd.f32 %v18754_v58, %v1210_v46  ;;  %v1176_v42 = vmul.f32 %v17107_v47, %v18615_v50  ;;  %v1180_v50 = vmul.f32 %v17109_v5, %v18633_v61  ;;  %v1254_v30 = vadd.f32 %v18743_v56, %v1214_v0 }
 0x281   : > { %v18774_v18 = vpack.c.bf16 %v1251_v40, %v1248_v62  ;;  %v18776_v20 = vpack.c.bf16 %v1252_v6, %v1249_v49  ;;  %v1217_v51 = vmul.f32 %v18730_v24, %v1177_v8  ;;  %v1218_v43 = vmul.f32 %v18733_v26, %v1178_v9  ;;  %v15963_v6 = vld [vmem:[%s18446_s29 + $0x5f0] ss:$36 sps:$4 sm:$0xff]  }
 0x282   : > { %v17111_v25 = vpop.eup %17110  ;;  %v18782_v28 = vpack.c.bf16 %v1250_v14, %v1247_v12  ;;  %v1216_v36 = vmul.f32 %v18739_v53, %v1176_v42  ;;  %v1213_v61 = vmul.f32 %v18739_v53, %v1173_v16  ;;  %v1255_v62 = vadd.f32 %v18747_v57, %v1215_v29  ;;  %v15966_v42 = vld [vmem:[%s18446_s29 + $0x128] ss:$36 sps:$4 sm:$0xff]  }
 0x283   : > { %2659 = vmatprep.mubr.bf16.mxu0 %v18774_v18  ;;  %2733 = vmatmul.mubr.bf16.vlgmr.msra.gmra.mxu1 %v18776_v20  ;;  %v1257_v48 = vadd.f32 %v18743_v56, %v1217_v51  ;;  %v1183_v55 = vmul.f32 %v17111_v25, %v18639_v3  ;;  %v1258_v31 = vadd.f32 %v18747_v57, %v1218_v43  ;;  %v18797_v35 = vpop.eup %17112  ;;  %v15974_v51 = vld [vmem:[%s18446_s29 + $0xe4] ss:$36 sps:$4 sm:$0xff]  }
 0x284   : > { %2774 = vmatpush1.bf16.msra.mxu1 %v15948_v10  ;;  %2660 = vmatmul.mubr.bf16.vlgmr.msra.gmra.mxu0 %v18782_v28  ;;  %v1220_v3 = vmul.f32 %v18730_v24, %v1180_v50  ;;  %v1256_v63 = vadd.f32 %v18754_v58, %v1216_v36  ;;  %v1181_v49 = vmul.f32 %v17109_v5, %v18643_v7  ;;  %v15977_v43 = vld [vmem:[%s18446_s29 + $0x564] ss:$36 sps:$4 sm:$0xff]  }
 0x285   : > { %2847 = vmatpush1.bf16.msra.mxu0 %v15951_v11  ;;  %2775 = vmatprep.subr.bf16.mxu1 %v15956_v23  ;;  %v18799_v27 = vpack.c.bf16 %v1257_v48, %v1254_v30  ;;  %v1223_v59 = vmul.f32 %v18730_v24, %v1183_v55  ;;  %v1184_v46 = vmul.f32 %v17111_v25, %v18651_v17  ;;  %v15968_v17 = vld [vmem:[%s18446_s29 + $0x12c] ss:$36 sps:$4 sm:$0xff]  }
 0x286   : > { %v17115_v60 = vpop.eup %17114  ;;  %2848 = vmatprep.subr.bf16.mxu0 %v15959_v54  ;;  %2742 = vmatprep.mubr.bf16.mxu1 %v22732_v52  ;;  %v1182_v0 = vmul.f32 %v17111_v25, %v18637_v1  ;;  %v18814_v40 = vpack.c.bf16 %v1258_v31, %v1255_v62  ;;  %v1253_v8 = vadd.f32 %v18754_v58, %v1213_v61  ;;  %v15971_v11 = vld [vmem:[%s18446_s29 + $0x5ac] ss:$36 sps:$4 sm:$0xff]   ;;  %v15986_v62 = vld [vmem:[%s18446_s29 + $0x54] ss:$36 sps:$4 sm:$0xff]  }
 0x287   : > { %2669 = vmatprep.mubr.bf16.mxu0 %v18799_v27  ;;  %v1263_v47 = vadd.f32 %v18743_v56, %v1223_v59  ;;  %v1179_v9 = vmul.f32 %v17109_v5, %v18631_v39  ;;  %v1189_v10 = vmul.f32 %v17115_v60, %v18659_v44  ;;  %v1260_v7 = vadd.f32 %v18743_v56, %v1220_v3  ;;  %v15969_v23 = vld [vmem:[%s18446_s29 + $0x5a8] ss:$36 sps:$4 sm:$0xff]   ;;  %v15981_v59 = vld [vmem:[%s18446_s29 + $0x518] ss:$36 sps:$4 sm:$0xff]  }
 0x288   : > { %2776 = vmatpush1.bf16.msra.mxu1 %v15954_v33  ;;  %v1224_v1 = vmul.f32 %v18733_v26, %v1184_v46  ;;  %v1186_v12 = vmul.f32 %v18797_v35, %v18655_v21  ;;  %v18826_v14 = vpack.c.bf16 %v1256_v63, %v1253_v8  ;;  %v1222_v39 = vmul.f32 %v18739_v53, %v1182_v0  ;;  %v15987_v46 = vld [vmem:[%s18446_s29 + $0x4d0] ss:$36 sps:$4 sm:$0xff]  }
 0x289   : > { %2849 = vmatpush1.bf16.msra.mxu0 %v15957_v34  ;;  %2777 = vmatprep.subr.bf16.mxu1 %v15962_v37  ;;  %v18830_v44 = vpack.c.bf16 %v1263_v47, %v1260_v7  ;;  %v1221_v5 = vmul.f32 %v18733_v26, %v1181_v49  ;;  %v1229_v16 = vmul.f32 %v18730_v24, %v1189_v10  ;;  %v15980_v37 = vld [vmem:[%s18446_s29 + $0x9c] ss:$36 sps:$4 sm:$0xff]   ;;  %v15989_v47 = vld [vmem:[%s18446_s29 + $0x4d4] ss:$36 sps:$4 sm:$0xff]   ;;  %v15995_v8 = vld [vmem:[%s18446_s29 + $0x48c] ss:$36 sps:$4 sm:$0xff]  }
 0x28a   : > { %2850 = vmatprep.subr.bf16.mxu0 %v15965_v38  ;;  %v1219_v21 = vmul.f32 %v18739_v53, %v1179_v9  ;;  %v1264_v54 = vadd.f32 %v18747_v57, %v1224_v1  ;;  %v1226_v25 = vmul.f32 %v18730_v24, %v1186_v12  ;;  %v1190_v29 = vmul.f32 %v17115_v60, %v18673_v32  ;;  %v15972_v24 = vld [vmem:[%s18446_s29 + $0xe0] ss:$36 sps:$4 sm:$0xff]   ;;  %v16001_v7 = vld [vmem:[%s18446_s29 + $0x20c] ss:$36 sps:$4 sm:$0xff]  }
 0x28b   : > { %2743 = vmatmul.mubr.bf16.gmra.mxu1 %v18814_v40  ;;  %v1262_v36 = vadd.f32 %v18754_v58, %v1222_v39  ;;  %v1261_v50 = vadd.f32 %v18747_v57, %v1221_v5  ;;  %v1269_v30 = vadd.f32 %v18743_v56, %v1229_v16  ;;  %v1187_v48 = vmul.f32 %v18797_v35, %v18667_v45  ;;  %v15975_v32 = vld [vmem:[%s18446_s29 + $0x560] ss:$36 sps:$4 sm:$0xff]   ;;  %v16002_v39 = vld [vmem:[%s18446_s29 + $0x3f8] ss:$36 sps:$4 sm:$0xff]  }
 0x28c   : > { %2778 = vmatpush1.bf16.msra.mxu1 %v15960_v2  ;;  %2670 = vmatmul.mubr.bf16.gmra.mxu0 %v18826_v14  ;;  %v1188_v55 = vmul.f32 %v17115_v60, %v18657_v41  ;;  %v1259_v33 = vadd.f32 %v18754_v58, %v1219_v21  ;;  %v1185_v34 = vmul.f32 %v18797_v35, %v18653_v19  ;;  %v15983_v45 = vld [vmem:[%s18446_s29 + $0x51c] ss:$36 sps:$4 sm:$0xff]   ;;  %v15998_v10 = vld [vmem:[%s18446_s29 + $0x444] ss:$36 sps:$4 sm:$0xff]   ;;  %v16010_v16 = vld [vmem:[%s18446_s29 + $0x3b4] ss:$36 sps:$4 sm:$0xff]  }
 0x28d   : > { %2851 = vmatpush1.bf16.msra.mxu0 %v15963_v6  ;;  %2679 = vmatprep.mubr.bf16.mxu0 %v18830_v44  ;;  %v18856_v31 = vpack.c.bf16 %v1264_v54, %v1261_v50  ;;  %v1266_v61 = vadd.f32 %v18743_v56, %v1226_v25  ;;  %v1230_v41 = vmul.f32 %v18733_v26, %v1190_v29  ;;  %v15978_v56 = vld [vmem:[%s18446_s29 + $0x98] ss:$36 sps:$4 sm:$0xff]   ;;  %v15992_v6 = vld [vmem:[%s18446_s29 + $0xc] ss:$36 sps:$4 sm:$0xff]   ;;  %v16007_v12 = vld [vmem:[%s18446_s29 + $0x1c4] ss:$36 sps:$4 sm:$0xff]  }
 0x28e   : > { %2779 = vmatprep.subr.bf16.mxu1 %v15968_v17  ;;  %2852 = vmatprep.subr.bf16.mxu0 %v15971_v11  ;;  %v18862_v38 = vpack.c.bf16 %v1262_v36, %v1259_v33  ;;  %v1228_v3 = vmul.f32 %v18739_v53, %v1188_v55  ;;  %v1227_v35 = vmul.f32 %v18733_v26, %v1187_v48  ;;  %v15996_v17 = vld [vmem:[%s18446_s29 + $0x440] ss:$36 sps:$4 sm:$0xff]   ;;  %v15999_v11 = vld [vmem:[%s18446_s29 + $0x208] ss:$36 sps:$4 sm:$0xff]   ;;  %v16011_v21 = vld [vmem:[%s18446_s29 + $0x178] ss:$36 sps:$4 sm:$0xff]  }
 0x28f   : > { %2752 = vmatprep.mubr.bf16.mxu1 %v22732_v52  ;;  %v18866_v19 = vpack.c.bf16 %v1269_v30, %v1266_v61  ;;  %v1225_v60 = vmul.f32 %v18739_v53, %v1185_v34  ;;  %v1270_v63 = vadd.f32 %v18747_v57, %v1230_v41  ;;  %v15984_v53 = vld [vmem:[%s18446_s29 + $0x50] ss:$36 sps:$4 sm:$0xff]   ;;  %v16004_v1 = vld [vmem:[%s18446_s29 + $0x3fc] ss:$36 sps:$4 sm:$0xff]   ;;  %v16022_v29 = vld [vmem:[%s18446_s29 + $0x324] ss:$36 sps:$4 sm:$0xff]  }
 0x290   : > { %2780 = vmatpush1.bf16.msra.mxu1 %v15966_v42  ;;  %v1268_v26 = vadd.f32 %v18754_v58, %v1228_v3  ;;  %v1267_v49 = vadd.f32 %v18747_v57, %v1227_v35  ;;  %v15990_v57 = vld [vmem:[%s18446_s29 + $0x8] ss:$36 sps:$4 sm:$0xff]   ;;  %v16005_v5 = vld [vmem:[%s18446_s29 + $0x1c0] ss:$36 sps:$4 sm:$0xff]   ;;  %v16019_v54 = vld [vmem:[%s18446_s29 + $0x134] ss:$36 sps:$4 sm:$0xff]  }
 0x291   : > { %2853 = vmatpush1.bf16.msra.mxu0 %v15969_v23  ;;  %2781 = vmatprep.subr.bf16.mxu1 %v15974_v51  ;;  %v1265_v0 = vadd.f32 %v18754_v58, %v1225_v60  ;;  %v15993_v58 = vld [vmem:[%s18446_s29 + $0x488] ss:$36 sps:$4 sm:$0xff]   ;;  %v16013_v42 = vld [vmem:[%s18446_s29 + $0x17c] ss:$36 sps:$4 sm:$0xff]   ;;  %v16008_v23 = vld [vmem:[%s18446_s29 + $0x3b0] ss:$36 sps:$4 sm:$0xff]  }
 0x292   : > { %2854 = vmatprep.subr.bf16.mxu0 %v15977_v43  ;;  %v18883_v2 = vpack.c.bf16 %v1270_v63, %v1267_v49  ;;  %v16016_v51 = vld [vmem:[%s18446_s29 + $0x36c] ss:$36 sps:$4 sm:$0xff]   ;;  %v16020_v50 = vld [vmem:[%s18446_s29 + $0x320] ss:$36 sps:$4 sm:$0xff]   ;;  %v16034_v33 = vld [vmem:[%s18446_s29 + $0x294] ss:$36 sps:$4 sm:$0xff]  }
 0x293   : > { %2753 = vmatmul.mubr.bf16.gmra.mxu1 %v18856_v31  ;;  %v18887_v9 = vpack.c.bf16 %v1268_v26, %v1265_v0  ;;  %v16014_v43 = vld [vmem:[%s18446_s29 + $0x368] ss:$36 sps:$4 sm:$0xff]   ;;  %v16017_v25 = vld [vmem:[%s18446_s29 + $0x130] ss:$36 sps:$4 sm:$0xff]   ;;  %v16028_v48 = vld [vmem:[%s18446_s29 + $0x2dc] ss:$36 sps:$4 sm:$0xff]  }
 0x294   : > { %2782 = vmatpush1.bf16.msra.mxu1 %v15972_v24  ;;  %2680 = vmatmul.mubr.bf16.gmra.mxu0 %v18862_v38  ;;  %v16025_v36 = vld [vmem:[%s18446_s29 + $0xec] ss:$36 sps:$4 sm:$0xff]   ;;  %v16031_v55 = vld [vmem:[%s18446_s29 + $0xa4] ss:$36 sps:$4 sm:$0xff]   ;;  %v16026_v24 = vld [vmem:[%s18446_s29 + $0x2d8] ss:$36 sps:$4 sm:$0xff]  }
 0x295   : > { %2855 = vmatpush1.bf16.msra.mxu0 %v15975_v32  ;;  %2689 = vmatprep.mubr.bf16.mxu0 %v18866_v19  ;;  %v16023_v30 = vld [vmem:[%s18446_s29 + $0xe8] ss:$36 sps:$4 sm:$0xff]   ;;  %v16029_v32 = vld [vmem:[%s18446_s29 + $0xa0] ss:$36 sps:$4 sm:$0xff]   ;;  %v16032_v61 = vld [vmem:[%s18446_s29 + $0x290] ss:$36 sps:$4 sm:$0xff]  }
 0x296   : > { %2783 = vmatprep.subr.bf16.mxu1 %v15980_v37  ;;  %2856 = vmatprep.subr.bf16.mxu0 %v15983_v45  ;;  %v16037_v34 = vld [vmem:[%s18446_s29 + $0x5c] ss:$36 sps:$4 sm:$0xff]   ;;  %v16040_v45 = vld [vmem:[%s18446_s29 + $0x24c] ss:$36 sps:$4 sm:$0xff]   ;;  %v16043_v41 = vld [vmem:[%s18446_s29 + $0x14] ss:$36 sps:$4 sm:$0xff]  }
 0x297   : > { %2762 = vmatprep.mubr.bf16.mxu1 %v22732_v52  ;;  %v16035_v37 = vld [vmem:[%s18446_s29 + $0x58] ss:$36 sps:$4 sm:$0xff]   ;;  %v16038_v3 = vld [vmem:[%s18446_s29 + $0x248] ss:$36 sps:$4 sm:$0xff]   ;;  %v16041_v35 = vld [vmem:[%s18446_s29 + $0x10] ss:$36 sps:$4 sm:$0xff]  }
 0x298   : > { %2784 = vmatpush1.bf16.msra.mxu1 %v15978_v56  ;;  %v16046_v56 = vld [vmem:[%s18446_s29 + $0x68c] ss:$36 sps:$4 sm:$0xff]   ;;  %v16052_v63 = vld [vmem:[%s18446_s29 + $0x644] ss:$36 sps:$4 sm:$0xff]   ;;  %v16056_v0 = vld [vmem:[%s18446_s29 + $0x5f8] ss:$36 sps:$4 sm:$0xff]  }
 0x299   : > { %2857 = vmatpush1.bf16.msra.mxu0 %v15981_v59  ;;  %2785 = vmatprep.subr.bf16.mxu1 %v15986_v62  ;;  %v16049_v59 = vld [vmem:[%s18446_s29 + $0x44c] ss:$36 sps:$4 sm:$0xff]   ;;  %v16050_v26 = vld [vmem:[%s18446_s29 + $0x640] ss:$36 sps:$4 sm:$0xff]  }
 0x29a   : > { %2858 = vmatprep.subr.bf16.mxu0 %v15989_v47  ;;  %v16044_v60 = vld [vmem:[%s18446_s29 + $0x688] ss:$36 sps:$4 sm:$0xff]   ;;  %v16053_v49 = vld [vmem:[%s18446_s29 + $0x400] ss:$36 sps:$4 sm:$0xff]  }
 0x29b   : > { %2763 = vmatmul.mubr.bf16.gmra.mxu1 %v18883_v2  ;;  %v16047_v62 = vld [vmem:[%s18446_s29 + $0x448] ss:$36 sps:$4 sm:$0xff]  }
 0x29c   : > { %2786 = vmatpush1.bf16.msra.mxu1 %v15984_v53  ;;  %2690 = vmatmul.mubr.bf16.gmra.mxu0 %v18887_v9  ;;  %v16055_v47 = vld [vmem:[%s18446_s29 + $0x404] ss:$36 sps:$4 sm:$0xff]   ;;  %v16058_v53 = vld [vmem:[%s18446_s29 + $0x5fc] ss:$36 sps:$4 sm:$0xff]  }
 0x29d   : > { %2805 = vmatprep.mubr.bf16.mxu1 %v18774_v18  ;;  %2859 = vmatpush1.bf16.msra.mxu0 %v15987_v46  ;;  %v16061_v46 = vld [vmem:[%s18446_s29 + $0x3bc] ss:$36 sps:$4 sm:$0xff]  }
 0x29e   : > { %2787 = vmatprep.subr.bf16.mxu1 %v15992_v6  ;;  %2860 = vmatprep.subr.bf16.mxu0 %v15995_v8  ;;  %v16059_v6 = vld [vmem:[%s18446_s29 + $0x3b8] ss:$36 sps:$4 sm:$0xff]  }
 0x29f   : > { %2878 = vmatprep.mubr.bf16.mxu0 %v22732_v52  ;;  %v16064_v8 = vld [vmem:[%s18446_s29 + $0x5b4] ss:$36 sps:$4 sm:$0xff]  }
 0x2a0   : > { %2788 = vmatpush1.bf16.msra.mxu1 %v15990_v57  ;;  %v16067_v57 = vld [vmem:[%s18446_s29 + $0x374] ss:$36 sps:$4 sm:$0xff]  }
 0x2a1   : > { %2861 = vmatpush1.bf16.msra.mxu0 %v15993_v58  ;;  %2789 = vmatprep.subr.bf16.mxu1 %v15998_v10  ;;  %v16062_v58 = vld [vmem:[%s18446_s29 + $0x5b0] ss:$36 sps:$4 sm:$0xff]  }
 0x2a2   : > { %2919 = vmatprep.subr.bf16.mxu0 %v16001_v7  ;;  %v16065_v10 = vld [vmem:[%s18446_s29 + $0x370] ss:$36 sps:$4 sm:$0xff]  }
 0x2a3   : > { %v16070_v7 = vld [vmem:[%s18446_s29 + $0x56c] ss:$36 sps:$4 sm:$0xff]  }
 0x2a4   : > { %2790 = vmatpush2.bf16.msra.mxu1 %v15996_v17  ;;  %2879 = vmatmul.mubr.bf16.vlgmr.msra.gmra.mxu0 %v18776_v20  ;;  %v16073_v17 = vld [vmem:[%s18446_s29 + $0x32c] ss:$36 sps:$4 sm:$0xff]  }
 0x2a5   : > { %2920 = vmatpush1.bf16.msra.mxu0 %v15999_v11  ;;  %2791 = vmatprep.subr.bf16.mxu1 %v16004_v1  ;;  %v16068_v11 = vld [vmem:[%s18446_s29 + $0x568] ss:$36 sps:$4 sm:$0xff]  }
 0x2a6   : > { %2921 = vmatprep.subr.bf16.mxu0 %v16007_v12  ;;  %2888 = vmatprep.mubr.bf16.mxu0 %v22732_v52  ;;  %v16071_v1 = vld [vmem:[%s18446_s29 + $0x328] ss:$36 sps:$4 sm:$0xff]  }
 0x2a7   : > { %v16076_v12 = vld [vmem:[%s18446_s29 + $0x524] ss:$36 sps:$4 sm:$0xff]  }
 0x2a8   : > { %2792 = vmatpush2.bf16.msra.mxu1 %v16002_v39  ;;  %v16079_v39 = vld [vmem:[%s18446_s29 + $0x2e4] ss:$36 sps:$4 sm:$0xff]  }
 0x2a9   : > { %2922 = vmatpush1.bf16.msra.mxu0 %v16005_v5  ;;  %2793 = vmatprep.subr.bf16.mxu1 %v16010_v16  ;;  %v16074_v5 = vld [vmem:[%s18446_s29 + $0x520] ss:$36 sps:$4 sm:$0xff]  }
 0x2aa   : > { %2923 = vmatprep.subr.bf16.mxu0 %v16013_v42  ;;  %v16077_v16 = vld [vmem:[%s18446_s29 + $0x2e0] ss:$36 sps:$4 sm:$0xff]  }
 0x2ab   : > { %v16082_v42 = vld [vmem:[%s18446_s29 + $0x4dc] ss:$36 sps:$4 sm:$0xff]  }
 0x2ac   : > { %2794 = vmatpush2.bf16.msra.mxu1 %v16008_v23  ;;  %2889 = vmatmul.mubr.bf16.gmra.mxu0 %v18814_v40  ;;  %v16085_v23 = vld [vmem:[%s18446_s29 + $0x29c] ss:$36 sps:$4 sm:$0xff]  }
 0x2ad   : > { %2924 = vmatpush1.bf16.msra.mxu0 %v16011_v21  ;;  %2795 = vmatprep.subr.bf16.mxu1 %v16016_v51  ;;  %v16080_v21 = vld [vmem:[%s18446_s29 + $0x4d8] ss:$36 sps:$4 sm:$0xff]  }
 0x2ae   : > { %2925 = vmatprep.subr.bf16.mxu0 %v16019_v54  ;;  %2898 = vmatprep.mubr.bf16.mxu0 %v22732_v52  ;;  %v16083_v51 = vld [vmem:[%s18446_s29 + $0x298] ss:$36 sps:$4 sm:$0xff]  }
 0x2af   : > { %v16088_v54 = vld [vmem:[%s18446_s29 + $0x494] ss:$36 sps:$4 sm:$0xff]  }
 0x2b0   : > { %2796 = vmatpush2.bf16.msra.mxu1 %v16014_v43  ;;  %v16091_v43 = vld [vmem:[%s18446_s29 + $0x254] ss:$36 sps:$4 sm:$0xff]  }
 0x2b1   : > { %2926 = vmatpush1.bf16.msra.mxu0 %v16017_v25  ;;  %2797 = vmatprep.subr.bf16.mxu1 %v16022_v29  ;;  %v16086_v25 = vld [vmem:[%s18446_s29 + $0x490] ss:$36 sps:$4 sm:$0xff]  }
 0x2b2   : > { %2927 = vmatprep.subr.bf16.mxu0 %v16025_v36  ;;  %v16089_v29 = vld [vmem:[%s18446_s29 + $0x250] ss:$36 sps:$4 sm:$0xff]  }
 0x2b3   : > { %v16094_v36 = vld [vmem:[%s18446_s29 + $0x214] ss:$36 sps:$4 sm:$0xff]  }
 0x2b4   : > { %2798 = vmatpush2.bf16.msra.mxu1 %v16020_v50  ;;  %2899 = vmatmul.mubr.bf16.gmra.mxu0 %v18856_v31  ;;  %v16097_v50 = vld [vmem:[%s18446_s29 + $0x694] ss:$36 sps:$4 sm:$0xff]  }
 0x2b5   : > { %2928 = vmatpush1.bf16.msra.mxu0 %v16023_v30  ;;  %2799 = vmatprep.subr.bf16.mxu1 %v16028_v48  ;;  %v16092_v30 = vld [vmem:[%s18446_s29 + $0x210] ss:$36 sps:$4 sm:$0xff]  }
 0x2b6   : > { %2929 = vmatprep.subr.bf16.mxu0 %v16031_v55  ;;  %2908 = vmatprep.mubr.bf16.mxu0 %v22732_v52  ;;  %v16095_v48 = vld [vmem:[%s18446_s29 + $0x690] ss:$36 sps:$4 sm:$0xff]  }
 0x2b7   : > { %v16100_v55 = vld [vmem:[%s18446_s29 + $0x1cc] ss:$36 sps:$4 sm:$0xff]  }
 0x2b8   : > { %2800 = vmatpush2.bf16.msra.mxu1 %v16026_v24  ;;  %v16103_v24 = vld [vmem:[%s18446_s29 + $0x64c] ss:$36 sps:$4 sm:$0xff]  }
 0x2b9   : > { %2930 = vmatpush1.bf16.msra.mxu0 %v16029_v32  ;;  %2801 = vmatprep.subr.bf16.mxu1 %v16034_v33  ;;  %v16098_v32 = vld [vmem:[%s18446_s29 + $0x1c8] ss:$36 sps:$4 sm:$0xff]  }
 0x2ba   : > { %2931 = vmatprep.subr.bf16.mxu0 %v16037_v34  ;;  %v16101_v33 = vld [vmem:[%s18446_s29 + $0x648] ss:$36 sps:$4 sm:$0xff]  }
 0x2bb   : > { %v16106_v34 = vld [vmem:[%s18446_s29 + $0x184] ss:$36 sps:$4 sm:$0xff]  }
 0x2bc   : > { %2802 = vmatpush2.bf16.msra.mxu1 %v16032_v61  ;;  %2909 = vmatmul.mubr.bf16.gmra.mxu0 %v18883_v2  ;;  %v16109_v61 = vld [vmem:[%s18446_s29 + $0x604] ss:$36 sps:$4 sm:$0xff]  }
 0x2bd   : > { %2932 = vmatpush1.bf16.msra.mxu0 %v16035_v37  ;;  %2951 = vmatprep.mubr.bf16.mxu0 %v18774_v18  ;;  %v16104_v37 = vld [vmem:[%s18446_s29 + $0x180] ss:$36 sps:$4 sm:$0xff]  }
 0x2be   : > { %2803 = vmatprep.subr.bf16.mxu1 %v16040_v45  ;;  %2933 = vmatprep.subr.bf16.mxu0 %v16043_v41  ;;  %v16107_v45 = vld [vmem:[%s18446_s29 + $0x600] ss:$36 sps:$4 sm:$0xff]  }
 0x2bf   : > { %v16112_v41 = vld [vmem:[%s18446_s29 + $0x13c] ss:$36 sps:$4 sm:$0xff]  }
 0x2c0   : > { %2804 = vmatpush2.bf16.msra.mxu1 %v16038_v3  ;;  %v16115_v3 = vld [vmem:[%s18446_s29 + $0x5bc] ss:$36 sps:$4 sm:$0xff]  }
 0x2c1   : > { %2934 = vmatpush1.bf16.msra.mxu0 %v16041_v35  ;;  %2992 = vmatprep.subr.bf16.mxu1 %v16046_v56  ;;  %v16110_v35 = vld [vmem:[%s18446_s29 + $0x138] ss:$36 sps:$4 sm:$0xff]  }
 0x2c2   : > { %2935 = vmatprep.subr.bf16.mxu0 %v16049_v59  ;;  %v16113_v56 = vld [vmem:[%s18446_s29 + $0x5b8] ss:$36 sps:$4 sm:$0xff]  }
 0x2c3   : > { %2806 = vmatmul.mubr.bf16.vlgmr.msra.gmra.mxu1 %v18782_v28  ;;  %v16118_v59 = vld [vmem:[%s18446_s29 + $0xf4] ss:$36 sps:$4 sm:$0xff]  }
 0x2c4   : > { %2815 = vmatprep.mubr.bf16.mxu1 %v18799_v27  ;;  %2993 = vmatpush1.bf16.msra.mxu1 %v16044_v60  ;;  %v16121_v60 = vld [vmem:[%s18446_s29 + $0x574] ss:$36 sps:$4 sm:$0xff]  }
 0x2c5   : > { %2936 = vmatpush2.bf16.msra.mxu0 %v16047_v62  ;;  %2994 = vmatprep.subr.bf16.mxu1 %v16052_v63  ;;  %v16116_v62 = vld [vmem:[%s18446_s29 + $0xf0] ss:$36 sps:$4 sm:$0xff]  }
 0x2c6   : > { %2937 = vmatprep.subr.bf16.mxu0 %v16055_v47  ;;  %v16119_v63 = vld [vmem:[%s18446_s29 + $0x570] ss:$36 sps:$4 sm:$0xff]  }
 0x2c7   : > { %v16124_v47 = vld [vmem:[%s18446_s29 + $0xac] ss:$36 sps:$4 sm:$0xff]  }
 0x2c8   : > { %2995 = vmatpush1.bf16.msra.mxu1 %v16050_v26  ;;  %v16127_v26 = vld [vmem:[%s18446_s29 + $0x52c] ss:$36 sps:$4 sm:$0xff]  }
 0x2c9   : > { %2938 = vmatpush2.bf16.msra.mxu0 %v16053_v49  ;;  %2996 = vmatprep.subr.bf16.mxu1 %v16058_v53  ;;  %v16122_v49 = vld [vmem:[%s18446_s29 + $0xa8] ss:$36 sps:$4 sm:$0xff]  }
 0x2ca   : > { %2939 = vmatprep.subr.bf16.mxu0 %v16061_v46  ;;  %v16125_v53 = vld [vmem:[%s18446_s29 + $0x528] ss:$36 sps:$4 sm:$0xff]  }
 0x2cb   : > { %2816 = vmatmul.mubr.bf16.gmra.mxu1 %v18826_v14  ;;  %v16130_v46 = vld [vmem:[%s18446_s29 + $0x64] ss:$36 sps:$4 sm:$0xff]  }
 0x2cc   : > { %2825 = vmatprep.mubr.bf16.mxu1 %v18830_v44  ;;  %2997 = vmatpush1.bf16.msra.mxu1 %v16056_v0  ;;  %v16133_v0 = vld [vmem:[%s18446_s29 + $0x4e4] ss:$36 sps:$4 sm:$0xff]  }
 0x2cd   : > { %2940 = vmatpush2.bf16.msra.mxu0 %v16059_v6  ;;  %2998 = vmatprep.subr.bf16.mxu1 %v16064_v8  ;;  %v16128_v6 = vld [vmem:[%s18446_s29 + $0x60] ss:$36 sps:$4 sm:$0xff]  }
 0x2ce   : > { %2941 = vmatprep.subr.bf16.mxu0 %v16067_v57  ;;  %v16131_v8 = vld [vmem:[%s18446_s29 + $0x4e0] ss:$36 sps:$4 sm:$0xff]  }
 0x2cf   : > { %v16136_v57 = vld [vmem:[%s18446_s29 + $0x1c] ss:$36 sps:$4 sm:$0xff]  }
 0x2d0   : > { %2999 = vmatpush1.bf16.msra.mxu1 %v16062_v58  ;;  %v16139_v58 = vld [vmem:[%s18446_s29 + $0x49c] ss:$36 sps:$4 sm:$0xff]  }
 0x2d1   : > { %2942 = vmatpush2.bf16.msra.mxu0 %v16065_v10  ;;  %3000 = vmatprep.subr.bf16.mxu1 %v16070_v7  ;;  %v16134_v10 = vld [vmem:[%s18446_s29 + $0x18] ss:$36 sps:$4 sm:$0xff]  }
 0x2d2   : > { %2943 = vmatprep.subr.bf16.mxu0 %v16073_v17  ;;  %v16137_v7 = vld [vmem:[%s18446_s29 + $0x498] ss:$36 sps:$4 sm:$0xff]  }
 0x2d3   : > { %2826 = vmatmul.mubr.bf16.gmra.mxu1 %v18862_v38  ;;  %v16142_v17 = vld [vmem:[%s18446_s29 + $0x454] ss:$36 sps:$4 sm:$0xff]  }
 0x2d4   : > { %2835 = vmatprep.mubr.bf16.mxu1 %v18866_v19  ;;  %3001 = vmatpush1.bf16.msra.mxu1 %v16068_v11  ;;  %v16143_v11 = vld [vmem:[%s18446_s29 + $0x458] ss:$36 sps:$4 sm:$0xff]  }
 0x2d5   : > { %2944 = vmatpush2.bf16.msra.mxu0 %v16071_v1  ;;  %3002 = vmatprep.subr.bf16.mxu1 %v16076_v12  ;;  %v16140_v1 = vld [vmem:[%s18446_s29 + $0x450] ss:$36 sps:$4 sm:$0xff]   ;;  %v16144_v12 = vld [vmem:[%s18446_s29 + $0x218] ss:$36 sps:$4 sm:$0xff]  }
 0x2d6   : > { %2945 = vmatprep.subr.bf16.mxu0 %v16079_v39  ;;  %v16147_v39 = vld [vmem:[%s18446_s29 + $0x40c] ss:$36 sps:$4 sm:$0xff]  }
 0x2d8   : > { %3003 = vmatpush1.bf16.msra.mxu1 %v16074_v5  ;;  %v16148_v5 = vld [vmem:[%s18446_s29 + $0x410] ss:$36 sps:$4 sm:$0xff]  }
 0x2d9   : > { %2946 = vmatpush2.bf16.msra.mxu0 %v16077_v16  ;;  %3004 = vmatprep.subr.bf16.mxu1 %v16082_v42  ;;  %v16145_v16 = vld [vmem:[%s18446_s29 + $0x408] ss:$36 sps:$4 sm:$0xff]   ;;  %v16149_v42 = vld [vmem:[%s18446_s29 + $0x1d0] ss:$36 sps:$4 sm:$0xff]  }
 0x2da   : > { %2947 = vmatprep.subr.bf16.mxu0 %v16085_v23  ;;  %v16152_v23 = vld [vmem:[%s18446_s29 + $0x3c4] ss:$36 sps:$4 sm:$0xff]  }
 0x2db   : > { %2836 = vmatmul.mubr.bf16.gmra.mxu1 %v18887_v9 }
 0x2dc   : > { %3005 = vmatpush1.bf16.msra.mxu1 %v16080_v21  ;;  %3024 = vmatprep.mubr.bf16.mxu1 %v22732_v52  ;;  %v16153_v21 = vld [vmem:[%s18446_s29 + $0x3c8] ss:$36 sps:$4 sm:$0xff]  }
 0x2dd   : > { %2948 = vmatpush2.bf16.msra.mxu0 %v16083_v51  ;;  %3006 = vmatprep.subr.bf16.mxu1 %v16088_v54  ;;  %v16150_v51 = vld [vmem:[%s18446_s29 + $0x3c0] ss:$36 sps:$4 sm:$0xff]   ;;  %v16154_v54 = vld [vmem:[%s18446_s29 + $0x188] ss:$36 sps:$4 sm:$0xff]  }
 0x2de   : > { %2949 = vmatprep.subr.bf16.mxu0 %v16091_v43  ;;  %v16157_v43 = vld [vmem:[%s18446_s29 + $0x37c] ss:$36 sps:$4 sm:$0xff]  }
 0x2e0   : > { %3007 = vmatpush1.bf16.msra.mxu1 %v16086_v25  ;;  %v16158_v25 = vld [vmem:[%s18446_s29 + $0x380] ss:$36 sps:$4 sm:$0xff]  }
 0x2e1   : > { %2950 = vmatpush2.bf16.msra.mxu0 %v16089_v29  ;;  %3065 = vmatprep.subr.bf16.mxu1 %v16094_v36  ;;  %v16155_v29 = vld [vmem:[%s18446_s29 + $0x378] ss:$36 sps:$4 sm:$0xff]   ;;  %v16159_v36 = vld [vmem:[%s18446_s29 + $0x140] ss:$36 sps:$4 sm:$0xff]  }
 0x2e2   : > { %3138 = vmatprep.subr.bf16.mxu0 %v16097_v50  ;;  %v16162_v50 = vld [vmem:[%s18446_s29 + $0x334] ss:$36 sps:$4 sm:$0xff]  }
 0x2e3   : > { %3025 = vmatmul.mubr.bf16.vlgmr.msra.gmra.mxu1 %v18776_v20 }
 0x2e4   : > { %2952 = vmatmul.mubr.bf16.vlgmr.msra.gmra.mxu0 %v18782_v28  ;;  %3066 = vmatpush1.bf16.msra.mxu1 %v16092_v30  ;;  %v16163_v30 = vld [vmem:[%s18446_s29 + $0x338] ss:$36 sps:$4 sm:$0xff]  }
 0x2e5   : > { %2961 = vmatprep.mubr.bf16.mxu0 %v18799_v27  ;;  %3139 = vmatpush1.bf16.msra.mxu0 %v16095_v48  ;;  %v16160_v48 = vld [vmem:[%s18446_s29 + $0x330] ss:$36 sps:$4 sm:$0xff]  }
 0x2e6   : > { %3067 = vmatprep.subr.bf16.mxu1 %v16100_v55  ;;  %3140 = vmatprep.subr.bf16.mxu0 %v16103_v24  ;;  %v16164_v55 = vld [vmem:[%s18446_s29 + $0xf8] ss:$36 sps:$4 sm:$0xff]   ;;  %v16167_v24 = vld [vmem:[%s18446_s29 + $0x2ec] ss:$36 sps:$4 sm:$0xff]  }
 0x2e7   : > { %3034 = vmatprep.mubr.bf16.mxu1 %v22732_v52 }
 0x2e8   : > { %3068 = vmatpush1.bf16.msra.mxu1 %v16098_v32  ;;  %v16168_v32 = vld [vmem:[%s18446_s29 + $0x2f0] ss:$36 sps:$4 sm:$0xff]  }
 0x2e9   : > { %3141 = vmatpush1.bf16.msra.mxu0 %v16101_v33  ;;  %3069 = vmatprep.subr.bf16.mxu1 %v16106_v34  ;;  %v16165_v33 = vld [vmem:[%s18446_s29 + $0x2e8] ss:$36 sps:$4 sm:$0xff]   ;;  %v16169_v34 = vld [vmem:[%s18446_s29 + $0xb0] ss:$36 sps:$4 sm:$0xff]  }
 0x2ea   : > { %3142 = vmatprep.subr.bf16.mxu0 %v16109_v61  ;;  %v16172_v61 = vld [vmem:[%s18446_s29 + $0x2a4] ss:$36 sps:$4 sm:$0xff]  }
 0x2eb   : > { %3035 = vmatmul.mubr.bf16.gmra.mxu1 %v18814_v40 }
 0x2ec   : > { %2962 = vmatmul.mubr.bf16.gmra.mxu0 %v18826_v14  ;;  %3070 = vmatpush1.bf16.msra.mxu1 %v16104_v37  ;;  %v16173_v37 = vld [vmem:[%s18446_s29 + $0x2a8] ss:$36 sps:$4 sm:$0xff]  }
 0x2ed   : > { %2971 = vmatprep.mubr.bf16.mxu0 %v18830_v44  ;;  %3143 = vmatpush1.bf16.msra.mxu0 %v16107_v45  ;;  %v16170_v45 = vld [vmem:[%s18446_s29 + $0x2a0] ss:$36 sps:$4 sm:$0xff]  }
 0x2ee   : > { %3071 = vmatprep.subr.bf16.mxu1 %v16112_v41  ;;  %3144 = vmatprep.subr.bf16.mxu0 %v16115_v3  ;;  %v16174_v41 = vld [vmem:[%s18446_s29 + $0x68] ss:$36 sps:$4 sm:$0xff]   ;;  %v16177_v3 = vld [vmem:[%s18446_s29 + $0x25c] ss:$36 sps:$4 sm:$0xff]  }
 0x2ef   : > { %3044 = vmatprep.mubr.bf16.mxu1 %v22732_v52 }
 0x2f0   : > { %3072 = vmatpush1.bf16.msra.mxu1 %v16110_v35  ;;  %v16178_v35 = vld [vmem:[%s18446_s29 + $0x260] ss:$36 sps:$4 sm:$0xff]  }
 0x2f1   : > { %3145 = vmatpush1.bf16.msra.mxu0 %v16113_v56  ;;  %3073 = vmatprep.subr.bf16.mxu1 %v16118_v59  ;;  %v16175_v56 = vld [vmem:[%s18446_s29 + $0x258] ss:$36 sps:$4 sm:$0xff]   ;;  %v16179_v59 = vld [vmem:[%s18446_s29 + $0x20] ss:$36 sps:$4 sm:$0xff]  }
 0x2f2   : > { %3146 = vmatprep.subr.bf16.mxu0 %v16121_v60  ;;  %v16180_v60 = vld [vmem:[%s18446_s29 + $0x698] ss:$36 sps:$4 sm:$0xff]  }
 0x2f3   : > { %3045 = vmatmul.mubr.bf16.gmra.mxu1 %v18856_v31 }
 0x2f4   : > { %2972 = vmatmul.mubr.bf16.gmra.mxu0 %v18862_v38  ;;  %3074 = vmatpush1.bf16.msra.mxu1 %v16116_v62  ;;  %v16181_v62 = vld [vmem:[%s18446_s29 + $0x650] ss:$36 sps:$4 sm:$0xff]  }
 0x2f5   : > { %2981 = vmatprep.mubr.bf16.mxu0 %v18866_v19  ;;  %3147 = vmatpush1.bf16.msra.mxu0 %v16119_v63  ;;  %v16183_v63 = vld [vmem:[%s18446_s29 + $0x5c0] ss:$36 sps:$4 sm:$0xff]  }
 0x2f6   : > { %3075 = vmatprep.subr.bf16.mxu1 %v16124_v47  ;;  %3148 = vmatprep.subr.bf16.mxu0 %v16127_v26  ;;  %v16187_v47 = vld [vmem:[%s18446_s29 + $0x4a0] ss:$36 sps:$4 sm:$0xff]  }
 0x2f7   : > { %3054 = vmatprep.mubr.bf16.mxu1 %v22732_v52 }
 0x2f8   : > { %3076 = vmatpush1.bf16.msra.mxu1 %v16122_v49 }
 0x2f9   : > { %3149 = vmatpush1.bf16.msra.mxu0 %v16125_v53  ;;  %3077 = vmatprep.subr.bf16.mxu1 %v16130_v46 }
 0x2fa   : > { %3150 = vmatprep.subr.bf16.mxu0 %v16133_v0 }
 0x2fb   : > { %3055 = vmatmul.mubr.bf16.gmra.mxu1 %v18883_v2 }
 0x2fc   : > { %2982 = vmatmul.mubr.bf16.gmra.mxu0 %v18887_v9  ;;  %3078 = vmatpush1.bf16.msra.mxu1 %v16128_v6 }
 0x2fd   : > { %3097 = vmatprep.mubr.bf16.mxu1 %v18774_v18  ;;  %3151 = vmatpush1.bf16.msra.mxu0 %v16131_v8 }
 0x2fe   : > { %3079 = vmatprep.subr.bf16.mxu1 %v16136_v57  ;;  %3152 = vmatprep.subr.bf16.mxu0 %v16139_v58 }
 0x2ff   : > { %3170 = vmatprep.mubr.bf16.mxu0 %v22732_v52 }
 0x300   : > { %3080 = vmatpush1.bf16.msra.mxu1 %v16134_v10 }
 0x301   : > { %3153 = vmatpush1.bf16.msra.mxu0 %v16137_v7  ;;  %3081 = vmatprep.subr.bf16.mxu1 %v16142_v17 }
 0x302   : > { %14874 = vmatprep.subr.bf16.mxu0 %v16143_v11 }
 0x304   : > { %3082 = vmatpush2.bf16.msra.mxu1 %v16140_v1  ;;  %3171 = vmatmul.mubr.bf16.vlgmr.msra.gmra.mxu0 %v18776_v20 }
 0x305   : > { %14875 = vmatpush3.bf16.msra.mxu0 %v16144_v12  ;;  %3083 = vmatprep.subr.bf16.mxu1 %v16147_v39 }
 0x306   : > { %14876 = vmatprep.subr.bf16.mxu0 %v16148_v5  ;;  %3180 = vmatprep.mubr.bf16.mxu0 %v22732_v52 }
 0x308   : > { %3084 = vmatpush2.bf16.msra.mxu1 %v16145_v16 }
 0x309   : > { %14877 = vmatpush3.bf16.msra.mxu0 %v16149_v42  ;;  %3085 = vmatprep.subr.bf16.mxu1 %v16152_v23 }
 0x30a   : > { %14878 = vmatprep.subr.bf16.mxu0 %v16153_v21 }
 0x30c   : > { %3086 = vmatpush2.bf16.msra.mxu1 %v16150_v51  ;;  %3181 = vmatmul.mubr.bf16.gmra.mxu0 %v18814_v40 }
 0x30d   : > { %14879 = vmatpush3.bf16.msra.mxu0 %v16154_v54  ;;  %3087 = vmatprep.subr.bf16.mxu1 %v16157_v43 }
 0x30e   : > { %14880 = vmatprep.subr.bf16.mxu0 %v16158_v25  ;;  %3190 = vmatprep.mubr.bf16.mxu0 %v22732_v52 }
 0x310   : > { %3088 = vmatpush2.bf16.msra.mxu1 %v16155_v29 }
 0x311   : > { %14881 = vmatpush3.bf16.msra.mxu0 %v16159_v36  ;;  %3089 = vmatprep.subr.bf16.mxu1 %v16162_v50 }
 0x312   : > { %14882 = vmatprep.subr.bf16.mxu0 %v16163_v30 }
 0x314   : > { %3090 = vmatpush2.bf16.msra.mxu1 %v16160_v48  ;;  %3191 = vmatmul.mubr.bf16.gmra.mxu0 %v18856_v31 }
 0x315   : > { %14883 = vmatpush3.bf16.msra.mxu0 %v16164_v55  ;;  %3091 = vmatprep.subr.bf16.mxu1 %v16167_v24 }
 0x316   : > { %14884 = vmatprep.subr.bf16.mxu0 %v16168_v32  ;;  %3200 = vmatprep.mubr.bf16.mxu0 %v22732_v52 }
 0x318   : > { %3092 = vmatpush2.bf16.msra.mxu1 %v16165_v33 }
 0x319   : > { %14885 = vmatpush3.bf16.msra.mxu0 %v16169_v34  ;;  %3093 = vmatprep.subr.bf16.mxu1 %v16172_v61 }
 0x31a   : > { %14886 = vmatprep.subr.bf16.mxu0 %v16173_v37 }
 0x31c   : > { %3094 = vmatpush2.bf16.msra.mxu1 %v16170_v45  ;;  %3201 = vmatmul.mubr.bf16.gmra.mxu0 %v18883_v2 }
 0x31d   : > { %14887 = vmatpush3.bf16.msra.mxu0 %v16174_v41  ;;  %3243 = vmatprep.mubr.bf16.mxu0 %v18774_v18  ;;  %v16182_v18 = vld [vmem:[%s18446_s29 + $0x608] ss:$36 sps:$4 sm:$0xff]  }
 0x31e   : > { %3095 = vmatprep.subr.bf16.mxu1 %v16177_v3  ;;  %14888 = vmatprep.subr.bf16.mxu0 %v16178_v35 }
 0x320   : > { %3096 = vmatpush2.bf16.msra.mxu1 %v16175_v56 }
 0x321   : > { %14889 = vmatpush3.bf16.msra.mxu0 %v16179_v59  ;;  %15310 = vmatprep.subr.bf16.mxu1 %v16180_v60 }
 0x323   : > { %3098 = vmatmul.mubr.bf16.vlgmr.msra.gmra.mxu1 %v18782_v28 }
 0x324   : > { %3107 = vmatprep.mubr.bf16.mxu1 %v18799_v27  ;;  %3244 = vmatmul.mubr.bf16.vlgmr.msra.gmra.mxu0 %v18782_v28  ;;  %v16184_v28 = vld [vmem:[%s18446_s29 + $0x578] ss:$36 sps:$4 sm:$0xff]  }
 0x325   : > { %15311 = vmatpush3.bf16.msra.mxu1 %v16180_v60  ;;  %3251 = vmatprep.mubr.bf16.mxu0 %v18799_v27  ;;  %v16185_v27 = vld [vmem:[%s18446_s29 + $0x530] ss:$36 sps:$4 sm:$0xff]  }
 0x326   : > { %15312 = vmatprep.subr.bf16.mxu1 %v16181_v62 }
 0x329   : > { %15313 = vmatpush3.bf16.msra.mxu1 %v16181_v62 }
 0x32a   : > { %15314 = vmatprep.subr.bf16.mxu1 %v16182_v18 }
 0x32b   : > { %3108 = vmatmul.mubr.bf16.gmra.mxu1 %v18826_v14 }
 0x32c   : > { %3117 = vmatprep.mubr.bf16.mxu1 %v18830_v44  ;;  %3252 = vmatmul.mubr.bf16.gmra.mxu0 %v18826_v14  ;;  %v16186_v14 = vld [vmem:[%s18446_s29 + $0x4e8] ss:$36 sps:$4 sm:$0xff]  }
 0x32d   : > { %15315 = vmatpush3.bf16.msra.mxu1 %v16182_v18  ;;  %3259 = vmatprep.mubr.bf16.mxu0 %v18830_v44 }
 0x32e   : > { %15316 = vmatprep.subr.bf16.mxu1 %v16183_v63 }
 0x331   : > { %15317 = vmatpush3.bf16.msra.mxu1 %v16183_v63 }
 0x332   : > { %15318 = vmatprep.subr.bf16.mxu1 %v16184_v28 }
 0x333   : > { %3118 = vmatmul.mubr.bf16.gmra.mxu1 %v18862_v38 }
 0x334   : > { %3127 = vmatprep.mubr.bf16.mxu1 %v18866_v19  ;;  %3260 = vmatmul.mubr.bf16.gmra.mxu0 %v18862_v38 }
 0x335   : > { %15319 = vmatpush3.bf16.msra.mxu1 %v16184_v28  ;;  %3267 = vmatprep.mubr.bf16.mxu0 %v18866_v19 }
 0x336   : > { %15320 = vmatprep.subr.bf16.mxu1 %v16185_v27 }
 0x339   : > { %15321 = vmatpush3.bf16.msra.mxu1 %v16185_v27 }
 0x33a   : > { %15322 = vmatprep.subr.bf16.mxu1 %v16186_v14 }
 0x33b   : > { %3128 = vmatmul.mubr.bf16.gmra.mxu1 %v18887_v9 }
 0x33c   : > { %3268 = vmatmul.mubr.bf16.gmra.mxu0 %v18887_v9  ;;  %15326 = vmatprep.mubr.bf16.mxu1 %v18776_v20 }
 0x33d   : > { %15323 = vmatpush3.bf16.msra.mxu1 %v16186_v14 }
 0x33e   : > { %15324 = vmatprep.subr.bf16.mxu1 %v16187_v47 }
 0x341   : > { %15325 = vmatpush3.bf16.msra.mxu1 %v16187_v47 }
 0x343   : > { %v2734_v44 = vpop.f32.mrf.mxu1 }
 0x344   : > { %15327 = vmatmul.mubr.bf16.vlgmr.msra.gmra.mxu1 %v18814_v40  ;;  %v2661_v38 = vpop.f32.mrf.mxu0 }
 0x345   : > { %15330 = vmatprep.mubr.bf16.mxu1 %v18856_v31  ;;  %v2736_v19 = vpop.f32.mrf.mxu1  ;;  %v2735_v0 = vadd.f32 %v2734_v44, %v2661_v38 }
 0x346   : > { %v2663_v26 = vpop.f32.mrf.mxu0 }
 0x347   : > { %v19088_v49 = vadd.f32 %v2736_v19, %v2663_v26  ;;  %v2738_v53 = vpop.f32.mrf.mxu1 }
 0x348   : > { %v2665_v46 = vpop.f32.mrf.mxu0 }
 0x349   : > { %22875 = vst [vmem:[#allocation55_spill] sm:$0xff] %v19088_v49  ;;  %v2739_v6 = vadd.f32 %v2738_v53, %v2665_v46  ;;  %v19090_v9 = vpop.f32.mrf.mxu1 }
 0x34a   : > { %v19092_v20 = vpop.f32.mrf.mxu0 }
 0x34b   : > { %v19094_v8 = vpack.c.bf16 %v2739_v6, %v2735_v0  ;;  %v2744_v57 = vpop.f32.mrf.mxu1 }
 0x34c   : > { %15331 = vmatmul.mubr.bf16.gmra.mxu1 %v18883_v2  ;;  %v2671_v40 = vpop.f32.mrf.mxu0 }
 0x34d   : > { %v2745_v31 = vadd.f32 %v2744_v57, %v2671_v40  ;;  %v2746_v58 = vpop.f32.mrf.mxu1  ;;  %15342 = vmatprep.mubr.msk.bf16.mxu0 %vm3481_vm0, %v19094_v8 }
 0x34e   : > { %v2673_v10 = vpop.f32.mrf.mxu0 }
 0x34f   : > { %v19099_v7 = vadd.f32 %v2746_v58, %v2673_v10  ;;  %v2748_v17 = vpop.f32.mrf.mxu1 }
 0x350   : > { %v2675_v11 = vpop.f32.mrf.mxu0 }
 0x351   : > { %22876 = vst [vmem:[#allocation56_spill] sm:$0xff] %v19099_v7  ;;  %v2749_v1 = vadd.f32 %v2748_v17, %v2675_v11  ;;  %v19101_v12 = vpop.f32.mrf.mxu1 }
 0x352   : > { %22877 = vst [vmem:[#allocation57_spill] sm:$0xff] %v19101_v12  ;;  %v19103_v39 = vpop.f32.mrf.mxu0 }
 0x353   : > { %22878 = vst [vmem:[#allocation58_spill] sm:$0xff] %v19103_v39  ;;  %v19105_v5 = vpack.c.bf16 %v2749_v1, %v2745_v31  ;;  %v2754_v16 = vpop.f32.mrf.mxu1 }
 0x354   : > { %v2681_v2 = vpop.f32.mrf.mxu0 }
 0x355   : > { %v2755_v42 = vadd.f32 %v2754_v16, %v2681_v2  ;;  %v2756_v23 = vpop.f32.mrf.mxu1 }
 0x356   : > { %v2683_v21 = vpop.f32.mrf.mxu0 }
 0x357   : > { %v19107_v51 = vadd.f32 %v2756_v23, %v2683_v21  ;;  %v2758_v54 = vpop.f32.mrf.mxu1 }
 0x358   : > { %v2685_v43 = vpop.f32.mrf.mxu0 }
 0x359   : > { %22879 = vst [vmem:[#allocation59_spill] sm:$0xff] %v19107_v51  ;;  %v2759_v25 = vadd.f32 %v2758_v54, %v2685_v43  ;;  %v19109_v29 = vpop.f32.mrf.mxu1 }
 0x35a   : > { %22880 = vst [vmem:[#allocation60_spill] sm:$0xff] %v19109_v29  ;;  %v19111_v36 = vpop.f32.mrf.mxu0 }
 0x35b   : > { %22881 = vst [vmem:[#allocation61_spill] sm:$0xff] %v19111_v36  ;;  %v19113_v50 = vpack.c.bf16 %v2759_v25, %v2755_v42  ;;  %v2764_v30 = vpop.f32.mrf.mxu1 }
 0x35c   : > { %v2691_v48 = vpop.f32.mrf.mxu0 }
 0x35d   : > { %v2765_v55 = vadd.f32 %v2764_v30, %v2691_v48  ;;  %v2766_v24 = vpop.f32.mrf.mxu1 }
 0x35e   : > { %v2693_v32 = vpop.f32.mrf.mxu0 }
 0x35f   : > { %v19115_v33 = vadd.f32 %v2766_v24, %v2693_v32  ;;  %v2768_v34 = vpop.f32.mrf.mxu1 }
 0x360   : > { %v2695_v61 = vpop.f32.mrf.mxu0 }
 0x361   : > { %22882 = vst [vmem:[#allocation62_spill] sm:$0xff] %v19115_v33  ;;  %v2769_v37 = vadd.f32 %v2768_v34, %v2695_v61  ;;  %v19127_v63 = vpop.f32.mrf.mxu1 }
 0x362   : > { %v19117_v45 = vpop.f32.mrf.mxu0  ;;  %22884 = vst [vmem:[#allocation64_spill] sm:$0xff] %v19127_v63 }
 0x363   : > { %22883 = vst [vmem:[#allocation63_spill] sm:$0xff] %v19117_v45  ;;  %v19119_v41 = vpack.c.bf16 %v2769_v37, %v2765_v55 }
 0x364   : > { %v2880_v3 = vpop.f32.mrf.mxu0 }
 0x366   : > { %v19121_v35 = vpop.f32.mrf.mxu0 }
 0x368   : > { %v2884_v56 = vpop.f32.mrf.mxu0 }
 0x36a   : > { %v19123_v59 = vpop.f32.mrf.mxu0 }
 0x36c   : > { %v2890_v60 = vpop.f32.mrf.mxu0 }
 0x36e   : > { %v19125_v62 = vpop.f32.mrf.mxu0 }
 0x370   : > { %v2894_v18 = vpop.f32.mrf.mxu0 }
 0x372   : > { %v2896_v28 = vpop.f32.mrf.mxu0 }
 0x374   : > { %v2900_v47 = vpop.f32.mrf.mxu0 }
 0x376   : > { %v2902_v26 = vpop.f32.mrf.mxu0 }
 0x378   : > { %v2904_v57 = vpop.f32.mrf.mxu0 }
 0x37a   : > { %v2906_v10 = vpop.f32.mrf.mxu0 }
 0x37c   : > { %v2910_v2 = vpop.f32.mrf.mxu0 }
 0x37e   : > { %v2912_v54 = vpop.f32.mrf.mxu0 }
 0x380   : > { %v2914_v55 = vpop.f32.mrf.mxu0 }
 0x382   : > { %v2916_v61 = vpop.f32.mrf.mxu0 }
 0x383   : > { %v2807_v27 = vpop.f32.mrf.mxu1 }
 0x384   : > { %v2881_v14 = vadd.f32 %v2880_v3, %v2807_v27 }
 0x385   : > { %v19129_v44 = vpop.f32.mrf.mxu1 }
 0x387   : > { %v2811_v38 = vpop.f32.mrf.mxu1 }
 0x388   : > { %v2885_v19 = vadd.f32 %v2884_v56, %v2811_v38 }
 0x389   : > { %v19131_v53 = vpop.f32.mrf.mxu1 }
 0x38a   : > { %v19133_v46 = vpack.c.bf16 %v2885_v19, %v2881_v14 }
 0x38b   : > { %v2817_v0 = vpop.f32.mrf.mxu1 }
 0x38c   : > { %22885 = vst [vmem:[#allocation65_spill] sm:$0xff] %v19133_v46  ;;  %v2891_v6 = vadd.f32 %v2890_v60, %v2817_v0 }
 0x38d   : > { %v2819_v40 = vpop.f32.mrf.mxu1 }
 0x38f   : > { %v2821_v31 = vpop.f32.mrf.mxu1 }
 0x390   : > { %v2895_v58 = vadd.f32 %v2894_v18, %v2821_v31 }
 0x391   : > { %v2823_v17 = vpop.f32.mrf.mxu1 }
 0x392   : > { %v19135_v11 = vpack.c.bf16 %v2895_v58, %v2891_v6 }
 0x393   : > { %v2827_v1 = vpop.f32.mrf.mxu1 }
 0x394   : > { %22886 = vst [vmem:[#allocation66_spill] sm:$0xff] %v19135_v11  ;;  %v2901_v16 = vadd.f32 %v2900_v47, %v2827_v1 }
 0x395   : > { %v2829_v42 = vpop.f32.mrf.mxu1 }
 0x396   : > { %v2903_v14 = vadd.f32 %v2902_v26, %v2829_v42 }
 0x397   : > { %v2831_v23 = vpop.f32.mrf.mxu1 }
 0x398   : > { %v2905_v21 = vadd.f32 %v2904_v57, %v2831_v23 }
 0x399   : > { %v2833_v43 = vpop.f32.mrf.mxu1 }
 0x39a   : > { %v19137_v25 = vpack.c.bf16 %v2905_v21, %v2901_v16  ;;  %v2907_v3 = vadd.f32 %v2906_v10, %v2833_v43 }
 0x39b   : > { %v2837_v30 = vpop.f32.mrf.mxu1 }
 0x39c   : > { %22887 = vst [vmem:[#allocation67_spill] sm:$0xff] %v19137_v25  ;;  %v2911_v48 = vadd.f32 %v2910_v2, %v2837_v30  ;;  %v19143_v6 = vpack.c.bf16 %v2907_v3, %v2903_v14  ;;  %v2897_v2 = vadd.f32 %v2896_v28, %v2823_v17 }
 0x39d   : > { %v2839_v24 = vpop.f32.mrf.mxu1 }
 0x39e   : > { %v2913_v56 = vadd.f32 %v2912_v54, %v2839_v24  ;;  %v2893_v54 = vadd.f32 %v19125_v62, %v2819_v40  ;;  %v2887_v62 = vadd.f32 %v19123_v59, %v19131_v53 }
 0x39f   : > { %v2841_v32 = vpop.f32.mrf.mxu1 }
 0x3a0   : > { %v2915_v34 = vadd.f32 %v2914_v55, %v2841_v32  ;;  %v19160_v55 = vpack.c.bf16 %v2897_v2, %v2893_v54  ;;  %v3501_v32 = vsel %vm3481_vm0, %v19143_v6, 0 }
 0x3a1   : > { %v2843_v37 = vpop.f32.mrf.mxu1 }
 0x3a2   : > { %v19139_v60 = vpack.c.bf16 %v2915_v34, %v2911_v48  ;;  %v2917_v18 = vadd.f32 %v2916_v61, %v2843_v37 }
 0x3a3   : > { %v3026_v27 = vpop.f32.mrf.mxu1 }
 0x3a4   : > { %22888 = vst [vmem:[#allocation68_spill] sm:$0xff] %v19139_v60  ;;  %v19141_v47 = vpack.c.bf16 %v2917_v18, %v2913_v56  ;;  %v2953_v38 = vpop.f32.mrf.mxu0  ;;  %v2883_v18 = vadd.f32 %v19121_v35, %v19129_v44 }
 0x3a5   : > { %v3027_v19 = vadd.f32 %v3026_v27, %v2953_v38  ;;  %v3028_v0 = vpop.f32.mrf.mxu1 }
 0x3a6   : > { %v2955_v57 = vpop.f32.mrf.mxu0  ;;  %15638 = vmatprep.subr.msk.bf16.mxu0 %vm3481_vm0, %v19141_v47  ;;  %v3504_v31 = vsel %vm3481_vm0, %v19141_v47, 0 }
 0x3a7   : > { %v19149_v58 = vadd.f32 %v3028_v0, %v2955_v57  ;;  %v3030_v10 = vpop.f32.mrf.mxu1  ;;  %15335 = vmatpush3.bf16.xpose.msra.mxu0 %v3504_v31  ;;  %v3498_v57 = vsel %vm3481_vm0, %v19160_v55, 0 }
 0x3a8   : > { %v2957_v1 = vpop.f32.mrf.mxu0  ;;  %15639 = vmatprep.subr.msk.bf16.mxu0 %vm3481_vm0, %v19143_v6 }
 0x3a9   : > { %22889 = vst [vmem:[#allocation69_spill] sm:$0xff] %v19149_v58  ;;  %v3031_v26 = vadd.f32 %v3030_v10, %v2957_v1  ;;  %v19153_v16 = vpop.f32.mrf.mxu1 }
 0x3aa   : > { %22890 = vst [vmem:[#allocation70_spill] sm:$0xff] %v19153_v16  ;;  %v19155_v42 = vpop.f32.mrf.mxu0 }
 0x3ab   : > { %22891 = vst [vmem:[#allocation71_spill] sm:$0xff] %v19155_v42  ;;  %v19157_v23 = vpack.c.bf16 %v3031_v26, %v3027_v19  ;;  %v3036_v21 = vpop.f32.mrf.mxu1  ;;  %v19178_v19 = vpack.c.bf16 %v2887_v62, %v2883_v18 }
 0x3ac   : > { %v2963_v43 = vpop.f32.mrf.mxu0 }
 0x3ad   : > { %v3037_v30 = vadd.f32 %v3036_v21, %v2963_v43  ;;  %v3038_v48 = vpop.f32.mrf.mxu1 }
 0x3ae   : > { %v2965_v24 = vpop.f32.mrf.mxu0 }
 0x3af   : > { %v19164_v34 = vadd.f32 %v3038_v48, %v2965_v24  ;;  %v3040_v61 = vpop.f32.mrf.mxu1  ;;  %15337 = vmatpush3.bf16.xpose.msra.mxu0 %v3501_v32 }
 0x3b0   : > { %v2967_v28 = vpop.f32.mrf.mxu0  ;;  %15640 = vmatprep.subr.msk.bf16.mxu0 %vm3481_vm0, %v19160_v55 }
 0x3b1   : > { %22892 = vst [vmem:[#allocation72_spill] sm:$0xff] %v19164_v34  ;;  %v3041_v17 = vadd.f32 %v3040_v61, %v2967_v28  ;;  %v19168_v37 = vpop.f32.mrf.mxu1 }
 0x3b2   : > { %22893 = vst [vmem:[#allocation73_spill] sm:$0xff] %v19168_v37  ;;  %v19172_v40 = vpop.f32.mrf.mxu0 }
 0x3b3   : > { %22894 = vst [vmem:[#allocation74_spill] sm:$0xff] %v19172_v40  ;;  %v19174_v3 = vpack.c.bf16 %v3041_v17, %v3037_v30  ;;  %v3046_v56 = vpop.f32.mrf.mxu1  ;;  %v3495_v30 = vsel %vm3481_vm0, %v19178_v19, 0 }
 0x3b4   : > { %v2973_v27 = vpop.f32.mrf.mxu0 }
 0x3b5   : > { %v3047_v14 = vadd.f32 %v3046_v56, %v2973_v27  ;;  %v3048_v38 = vpop.f32.mrf.mxu1 }
 0x3b6   : > { %v2975_v0 = vpop.f32.mrf.mxu0 }
 0x3b7   : > { %v19182_v31 = vadd.f32 %v3048_v38, %v2975_v0  ;;  %v3050_v59 = vpop.f32.mrf.mxu1  ;;  %15339 = vmatpush3.bf16.xpose.msra.mxu0 %v3498_v57 }
 0x3b8   : > { %v2977_v53 = vpop.f32.mrf.mxu0  ;;  %15641 = vmatprep.subr.msk.bf16.mxu0 %vm3481_vm0, %v19178_v19 }
 0x3b9   : > { %22895 = vst [vmem:[#allocation75_spill] sm:$0xff] %v19182_v31  ;;  %v3051_v10 = vadd.f32 %v3050_v59, %v2977_v53  ;;  %v19186_v1 = vpop.f32.mrf.mxu1 }
 0x3ba   : > { %22896 = vst [vmem:[#allocation76_spill] sm:$0xff] %v19186_v1  ;;  %v19188_v35 = vpop.f32.mrf.mxu0 }
 0x3bb   : > { %22897 = vst [vmem:[#allocation77_spill] sm:$0xff] %v19188_v35  ;;  %v19190_v44 = vpack.c.bf16 %v3051_v10, %v3047_v14  ;;  %v3056_v26 = vpop.f32.mrf.mxu1 }
 0x3bc   : > { %v2983_v2 = vpop.f32.mrf.mxu0 }
 0x3bd   : > { %v3057_v21 = vadd.f32 %v3056_v26, %v2983_v2  ;;  %v3058_v54 = vpop.f32.mrf.mxu1 }
 0x3be   : > { %v2985_v43 = vpop.f32.mrf.mxu0 }
 0x3bf   : > { %v19194_v48 = vadd.f32 %v3058_v54, %v2985_v43  ;;  %v3060_v24 = vpop.f32.mrf.mxu1  ;;  %15341 = vmatpush3.bf16.xpose.msra.mxu0 %v3495_v30 }
 0x3c0   : > { %v2987_v32 = vpop.f32.mrf.mxu0 }
 0x3c1   : > { %22898 = vst [vmem:[#allocation78_spill] sm:$0xff] %v19194_v48  ;;  %v3061_v61 = vadd.f32 %v3060_v24, %v2987_v32  ;;  %v19218_v43 = vpop.f32.mrf.mxu1 }
 0x3c2   : > { %v19196_v28 = vpop.f32.mrf.mxu0  ;;  %22900 = vst [vmem:[#allocation80_spill] sm:$0xff] %v19218_v43 }
 0x3c3   : > { %22899 = vst [vmem:[#allocation79_spill] sm:$0xff] %v19196_v28  ;;  %v19198_v17 = vpack.c.bf16 %v3061_v61, %v3057_v21 }
 0x3c4   : > { %v19200_v62 = vpop.f32.mrf.mxu0 }
 0x3c6   : > { %v3174_v56 = vpop.f32.mrf.mxu0  ;;  %15343 = vmatmul.mubr.msk.bf16.vlgmr.msra.gmra.mxu0 %vm3481_vm0, %v19105_v5 }
 0x3c7   : > { %15346 = vmatprep.mubr.msk.bf16.mxu0 %vm3481_vm0, %v19113_v50 }
 0x3c8   : > { %v19206_v18 = vpop.f32.mrf.mxu0 }
 0x3ca   : > { %v19208_v27 = vpop.f32.mrf.mxu0 }
 0x3cc   : > { %v19210_v14 = vpop.f32.mrf.mxu0 }
 0x3ce   : > { %v3184_v38 = vpop.f32.mrf.mxu0  ;;  %15347 = vmatmul.mubr.msk.bf16.gmra.mxu0 %vm3481_vm0, %v19119_v41 }
 0x3d0   : > { %v3186_v0 = vpop.f32.mrf.mxu0 }
 0x3d2   : > { %v19214_v57 = vpop.f32.mrf.mxu0 }
 0x3d4   : > { %v3192_v59 = vpop.f32.mrf.mxu0 }
 0x3d6   : > { %v3194_v53 = vpop.f32.mrf.mxu0 }
 0x3d8   : > { %v3196_v10 = vpop.f32.mrf.mxu0 }
 0x3da   : > { %v19216_v26 = vpop.f32.mrf.mxu0 }
 0x3dc   : > { %v3202_v2 = vpop.f32.mrf.mxu0 }
 0x3de   : > { %v3204_v21 = vpop.f32.mrf.mxu0 }
 0x3e0   : > { %v3206_v54 = vpop.f32.mrf.mxu0 }
 0x3e2   : > { %v19220_v30 = vpop.f32.mrf.mxu0 }
 0x3e3   : > { %v3099_v24 = vpop.f32.mrf.mxu1 }
 0x3e4   : > { %v14890_v32 = vpop.f32.mrf.mxu0 }
 0x3e5   : > { %v3101_v61 = vpop.f32.mrf.mxu1 }
 0x3e6   : > { %v19222_v52 = vadd.f32 %v3174_v56, %v3101_v61  ;;  %v14891_v4 = vpop.f32.mrf.mxu0 }
 0x3e7   : > { %v14892_v15 = vadd.f32 %v14891_v4, %v14890_v32  ;;  %v3103_v13 = vpop.f32.mrf.mxu1 }
 0x3e8   : > { %22901 = vst [vmem:[#allocation81_spill] sm:$0xff] %v19222_v52  ;;  %v14893_v22 = vpop.f32.mrf.mxu0 }
 0x3e9   : > { %v19224_v60 = vpop.f32.mrf.mxu1 }
 0x3ea   : > { %v14894_v25 = vpop.f32.mrf.mxu0 }
 0x3eb   : > { %v3109_v11 = vpop.f32.mrf.mxu1 }
 0x3ec   : > { %v14896_v46 = vpop.f32.mrf.mxu0 }
 0x3ed   : > { %v3111_v58 = vpop.f32.mrf.mxu1 }
 0x3ee   : > { %v19226_v16 = vadd.f32 %v3184_v38, %v3111_v58  ;;  %v14897_v42 = vpop.f32.mrf.mxu0 }
 0x3ef   : > { %v14898_v34 = vadd.f32 %v14897_v42, %v14896_v46  ;;  %v3113_v37 = vpop.f32.mrf.mxu1 }
 0x3f0   : > { %v14899_v40 = vpop.f32.mrf.mxu0 }
 0x3f1   : > { %v19228_v31 = vpop.f32.mrf.mxu1 }
 0x3f2   : > { %v14900_v56 = vpop.f32.mrf.mxu0 }
 0x3f3   : > { %v3119_v61 = vpop.f32.mrf.mxu1 }
 0x3f4   : > { %v14902_v1 = vpop.f32.mrf.mxu0 }
 0x3f5   : > { %v3121_v4 = vpop.f32.mrf.mxu1 }
 0x3f6   : > { %v19230_v32 = vadd.f32 %v3194_v53, %v3121_v4  ;;  %v14903_v35 = vpop.f32.mrf.mxu0  ;;  %v3193_v4 = vadd.f32 %v3192_v59, %v3119_v61  ;;  %v3177_v59 = vadd.f32 %v19206_v18, %v3103_v13 }
 0x3f7   : > { %v14904_v48 = vadd.f32 %v14903_v35, %v14902_v1  ;;  %v3123_v43 = vpop.f32.mrf.mxu1  ;;  %v3187_v35 = vadd.f32 %v3186_v0, %v3113_v37  ;;  %v14895_v37 = vadd.f32 %v14894_v25, %v14893_v22 }
 0x3f8   : > { %v14905_v28 = vpop.f32.mrf.mxu0  ;;  %v3197_v29 = vadd.f32 %v3196_v10, %v3123_v43 }
 0x3f9   : > { %v19232_v33 = vpop.f32.mrf.mxu1 }
 0x3fa   : > { %v14906_v58 = vpop.f32.mrf.mxu0  ;;  %v19240_v39 = vpack.c.bf16 %v3197_v29, %v3193_v4  ;;  %v19279_v4 = vld [vmem:[%s22905_s30 + $0x8] sm:$0xff] }
 0x3fb   : > { %v3129_v38 = vpop.f32.mrf.mxu1 }
 0x3fc   : > { %v14908_v63 = vpop.f32.mrf.mxu0  ;;  %v3203_v36 = vadd.f32 %v3202_v2, %v3129_v38 }
 0x3fd   : > { %v3131_v46 = vpop.f32.mrf.mxu1 }
 0x3fe   : > { %v19234_v42 = vadd.f32 %v3204_v21, %v3131_v46  ;;  %v14909_v45 = vpop.f32.mrf.mxu0 }
 0x3ff   : > { %v14910_v51 = vadd.f32 %v14909_v45, %v14908_v63  ;;  %v3133_v7 = vpop.f32.mrf.mxu1  ;;  %v3183_v45 = vadd.f32 %v19210_v14, %v3109_v11 }
 0x400   : > { %v3207_v12 = vadd.f32 %v3206_v54, %v3133_v7  ;;  %v14901_v7 = vadd.f32 %v14900_v56, %v14899_v40  ;;  %v14907_v54 = vadd.f32 %v14906_v58, %v14905_v28 }
 0x401   : > { %v19236_v53 = vpop.f32.mrf.mxu1 }
 0x402   : > { %v19238_v1 = vpack.c.bf16 %v3207_v12, %v3203_v36  ;;  %v19247_v12 = vpack.c.bf16 %v3187_v35, %v3183_v45  ;;  %v14911_v36 = vpop.f32.mrf.mxu0 }
 0x404   : > { %v15328_v49 = vpop.f32.mrf.mxu1  ;;  %15350 = vmatprep.subr.bf16.mxu1 %v19238_v1 }
 0x405   : > { %v3319_v52 = vadd.f32 %v15328_v49, %v14898_v34  ;;  %15351 = vmatpush3.bf16.msra.mxu1 %v19238_v1  ;;  %v3173_v49 = vadd.f32 %v19200_v62, %v3099_v24 }
 0x406   : > { %v3310_v63 = vpop.f32.mrf.mxu1  ;;  %15352 = vmatprep.subr.bf16.mxu1 %v19240_v39 }
 0x407   : > { %v3311_v10 = vadd.f32 %v14892_v15, %v3310_v63  ;;  %v19254_v40 = vpack.c.bf16 %v3177_v59, %v3173_v49  ;;  %v14912_v15 = vpop.f32.mrf.mxu0  ;;  %v19286_v63 = vld [vmem:[%s22905_s30 + $0x18] sm:$0xff]  ;;  %v19300_v49 = vld [vmem:[%s22905_s30 + $0x30] sm:$0xff] }
 0x408   : > { %v15329_v29 = vpop.f32.mrf.mxu1  ;;  %v14913_v25 = vadd.f32 %v14912_v15, %v14911_v36  ;;  %v19292_v36 = vld [vmem:[%s22905_s30 + $0x20] sm:$0xff] }
 0x409   : > { %v3322_v0 = vadd.f32 %v15329_v29, %v14901_v7  ;;  %15353 = vmatpush3.bf16.msra.mxu1 %v19240_v39 }
 0x40a   : > { %v3313_v34 = vpop.f32.mrf.mxu1  ;;  %15354 = vmatprep.subr.bf16.mxu1 %v19247_v12 }
 0x40b   : > { %v19252_v11 = vpack.c.bf16 %v3322_v0, %v3319_v52  ;;  %v3314_v14 = vadd.f32 %v14895_v37, %v3313_v34 }
 0x40c   : > { %v15332_v13 = vpop.f32.mrf.mxu1 }
 0x40d   : > { %22902 = vst [vmem:[#allocation82_spill] sm:$0xff] %v19252_v11  ;;  %v19256_v18 = vpack.c.bf16 %v3314_v14, %v3311_v10  ;;  %v3335_v2 = vadd.f32 %v15332_v13, %v14910_v51  ;;  %15355 = vmatpush3.bf16.msra.mxu1 %v19247_v12  ;;  %v19268_v51 = vld [vmem:[%s22905_s30] sm:$0xff]  ;;  %v19306_v13 = vld [vmem:[%s22905_s30 + $0x28] sm:$0xff] }
 0x40e   : > { %v3326_v22 = vpop.f32.mrf.mxu1  ;;  %15356 = vmatprep.subr.bf16.mxu1 %v19254_v40 }
 0x40f   : > { %22903 = vst [vmem:[#allocation83_spill] sm:$0xff] %v19256_v18  ;;  %v3327_v62 = vadd.f32 %v14904_v48, %v3326_v22  ;;  %v19273_v48 = vld [vmem:[%s22905_s30 + $0x10] sm:$0xff] }
 0x410   : > { %v15333_v21 = vpop.f32.mrf.mxu1 }
 0x411   : > { %v3338_v43 = vadd.f32 %v15333_v21, %v14913_v25  ;;  %15357 = vmatpush3.bf16.msra.mxu1 %v19254_v40 }
 0x412   : > { %v3329_v52 = vpop.f32.mrf.mxu1 }
 0x413   : > { %v19261_v24 = vpack.c.bf16 %v3338_v43, %v3335_v2  ;;  %v3330_v56 = vadd.f32 %v14907_v54, %v3329_v52 }
 0x415   : > { %v19263_v61 = vpack.c.bf16 %v3330_v56, %v3327_v62  ;;  %v19314_v62 = vld [vmem:[%s22905_s30 + $0x38] sm:$0xff] }
 0x417   : > { %22904 = vst [vmem:[#allocation84_spill] sm:$0xff] %v19263_v61 }
 0x486   : > { %v15344_v38 = vpop.f32.mrf.mxu0 }
 0x487   : > { %v3549_v35 = vadd.f32 %v15344_v38, %v19273_v48 }
 0x488   : > { %v3540_v28 = vpop.f32.mrf.mxu0 }
 0x489   : > { %v3541_v58 = vadd.f32 %v3540_v28, %v19268_v51  ;;  %v3577_v0 = vsel %vm3481_vm0, %v3549_v35, -inf }
 0x48a   : > { %v15345_v46 = vpop.f32.mrf.mxu0 }
 0x48b   : > { %v3571_v45 = vsel %vm3481_vm0, %v3541_v58, -inf  ;;  %v3552_v29 = vadd.f32 %v15345_v46, %v19286_v63 }
 0x48c   : > { %v3543_v7 = vpop.f32.mrf.mxu0  ;;  %3572 = vmax.xlane.f32.xlu0 %v3571_v45 }
 0x48d   : > { %v3544_v10 = vadd.f32 %v3543_v7, %v19279_v4  ;;  %v3580_v22 = vsel %vm3481_vm0, %v3552_v29, -inf }
 0x48e   : > { %v15348_v59 = vpop.f32.mrf.mxu0 }
 0x48f   : > { %v3574_v37 = vsel %vm3481_vm0, %v3544_v10, -inf  ;;  %v3565_v2 = vadd.f32 %v15348_v59, %v19300_v49 }
 0x490   : > { %v3556_v34 = vpop.f32.mrf.mxu0  ;;  %3575 = vmax.xlane.f32.xlu1 %v3574_v37  ;;  %3578 = vmax.xlane.f32.xlu0 %v3577_v0 }
 0x491   : > { %v3557_v14 = vadd.f32 %v3556_v34, %v19292_v36  ;;  %v3589_v56 = vsel %vm3481_vm0, %v3565_v2, -inf }
 0x492   : > { %v15349_v15 = vpop.f32.mrf.mxu0 }
 0x493   : > { %v3583_v25 = vsel %vm3481_vm0, %v3557_v14, -inf  ;;  %v3568_v43 = vadd.f32 %v15349_v15, %v19314_v62 }
 0x494   : > { %v3559_v21 = vpop.f32.mrf.mxu0  ;;  %3581 = vmax.xlane.f32.xlu1 %v3580_v22  ;;  %3584 = vmax.xlane.f32.xlu0 %v3583_v25 }
 0x495   : > { %v3560_v54 = vadd.f32 %v3559_v21, %v19306_v13  ;;  %v3592_v38 = vsel %vm3481_vm0, %v3568_v43, -inf }
 0x497   : > { %v3586_v52 = vsel %vm3481_vm0, %v3560_v54, -inf }
 0x498   : > { %3587 = vmax.xlane.f32.xlu1 %v3586_v52  ;;  %3590 = vmax.xlane.f32.xlu0 %v3589_v56 }
 0x49c   : > { %3593 = vmax.xlane.f32.xlu1 %v3592_v38 }
 0x515   : > { %v3573_v28 = vpop.xlane.xlu0 %3572 }
 0x516   : > { %v3595_v46 = vsub.f32 %v3541_v58, %v3573_v28 }
 0x518   : > { %v3603_v34 = vmul.f32 1.442695, %v3595_v46 }
 0x519   : > { %v3576_v45 = vpop.xlane.xlu1 %3575  ;;  %v3579_v7 = vpop.xlane.xlu0 %3578 }
 0x51a   : > { %v3597_v59 = vsub.f32 %v3549_v35, %v3579_v7  ;;  %v3596_v37 = vsub.f32 %v3544_v10, %v3576_v45 }
 0x51c   : > { %v3607_v0 = vmul.f32 1.442695, %v3597_v59  ;;  %v3605_v21 = vmul.f32 1.442695, %v3596_v37 }
 0x51d   : > { %v3582_v22 = vpop.xlane.xlu1 %3581  ;;  %v3585_v25 = vpop.xlane.xlu0 %3584 }
 0x51e   : > { %v3598_v15 = vsub.f32 %v3552_v29, %v3582_v22  ;;  %17116 = vpow2.f32 %v3607_v0  ;;  %v3599_v52 = vsub.f32 %v3557_v14, %v3585_v25 }
 0x51f   : > { %17118 = vpow2.f32 %v3603_v34 }
 0x520   : > { %v3609_v18 = vmul.f32 1.442695, %v3598_v15  ;;  %v3611_v58 = vmul.f32 1.442695, %v3599_v52 }
 0x521   : > { %v3591_v56 = vpop.xlane.xlu0 %3590  ;;  %v3588_v37 = vpop.xlane.xlu1 %3587 }
 0x522   : > { %17120 = vpow2.f32 %v3609_v18  ;;  %v3601_v11 = vsub.f32 %v3565_v2, %v3591_v56  ;;  %v3600_v22 = vsub.f32 %v3560_v54, %v3588_v37 }
 0x523   : > { %17122 = vpow2.f32 %v3605_v21 }
 0x524   : > { %v3615_v38 = vmul.f32 1.442695, %v3601_v11  ;;  %v3613_v15 = vmul.f32 1.442695, %v3600_v22 }
 0x525   : > { %v3594_v0 = vpop.xlane.xlu1 %3593 }
 0x526   : > { %17124 = vpow2.f32 %v3615_v38  ;;  %v3602_v34 = vsub.f32 %v3568_v43, %v3594_v0 }
 0x527   : > { %17126 = vpow2.f32 %v3611_v58 }
 0x528   : > { %v3617_v25 = vmul.f32 1.442695, %v3602_v34 }
 0x52a   : > { %17128 = vpow2.f32 %v3617_v25 }
 0x52b   : > { %v17117_v35 = vpop.eup %17116  ;;  %17130 = vpow2.f32 %v3613_v15 }
 0x52c   : > { %v3625_v10 = vsel %vm3481_vm0, %v17117_v35, 0.0  ;;  %v17119_v28 = vpop.eup %17118 }
 0x52d   : > { %3626 = vadd.xlane.f32.xlu0 %v3625_v10  ;;  %v3619_v14 = vsel %vm3481_vm0, %v17119_v28, 0.0 }
 0x52f   : > { %v17121_v46 = vpop.eup %17120 }
 0x530   : > { %v3628_v29 = vsel %vm3481_vm0, %v17121_v46, 0.0  ;;  %v17123_v45 = vpop.eup %17122 }
 0x531   : > { %3629 = vadd.xlane.f32.xlu1 %v3628_v29  ;;  %3620 = vadd.xlane.f32.xlu0 %v3619_v14  ;;  %v3622_v11 = vsel %vm3481_vm0, %v17123_v45, 0.0 }
 0x533   : > { %v19324_v18 = vpop.eup %17124 }
 0x534   : > { %v3637_v2 = vsel %vm3481_vm0, %v19324_v18, 0.0  ;;  %v19329_v7 = vpop.eup %17126 }
 0x535   : > { %3623 = vadd.xlane.f32.xlu1 %v3622_v11  ;;  %3638 = vadd.xlane.f32.xlu0 %v3637_v2  ;;  %v3631_v59 = vsel %vm3481_vm0, %v19329_v7, 0.0 }
 0x539   : > { %3632 = vadd.xlane.f32.xlu0 %v3631_v59 }
 0x546   : > { %3764 = vrot.lane.b32.xlu1 %v19143_v6, %s18049_s15  ;;  %v17129_v6 = vpop.eup %17128 }
 0x547   : > { %v17131_v21 = vpop.eup %17130 }
 0x54a   : > { %3762 = vrot.lane.b32.xlu1 %v19160_v55, %s18049_s15  ;;  %v3640_v55 = vsel %vm3481_vm0, %v17129_v6, 0.0 }
 0x54f   : > { %3766 = vrot.lane.b32.xlu0 %v19141_v47, %s18049_s15  ;;  %v3634_v47 = vsel %vm3481_vm0, %v17131_v21, 0.0 }
 0x553   : > { %3748 = vrot.lane.b32.xlu0 %v19094_v8, %s18049_s15 }
 0x557   : > { %3752 = vrot.lane.b32.xlu0 %v19113_v50, %s18049_s15 }
 0x56e   : > { %3641 = vadd.xlane.f32.xlu1 %v3640_v55 }
 0x572   : > { %3635 = vadd.xlane.f32.xlu1 %v3634_v47 }
 0x583   : > { %3760 = vrot.lane.b32.xlu1 %v19178_v19, %s18049_s15 }
 0x587   : > { %3750 = vrot.lane.b32.xlu1 %v19105_v5, %s18049_s15 }
 0x58b   : > { %3754 = vrot.lane.b32.xlu1 %v19119_v41, %s18049_s15 }
 0x5b6   : > { %v3627_v8 = vpop.xlane.xlu0 %3626 }
 0x5ba   : > { %v3630_v50 = vpop.xlane.xlu1 %3629  ;;  %v3621_v54 = vpop.xlane.xlu0 %3620 }
 0x5bb   : > { %17132 = vrcp.f32 %v3630_v50 }
 0x5bc   : > { %17134 = vrcp.f32 %v3621_v54 }
 0x5bd   : > { %17136 = vrcp.f32 %v3627_v8 }
 0x5be   : > { %v3624_v43 = vpop.xlane.xlu1 %3623  ;;  %v3639_v52 = vpop.xlane.xlu0 %3638 }
 0x5bf   : > { %17138 = vrcp.f32 %v3624_v43 }
 0x5c2   : > { %v3633_v56 = vpop.xlane.xlu0 %3632  ;;  %v3765_v0 = vpop.permute.xlu1 %3764 }
 0x5c3   : > { %v3787_v34 = vsel %vm3481_vm0, %v3765_v0, 0 }
 0x5c6   : > { %v3767_v38 = vpop.permute.xlu0 %3766  ;;  %v3763_v22 = vpop.permute.xlu1 %3762 }
 0x5c7   : > { %15642 = vmatprep.subr.msk.bf16.mxu1 %vm3481_vm0, %v3767_v38  ;;  %v3790_v37 = vsel %vm3481_vm0, %v3767_v38, 0 }
 0x5c8   : > { %v17133_v19 = vpop.eup %17132 }
 0x5c9   : > { %v17135_v58 = vpop.eup %17134  ;;  %v3654_v29 = vmul.f32 %v17133_v19, %v17121_v46 }
 0x5ca   : > { %v17137_v10 = vpop.eup %17136  ;;  %v3651_v14 = vmul.f32 %v17135_v58, %v17119_v28  ;;  %v3749_v19 = vpop.permute.xlu0 %3748 }
 0x5cb   : > { %v3653_v11 = vmul.f32 %v17137_v10, %v17117_v35  ;;  %v3784_v35 = vsel %vm3481_vm0, %v3763_v22, 0 }
 0x5cc   : > { %v17139_v5 = vpop.eup %17138 }
 0x5cd   : > { %v3652_v41 = vmul.f32 %v17139_v5, %v17123_v45  ;;  %v3660_v59 = vpack.c.bf16 %v3654_v29, %v3653_v11 }
 0x5ce   : > { %v3753_v10 = vpop.permute.xlu0 %3752 }
 0x5cf   : > { %v3659_v2 = vpack.c.bf16 %v3652_v41, %v3651_v14 }
 0x5d1   : > { %15358 = vmatprep.mubr.msk.bf16.mxu1 %vm3481_vm0, %v3659_v2 }
 0x5d2   : > { %15359 = vmatmul.mubr.msk.bf16.vlgmr.msra.gmra.mxu1 %vm3481_vm0, %v3660_v59 }
 0x5d3   : > { %15367 = vmatpush3.bf16.xpose.msra.mxu1 %v3790_v37 }
 0x5d4   : > { %15643 = vmatprep.subr.msk.bf16.mxu1 %vm3481_vm0, %v3765_v0 }
 0x5db   : > { %15369 = vmatpush3.bf16.xpose.msra.mxu1 %v3787_v34 }
 0x5dc   : > { %15644 = vmatprep.subr.msk.bf16.mxu1 %vm3481_vm0, %v3763_v22 }
 0x5e3   : > { %15371 = vmatpush3.bf16.xpose.msra.mxu1 %v3784_v35 }
 0x5f7   : > { %v3642_v28 = vpop.xlane.xlu1 %3641 }
 0x5f8   : > { %17140 = vrcp.f32 %v3642_v28 }
 0x5f9   : > { %17142 = vrcp.f32 %v3633_v56 }
 0x5fa   : > { %17144 = vrcp.f32 %v3639_v52 }
 0x5fb   : > { %v3636_v46 = vpop.xlane.xlu1 %3635 }
 0x5fc   : > { %17146 = vrcp.f32 %v3636_v46 }
 0x5ff   : > { %v3761_v45 = vpop.permute.xlu1 %3760 }
 0x600   : > { %15645 = vmatprep.subr.msk.bf16.mxu1 %vm3481_vm0, %v3761_v45  ;;  %v3781_v25 = vsel %vm3481_vm0, %v3761_v45, 0 }
 0x601   : > { %15373 = vmatpush3.bf16.xpose.msra.mxu1 %v3781_v25 }
 0x603   : > { %v3751_v58 = vpop.permute.xlu1 %3750 }
 0x605   : > { %v17141_v15 = vpop.eup %17140 }
 0x606   : > { %v17143_v55 = vpop.eup %17142  ;;  %v3658_v50 = vmul.f32 %v17141_v15, %v17129_v6 }
 0x607   : > { %v17145_v47 = vpop.eup %17144  ;;  %v3655_v54 = vmul.f32 %v17143_v55, %v19329_v7  ;;  %v3755_v6 = vpop.permute.xlu1 %3754 }
 0x608   : > { %v3657_v38 = vmul.f32 %v17145_v47, %v19324_v18 }
 0x609   : > { %v17147_v8 = vpop.eup %17146 }
 0x60a   : > { %v3656_v43 = vmul.f32 %v17147_v8, %v17131_v21  ;;  %v3662_v52 = vpack.c.bf16 %v3658_v50, %v3657_v38 }
 0x60c   : > { %v3661_v56 = vpack.c.bf16 %v3656_v43, %v3655_v54 }
 0x60e   : > { %15362 = vmatprep.mubr.msk.bf16.mxu1 %vm3481_vm0, %v3661_v56 }
 0x60f   : > { %15363 = vmatmul.mubr.msk.bf16.gmra.mxu1 %vm3481_vm0, %v3662_v52 }
 0x610   : > { %15374 = vmatprep.mubr.msk.bf16.mxu1 %vm3481_vm0, %v3749_v19 }
 0x617   : > { %15375 = vmatmul.mubr.msk.bf16.vlgmr.msra.gmra.mxu1 %vm3481_vm0, %v3751_v58 }
 0x618   : > { %15378 = vmatprep.mubr.msk.bf16.mxu1 %vm3481_vm0, %v3753_v10 }
 0x61f   : > { %15379 = vmatmul.mubr.msk.bf16.gmra.mxu1 %vm3481_vm0, %v3755_v6 }
 0x692   : > { %v15360_v7 = vpop.f32.mrf.mxu1 }
 0x694   : > { %v19369_v18 = vpop.f32.mrf.mxu1 }
 0x696   : > { %v15361_v21 = vpop.f32.mrf.mxu1 }
 0x697   : > { %v19371_v5 = vpack.c.bf16 %v15361_v21, %v15360_v7 }
 0x698   : > { %v19373_v29 = vpop.f32.mrf.mxu1 }
 0x6cf   : > { %v15364_v14 = vpop.f32.mrf.mxu1 }
 0x6d1   : > { %v19375_v41 = vpop.f32.mrf.mxu1 }
 0x6d3   : > { %v15365_v11 = vpop.f32.mrf.mxu1 }
 0x6d4   : > { %v19377_v2 = vpack.c.bf16 %v15365_v11, %v15364_v14 }
 0x6d5   : > { %v19379_v59 = vpop.f32.mrf.mxu1 }
 0x6d7   : > { %v15376_v37 = vpop.f32.mrf.mxu1 }
 0x6d8   : > { %v3835_v35 = vadd.f32 %v15376_v37, %v19273_v48 }
 0x6d9   : > { %v3826_v0 = vpop.f32.mrf.mxu1 }
 0x6da   : > { %v3827_v34 = vadd.f32 %v3826_v0, %v19268_v51  ;;  %v3863_v47 = vsel %vm3481_vm0, %v3835_v35, -inf }
 0x6db   : > { %v15377_v22 = vpop.f32.mrf.mxu1 }
 0x6dc   : > { %v3857_v28 = vsel %vm3481_vm0, %v3827_v34, -inf  ;;  %v3838_v15 = vadd.f32 %v15377_v22, %v19286_v63 }
 0x6dd   : > { %v3829_v46 = vpop.f32.mrf.mxu1  ;;  %3858 = vmax.xlane.f32.xlu0 %v3857_v28 }
 0x6de   : > { %v3830_v45 = vadd.f32 %v3829_v46, %v19279_v4  ;;  %v3866_v48 = vsel %vm3481_vm0, %v3838_v15, -inf }
 0x6df   : > { %v15380_v25 = vpop.f32.mrf.mxu1 }
 0x6e0   : > { %v3860_v55 = vsel %vm3481_vm0, %v3830_v45, -inf  ;;  %v3851_v4 = vadd.f32 %v15380_v25, %v19300_v49 }
 0x6e1   : > { %3861 = vmax.xlane.f32.xlu1 %v3860_v55  ;;  %3864 = vmax.xlane.f32.xlu0 %v3863_v47  ;;  %v3842_v8 = vpop.f32.mrf.mxu1 }
 0x6e2   : > { %v3843_v50 = vadd.f32 %v3842_v8, %v19292_v36  ;;  %v3875_v36 = vsel %vm3481_vm0, %v3851_v4, -inf }
 0x6e3   : > { %v15381_v51 = vpop.f32.mrf.mxu1 }
 0x6e4   : > { %v3854_v63 = vadd.f32 %v15381_v51, %v19314_v62  ;;  %v3869_v56 = vsel %vm3481_vm0, %v3843_v50, -inf }
 0x6e5   : > { %3867 = vmax.xlane.f32.xlu0 %v3866_v48  ;;  %v3845_v54 = vpop.f32.mrf.mxu1 }
 0x6e6   : > { %v3846_v43 = vadd.f32 %v3845_v54, %v19306_v13  ;;  %v3878_v52 = vsel %vm3481_vm0, %v3854_v63, -inf }
 0x6e8   : > { %v3872_v38 = vsel %vm3481_vm0, %v3846_v43, -inf }
 0x6e9   : > { %3873 = vmax.xlane.f32.xlu1 %v3872_v38  ;;  %3870 = vmax.xlane.f32.xlu0 %v3869_v56 }
 0x6ed   : > { %3879 = vmax.xlane.f32.xlu1 %v3878_v52  ;;  %3876 = vmax.xlane.f32.xlu0 %v3875_v36 }
 0x766   : > { %v3859_v19 = vpop.xlane.xlu0 %3858 }
 0x767   : > { %v3881_v58 = vsub.f32 %v3827_v34, %v3859_v19 }
 0x769   : > { %v3889_v62 = vmul.f32 1.442695, %v3881_v58 }
 0x76a   : > { %v3862_v10 = vpop.xlane.xlu1 %3861  ;;  %v3865_v13 = vpop.xlane.xlu0 %3864 }
 0x76b   : > { %v3883_v6 = vsub.f32 %v3835_v35, %v3865_v13  ;;  %v3882_v49 = vsub.f32 %v3830_v45, %v3862_v10 }
 0x76d   : > { %v3893_v7 = vmul.f32 1.442695, %v3883_v6  ;;  %v3891_v11 = vmul.f32 1.442695, %v3882_v49 }
 0x76e   : > { %v3868_v21 = vpop.xlane.xlu0 %3867 }
 0x76f   : > { %v3884_v14 = vsub.f32 %v3838_v15, %v3868_v21  ;;  %17148 = vpow2.f32 %v3893_v7 }
 0x770   : > { %17150 = vpow2.f32 %v3889_v62 }
 0x771   : > { %v3895_v37 = vmul.f32 1.442695, %v3884_v14 }
 0x772   : > { %v3871_v0 = vpop.xlane.xlu0 %3870  ;;  %v3874_v56 = vpop.xlane.xlu1 %3873 }
 0x773   : > { %17152 = vpow2.f32 %v3895_v37  ;;  %v3885_v22 = vsub.f32 %v3843_v50, %v3871_v0  ;;  %v3886_v19 = vsub.f32 %v3846_v43, %v3874_v56  ;;  %v16195_v43 = vld [vmem:[%s18448_s18 + $0x98] ss:$12 sps:$4 sm:$0xff]  }
 0x774   : > { %17154 = vpow2.f32 %v3891_v11 }
 0x775   : > { %v3897_v34 = vmul.f32 1.442695, %v3885_v22  ;;  %v3899_v10 = vmul.f32 1.442695, %v3886_v19 }
 0x776   : > { %v3877_v28 = vpop.xlane.xlu0 %3876  ;;  %v3880_v52 = vpop.xlane.xlu1 %3879 }
 0x777   : > { %v3887_v46 = vsub.f32 %v3851_v4, %v3877_v28  ;;  %v3888_v36 = vsub.f32 %v3854_v63, %v3880_v52  ;;  %v16194_v52 = vld [vmem:[%s18448_s18 + $0x94] ss:$12 sps:$4 sm:$0xff]  }
 0x779   : > { %v3901_v25 = vmul.f32 1.442695, %v3887_v46  ;;  %v3903_v58 = vmul.f32 1.442695, %v3888_v36  ;;  %v16192_v36 = vld [vmem:[%s18448_s18 + $0x90] ss:$12 sps:$4 sm:$0xff]  }
 0x77b   : > { %17156 = vpow2.f32 %v3901_v25 }
 0x77c   : > { %v19397_v55 = vpop.eup %17148  ;;  %17158 = vpow2.f32 %v3897_v34 }
 0x77d   : > { %v3911_v35 = vsel %vm3481_vm0, %v19397_v55, 0.0  ;;  %v17151_v45 = vpop.eup %17150  ;;  %17160 = vpow2.f32 %v3903_v58 }
 0x77e   : > { %3912 = vadd.xlane.f32.xlu0 %v3911_v35  ;;  %v3905_v51 = vsel %vm3481_vm0, %v17151_v45, 0.0  ;;  %17162 = vpow2.f32 %v3899_v10 }
 0x780   : > { %v19401_v15 = vpop.eup %17152 }
 0x781   : > { %v3914_v47 = vsel %vm3481_vm0, %v19401_v15, 0.0  ;;  %v17155_v8 = vpop.eup %17154 }
 0x782   : > { %3915 = vadd.xlane.f32.xlu1 %v3914_v47  ;;  %3906 = vadd.xlane.f32.xlu0 %v3905_v51  ;;  %v3908_v50 = vsel %vm3481_vm0, %v17155_v8, 0.0  ;;  %v16190_v51 = vld [vmem:[%s18448_s18 + $0xac] ss:$12 sps:$4 sm:$0xff]  }
 0x786   : > { %3909 = vadd.xlane.f32.xlu1 %v3908_v50 }
 0x788   : > { %v19407_v48 = vpop.eup %17156 }
 0x789   : > { %v3923_v54 = vsel %vm3481_vm0, %v19407_v48, 0.0  ;;  %v19411_v4 = vpop.eup %17158 }
 0x78a   : > { %3924 = vadd.xlane.f32.xlu0 %v3923_v54  ;;  %v3917_v38 = vsel %vm3481_vm0, %v19411_v4, 0.0  ;;  %v19421_v13 = vpop.eup %17160 }
 0x78b   : > { %v19425_v6 = vpop.eup %17162 }
 0x78e   : > { %3918 = vadd.xlane.f32.xlu0 %v3917_v38  ;;  %v16188_v38 = vld [vmem:[%s18448_s18 + $0xa8] ss:$12 sps:$4 sm:$0xff]  }
 0x797   : > { %3957 = vrot.lane.b32.xlu1 %v19240_v39, %s18049_s15  ;;  %v3926_v39 = vsel %vm3481_vm0, %v19421_v13, 0.0 }
 0x79b   : > { %3955 = vrot.lane.b32.xlu1 %v19247_v12, %s18049_s15  ;;  %v3920_v12 = vsel %vm3481_vm0, %v19425_v6, 0.0 }
 0x7a4   : > { %3959 = vrot.lane.b32.xlu0 %v19238_v1, %s18049_s15  ;;  %v16191_v1 = vld [vmem:[%s18448_s18 + $0xb0] ss:$12 sps:$4 sm:$0xff]  }
 0x7a5   : > { %15398 = vmatprep.subr.bf16.mxu1 %v16191_v1 }
 0x7a6   : > { %15399 = vmatpush3.bf16.msra.mxu1 %v16191_v1 }
 0x7a7   : > { %15400 = vmatprep.subr.bf16.mxu1 %v16195_v43 }
 0x7aa   : > { %15401 = vmatpush3.bf16.msra.mxu1 %v16195_v43 }
 0x7bf   : > { %3927 = vadd.xlane.f32.xlu1 %v3926_v39 }
 0x7c3   : > { %3921 = vadd.xlane.f32.xlu1 %v3920_v12 }
 0x7d4   : > { %3953 = vrot.lane.b32.xlu1 %v19254_v40, %s18049_s15 }
 0x807   : > { %v3913_v63 = vpop.xlane.xlu0 %3912 }
 0x80b   : > { %v3916_v49 = vpop.xlane.xlu1 %3915  ;;  %v3907_v7 = vpop.xlane.xlu0 %3906 }
 0x80c   : > { %17164 = vrcp.f32 %v3907_v7  ;;  %v16198_v7 = vld [vmem:[%s18448_s18 + $0x7c] ss:$12 sps:$4 sm:$0xff]  }
 0x80f   : > { %v3910_v62 = vpop.xlane.xlu1 %3909 }
 0x810   : > { %17166 = vrcp.f32 %v3910_v62  ;;  %v16199_v62 = vld [vmem:[%s18448_s18 + $0x80] ss:$12 sps:$4 sm:$0xff]  }
 0x811   : > { %17168 = vrcp.f32 %v3916_v49  ;;  %v22906_v49 = vmov 0   ;;  %15402 = vmatprep.subr.bf16.mxu1 %v16199_v62 }
 0x812   : > { %17170 = vrcp.f32 %v3913_v63  ;;  %15403 = vmatpush3.bf16.msra.mxu1 %v16199_v62  ;;  %v22917_v62 = vld [vmem:[#allocation64_spill] sm:$0xff] }
 0x813   : > { %v3925_v21 = vpop.xlane.xlu0 %3924  ;;  %v3958_v37 = vpop.permute.xlu1 %3957 }
 0x817   : > { %v3919_v14 = vpop.xlane.xlu0 %3918  ;;  %v3956_v25 = vpop.permute.xlu1 %3955 }
 0x819   : > { %v17165_v11 = vpop.eup %17164 }
 0x81a   : > { %v3937_v40 = vmul.f32 %v17165_v11, %v17151_v45 }
 0x81b   : > { %v3960_v0 = vpop.permute.xlu0 %3959 }
 0x81c   : > { %15382 = vmatprep.subr.bf16.mxu0 %v3960_v0 }
 0x81d   : > { %v17167_v22 = vpop.eup %17166  ;;  %15383 = vmatpush3.bf16.msra.mxu0 %v3960_v0 }
 0x81e   : > { %v3938_v28 = vmul.f32 %v17167_v22, %v17155_v8  ;;  %15384 = vmatprep.subr.bf16.mxu0 %v3958_v37  ;;  %v17169_v35 = vpop.eup %17168 }
 0x81f   : > { %v17171_v47 = vpop.eup %17170  ;;  %v3940_v8 = vmul.f32 %v17169_v35, %v19401_v15 }
 0x820   : > { %v3945_v46 = vpack.c.bf16 %v3938_v28, %v3937_v40  ;;  %v3939_v54 = vmul.f32 %v17171_v47, %v19397_v55  ;;  %v16205_v28 = vld [vmem:[%s18448_s18 + $0x48] ss:$12 sps:$4 sm:$0xff]   ;;  %v16212_v47 = vld [vmem:[%s18448_s18 + $0x20] ss:$12 sps:$4 sm:$0xff]  }
 0x821   : > { %15385 = vmatpush3.bf16.msra.mxu0 %v3958_v37 }
 0x822   : > { %15390 = vmatprep.mubr.msk.bf16.mxu0 %vm3481_vm0, %v3945_v46  ;;  %15386 = vmatprep.subr.bf16.mxu0 %v3956_v25  ;;  %v3946_v56 = vpack.c.bf16 %v3940_v8, %v3939_v54  ;;  %v16208_v46 = vld [vmem:[%s18448_s18 + $0x38] ss:$12 sps:$4 sm:$0xff]   ;;  %v16215_v8 = vld [vmem:[%s18448_s18 + $0x1c] ss:$12 sps:$4 sm:$0xff]  }
 0x823   : > { %v16213_v54 = vld [vmem:[%s18448_s18 + $0x18] ss:$12 sps:$4 sm:$0xff]  }
 0x825   : > { %15387 = vmatpush3.bf16.msra.mxu0 %v3956_v25 }
 0x848   : > { %v3928_v34 = vpop.xlane.xlu1 %3927 }
 0x849   : > { %17172 = vrcp.f32 %v3928_v34  ;;  %v16211_v34 = vld [vmem:[%s18448_s18 + $0x34] ss:$12 sps:$4 sm:$0xff]  }
 0x84a   : > { %17174 = vrcp.f32 %v3919_v14  ;;  %v16207_v14 = vld [vmem:[%s18448_s18 + $0x4c] ss:$12 sps:$4 sm:$0xff]  }
 0x84b   : > { %17176 = vrcp.f32 %v3925_v21  ;;  %v16204_v21 = vld [vmem:[%s18448_s18 + $0x50] ss:$12 sps:$4 sm:$0xff]  }
 0x84c   : > { %v3922_v45 = vpop.xlane.xlu1 %3921 }
 0x84d   : > { %17178 = vrcp.f32 %v3922_v45  ;;  %v16209_v45 = vld [vmem:[%s18448_s18 + $0x30] ss:$12 sps:$4 sm:$0xff]  }
 0x850   : > { %v3954_v50 = vpop.permute.xlu1 %3953 }
 0x851   : > { %15388 = vmatprep.subr.bf16.mxu0 %v3954_v50 }
 0x852   : > { %15389 = vmatpush3.bf16.msra.mxu0 %v3954_v50 }
 0x853   : > { %4130 = vmatprep.subr.bf16.mxu0 %v16190_v51 }
 0x855   : > { %15391 = vmatmul.mubr.msk.bf16.vlgmr.msra.gmra.mxu0 %vm3481_vm0, %v3946_v56  ;;  %v16219_v56 = vld [vmem:[%s18448_s18 + $0x4] ss:$12 sps:$4 sm:$0xff]  }
 0x856   : > { %4131 = vmatpush1.bf16.msra.mxu0 %v16188_v38  ;;  %v17173_v19 = vpop.eup %17172  ;;  %v16216_v38 = vld [vmem:[%s18448_s18 + $0x8] ss:$12 sps:$4 sm:$0xff]  }
 0x857   : > { %4132 = vmatprep.subr.bf16.mxu0 %v16194_v52  ;;  %v17175_v15 = vpop.eup %17174  ;;  %v3944_v55 = vmul.f32 %v17173_v19, %v19421_v13  ;;  %v16196_v13 = vld [vmem:[%s18448_s18 + $0x78] ss:$12 sps:$4 sm:$0xff]   ;;  %v3209_v52 = vadd.f32 %v19220_v30, %v19236_v53  ;;  %v3740_v30 = vpack.c.bf16 %v19373_v29, %v19369_v18  ;;  %v3199_v53 = vadd.f32 %v19216_v26, %v19232_v33 }
 0x858   : > { %v17177_v58 = vpop.eup %17176  ;;  %v3941_v39 = vmul.f32 %v17175_v15, %v19411_v4  ;;  %v16200_v4 = vld [vmem:[%s18448_s18 + $0x60] ss:$12 sps:$4 sm:$0xff]   ;;  %v4493_v18 = vsel %vm3481_vm0, %v19190_v44, 0  ;;  %v3742_v29 = vpack.c.bf16 %v19379_v59, %v19375_v41  ;;  %v3179_v26 = vadd.f32 %v19208_v27, %v19224_v60 }
 0x859   : > { %v3943_v1 = vmul.f32 %v17177_v58, %v19407_v48  ;;  %v16202_v48 = vld [vmem:[%s18448_s18 + $0x64] ss:$12 sps:$4 sm:$0xff]   ;;  %v16217_v58 = vld [vmem:[%s18448_s18] ss:$12 sps:$4 sm:$0xff]   ;;  %v19509_v33 = vpack.c.bf16 %v3199_v53, %v19230_v32  ;;  %v2741_v60 = vadd.f32 %v19090_v9, %v19092_v20 }
 0x85a   : > { %v17179_v10 = vpop.eup %17178  ;;  %4133 = vmatpush1.bf16.msra.mxu0 %v16192_v36  ;;  %v22910_v9 = vld [vmem:[#allocation58_spill] sm:$0xff]  ;;  %v22911_v20 = vld [vmem:[#allocation57_spill] sm:$0xff] }
 0x85b   : > { %v3942_v12 = vmul.f32 %v17179_v10, %v19425_v6  ;;  %v3948_v63 = vpack.c.bf16 %v3944_v55, %v3943_v1  ;;  %4134 = vmatprep.subr.bf16.mxu0 %v16198_v7  ;;  %v16203_v6 = vld [vmem:[%s18448_s18 + $0x68] ss:$12 sps:$4 sm:$0xff]   ;;  %v19476_v10 = vpack.c.bf16 %v3209_v52, %v19234_v42  ;;  %v4496_v42 = vsel %vm3481_vm0, %v19198_v17, 0  ;;  %22907 = vst [vmem:[#allocation85_spill] sm:$0xff] %v19509_v33 }
 0x85c   : > { %15404 = vmatprep.subr.bf16.mxu1 %v16203_v6  ;;  %v3189_v55 = vadd.f32 %v19214_v57, %v19228_v31  ;;  %v4490_v31 = vsel %vm3481_vm0, %v19174_v3, 0  ;;  %v22909_v57 = vld [vmem:[#allocation55_spill] sm:$0xff]  ;;  %v2751_v59 = vadd.f32 %v22911_v20, %v22910_v9 }
 0x85d   : > { %v3947_v43 = vpack.c.bf16 %v3942_v12, %v3941_v39  ;;  %15405 = vmatpush3.bf16.msra.mxu1 %v16203_v6  ;;  %v19539_v32 = vpack.c.bf16 %v2741_v60, %v22909_v57  ;;  %v22912_v39 = vld [vmem:[#allocation61_spill] sm:$0xff]  ;;  %v22913_v12 = vld [vmem:[#allocation60_spill] sm:$0xff]  ;;  %v22916_v7 = vld [vmem:[#allocation63_spill] sm:$0xff] }
 0x85e   : > { %4135 = vmatpush1.bf16.msra.mxu0 %v16196_v13  ;;  %4344 = vmatprep.subr.bf16.mxu1 %v16207_v14  ;;  %v19519_v41 = vpack.c.bf16 %v3189_v55, %v19226_v16  ;;  %v22908_v16 = vld [vmem:[#allocation81_spill] sm:$0xff]  ;;  %v2761_v1 = vadd.f32 %v22913_v12, %v22912_v39  ;;  %v22915_v13 = vld [vmem:[#allocation59_spill] sm:$0xff] }
 0x85f   : > { %15394 = vmatprep.mubr.msk.bf16.mxu0 %vm3481_vm0, %v3947_v43  ;;  %4136 = vmatprep.subr.bf16.mxu0 %v16202_v48  ;;  %v19532_v27 = vpack.c.bf16 %v3179_v26, %v22908_v16  ;;  %v22914_v43 = vld [vmem:[#allocation56_spill] sm:$0xff]  ;;  %v22918_v48 = vld [vmem:[#allocation62_spill] sm:$0xff] }
 0x860   : > { %15395 = vmatmul.mubr.msk.bf16.gmra.mxu0 %vm3481_vm0, %v3948_v63  ;;  %v19553_v63 = vpack.c.bf16 %v2751_v59, %v22914_v43 }
 0x861   : > { %4154 = vmatprep.mubr.bf16.mxu0 %v22906_v49 }
 0x862   : > { %4137 = vmatpush1.bf16.msra.mxu0 %v16200_v4  ;;  %v2771_v4 = vadd.f32 %v22917_v62, %v22916_v7 }
 0x863   : > { %15414 = vmatprep.subr.bf16.mxu0 %v16204_v21 }
 0x864   : > { %v19565_v6 = vpack.c.bf16 %v2771_v4, %v22918_v48 }
 0x915   : > { %v15392_v11 = vpop.f32.mrf.mxu0 }
 0x917   : > { %v4011_v37 = vpop.f32.mrf.mxu0 }
 0x919   : > { %v15393_v0 = vpop.f32.mrf.mxu0 }
 0x91a   : > { %v4043_v25 = vpack.c.bf16 %v15393_v0, %v15392_v11 }
 0x91b   : > { %v4014_v22 = vpop.f32.mrf.mxu0 }
 0x91c   : > { %v4042_v40 = vpack.c.bf16 %v4014_v22, %v4011_v37 }
 0x91e   : > { %14055 = vmatmul.mubr.msk.bf16.vlgmr.msra.gmra.mxu0 %vm3481_vm0, %v4042_v40  ;;  %15406 = vmatprep.mubr.msk.bf16.mxu1 %vm3481_vm0, %v4042_v40 }
 0x91f   : > { %15415 = vmatpush3.bf16.msra.mxu0 %v16204_v21  ;;  %15407 = vmatmul.mubr.msk.bf16.vlgmr.msra.gmra.mxu1 %vm3481_vm0, %v4043_v25 }
 0x920   : > { %4345 = vmatpush1.bf16.msra.mxu1 %v16205_v28  ;;  %v15396_v35 = vpop.f32.mrf.mxu0  ;;  %15416 = vmatprep.subr.bf16.mxu0 %v16208_v46 }
 0x921   : > { %4346 = vmatprep.subr.bf16.mxu1 %v16211_v34  ;;  %4164 = vmatprep.mubr.bf16.mxu0 %v22906_v49 }
 0x922   : > { %v4027_v51 = vpop.f32.mrf.mxu0 }
 0x923   : > { %15417 = vmatpush3.bf16.msra.mxu0 %v16208_v46 }
 0x924   : > { %4347 = vmatpush1.bf16.msra.mxu1 %v16209_v45  ;;  %v15397_v50 = vpop.f32.mrf.mxu0  ;;  %15418 = vmatprep.subr.bf16.mxu0 %v16212_v47 }
 0x925   : > { %4348 = vmatprep.subr.bf16.mxu1 %v16215_v8  ;;  %v4045_v15 = vpack.c.bf16 %v15397_v50, %v15396_v35 }
 0x926   : > { %v4030_v36 = vpop.f32.mrf.mxu0  ;;  %14056 = vmatmul.mubr.msk.bf16.gmra.mxu0 %vm3481_vm0, %v4043_v25 }
 0x927   : > { %v4044_v19 = vpack.c.bf16 %v4030_v36, %v4027_v51  ;;  %15419 = vmatpush3.bf16.msra.mxu0 %v16212_v47  ;;  %4174 = vmatprep.mubr.bf16.mxu0 %v22906_v49 }
 0x928   : > { %4349 = vmatpush1.bf16.msra.mxu1 %v16213_v54  ;;  %15420 = vmatprep.subr.bf16.mxu0 %v16216_v38 }
 0x929   : > { %15410 = vmatprep.mubr.msk.bf16.mxu1 %vm3481_vm0, %v4044_v19  ;;  %4350 = vmatprep.subr.bf16.mxu1 %v16219_v56 }
 0x92a   : > { %15411 = vmatmul.mubr.msk.bf16.gmra.mxu1 %vm3481_vm0, %v4045_v15 }
 0x92b   : > { %15421 = vmatpush3.bf16.msra.mxu0 %v16216_v38  ;;  %4368 = vmatprep.mubr.bf16.mxu1 %v22906_v49 }
 0x92c   : > { %4351 = vmatpush1.bf16.msra.mxu1 %v16217_v58  ;;  %15446 = vmatprep.subr.bf16.mxu0 %v19476_v10 }
 0x92d   : > { %15646 = vmatprep.subr.msk.bf16.mxu1 %vm3481_vm0, %v19198_v17 }
 0x92e   : > { %14057 = vmatmul.mubr.msk.bf16.gmra.mxu0 %vm3481_vm0, %v4044_v19 }
 0x92f   : > { %4184 = vmatprep.mubr.bf16.mxu0 %v22906_v49 }
 0x932   : > { %14075 = vmatmul.mubr.msk.bf16.vlgmr.msra.gmra.mxu1 %vm3481_vm0, %v3740_v30 }
 0x933   : > { %15431 = vmatpush3.bf16.xpose.msra.mxu1 %v4496_v42  ;;  %4378 = vmatprep.mubr.bf16.mxu1 %v22906_v49 }
 0x934   : > { %15647 = vmatprep.subr.msk.bf16.mxu1 %vm3481_vm0, %v19190_v44 }
 0x936   : > { %14058 = vmatmul.mubr.msk.bf16.gmra.mxu0 %vm3481_vm0, %v4045_v15 }
 0x937   : > { %15422 = vmatprep.mubr.msk.bf16.mxu0 %vm3481_vm0, %v3740_v30 }
 0x93a   : > { %14076 = vmatmul.mubr.msk.bf16.gmra.mxu1 %vm3481_vm0, %v19371_v5 }
 0x93b   : > { %15433 = vmatpush3.bf16.xpose.msra.mxu1 %v4493_v18  ;;  %4388 = vmatprep.mubr.bf16.mxu1 %v22906_v49 }
 0x93c   : > { %15648 = vmatprep.subr.msk.bf16.mxu1 %vm3481_vm0, %v19174_v3 }
 0x93e   : > { %15423 = vmatmul.mubr.msk.bf16.vlgmr.msra.gmra.mxu0 %vm3481_vm0, %v19371_v5  ;;  %v4487_v5 = vsel %vm3481_vm0, %v19157_v23, 0 }
 0x93f   : > { %15447 = vmatpush3.bf16.msra.mxu0 %v19476_v10  ;;  %15426 = vmatprep.mubr.msk.bf16.mxu0 %vm3481_vm0, %v3742_v29 }
 0x940   : > { %15448 = vmatprep.subr.bf16.mxu0 %v19509_v33 }
 0x942   : > { %14077 = vmatmul.mubr.msk.bf16.gmra.mxu1 %vm3481_vm0, %v3742_v29 }
 0x943   : > { %15435 = vmatpush3.bf16.xpose.msra.mxu1 %v4490_v31  ;;  %15449 = vmatpush3.bf16.msra.mxu0 %v19509_v33 }
 0x944   : > { %15649 = vmatprep.subr.msk.bf16.mxu1 %vm3481_vm0, %v19157_v23  ;;  %15450 = vmatprep.subr.bf16.mxu0 %v19519_v41 }
 0x945   : > { %4398 = vmatprep.mubr.bf16.mxu1 %v22906_v49 }
 0x946   : > { %15427 = vmatmul.mubr.msk.bf16.gmra.mxu0 %vm3481_vm0, %v19377_v2 }
 0x947   : > { %15451 = vmatpush3.bf16.msra.mxu0 %v19519_v41 }
 0x948   : > { %15452 = vmatprep.subr.bf16.mxu0 %v19532_v27 }
 0x94a   : > { %14078 = vmatmul.mubr.msk.bf16.gmra.mxu1 %vm3481_vm0, %v19377_v2  ;;  %v19556_v2 = vpack.c.bf16 %v2761_v1, %v22915_v13 }
 0x94b   : > { %15437 = vmatpush3.bf16.xpose.msra.mxu1 %v4487_v5  ;;  %15453 = vmatpush3.bf16.msra.mxu0 %v19532_v27 }
 0x94c   : > { %15438 = vmatprep.mubr.msk.bf16.mxu1 %vm3481_vm0, %v19539_v32 }
 0x952   : > { %15439 = vmatmul.mubr.msk.bf16.vlgmr.msra.gmra.mxu1 %vm3481_vm0, %v19553_v63 }
 0x953   : > { %15442 = vmatprep.mubr.msk.bf16.mxu1 %vm3481_vm0, %v19556_v2 }
 0x95a   : > { %15443 = vmatmul.mubr.msk.bf16.gmra.mxu1 %vm3481_vm0, %v19565_v6 }
 0x9de   : > { %v4156_v21 = vpop.f32.mrf.mxu0 }
 0x9df   : > { %v15408_v14 = vpop.f32.mrf.mxu1 }
 0x9e0   : > { %v4158_v11 = vpop.f32.mrf.mxu0 }
 0x9e1   : > { %v4229_v37 = vpop.f32.mrf.mxu1 }
 0x9e2   : > { %v4160_v0 = vpop.f32.mrf.mxu0 }
 0x9e3   : > { %v15409_v22 = vpop.f32.mrf.mxu1 }
 0x9e4   : > { %v19569_v40 = vpop.f32.mrf.mxu0 }
 0x9e5   : > { %22919 = vst [vmem:[#allocation81_spill] sm:$0xff] %v19569_v40  ;;  %v19571_v46 = vpop.f32.mrf.mxu1 }
 0x9e6   : > { %v4166_v28 = vpop.f32.mrf.mxu0  ;;  %22920 = vst [vmem:[#allocation55_spill] sm:$0xff] %v19571_v46 }
 0x9e8   : > { %v4168_v25 = vpop.f32.mrf.mxu0 }
 0x9ea   : > { %v4170_v34 = vpop.f32.mrf.mxu0  ;;  %v15412_v35 = vpop.f32.mrf.mxu1 }
 0x9ec   : > { %v19573_v45 = vpop.f32.mrf.mxu0  ;;  %v4245_v47 = vpop.f32.mrf.mxu1 }
 0x9ed   : > { %22921 = vst [vmem:[#allocation58_spill] sm:$0xff] %v19573_v45 }
 0x9ee   : > { %v4176_v8 = vpop.f32.mrf.mxu0  ;;  %v15413_v51 = vpop.f32.mrf.mxu1 }
 0x9f0   : > { %v4178_v50 = vpop.f32.mrf.mxu0  ;;  %v19575_v54 = vpop.f32.mrf.mxu1 }
 0x9f1   : > { %22922 = vst [vmem:[#allocation57_spill] sm:$0xff] %v19575_v54 }
 0x9f2   : > { %v4180_v38 = vpop.f32.mrf.mxu0  ;;  %v4370_v56 = vpop.f32.mrf.mxu1 }
 0x9f3   : > { %v19577_v52 = vadd.f32 %v4370_v56, %v4156_v21 }
 0x9f4   : > { %v19579_v36 = vpop.f32.mrf.mxu0  ;;  %v4372_v19 = vpop.f32.mrf.mxu1 }
 0x9f5   : > { %22923 = vst [vmem:[#allocation61_spill] sm:$0xff] %v19579_v36  ;;  %v19581_v15 = vadd.f32 %v4372_v19, %v4158_v11 }
 0x9f6   : > { %v4186_v58 = vpop.f32.mrf.mxu0  ;;  %v4374_v30 = vpop.f32.mrf.mxu1 }
 0x9f7   : > { %v19583_v42 = vadd.f32 %v4374_v30, %v4160_v0 }
 0x9f8   : > { %v4188_v53 = vpop.f32.mrf.mxu0  ;;  %v19585_v18 = vpop.f32.mrf.mxu1 }
 0x9f9   : > { %22924 = vst [vmem:[#allocation60_spill] sm:$0xff] %v19585_v18 }
 0x9fa   : > { %v4190_v29 = vpop.f32.mrf.mxu0  ;;  %v4380_v55 = vpop.f32.mrf.mxu1 }
 0x9fb   : > { %v19587_v26 = vadd.f32 %v4380_v55, %v4166_v28 }
 0x9fc   : > { %v19589_v31 = vpop.f32.mrf.mxu0  ;;  %v4382_v60 = vpop.f32.mrf.mxu1 }
 0x9fd   : > { %22925 = vst [vmem:[#allocation56_spill] sm:$0xff] %v19589_v31  ;;  %v19591_v16 = vadd.f32 %v4382_v60, %v4168_v25 }
 0x9fe   : > { %v4384_v57 = vpop.f32.mrf.mxu1  ;;  %v15424_v5 = vpop.f32.mrf.mxu0 }
 0x9ff   : > { %v19593_v9 = vadd.f32 %v4384_v57, %v4170_v34  ;;  %v19595_v20 = vadd.f32 %v15424_v5, %v15408_v14 }
 0xa00   : > { %v19597_v59 = vpop.f32.mrf.mxu1  ;;  %v4443_v39 = vpop.f32.mrf.mxu0 }
 0xa01   : > { %22926 = vst [vmem:[#allocation59_spill] sm:$0xff] %v19597_v59  ;;  %v19599_v12 = vadd.f32 %v4443_v39, %v4229_v37  ;;  %v19643_v39 = vld [vmem:[%s22905_s30 + $0x8] sm:$0xff] }
 0xa02   : > { %v4390_v1 = vpop.f32.mrf.mxu1  ;;  %v15425_v43 = vpop.f32.mrf.mxu0 }
 0xa03   : > { %v19601_v13 = vadd.f32 %v4390_v1, %v4176_v8  ;;  %v19603_v7 = vadd.f32 %v15425_v43, %v15409_v22 }
 0xa04   : > { %v4392_v62 = vpop.f32.mrf.mxu1  ;;  %v19605_v4 = vpop.f32.mrf.mxu0 }
 0xa05   : > { %22927 = vst [vmem:[#allocation63_spill] sm:$0xff] %v19605_v4  ;;  %v19607_v48 = vadd.f32 %v4392_v62, %v4178_v50  ;;  %v19649_v62 = vld [vmem:[%s22905_s30 + $0x18] sm:$0xff] }
 0xa06   : > { %v4394_v21 = vpop.f32.mrf.mxu1  ;;  %v15428_v11 = vpop.f32.mrf.mxu0 }
 0xa07   : > { %v19609_v14 = vadd.f32 %v4394_v21, %v4180_v38  ;;  %v19611_v0 = vadd.f32 %v15428_v11, %v15412_v35 }
 0xa08   : > { %v19613_v28 = vpop.f32.mrf.mxu1  ;;  %v4459_v37 = vpop.f32.mrf.mxu0 }
 0xa09   : > { %22928 = vst [vmem:[#allocation64_spill] sm:$0xff] %v19613_v28  ;;  %v19615_v25 = vadd.f32 %v4459_v37, %v4245_v47  ;;  %v19630_v47 = vld [vmem:[%s22905_s30] sm:$0xff] }
 0xa0a   : > { %v4400_v34 = vpop.f32.mrf.mxu1  ;;  %v15429_v8 = vpop.f32.mrf.mxu0 }
 0xa0b   : > { %v19617_v22 = vadd.f32 %v4400_v34, %v4186_v58  ;;  %v19619_v56 = vadd.f32 %v15429_v8, %v15413_v51  ;;  %v19636_v51 = vld [vmem:[%s22905_s30 + $0x10] sm:$0xff] }
 0xa0c   : > { %v4402_v19 = vpop.f32.mrf.mxu1 }
 0xa0d   : > { %v19621_v50 = vadd.f32 %v4402_v19, %v4188_v53  ;;  %v19657_v19 = vld [vmem:[%s22905_s30 + $0x20] sm:$0xff] }
 0xa0e   : > { %v4404_v30 = vpop.f32.mrf.mxu1 }
 0xa0f   : > { %v19623_v55 = vadd.f32 %v4404_v30, %v4190_v29 }
 0xa10   : > { %v19625_v38 = vpop.f32.mrf.mxu1 }
 0xa11   : > { %22929 = vst [vmem:[#allocation62_spill] sm:$0xff] %v19625_v38 }
 0xa12   : > { %v15440_v35 = vpop.f32.mrf.mxu1 }
 0xa13   : > { %v4541_v53 = vadd.f32 %v19636_v51, %v15440_v35 }
 0xa14   : > { %v4532_v60 = vpop.f32.mrf.mxu1 }
 0xa15   : > { %v4533_v58 = vadd.f32 %v19630_v47, %v4532_v60  ;;  %v4569_v37 = vsel %vm3481_vm0, %v4541_v53, -inf }
 0xa16   : > { %v15441_v57 = vpop.f32.mrf.mxu1 }
 0xa17   : > { %v4563_v29 = vsel %vm3481_vm0, %v4533_v58, -inf  ;;  %v4544_v21 = vadd.f32 %v19649_v62, %v15441_v57  ;;  %v19664_v57 = vld [vmem:[%s22905_s30 + $0x28] sm:$0xff] }
 0xa18   : > { %v4535_v5 = vpop.f32.mrf.mxu1  ;;  %4564 = vmax.xlane.f32.xlu0 %v4563_v29 }
 0xa19   : > { %v4536_v1 = vadd.f32 %v19643_v39, %v4535_v5  ;;  %v4572_v35 = vsel %vm3481_vm0, %v4544_v21, -inf  ;;  %v19670_v5 = vld [vmem:[%s22905_s30 + $0x30] sm:$0xff] }
 0xa1a   : > { %v15444_v43 = vpop.f32.mrf.mxu1 }
 0xa1b   : > { %v4566_v11 = vsel %vm3481_vm0, %v4536_v1, -inf }
 0xa1c   : > { %4567 = vmax.xlane.f32.xlu1 %v4566_v11  ;;  %4570 = vmax.xlane.f32.xlu0 %v4569_v37  ;;  %v4548_v34 = vpop.f32.mrf.mxu1  ;;  %v4557_v11 = vadd.f32 %v19670_v5, %v15444_v43  ;;  %v19676_v37 = vld [vmem:[%s22905_s30 + $0x38] sm:$0xff] }
 0xa1d   : > { %v4549_v30 = vadd.f32 %v19657_v19, %v4548_v34 }
 0xa1e   : > { %v15445_v8 = vpop.f32.mrf.mxu1  ;;  %v4581_v31 = vsel %vm3481_vm0, %v4557_v11, -inf }
 0xa1f   : > { %v4560_v34 = vadd.f32 %v19676_v37, %v15445_v8  ;;  %v4575_v38 = vsel %vm3481_vm0, %v4549_v30, -inf }
 0xa20   : > { %4573 = vmax.xlane.f32.xlu0 %v4572_v35  ;;  %v4551_v60 = vpop.f32.mrf.mxu1 }
 0xa21   : > { %v4552_v29 = vadd.f32 %v19664_v57, %v4551_v60  ;;  %v4584_v60 = vsel %vm3481_vm0, %v4560_v34, -inf }
 0xa23   : > { %v4578_v35 = vsel %vm3481_vm0, %v4552_v29, -inf }
 0xa24   : > { %4579 = vmax.xlane.f32.xlu1 %v4578_v35  ;;  %4576 = vmax.xlane.f32.xlu0 %v4575_v38 }
 0xa28   : > { %4585 = vmax.xlane.f32.xlu1 %v4584_v60  ;;  %4582 = vmax.xlane.f32.xlu0 %v4581_v31 }
 0xaa1   : > { %v4565_v43 = vpop.xlane.xlu0 %4564 }
 0xaa2   : > { %v4587_v54 = vsub.f32 %v4533_v58, %v4565_v43 }
 0xaa4   : > { %v4595_v28 = vmul.f32 1.442695, %v4587_v54 }
 0xaa5   : > { %v4568_v36 = vpop.xlane.xlu1 %4567  ;;  %v4571_v59 = vpop.xlane.xlu0 %4570 }
 0xaa6   : > { %17180 = vpow2.f32 %v4595_v28  ;;  %v4588_v45 = vsub.f32 %v4536_v1, %v4568_v36  ;;  %v4589_v8 = vsub.f32 %v4541_v53, %v4571_v59 }
 0xaa8   : > { %v4597_v4 = vmul.f32 1.442695, %v4588_v45  ;;  %v4599_v46 = vmul.f32 1.442695, %v4589_v8 }
 0xaa9   : > { %v4574_v18 = vpop.xlane.xlu0 %4573 }
 0xaaa   : > { %17182 = vpow2.f32 %v4597_v4  ;;  %v4590_v35 = vsub.f32 %v4544_v21, %v4574_v18 }
 0xaab   : > { %17184 = vpow2.f32 %v4599_v46 }
 0xaac   : > { %v4601_v38 = vmul.f32 1.442695, %v4590_v35 }
 0xaad   : > { %v4580_v40 = vpop.xlane.xlu1 %4579  ;;  %v4577_v61 = vpop.xlane.xlu0 %4576 }
 0xaae   : > { %17186 = vpow2.f32 %v4601_v38  ;;  %v4592_v60 = vsub.f32 %v4552_v29, %v4580_v40  ;;  %v4591_v31 = vsub.f32 %v4549_v30, %v4577_v61 }
 0xab0   : > { %v4605_v33 = vmul.f32 1.442695, %v4592_v60  ;;  %v4603_v58 = vmul.f32 1.442695, %v4591_v31  ;;  %v16222_v60 = vld [vmem:[%s18448_s18 + $0x10c] ss:$12 sps:$4 sm:$0xff]  }
 0xab1   : > { %v4586_v54 = vpop.xlane.xlu1 %4585  ;;  %v4583_v43 = vpop.xlane.xlu0 %4582  ;;  %4820 = vmatprep.subr.bf16.mxu0 %v16222_v60 }
 0xab2   : > { %17188 = vpow2.f32 %v4605_v33  ;;  %v4594_v28 = vsub.f32 %v4560_v34, %v4586_v54  ;;  %v4593_v36 = vsub.f32 %v4557_v11, %v4583_v43 }
 0xab3   : > { %v19683_v59 = vpop.eup %17180  ;;  %17190 = vpow2.f32 %v4603_v58 }
 0xab4   : > { %v4609_v45 = vmul.f32 1.442695, %v4594_v28  ;;  %v4607_v4 = vmul.f32 1.442695, %v4593_v36  ;;  %v4611_v46 = vsel %vm3481_vm0, %v19683_v59, 0.0 }
 0xab5   : > { %4612 = vadd.xlane.f32.xlu0 %v4611_v46 }
 0xab6   : > { %17192 = vpow2.f32 %v4609_v45 }
 0xab7   : > { %v17183_v18 = vpop.eup %17182  ;;  %17194 = vpow2.f32 %v4607_v4 }
 0xab8   : > { %v17185_v61 = vpop.eup %17184  ;;  %v4614_v40 = vsel %vm3481_vm0, %v17183_v18, 0.0 }
 0xab9   : > { %4615 = vadd.xlane.f32.xlu1 %v4614_v40  ;;  %v4617_v33 = vsel %vm3481_vm0, %v17185_v61, 0.0 }
 0xaba   : > { %4618 = vadd.xlane.f32.xlu0 %v4617_v33 }
 0xabb   : > { %v17187_v53 = vpop.eup %17186 }
 0xabc   : > { %v4620_v1 = vsel %vm3481_vm0, %v17187_v53, 0.0 }
 0xabd   : > { %4621 = vadd.xlane.f32.xlu1 %v4620_v1  ;;  %v16220_v1 = vld [vmem:[%s18448_s18 + $0x108] ss:$12 sps:$4 sm:$0xff]  }
 0xabf   : > { %v17189_v21 = vpop.eup %17188 }
 0xac0   : > { %v17191_v30 = vpop.eup %17190  ;;  %v4626_v29 = vsel %vm3481_vm0, %v17189_v21, 0.0 }
 0xac1   : > { %4627 = vadd.xlane.f32.xlu1 %v4626_v29  ;;  %v4623_v11 = vsel %vm3481_vm0, %v17191_v30, 0.0 }
 0xac2   : > { %4624 = vadd.xlane.f32.xlu0 %v4623_v11  ;;  %v16225_v11 = vld [vmem:[%s18448_s18 + $0xf4] ss:$12 sps:$4 sm:$0xff]  }
 0xac3   : > { %v19692_v34 = vpop.eup %17192 }
 0xac4   : > { %v19694_v8 = vpop.eup %17194  ;;  %v4632_v35 = vsel %vm3481_vm0, %v19692_v34, 0.0 }
 0xac5   : > { %4633 = vadd.xlane.f32.xlu1 %v4632_v35  ;;  %v4629_v38 = vsel %vm3481_vm0, %v19694_v8, 0.0 }
 0xac6   : > { %4630 = vadd.xlane.f32.xlu0 %v4629_v38 }
 0xad6   : > { %4994 = vrot.lane.b32.xlu1 %v19190_v44, %s18049_s15  ;;  %v16232_v44 = vld [vmem:[%s18448_s18 + $0x110] ss:$12 sps:$4 sm:$0xff]  }
 0xad7   : > { %15462 = vmatprep.subr.bf16.mxu1 %v16232_v44 }
 0xad8   : > { %15463 = vmatpush3.bf16.msra.mxu1 %v16232_v44  ;;  %v16228_v44 = vld [vmem:[%s18448_s18 + $0xdc] ss:$12 sps:$4 sm:$0xff]  }
 0xada   : > { %4992 = vrot.lane.b32.xlu1 %v19174_v3, %s18049_s15  ;;  %v16233_v3 = vld [vmem:[%s18448_s18 + $0xf8] ss:$12 sps:$4 sm:$0xff]  }
 0xadb   : > { %15464 = vmatprep.subr.bf16.mxu1 %v16233_v3 }
 0xadc   : > { %4996 = vrot.lane.b32.xlu0 %v19198_v17, %s18049_s15  ;;  %15465 = vmatpush3.bf16.msra.mxu1 %v16233_v3 }
 0xade   : > { %4990 = vrot.lane.b32.xlu1 %v19157_v23, %s18049_s15 }
 0xae0   : > { %4978 = vrot.lane.b32.xlu0 %v19539_v32, %s18049_s15 }
 0xae2   : > { %4980 = vrot.lane.b32.xlu1 %v19553_v63, %s18049_s15 }
 0xae4   : > { %4982 = vrot.lane.b32.xlu0 %v19556_v2, %s18049_s15 }
 0xae6   : > { %4984 = vrot.lane.b32.xlu1 %v19565_v6, %s18049_s15 }
 0xb3e   : > { %v4613_v17 = vpop.xlane.xlu0 %4612 }
 0xb3f   : > { %17196 = vrcp.f32 %v4613_v17 }
 0xb42   : > { %v4616_v23 = vpop.xlane.xlu1 %4615 }
 0xb43   : > { %17198 = vrcp.f32 %v4616_v23  ;;  %v4619_v32 = vpop.xlane.xlu0 %4618 }
 0xb44   : > { %17200 = vrcp.f32 %v4619_v32 }
 0xb46   : > { %v4622_v31 = vpop.xlane.xlu1 %4621 }
 0xb47   : > { %17202 = vrcp.f32 %v4622_v31  ;;  %v16231_v31 = vld [vmem:[%s18448_s18 + $0xc4] ss:$12 sps:$4 sm:$0xff]  }
 0xb4a   : > { %v4628_v63 = vpop.xlane.xlu1 %4627 }
 0xb4b   : > { %17204 = vrcp.f32 %v4628_v63  ;;  %v4625_v2 = vpop.xlane.xlu0 %4624 }
 0xb4c   : > { %17206 = vrcp.f32 %v4625_v2  ;;  %v17197_v6 = vpop.eup %17196  ;;  %v19737_v2 = vpop.f32.mrf.mxu0 }
 0xb4d   : > { %v4643_v28 = vmul.f32 %v17197_v6, %v19683_v59  ;;  %v16223_v59 = vld [vmem:[%s18448_s18 + $0xf0] ss:$12 sps:$4 sm:$0xff]   ;;  %22930 = vst [vmem:[#allocation86_spill] sm:$0xff] %v19737_v2 }
 0xb4e   : > { %v4634_v58 = vpop.xlane.xlu1 %4633 }
 0xb4f   : > { %17208 = vrcp.f32 %v4634_v58  ;;  %v4631_v54 = vpop.xlane.xlu0 %4630 }
 0xb50   : > { %v17199_v43 = vpop.eup %17198  ;;  %17210 = vrcp.f32 %v4631_v54 }
 0xb51   : > { %v4644_v36 = vmul.f32 %v17199_v43, %v17183_v18  ;;  %v17201_v45 = vpop.eup %17200 }
 0xb52   : > { %v4645_v40 = vmul.f32 %v17201_v45, %v17185_v61 }
 0xb53   : > { %v4651_v4 = vpack.c.bf16 %v4644_v36, %v4643_v28  ;;  %v4997_v63 = vpop.permute.xlu0 %4996 }
 0xb54   : > { %v17203_v46 = vpop.eup %17202  ;;  %v5020_v45 = vsel %vm3481_vm0, %v4997_v63, 0 }
 0xb55   : > { %v4646_v33 = vmul.f32 %v17203_v46, %v17187_v53  ;;  %15454 = vmatprep.mubr.msk.bf16.mxu0 %vm3481_vm0, %v4651_v4  ;;  %v4995_v46 = vpop.permute.xlu1 %4994 }
 0xb57   : > { %v4652_v29 = vpack.c.bf16 %v4646_v33, %v4645_v40 }
 0xb58   : > { %v17205_v35 = vpop.eup %17204 }
 0xb59   : > { %v17207_v38 = vpop.eup %17206  ;;  %15455 = vmatmul.mubr.msk.bf16.vlgmr.msra.gmra.mxu0 %vm3481_vm0, %v4652_v29  ;;  %v4648_v60 = vmul.f32 %v17205_v35, %v17189_v21  ;;  %v16226_v21 = vld [vmem:[%s18448_s18 + $0xd8] ss:$12 sps:$4 sm:$0xff]  }
 0xb5a   : > { %4821 = vmatpush1.bf16.msra.mxu0 %v16220_v1  ;;  %v4647_v18 = vmul.f32 %v17207_v38, %v17191_v30  ;;  %v16229_v30 = vld [vmem:[%s18448_s18 + $0xc0] ss:$12 sps:$4 sm:$0xff]   ;;  %v4993_v38 = vpop.permute.xlu1 %4992 }
 0xb5b   : > { %4822 = vmatprep.subr.bf16.mxu0 %v16225_v11  ;;  %v5017_v11 = vsel %vm3481_vm0, %v4995_v46, 0 }
 0xb5c   : > { %v17209_v61 = vpop.eup %17208  ;;  %v4653_v53 = vpack.c.bf16 %v4648_v60, %v4647_v18  ;;  %v5014_v60 = vsel %vm3481_vm0, %v4993_v38, 0  ;;  %v16236_v18 = vld [vmem:[%s18448_s18 + $0x170] ss:$12 sps:$4 sm:$0xff]  }
 0xb5d   : > { %v17211_v3 = vpop.eup %17210  ;;  %v4650_v17 = vmul.f32 %v17209_v61, %v19692_v34  ;;  %v16234_v34 = vld [vmem:[%s18448_s18 + $0xe0] ss:$12 sps:$4 sm:$0xff]  }
 0xb5e   : > { %15458 = vmatprep.mubr.msk.bf16.mxu0 %vm3481_vm0, %v4653_v53  ;;  %4823 = vmatpush1.bf16.msra.mxu0 %v16223_v59  ;;  %v4649_v23 = vmul.f32 %v17211_v3, %v19694_v8  ;;  %v16235_v8 = vld [vmem:[%s18448_s18 + $0xc8] ss:$12 sps:$4 sm:$0xff]   ;;  %v4991_v59 = vpop.permute.xlu1 %4990  ;;  %v16237_v53 = vld [vmem:[%s18448_s18 + $0x158] ss:$12 sps:$4 sm:$0xff]  }
 0xb5f   : > { %4824 = vmatprep.subr.bf16.mxu0 %v16228_v44  ;;  %15466 = vmatprep.subr.bf16.mxu1 %v16234_v34  ;;  %v4979_v44 = vpop.permute.xlu0 %4978  ;;  %v5011_v61 = vsel %vm3481_vm0, %v4991_v59, 0 }
 0xb60   : > { %v4654_v32 = vpack.c.bf16 %v4650_v17, %v4649_v23  ;;  %15467 = vmatpush3.bf16.msra.mxu1 %v16234_v34  ;;  %v16238_v23 = vld [vmem:[%s18448_s18 + $0x140] ss:$12 sps:$4 sm:$0xff]  }
 0xb61   : > { %15468 = vmatprep.subr.bf16.mxu1 %v16235_v8 }
 0xb62   : > { %15459 = vmatmul.mubr.msk.bf16.gmra.mxu0 %vm3481_vm0, %v4654_v32  ;;  %v4981_v3 = vpop.permute.xlu1 %4980 }
 0xb63   : > { %4825 = vmatpush1.bf16.msra.mxu0 %v16226_v21  ;;  %4844 = vmatprep.mubr.bf16.mxu0 %v22906_v49  ;;  %v4983_v17 = vpop.permute.xlu0 %4982  ;;  %v16239_v21 = vld [vmem:[%s18448_s18 + $0x128] ss:$12 sps:$4 sm:$0xff]  }
 0xb64   : > { %4826 = vmatprep.subr.bf16.mxu0 %v16231_v31  ;;  %15469 = vmatpush3.bf16.msra.mxu1 %v16235_v8 }
 0xb66   : > { %v4985_v32 = vpop.permute.xlu1 %4984 }
 0xb67   : > { %4827 = vmatpush1.bf16.msra.mxu0 %v16229_v30 }
 0xb68   : > { %15650 = vmatprep.subr.msk.bf16.mxu0 %vm3481_vm0, %v4997_v63 }
 0xc19   : > { %v15456_v6 = vpop.f32.mrf.mxu0 }
 0xc1b   : > { %v4701_v58 = vpop.f32.mrf.mxu0 }
 0xc1d   : > { %v15457_v54 = vpop.f32.mrf.mxu0 }
 0xc1e   : > { %v4733_v36 = vpack.c.bf16 %v15457_v54, %v15456_v6 }
 0xc1f   : > { %v4704_v43 = vpop.f32.mrf.mxu0 }
 0xc20   : > { %v4732_v28 = vpack.c.bf16 %v4704_v43, %v4701_v58 }
 0xc22   : > { %v15460_v4 = vpop.f32.mrf.mxu0  ;;  %14103 = vmatmul.mubr.msk.bf16.vlgmr.msra.gmra.mxu0 %vm3481_vm0, %v4732_v28  ;;  %15470 = vmatprep.mubr.msk.bf16.mxu1 %vm3481_vm0, %v4732_v28 }
 0xc23   : > { %15479 = vmatpush3.bf16.xpose.msra.mxu0 %v5020_v45  ;;  %15471 = vmatmul.mubr.msk.bf16.vlgmr.msra.gmra.mxu1 %vm3481_vm0, %v4733_v36 }
 0xc24   : > { %v4717_v40 = vpop.f32.mrf.mxu0  ;;  %15651 = vmatprep.subr.msk.bf16.mxu0 %vm3481_vm0, %v4995_v46  ;;  %4854 = vmatprep.mubr.bf16.mxu0 %v22906_v49 }
 0xc26   : > { %v15461_v33 = vpop.f32.mrf.mxu0 }
 0xc27   : > { %v4735_v35 = vpack.c.bf16 %v15461_v33, %v15460_v4 }
 0xc28   : > { %v4720_v1 = vpop.f32.mrf.mxu0 }
 0xc29   : > { %v4734_v29 = vpack.c.bf16 %v4720_v1, %v4717_v40 }
 0xc2a   : > { %14104 = vmatmul.mubr.msk.bf16.gmra.mxu0 %vm3481_vm0, %v4733_v36 }
 0xc2b   : > { %15474 = vmatprep.mubr.msk.bf16.mxu1 %vm3481_vm0, %v4734_v29  ;;  %15481 = vmatpush3.bf16.xpose.msra.mxu0 %v5017_v11 }
 0xc2c   : > { %15475 = vmatmul.mubr.msk.bf16.gmra.mxu1 %vm3481_vm0, %v4735_v35  ;;  %15652 = vmatprep.subr.msk.bf16.mxu0 %vm3481_vm0, %v4993_v38 }
 0xc2d   : > { %4864 = vmatprep.mubr.bf16.mxu0 %v22906_v49 }
 0xc32   : > { %14105 = vmatmul.mubr.msk.bf16.gmra.mxu0 %vm3481_vm0, %v4734_v29 }
 0xc33   : > { %15483 = vmatpush3.bf16.xpose.msra.mxu0 %v5014_v60  ;;  %4874 = vmatprep.mubr.bf16.mxu0 %v22906_v49 }
 0xc34   : > { %15653 = vmatprep.subr.msk.bf16.mxu0 %vm3481_vm0, %v4991_v59 }
 0xc3a   : > { %14106 = vmatmul.mubr.msk.bf16.gmra.mxu0 %vm3481_vm0, %v4735_v35 }
 0xc3b   : > { %15485 = vmatpush3.bf16.xpose.msra.mxu0 %v5011_v61  ;;  %15486 = vmatprep.mubr.msk.bf16.mxu0 %vm3481_vm0, %v4979_v44 }
 0xc3c   : > { %15510 = vmatprep.subr.bf16.mxu0 %v16236_v18 }
 0xc42   : > { %15487 = vmatmul.mubr.msk.bf16.vlgmr.msra.gmra.mxu0 %vm3481_vm0, %v4981_v3 }
 0xc43   : > { %15511 = vmatpush3.bf16.msra.mxu0 %v16236_v18  ;;  %15490 = vmatprep.mubr.msk.bf16.mxu0 %vm3481_vm0, %v4983_v17 }
 0xc44   : > { %15512 = vmatprep.subr.bf16.mxu0 %v16237_v53 }
 0xc47   : > { %15513 = vmatpush3.bf16.msra.mxu0 %v16237_v53 }
 0xc48   : > { %15514 = vmatprep.subr.bf16.mxu0 %v16238_v23 }
 0xc4a   : > { %15491 = vmatmul.mubr.msk.bf16.gmra.mxu0 %vm3481_vm0, %v4985_v32 }
 0xc4b   : > { %15515 = vmatpush3.bf16.msra.mxu0 %v16238_v23 }
 0xc4c   : > { %15516 = vmatprep.subr.bf16.mxu0 %v16239_v21 }
 0xc4f   : > { %15517 = vmatpush3.bf16.msra.mxu0 %v16239_v21 }
 0xc50   : > { %15542 = vmatprep.subr.bf16.mxu0 %v19261_v24 }
 0xce2   : > { %v4846_v31 = vpop.f32.mrf.mxu0 }
 0xce3   : > { %v19767_v30 = vadd.f32 %v4846_v31, %v19577_v52  ;;  %v15472_v63 = vpop.f32.mrf.mxu1 }
 0xce4   : > { %v19770_v34 = vadd.f32 %v15472_v63, %v19595_v20  ;;  %v4848_v8 = vpop.f32.mrf.mxu0 }
 0xce5   : > { %v19773_v6 = vadd.f32 %v4848_v8, %v19581_v15  ;;  %v4919_v58 = vpop.f32.mrf.mxu1 }
 0xce6   : > { %v19776_v54 = vadd.f32 %v4919_v58, %v19599_v12  ;;  %v4850_v43 = vpop.f32.mrf.mxu0 }
 0xce7   : > { %v19779_v28 = vadd.f32 %v4850_v43, %v19583_v42  ;;  %v15473_v36 = vpop.f32.mrf.mxu1 }
 0xce8   : > { %v19782_v52 = vadd.f32 %v15473_v36, %v19603_v7  ;;  %v19784_v45 = vpop.f32.mrf.mxu0 }
 0xce9   : > { %22931 = vst [vmem:[#allocation87_spill] sm:$0xff] %v19784_v45  ;;  %v19786_v20 = vpop.f32.mrf.mxu1 }
 0xcea   : > { %22932 = vst [vmem:[#allocation88_spill] sm:$0xff] %v19786_v20  ;;  %v4856_v4 = vpop.f32.mrf.mxu0 }
 0xceb   : > { %v19789_v15 = vadd.f32 %v4856_v4, %v19587_v26 }
 0xcec   : > { %v15476_v46 = vpop.f32.mrf.mxu1  ;;  %v4858_v40 = vpop.f32.mrf.mxu0 }
 0xced   : > { %v19792_v12 = vadd.f32 %v15476_v46, %v19611_v0  ;;  %v19795_v42 = vadd.f32 %v4858_v40, %v19591_v16 }
 0xcee   : > { %v4935_v33 = vpop.f32.mrf.mxu1  ;;  %v4860_v1 = vpop.f32.mrf.mxu0 }
 0xcef   : > { %v19798_v7 = vadd.f32 %v4935_v33, %v19615_v25  ;;  %v19801_v29 = vadd.f32 %v4860_v1, %v19593_v9 }
 0xcf0   : > { %v15477_v11 = vpop.f32.mrf.mxu1  ;;  %v19803_v35 = vpop.f32.mrf.mxu0 }
 0xcf1   : > { %22933 = vst [vmem:[#allocation89_spill] sm:$0xff] %v19803_v35  ;;  %v19806_v26 = vadd.f32 %v15477_v11, %v19619_v56 }
 0xcf2   : > { %v4866_v38 = vpop.f32.mrf.mxu0 }
 0xcf3   : > { %v19809_v0 = vadd.f32 %v4866_v38, %v19601_v13 }
 0xcf4   : > { %v4868_v16 = vpop.f32.mrf.mxu0 }
 0xcf5   : > { %v19812_v60 = vadd.f32 %v4868_v16, %v19607_v48 }
 0xcf6   : > { %v4870_v59 = vpop.f32.mrf.mxu0 }
 0xcf7   : > { %v19815_v25 = vadd.f32 %v4870_v59, %v19609_v14 }
 0xcf8   : > { %v19817_v9 = vpop.f32.mrf.mxu0 }
 0xcf9   : > { %22934 = vst [vmem:[#allocation90_spill] sm:$0xff] %v19817_v9 }
 0xcfa   : > { %v4876_v18 = vpop.f32.mrf.mxu0 }
 0xcfb   : > { %v19820_v44 = vadd.f32 %v4876_v18, %v19617_v22 }
 0xcfc   : > { %v4878_v56 = vpop.f32.mrf.mxu0 }
 0xcfd   : > { %v19823_v61 = vadd.f32 %v4878_v56, %v19621_v50 }
 0xcfe   : > { %v4880_v13 = vpop.f32.mrf.mxu0 }
 0xcff   : > { %v19826_v53 = vadd.f32 %v4880_v13, %v19623_v55 }
 0xd00   : > { %v19828_v48 = vpop.f32.mrf.mxu0 }
 0xd01   : > { %22935 = vst [vmem:[#allocation91_spill] sm:$0xff] %v19828_v48 }
 0xd02   : > { %v15488_v3 = vpop.f32.mrf.mxu0 }
 0xd03   : > { %v5065_v21 = vadd.f32 %v19636_v51, %v15488_v3 }
 0xd04   : > { %v5056_v17 = vpop.f32.mrf.mxu0 }
 0xd05   : > { %v5057_v14 = vadd.f32 %v19630_v47, %v5056_v17  ;;  %v5093_v8 = vsel %vm3481_vm0, %v5065_v21, -inf }
 0xd06   : > { %v15489_v23 = vpop.f32.mrf.mxu0 }
 0xd07   : > { %v5087_v22 = vsel %vm3481_vm0, %v5057_v14, -inf  ;;  %v5068_v63 = vadd.f32 %v19649_v62, %v15489_v23 }
 0xd08   : > { %v5059_v32 = vpop.f32.mrf.mxu0  ;;  %5088 = vmax.xlane.f32.xlu0 %v5087_v22 }
 0xd09   : > { %v5060_v50 = vadd.f32 %v19643_v39, %v5059_v32  ;;  %v5096_v51 = vsel %vm3481_vm0, %v5068_v63, -inf }
 0xd0a   : > { %v15492_v31 = vpop.f32.mrf.mxu0 }
 0xd0b   : > { %v5090_v55 = vsel %vm3481_vm0, %v5060_v50, -inf  ;;  %v5081_v39 = vadd.f32 %v19670_v5, %v15492_v31 }
 0xd0c   : > { %5091 = vmax.xlane.f32.xlu1 %v5090_v55  ;;  %5094 = vmax.xlane.f32.xlu0 %v5093_v8  ;;  %v5072_v58 = vpop.f32.mrf.mxu0 }
 0xd0d   : > { %v5073_v43 = vadd.f32 %v19657_v19, %v5072_v58  ;;  %v5105_v19 = vsel %vm3481_vm0, %v5081_v39, -inf }
 0xd0e   : > { %v15493_v47 = vpop.f32.mrf.mxu0 }
 0xd0f   : > { %v5084_v62 = vadd.f32 %v19676_v37, %v15493_v47  ;;  %v5099_v40 = vsel %vm3481_vm0, %v5073_v43, -inf }
 0xd10   : > { %5097 = vmax.xlane.f32.xlu0 %v5096_v51  ;;  %v5075_v36 = vpop.f32.mrf.mxu0 }
 0xd11   : > { %v5076_v4 = vadd.f32 %v19664_v57, %v5075_v36  ;;  %v5108_v33 = vsel %vm3481_vm0, %v5084_v62, -inf }
 0xd13   : > { %v5102_v46 = vsel %vm3481_vm0, %v5076_v4, -inf }
 0xd14   : > { %5103 = vmax.xlane.f32.xlu1 %v5102_v46  ;;  %5100 = vmax.xlane.f32.xlu0 %v5099_v40 }
 0xd18   : > { %5109 = vmax.xlane.f32.xlu1 %v5108_v33  ;;  %5106 = vmax.xlane.f32.xlu0 %v5105_v19 }
 0xd2e   : > { %5189 = vrot.lane.b32.xlu0 %v19476_v10, %s18049_s15 }
 0xd91   : > { %v5089_v57 = vpop.xlane.xlu0 %5088 }
 0xd92   : > { %v5111_v1 = vsub.f32 %v5057_v14, %v5089_v57 }
 0xd94   : > { %v5119_v59 = vmul.f32 1.442695, %v5111_v1 }
 0xd95   : > { %v5092_v5 = vpop.xlane.xlu1 %5091  ;;  %v5095_v11 = vpop.xlane.xlu0 %5094 }
 0xd96   : > { %v5113_v37 = vsub.f32 %v5065_v21, %v5095_v11  ;;  %v5112_v38 = vsub.f32 %v5060_v50, %v5092_v5 }
 0xd98   : > { %v5123_v16 = vmul.f32 1.442695, %v5113_v37  ;;  %v5121_v13 = vmul.f32 1.442695, %v5112_v38  ;;  %v22936_v38 = vld [vmem:[#allocation85_spill] sm:$0xff] }
 0xd99   : > { %v5098_v18 = vpop.xlane.xlu0 %5097 }
 0xd9a   : > { %v5114_v56 = vsub.f32 %v5068_v63, %v5098_v18  ;;  %17212 = vpow2.f32 %v5123_v16 }
 0xd9b   : > { %17214 = vpow2.f32 %v5119_v59 }
 0xd9c   : > { %v5125_v3 = vmul.f32 1.442695, %v5114_v56 }
 0xd9d   : > { %v5104_v17 = vpop.xlane.xlu1 %5103  ;;  %v5101_v23 = vpop.xlane.xlu0 %5100 }
 0xd9e   : > { %17216 = vpow2.f32 %v5125_v3  ;;  %v5115_v22 = vsub.f32 %v5073_v43, %v5101_v23  ;;  %v5116_v8 = vsub.f32 %v5076_v4, %v5104_v17 }
 0xd9f   : > { %17218 = vpow2.f32 %v5121_v13 }
 0xda0   : > { %v5127_v55 = vmul.f32 1.442695, %v5115_v22  ;;  %v5129_v46 = vmul.f32 1.442695, %v5116_v8 }
 0xda1   : > { %v5107_v10 = vpop.xlane.xlu0 %5106  ;;  %v5110_v32 = vpop.xlane.xlu1 %5109 }
 0xda2   : > { %v5117_v14 = vsub.f32 %v5081_v39, %v5107_v10  ;;  %v5118_v21 = vsub.f32 %v5084_v62, %v5110_v32 }
 0xda4   : > { %v5131_v31 = vmul.f32 1.442695, %v5117_v14  ;;  %v5133_v58 = vmul.f32 1.442695, %v5118_v21 }
 0xda5   : > { %v5190_v50 = vpop.permute.xlu0 %5189 }
 0xda6   : > { %15494 = vmatprep.subr.bf16.mxu1 %v5190_v50  ;;  %17220 = vpow2.f32 %v5131_v31 }
 0xda7   : > { %15495 = vmatpush3.bf16.msra.mxu1 %v5190_v50  ;;  %v19848_v63 = vpop.eup %17212  ;;  %17222 = vpow2.f32 %v5127_v55 }
 0xda8   : > { %v5141_v47 = vsel %vm3481_vm0, %v19848_v63, 0.0  ;;  %v17215_v51 = vpop.eup %17214  ;;  %17224 = vpow2.f32 %v5133_v58  ;;  %v16242_v58 = vld [vmem:[%s18448_s18 + $0x16c] ss:$12 sps:$4 sm:$0xff]  }
 0xda9   : > { %5142 = vadd.xlane.f32.xlu0 %v5141_v47  ;;  %v5135_v62 = vsel %vm3481_vm0, %v17215_v51, 0.0  ;;  %17226 = vpow2.f32 %v5129_v46 }
 0xdab   : > { %v17217_v43 = vpop.eup %17216 }
 0xdac   : > { %v5144_v36 = vsel %vm3481_vm0, %v17217_v43, 0.0  ;;  %v17219_v39 = vpop.eup %17218 }
 0xdad   : > { %5145 = vadd.xlane.f32.xlu1 %v5144_v36  ;;  %5136 = vadd.xlane.f32.xlu0 %v5135_v62  ;;  %v5138_v40 = vsel %vm3481_vm0, %v17219_v39, 0.0 }
 0xdb1   : > { %5139 = vadd.xlane.f32.xlu1 %v5138_v40 }
 0xdb3   : > { %v19855_v4 = vpop.eup %17220 }
 0xdb4   : > { %v5153_v33 = vsel %vm3481_vm0, %v19855_v4, 0.0  ;;  %v17223_v19 = vpop.eup %17222 }
 0xdb5   : > { %5154 = vadd.xlane.f32.xlu1 %v5153_v33  ;;  %v5147_v57 = vsel %vm3481_vm0, %v17223_v19, 0.0  ;;  %v17225_v1 = vpop.eup %17224  ;;  %v16245_v33 = vld [vmem:[%s18448_s18 + $0x154] ss:$12 sps:$4 sm:$0xff]  }
 0xdb6   : > { %v5156_v5 = vsel %vm3481_vm0, %v17225_v1, 0.0  ;;  %v17227_v11 = vpop.eup %17226 }
 0xdb7   : > { %v5150_v37 = vsel %vm3481_vm0, %v17227_v11, 0.0 }
 0xdb9   : > { %5148 = vadd.xlane.f32.xlu1 %v5147_v57 }
 0xdbd   : > { %5157 = vadd.xlane.f32.xlu1 %v5156_v5 }
 0xdc1   : > { %5151 = vadd.xlane.f32.xlu1 %v5150_v37  ;;  %v16243_v37 = vld [vmem:[%s18448_s18 + $0x150] ss:$12 sps:$4 sm:$0xff]  }
 0xdc3   : > { %5185 = vrot.lane.b32.xlu0 %v19519_v41, %s18049_s15 }
 0xdc7   : > { %5183 = vrot.lane.b32.xlu0 %v19532_v27, %s18049_s15 }
 0xdd2   : > { %5187 = vrot.lane.b32.xlu1 %v22936_v38, %s18049_s15  ;;  %v16248_v38 = vld [vmem:[%s18448_s18 + $0x13c] ss:$12 sps:$4 sm:$0xff]  }
 0xe32   : > { %v5143_v16 = vpop.xlane.xlu0 %5142 }
 0xe36   : > { %v5146_v59 = vpop.xlane.xlu1 %5145  ;;  %v5137_v18 = vpop.xlane.xlu0 %5136 }
 0xe37   : > { %17228 = vrcp.f32 %v5137_v18  ;;  %v22937_v18 = vld [vmem:[#allocation79_spill] sm:$0xff] }
 0xe3a   : > { %v5140_v56 = vpop.xlane.xlu1 %5139  ;;  %v5186_v14 = vpop.permute.xlu0 %5185 }
 0xe3b   : > { %17230 = vrcp.f32 %v5140_v56  ;;  %v22938_v56 = vld [vmem:[#allocation80_spill] sm:$0xff] }
 0xe3c   : > { %17232 = vrcp.f32 %v5146_v59  ;;  %v16251_v59 = vld [vmem:[%s18448_s18 + $0x124] ss:$12 sps:$4 sm:$0xff]  }
 0xe3d   : > { %17234 = vrcp.f32 %v5143_v16 }
 0xe3e   : > { %v5155_v13 = vpop.xlane.xlu1 %5154  ;;  %v5184_v50 = vpop.permute.xlu0 %5183 }
 0xe42   : > { %v5149_v3 = vpop.xlane.xlu1 %5148 }
 0xe43   : > { %17236 = vrcp.f32 %v5149_v3  ;;  %v16249_v3 = vld [vmem:[%s18448_s18 + $0x120] ss:$12 sps:$4 sm:$0xff]  }
 0xe44   : > { %v17229_v17 = vpop.eup %17228 }
 0xe45   : > { %v5167_v41 = vmul.f32 %v17229_v17, %v17215_v51  ;;  %v22939_v17 = vld [vmem:[#allocation78_spill] sm:$0xff] }
 0xe46   : > { %v5158_v23 = vpop.xlane.xlu1 %5157 }
 0xe48   : > { %v17231_v22 = vpop.eup %17230 }
 0xe49   : > { %v5168_v10 = vmul.f32 %v17231_v22, %v17219_v39  ;;  %v17233_v55 = vpop.eup %17232  ;;  %v16240_v39 = vld [vmem:[%s18448_s18 + $0x168] ss:$12 sps:$4 sm:$0xff]  }
 0xe4a   : > { %v5152_v27 = vpop.xlane.xlu1 %5151  ;;  %v17235_v21 = vpop.eup %17234  ;;  %v5170_v8 = vmul.f32 %v17233_v55, %v17217_v43 }
 0xe4b   : > { %v5175_v32 = vpack.c.bf16 %v5168_v10, %v5167_v41  ;;  %17238 = vrcp.f32 %v5152_v27  ;;  %v5169_v51 = vmul.f32 %v17235_v21, %v19848_v63  ;;  %v22941_v10 = vld [vmem:[#allocation77_spill] sm:$0xff]  ;;  %v22942_v27 = vld [vmem:[#allocation76_spill] sm:$0xff] }
 0xe4c   : > { %17240 = vrcp.f32 %v5158_v23 }
 0xe4d   : > { %15502 = vmatprep.mubr.msk.bf16.mxu1 %vm3481_vm0, %v5175_v32  ;;  %17242 = vrcp.f32 %v5155_v13  ;;  %v5176_v46 = vpack.c.bf16 %v5170_v8, %v5169_v51  ;;  %v3063_v13 = vadd.f32 %v22938_v56, %v22937_v18  ;;  %v3053_v32 = vadd.f32 %v22942_v27, %v22941_v10  ;;  %v22944_v51 = vld [vmem:[#allocation84_spill] sm:$0xff] }
 0xe4e   : > { %v5188_v31 = vpop.permute.xlu1 %5187 }
 0xe4f   : > { %15496 = vmatprep.subr.bf16.mxu1 %v5188_v31 }
 0xe50   : > { %15497 = vmatpush3.bf16.msra.mxu1 %v5188_v31  ;;  %v17237_v47 = vpop.eup %17236 }
 0xe51   : > { %15498 = vmatprep.subr.bf16.mxu1 %v5186_v14  ;;  %v5171_v62 = vmul.f32 %v17237_v47, %v17223_v19  ;;  %v16246_v19 = vld [vmem:[%s18448_s18 + $0x138] ss:$12 sps:$4 sm:$0xff]  }
 0xe54   : > { %15499 = vmatpush3.bf16.msra.mxu1 %v5186_v14 }
 0xe55   : > { %15500 = vmatprep.subr.bf16.mxu1 %v5184_v50 }
 0xe58   : > { %v17239_v36 = vpop.eup %17238  ;;  %15501 = vmatpush3.bf16.msra.mxu1 %v5184_v50  ;;  %v22943_v50 = vld [vmem:[#allocation75_spill] sm:$0xff] }
 0xe59   : > { %5360 = vmatprep.subr.bf16.mxu1 %v16242_v58  ;;  %v5172_v40 = vmul.f32 %v17239_v36, %v17227_v11  ;;  %v17241_v57 = vpop.eup %17240  ;;  %v19895_v8 = vpack.c.bf16 %v3053_v32, %v22943_v50 }
 0xe5a   : > { %v17243_v5 = vpop.eup %17242  ;;  %v5174_v63 = vmul.f32 %v17241_v57, %v17225_v1  ;;  %v19886_v1 = vpack.c.bf16 %v3063_v13, %v22939_v17  ;;  %v22954_v17 = vld [vmem:[#allocation66_spill] sm:$0xff] }
 0xe5b   : > { %15503 = vmatmul.mubr.msk.bf16.vlgmr.msra.gmra.mxu1 %vm3481_vm0, %v5176_v46  ;;  %v5177_v43 = vpack.c.bf16 %v5172_v40, %v5171_v62  ;;  %v5173_v16 = vmul.f32 %v17243_v5, %v19855_v4  ;;  %v19890_v4 = vpop.f32.mrf.mxu1  ;;  %v22946_v46 = vld [vmem:[#allocation73_spill] sm:$0xff]  ;;  %v22948_v5 = vld [vmem:[#allocation72_spill] sm:$0xff] }
 0xe5c   : > { %5361 = vmatpush1.bf16.msra.mxu1 %v16240_v39  ;;  %22940 = vst [vmem:[#allocation85_spill] sm:$0xff] %v19890_v4  ;;  %v5536_v58 = vsel %vm3481_vm0, %v19886_v1, 0  ;;  %v22945_v39 = vld [vmem:[#allocation74_spill] sm:$0xff] }
 0xe5d   : > { %15506 = vmatprep.mubr.msk.bf16.mxu1 %vm3481_vm0, %v5177_v43  ;;  %5362 = vmatprep.subr.bf16.mxu1 %v16245_v33  ;;  %v5178_v11 = vpack.c.bf16 %v5174_v63, %v5173_v16  ;;  %v3043_v62 = vadd.f32 %v22946_v46, %v22945_v39  ;;  %v22947_v43 = vld [vmem:[#allocation82_spill] sm:$0xff]  ;;  %v5533_v63 = vsel %vm3481_vm0, %v19895_v8, 0  ;;  %v22950_v16 = vld [vmem:[#allocation71_spill] sm:$0xff] }
 0xe60   : > { %5363 = vmatpush1.bf16.msra.mxu1 %v16243_v37  ;;  %v19912_v37 = vpack.c.bf16 %v3043_v62, %v22948_v5 }
 0xe61   : > { %5364 = vmatprep.subr.bf16.mxu1 %v16248_v38  ;;  %v22949_v38 = vld [vmem:[#allocation83_spill] sm:$0xff] }
 0xe62   : > { %v5530_v56 = vsel %vm3481_vm0, %v19912_v37, 0 }
 0xe63   : > { %15507 = vmatmul.mubr.msk.bf16.gmra.mxu1 %vm3481_vm0, %v5178_v11 }
 0xe64   : > { %5365 = vmatpush1.bf16.msra.mxu1 %v16246_v19  ;;  %5384 = vmatprep.mubr.bf16.mxu1 %v22906_v49  ;;  %v22951_v19 = vld [vmem:[#allocation70_spill] sm:$0xff] }
 0xe65   : > { %5366 = vmatprep.subr.bf16.mxu1 %v16251_v59  ;;  %v3033_v11 = vadd.f32 %v22951_v19, %v22950_v16  ;;  %v22952_v59 = vld [vmem:[#allocation69_spill] sm:$0xff] }
 0xe67   : > { %v19928_v18 = vpack.c.bf16 %v3033_v11, %v22952_v59 }
 0xe68   : > { %5367 = vmatpush1.bf16.msra.mxu1 %v16249_v3  ;;  %v22953_v3 = vld [vmem:[#allocation65_spill] sm:$0xff] }
 0xe69   : > { %15654 = vmatprep.subr.msk.bf16.mxu1 %vm3481_vm0, %v19886_v1  ;;  %v5527_v13 = vsel %vm3481_vm0, %v19928_v18, 0 }
 0xf1b   : > { %v15504_v23 = vpop.f32.mrf.mxu1 }
 0xf1d   : > { %v5241_v22 = vpop.f32.mrf.mxu1 }
 0xf1f   : > { %v15505_v41 = vpop.f32.mrf.mxu1 }
 0xf20   : > { %v5273_v55 = vpack.c.bf16 %v15505_v41, %v15504_v23  ;;  %v22955_v23 = vld [vmem:[#allocation67_spill] sm:$0xff] }
 0xf21   : > { %v5244_v14 = vpop.f32.mrf.mxu1 }
 0xf22   : > { %v5272_v31 = vpack.c.bf16 %v5244_v14, %v5241_v22  ;;  %v22956_v22 = vld [vmem:[#allocation68_spill] sm:$0xff] }
 0xf23   : > { %v15508_v21 = vpop.f32.mrf.mxu1 }
 0xf24   : > { %14131 = vmatmul.mubr.msk.bf16.vlgmr.msra.gmra.mxu1 %vm3481_vm0, %v5272_v31  ;;  %15518 = vmatprep.mubr.msk.bf16.mxu0 %vm3481_vm0, %v5272_v31 }
 0xf25   : > { %15527 = vmatpush3.bf16.xpose.msra.mxu1 %v5536_v58  ;;  %v5257_v47 = vpop.f32.mrf.mxu1  ;;  %15519 = vmatmul.mubr.msk.bf16.vlgmr.msra.gmra.mxu0 %vm3481_vm0, %v5273_v55 }
 0xf26   : > { %15655 = vmatprep.subr.msk.bf16.mxu1 %vm3481_vm0, %v19895_v8  ;;  %15543 = vmatpush3.bf16.msra.mxu0 %v19261_v24 }
 0xf27   : > { %15544 = vmatprep.subr.bf16.mxu0 %v22944_v51  ;;  %v15509_v36 = vpop.f32.mrf.mxu1  ;;  %5394 = vmatprep.mubr.bf16.mxu1 %v22906_v49 }
 0xf28   : > { %v5275_v57 = vpack.c.bf16 %v15509_v36, %v15508_v21 }
 0xf29   : > { %v5260_v40 = vpop.f32.mrf.mxu1 }
 0xf2a   : > { %v5274_v33 = vpack.c.bf16 %v5260_v40, %v5257_v47  ;;  %15545 = vmatpush3.bf16.msra.mxu0 %v22944_v51 }
 0xf2b   : > { %15546 = vmatprep.subr.bf16.mxu0 %v22947_v43 }
 0xf2c   : > { %14132 = vmatmul.mubr.msk.bf16.gmra.mxu1 %vm3481_vm0, %v5273_v55  ;;  %15522 = vmatprep.mubr.msk.bf16.mxu0 %vm3481_vm0, %v5274_v33 }
 0xf2d   : > { %15529 = vmatpush3.bf16.xpose.msra.mxu1 %v5533_v63  ;;  %15523 = vmatmul.mubr.msk.bf16.gmra.mxu0 %vm3481_vm0, %v5275_v57 }
 0xf2e   : > { %15656 = vmatprep.subr.msk.bf16.mxu1 %vm3481_vm0, %v19912_v37  ;;  %15547 = vmatpush3.bf16.msra.mxu0 %v22947_v43 }
 0xf2f   : > { %15548 = vmatprep.subr.bf16.mxu0 %v22949_v38  ;;  %5404 = vmatprep.mubr.bf16.mxu1 %v22906_v49 }
 0xf32   : > { %15549 = vmatpush3.bf16.msra.mxu0 %v22949_v38 }
 0xf34   : > { %14133 = vmatmul.mubr.msk.bf16.gmra.mxu1 %vm3481_vm0, %v5274_v33 }
 0xf35   : > { %15531 = vmatpush3.bf16.xpose.msra.mxu1 %v5530_v56  ;;  %5414 = vmatprep.mubr.bf16.mxu1 %v22906_v49 }
 0xf36   : > { %15657 = vmatprep.subr.msk.bf16.mxu1 %vm3481_vm0, %v19928_v18 }
 0xf3c   : > { %14134 = vmatmul.mubr.msk.bf16.gmra.mxu1 %vm3481_vm0, %v5275_v57 }
 0xf3d   : > { %15533 = vmatpush3.bf16.xpose.msra.mxu1 %v5527_v13  ;;  %15534 = vmatprep.mubr.msk.bf16.mxu1 %vm3481_vm0, %v22953_v3 }
 0xf44   : > { %15535 = vmatmul.mubr.msk.bf16.vlgmr.msra.gmra.mxu1 %vm3481_vm0, %v22954_v17 }
 0xf45   : > { %15538 = vmatprep.mubr.msk.bf16.mxu1 %vm3481_vm0, %v22955_v23 }
 0xf4c   : > { %15539 = vmatmul.mubr.msk.bf16.gmra.mxu1 %vm3481_vm0, %v22956_v22 }
 0xfe4   : > { %v5386_v41 = vpop.f32.mrf.mxu1 }
 0xfe5   : > { %v19948_v10 = vadd.f32 %v5386_v41, %v19767_v30  ;;  %v15520_v27 = vpop.f32.mrf.mxu0 }
 0xfe6   : > { %v19951_v32 = vadd.f32 %v15520_v27, %v19770_v34  ;;  %v5388_v14 = vpop.f32.mrf.mxu1 }
 0xfe7   : > { %v19954_v31 = vadd.f32 %v5388_v14, %v19773_v6  ;;  %v5459_v55 = vpop.f32.mrf.mxu0 }
 0xfe8   : > { %v19957_v21 = vadd.f32 %v5459_v55, %v19776_v54  ;;  %v5390_v50 = vpop.f32.mrf.mxu1 }
 0xfe9   : > { %v19960_v58 = vadd.f32 %v5390_v50, %v19779_v28  ;;  %v15521_v47 = vpop.f32.mrf.mxu0 }
 0xfea   : > { %v19963_v30 = vadd.f32 %v15521_v47, %v19782_v52  ;;  %v19965_v36 = vpop.f32.mrf.mxu1 }
 0xfeb   : > { %22957 = vst [vmem:[#allocation79_spill] sm:$0xff] %v19965_v36  ;;  %v19967_v34 = vpop.f32.mrf.mxu0 }
 0xfec   : > { %22958 = vst [vmem:[#allocation80_spill] sm:$0xff] %v19967_v34  ;;  %v5396_v39 = vpop.f32.mrf.mxu1 }
 0xfed   : > { %v19970_v6 = vadd.f32 %v5396_v39, %v19789_v15  ;;  %v15524_v46 = vpop.f32.mrf.mxu0  ;;  %v20027_v39 = vld [vmem:[%s22905_s30 + $0x8] sm:$0xff] }
 0xfee   : > { %v19973_v54 = vadd.f32 %v15524_v46, %v19792_v12  ;;  %v5398_v62 = vpop.f32.mrf.mxu1 }
 0xfef   : > { %v19976_v28 = vadd.f32 %v5398_v62, %v19795_v42  ;;  %v5475_v40 = vpop.f32.mrf.mxu0 }
 0xff0   : > { %v19979_v52 = vadd.f32 %v5475_v40, %v19798_v7  ;;  %v5400_v33 = vpop.f32.mrf.mxu1  ;;  %v20033_v40 = vld [vmem:[%s22905_s30 + $0x18] sm:$0xff] }
 0xff1   : > { %v19982_v57 = vadd.f32 %v5400_v33, %v19801_v29  ;;  %v15525_v5 = vpop.f32.mrf.mxu0 }
 0xff2   : > { %v19985_v15 = vadd.f32 %v15525_v5, %v19806_v26  ;;  %v19987_v63 = vpop.f32.mrf.mxu1 }
 0xff3   : > { %22959 = vst [vmem:[#allocation78_spill] sm:$0xff] %v19987_v63 }
 0xff4   : > { %v5406_v12 = vpop.f32.mrf.mxu1 }
 0xff5   : > { %v19990_v16 = vadd.f32 %v5406_v12, %v19809_v0 }
 0xff6   : > { %v5408_v42 = vpop.f32.mrf.mxu1 }
 0xff7   : > { %v19993_v19 = vadd.f32 %v5408_v42, %v19812_v60 }
 0xff8   : > { %v5410_v7 = vpop.f32.mrf.mxu1 }
 0xff9   : > { %v19996_v11 = vadd.f32 %v5410_v7, %v19815_v25  ;;  %v20014_v25 = vld [vmem:[%s22905_s30] sm:$0xff] }
 0xffa   : > { %v19998_v29 = vpop.f32.mrf.mxu1 }
 0xffb   : > { %22960 = vst [vmem:[#allocation77_spill] sm:$0xff] %v19998_v29 }
 0xffc   : > { %v5416_v59 = vpop.f32.mrf.mxu1 }
 0xffd   : > { %v20001_v26 = vadd.f32 %v5416_v59, %v19820_v44  ;;  %v20041_v59 = vld [vmem:[%s22905_s30 + $0x20] sm:$0xff] }
 0xffe   : > { %v5418_v56 = vpop.f32.mrf.mxu1 }
 0xfff   : > { %v20004_v13 = vadd.f32 %v5418_v56, %v19823_v61  ;;  %v20020_v61 = vld [vmem:[%s22905_s30 + $0x10] sm:$0xff] }
0x1000   : > { %v5420_v0 = vpop.f32.mrf.mxu1 }
0x1001   : > { %v20007_v41 = vadd.f32 %v5420_v0, %v19826_v53 }
0x1002   : > { %v20009_v60 = vpop.f32.mrf.mxu1 }
0x1003   : > { %22961 = vst [vmem:[#allocation76_spill] sm:$0xff] %v20009_v60 }
0x1004   : > { %v15536_v27 = vpop.f32.mrf.mxu1 }
0x1005   : > { %v5581_v53 = vadd.f32 %v20020_v61, %v15536_v27 }
0x1006   : > { %v5572_v14 = vpop.f32.mrf.mxu1 }
0x1007   : > { %v5573_v44 = vadd.f32 %v20014_v25, %v5572_v14  ;;  %v5609_v12 = vsel %vm3481_vm0, %v5581_v53, -inf  ;;  %v20048_v14 = vld [vmem:[%s22905_s30 + $0x28] sm:$0xff] }
0x1008   : > { %v15537_v55 = vpop.f32.mrf.mxu1 }
0x1009   : > { %v5603_v50 = vsel %vm3481_vm0, %v5573_v44, -inf  ;;  %v5584_v33 = vadd.f32 %v20033_v40, %v15537_v55 }
0x100a   : > { %v5575_v47 = vpop.f32.mrf.mxu1  ;;  %5604 = vmax.xlane.f32.xlu0 %v5603_v50  ;;  %v20054_v50 = vld [vmem:[%s22905_s30 + $0x30] sm:$0xff] }
0x100b   : > { %v5576_v46 = vadd.f32 %v20027_v39, %v5575_v47  ;;  %v5612_v0 = vsel %vm3481_vm0, %v5584_v33, -inf }
0x100c   : > { %v15540_v62 = vpop.f32.mrf.mxu1 }
0x100d   : > { %v5606_v5 = vsel %vm3481_vm0, %v5576_v46, -inf  ;;  %v5597_v47 = vadd.f32 %v20054_v50, %v15540_v62 }
0x100e   : > { %v5588_v42 = vpop.f32.mrf.mxu1  ;;  %5607 = vmax.xlane.f32.xlu1 %v5606_v5  ;;  %5610 = vmax.xlane.f32.xlu0 %v5609_v12  ;;  %v20060_v5 = vld [vmem:[%s22905_s30 + $0x38] sm:$0xff] }
0x100f   : > { %v5589_v56 = vadd.f32 %v20041_v59, %v5588_v42  ;;  %v5621_v60 = vsel %vm3481_vm0, %v5597_v47, -inf }
0x1010   : > { %v15541_v7 = vpop.f32.mrf.mxu1 }
0x1011   : > { %v5600_v12 = vadd.f32 %v20060_v5, %v15541_v7 }
0x1012   : > { %v5591_v27 = vpop.f32.mrf.mxu1  ;;  %5613 = vmax.xlane.f32.xlu0 %v5612_v0  ;;  %v5615_v0 = vsel %vm3481_vm0, %v5589_v56, -inf }
0x1013   : > { %v5592_v55 = vadd.f32 %v20048_v14, %v5591_v27  ;;  %v5624_v27 = vsel %vm3481_vm0, %v5600_v12, -inf }
0x1015   : > { %v5618_v42 = vsel %vm3481_vm0, %v5592_v55, -inf }
0x1016   : > { %5619 = vmax.xlane.f32.xlu1 %v5618_v42  ;;  %5616 = vmax.xlane.f32.xlu0 %v5615_v0 }
0x101a   : > { %5625 = vmax.xlane.f32.xlu1 %v5624_v27  ;;  %5622 = vmax.xlane.f32.xlu0 %v5621_v60 }
0x1093   : > { %v5605_v62 = vpop.xlane.xlu0 %5604 }
0x1094   : > { %v5627_v48 = vsub.f32 %v5573_v44, %v5605_v62 }
0x1096   : > { %v5635_v29 = vmul.f32 1.442695, %v5627_v48 }
0x1097   : > { %v5608_v4 = vpop.xlane.xlu1 %5607  ;;  %v5611_v9 = vpop.xlane.xlu0 %5610 }
0x1098   : > { %17244 = vpow2.f32 %v5635_v29  ;;  %v5628_v2 = vsub.f32 %v5576_v46, %v5608_v4  ;;  %v5629_v7 = vsub.f32 %v5581_v53, %v5611_v9 }
0x109a   : > { %v5637_v63 = vmul.f32 1.442695, %v5628_v2  ;;  %v5639_v35 = vmul.f32 1.442695, %v5629_v7 }
0x109b   : > { %v5614_v34 = vpop.xlane.xlu0 %5613 }
0x109c   : > { %17246 = vpow2.f32 %v5637_v63  ;;  %v5630_v42 = vsub.f32 %v5584_v33, %v5614_v34 }
0x109d   : > { %17248 = vpow2.f32 %v5639_v35 }
0x109e   : > { %v5641_v0 = vmul.f32 1.442695, %v5630_v42 }
0x109f   : > { %v5620_v36 = vpop.xlane.xlu1 %5619  ;;  %v5617_v20 = vpop.xlane.xlu0 %5616 }
0x10a0   : > { %17250 = vpow2.f32 %v5641_v0  ;;  %v5632_v27 = vsub.f32 %v5592_v55, %v5620_v36  ;;  %v5631_v60 = vsub.f32 %v5589_v56, %v5617_v20 }
0x10a2   : > { %v5645_v45 = vmul.f32 1.442695, %v5632_v27  ;;  %v5643_v44 = vmul.f32 1.442695, %v5631_v60  ;;  %v16254_v27 = vld [vmem:[%s18448_s18 + $0x1cc] ss:$12 sps:$4 sm:$0xff]  }
0x10a3   : > { %v5626_v48 = vpop.xlane.xlu1 %5625  ;;  %v5623_v62 = vpop.xlane.xlu0 %5622  ;;  %5860 = vmatprep.subr.bf16.mxu0 %v16254_v27 }
0x10a4   : > { %17252 = vpow2.f32 %v5645_v45  ;;  %v5634_v29 = vsub.f32 %v5600_v12, %v5626_v48  ;;  %v5633_v4 = vsub.f32 %v5597_v47, %v5623_v62 }
0x10a5   : > { %v20067_v9 = vpop.eup %17244  ;;  %17254 = vpow2.f32 %v5643_v44 }
0x10a6   : > { %v5649_v2 = vmul.f32 1.442695, %v5634_v29  ;;  %v5647_v63 = vmul.f32 1.442695, %v5633_v4  ;;  %v5651_v35 = vsel %vm3481_vm0, %v20067_v9, 0.0 }
0x10a7   : > { %5652 = vadd.xlane.f32.xlu0 %v5651_v35 }
0x10a8   : > { %17256 = vpow2.f32 %v5649_v2 }
0x10a9   : > { %v17247_v34 = vpop.eup %17246  ;;  %17258 = vpow2.f32 %v5647_v63 }
0x10aa   : > { %v17249_v20 = vpop.eup %17248  ;;  %v5654_v36 = vsel %vm3481_vm0, %v17247_v34, 0.0 }
0x10ab   : > { %5655 = vadd.xlane.f32.xlu1 %v5654_v36  ;;  %v5657_v45 = vsel %vm3481_vm0, %v17249_v20, 0.0 }
0x10ac   : > { %5658 = vadd.xlane.f32.xlu0 %v5657_v45 }
0x10ad   : > { %v17251_v53 = vpop.eup %17250 }
0x10ae   : > { %v5660_v46 = vsel %vm3481_vm0, %v17251_v53, 0.0 }
0x10af   : > { %5661 = vadd.xlane.f32.xlu1 %v5660_v46  ;;  %v16252_v46 = vld [vmem:[%s18448_s18 + $0x1c8] ss:$12 sps:$4 sm:$0xff]  }
0x10b1   : > { %v17253_v33 = vpop.eup %17252 }
0x10b2   : > { %v17255_v56 = vpop.eup %17254  ;;  %v5666_v55 = vsel %vm3481_vm0, %v17253_v33, 0.0 }
0x10b3   : > { %5667 = vadd.xlane.f32.xlu1 %v5666_v55  ;;  %v5663_v47 = vsel %vm3481_vm0, %v17255_v56, 0.0 }
0x10b4   : > { %5664 = vadd.xlane.f32.xlu0 %v5663_v47  ;;  %v16257_v47 = vld [vmem:[%s18448_s18 + $0x1b4] ss:$12 sps:$4 sm:$0xff]  }
0x10b5   : > { %v20076_v12 = vpop.eup %17256 }
0x10b6   : > { %v20078_v7 = vpop.eup %17258  ;;  %v5672_v42 = vsel %vm3481_vm0, %v20076_v12, 0.0 }
0x10b7   : > { %5673 = vadd.xlane.f32.xlu1 %v5672_v42  ;;  %v5669_v0 = vsel %vm3481_vm0, %v20078_v7, 0.0 }
0x10b8   : > { %5670 = vadd.xlane.f32.xlu0 %v5669_v0 }
0x10c8   : > { %6034 = vrot.lane.b32.xlu1 %v19895_v8, %s18049_s15  ;;  %v16264_v8 = vld [vmem:[%s18448_s18 + $0x1d0] ss:$12 sps:$4 sm:$0xff]  }
0x10c9   : > { %15558 = vmatprep.subr.bf16.mxu1 %v16264_v8 }
0x10ca   : > { %15559 = vmatpush3.bf16.msra.mxu1 %v16264_v8  ;;  %v16260_v8 = vld [vmem:[%s18448_s18 + $0x19c] ss:$12 sps:$4 sm:$0xff]  }
0x10cc   : > { %6032 = vrot.lane.b32.xlu1 %v19912_v37, %s18049_s15  ;;  %v16265_v37 = vld [vmem:[%s18448_s18 + $0x1b8] ss:$12 sps:$4 sm:$0xff]  }
0x10cd   : > { %15560 = vmatprep.subr.bf16.mxu1 %v16265_v37 }
0x10ce   : > { %6036 = vrot.lane.b32.xlu0 %v19886_v1, %s18049_s15  ;;  %15561 = vmatpush3.bf16.msra.mxu1 %v16265_v37 }
0x10d0   : > { %6030 = vrot.lane.b32.xlu1 %v19928_v18, %s18049_s15 }
0x10d2   : > { %6018 = vrot.lane.b32.xlu0 %v22953_v3, %s18049_s15 }
0x10d4   : > { %6020 = vrot.lane.b32.xlu1 %v22954_v17, %s18049_s15 }
0x10d6   : > { %6022 = vrot.lane.b32.xlu0 %v22955_v23, %s18049_s15 }
0x10d8   : > { %6024 = vrot.lane.b32.xlu1 %v22956_v22, %s18049_s15 }
0x1130   : > { %v5653_v1 = vpop.xlane.xlu0 %5652 }
0x1131   : > { %17260 = vrcp.f32 %v5653_v1 }
0x1134   : > { %v5656_v18 = vpop.xlane.xlu1 %5655 }
0x1135   : > { %17262 = vrcp.f32 %v5656_v18  ;;  %v5659_v3 = vpop.xlane.xlu0 %5658 }
0x1136   : > { %17264 = vrcp.f32 %v5659_v3 }
0x1138   : > { %v5662_v60 = vpop.xlane.xlu1 %5661 }
0x1139   : > { %17266 = vrcp.f32 %v5662_v60  ;;  %v16263_v60 = vld [vmem:[%s18448_s18 + $0x184] ss:$12 sps:$4 sm:$0xff]  }
0x113c   : > { %v5668_v17 = vpop.xlane.xlu1 %5667 }
0x113d   : > { %17268 = vrcp.f32 %v5668_v17  ;;  %v5665_v23 = vpop.xlane.xlu0 %5664 }
0x113e   : > { %17270 = vrcp.f32 %v5665_v23  ;;  %v17261_v22 = vpop.eup %17260  ;;  %v20121_v23 = vpop.f32.mrf.mxu0 }
0x113f   : > { %v5683_v29 = vmul.f32 %v17261_v22, %v20067_v9  ;;  %v16255_v9 = vld [vmem:[%s18448_s18 + $0x1b0] ss:$12 sps:$4 sm:$0xff]  }
0x1140   : > { %v5674_v44 = vpop.xlane.xlu1 %5673 }
0x1141   : > { %17272 = vrcp.f32 %v5674_v44  ;;  %v5671_v48 = vpop.xlane.xlu0 %5670 }
0x1142   : > { %v17263_v62 = vpop.eup %17262  ;;  %17274 = vrcp.f32 %v5671_v48 }
0x1143   : > { %v5684_v4 = vmul.f32 %v17263_v62, %v17247_v34  ;;  %v17265_v2 = vpop.eup %17264 }
0x1144   : > { %v5685_v36 = vmul.f32 %v17265_v2, %v17249_v20 }
0x1145   : > { %v5691_v63 = vpack.c.bf16 %v5684_v4, %v5683_v29  ;;  %v6037_v17 = vpop.permute.xlu0 %6036 }
0x1146   : > { %v17267_v35 = vpop.eup %17266  ;;  %v6060_v2 = vsel %vm3481_vm0, %v6037_v17, 0 }
0x1147   : > { %v5686_v45 = vmul.f32 %v17267_v35, %v17251_v53  ;;  %15550 = vmatprep.mubr.msk.bf16.mxu0 %vm3481_vm0, %v5691_v63  ;;  %v6035_v35 = vpop.permute.xlu1 %6034 }
0x1149   : > { %v5692_v55 = vpack.c.bf16 %v5686_v45, %v5685_v36 }
0x114a   : > { %v17269_v42 = vpop.eup %17268 }
0x114b   : > { %v17271_v0 = vpop.eup %17270  ;;  %15551 = vmatmul.mubr.msk.bf16.vlgmr.msra.gmra.mxu0 %vm3481_vm0, %v5692_v55  ;;  %v5688_v27 = vmul.f32 %v17269_v42, %v17253_v33  ;;  %v16258_v33 = vld [vmem:[%s18448_s18 + $0x198] ss:$12 sps:$4 sm:$0xff]  }
0x114c   : > { %5861 = vmatpush1.bf16.msra.mxu0 %v16252_v46  ;;  %v5687_v34 = vmul.f32 %v17271_v0, %v17255_v56  ;;  %v16261_v56 = vld [vmem:[%s18448_s18 + $0x180] ss:$12 sps:$4 sm:$0xff]   ;;  %v6033_v0 = vpop.permute.xlu1 %6032 }
0x114d   : > { %5862 = vmatprep.subr.bf16.mxu0 %v16257_v47  ;;  %v6057_v47 = vsel %vm3481_vm0, %v6035_v35, 0 }
0x114e   : > { %v17273_v20 = vpop.eup %17272  ;;  %v5693_v53 = vpack.c.bf16 %v5688_v27, %v5687_v34  ;;  %v6054_v27 = vsel %vm3481_vm0, %v6033_v0, 0  ;;  %v6019_v34 = vpop.permute.xlu0 %6018 }
0x114f   : > { %v17275_v37 = vpop.eup %17274  ;;  %v5690_v1 = vmul.f32 %v17273_v20, %v20076_v12  ;;  %v16266_v12 = vld [vmem:[%s18448_s18 + $0x1a0] ss:$12 sps:$4 sm:$0xff]  }
0x1150   : > { %15554 = vmatprep.mubr.msk.bf16.mxu0 %vm3481_vm0, %v5693_v53  ;;  %5863 = vmatpush1.bf16.msra.mxu0 %v16255_v9  ;;  %v5689_v18 = vmul.f32 %v17275_v37, %v20078_v7  ;;  %v16267_v7 = vld [vmem:[%s18448_s18 + $0x188] ss:$12 sps:$4 sm:$0xff]   ;;  %v6031_v9 = vpop.permute.xlu1 %6030 }
0x1151   : > { %5864 = vmatprep.subr.bf16.mxu0 %v16260_v8  ;;  %15562 = vmatprep.subr.bf16.mxu1 %v16266_v12  ;;  %v6051_v8 = vsel %vm3481_vm0, %v6031_v9, 0 }
0x1152   : > { %v5694_v3 = vpack.c.bf16 %v5690_v1, %v5689_v18  ;;  %15563 = vmatpush3.bf16.msra.mxu1 %v16266_v12  ;;  %v6023_v53 = vpop.permute.xlu0 %6022 }
0x1153   : > { %15564 = vmatprep.subr.bf16.mxu1 %v16267_v7 }
0x1154   : > { %15555 = vmatmul.mubr.msk.bf16.gmra.mxu0 %vm3481_vm0, %v5694_v3  ;;  %v6021_v20 = vpop.permute.xlu1 %6020 }
0x1155   : > { %5865 = vmatpush1.bf16.msra.mxu0 %v16258_v33  ;;  %5884 = vmatprep.mubr.bf16.mxu0 %v22906_v49 }
0x1156   : > { %5866 = vmatprep.subr.bf16.mxu0 %v16263_v60  ;;  %15565 = vmatpush3.bf16.msra.mxu1 %v16267_v7 }
0x1158   : > { %v6025_v37 = vpop.permute.xlu1 %6024 }
0x1159   : > { %5867 = vmatpush1.bf16.msra.mxu0 %v16261_v56 }
0x115a   : > { %15658 = vmatprep.subr.msk.bf16.mxu0 %vm3481_vm0, %v6037_v17 }
0x120b   : > { %v15552_v22 = vpop.f32.mrf.mxu0 }
0x120d   : > { %v5741_v44 = vpop.f32.mrf.mxu0 }
0x120f   : > { %v15553_v48 = vpop.f32.mrf.mxu0 }
0x1210   : > { %v5773_v4 = vpack.c.bf16 %v15553_v48, %v15552_v22 }
0x1211   : > { %v5744_v62 = vpop.f32.mrf.mxu0 }
0x1212   : > { %v5772_v29 = vpack.c.bf16 %v5744_v62, %v5741_v44 }
0x1214   : > { %v15556_v63 = vpop.f32.mrf.mxu0  ;;  %14159 = vmatmul.mubr.msk.bf16.vlgmr.msra.gmra.mxu0 %vm3481_vm0, %v5772_v29  ;;  %15566 = vmatprep.mubr.msk.bf16.mxu1 %vm3481_vm0, %v5772_v29 }
0x1215   : > { %15575 = vmatpush3.bf16.xpose.msra.mxu0 %v6060_v2  ;;  %15567 = vmatmul.mubr.msk.bf16.vlgmr.msra.gmra.mxu1 %vm3481_vm0, %v5773_v4 }
0x1216   : > { %v5757_v36 = vpop.f32.mrf.mxu0  ;;  %15659 = vmatprep.subr.msk.bf16.mxu0 %vm3481_vm0, %v6035_v35  ;;  %5894 = vmatprep.mubr.bf16.mxu0 %v22906_v49 }
0x1218   : > { %v15557_v45 = vpop.f32.mrf.mxu0 }
0x1219   : > { %v5775_v42 = vpack.c.bf16 %v15557_v45, %v15556_v63 }
0x121a   : > { %v5760_v46 = vpop.f32.mrf.mxu0 }
0x121b   : > { %v5774_v55 = vpack.c.bf16 %v5760_v46, %v5757_v36 }
0x121c   : > { %14160 = vmatmul.mubr.msk.bf16.gmra.mxu0 %vm3481_vm0, %v5773_v4 }
0x121d   : > { %15570 = vmatprep.mubr.msk.bf16.mxu1 %vm3481_vm0, %v5774_v55  ;;  %15577 = vmatpush3.bf16.xpose.msra.mxu0 %v6057_v47 }
0x121e   : > { %15571 = vmatmul.mubr.msk.bf16.gmra.mxu1 %vm3481_vm0, %v5775_v42  ;;  %15660 = vmatprep.subr.msk.bf16.mxu0 %vm3481_vm0, %v6033_v0 }
0x121f   : > { %5904 = vmatprep.mubr.bf16.mxu0 %v22906_v49 }
0x1224   : > { %14161 = vmatmul.mubr.msk.bf16.gmra.mxu0 %vm3481_vm0, %v5774_v55 }
0x1225   : > { %15579 = vmatpush3.bf16.xpose.msra.mxu0 %v6054_v27  ;;  %5914 = vmatprep.mubr.bf16.mxu0 %v22906_v49 }
0x1226   : > { %15661 = vmatprep.subr.msk.bf16.mxu0 %vm3481_vm0, %v6031_v9 }
0x122c   : > { %14162 = vmatmul.mubr.msk.bf16.gmra.mxu0 %vm3481_vm0, %v5775_v42 }
0x122d   : > { %15581 = vmatpush3.bf16.xpose.msra.mxu0 %v6051_v8  ;;  %15582 = vmatprep.mubr.msk.bf16.mxu0 %vm3481_vm0, %v6019_v34 }
0x1234   : > { %15583 = vmatmul.mubr.msk.bf16.vlgmr.msra.gmra.mxu0 %vm3481_vm0, %v6021_v20 }
0x1235   : > { %15586 = vmatprep.mubr.msk.bf16.mxu0 %vm3481_vm0, %v6023_v53 }
0x123c   : > { %15587 = vmatmul.mubr.msk.bf16.gmra.mxu0 %vm3481_vm0, %v6025_v37 }
0x12d4   : > { %v5886_v1 = vpop.f32.mrf.mxu0 }
0x12d5   : > { %v20146_v18 = vadd.f32 %v5886_v1, %v19948_v10  ;;  %v15568_v33 = vpop.f32.mrf.mxu1 }
0x12d6   : > { %v20149_v3 = vadd.f32 %v15568_v33, %v19951_v32  ;;  %v5888_v60 = vpop.f32.mrf.mxu0 }
0x12d7   : > { %v20152_v56 = vadd.f32 %v5888_v60, %v19954_v31  ;;  %v5959_v17 = vpop.f32.mrf.mxu1 }
0x12d8   : > { %v20155_v12 = vadd.f32 %v5959_v17, %v19957_v21  ;;  %v5890_v7 = vpop.f32.mrf.mxu0 }
0x12d9   : > { %v20158_v22 = vadd.f32 %v5890_v7, %v19960_v58  ;;  %v15569_v44 = vpop.f32.mrf.mxu1 }
0x12da   : > { %v20161_v10 = vadd.f32 %v15569_v44, %v19963_v30  ;;  %v20163_v48 = vpop.f32.mrf.mxu0 }
0x12db   : > { %v20165_v32 = vpop.f32.mrf.mxu1 }
0x12dc   : > { %v5896_v62 = vpop.f32.mrf.mxu0 }
0x12dd   : > { %v20168_v31 = vadd.f32 %v5896_v62, %v19970_v6 }
0x12de   : > { %v15572_v29 = vpop.f32.mrf.mxu1  ;;  %v5898_v4 = vpop.f32.mrf.mxu0 }
0x12df   : > { %v20171_v21 = vadd.f32 %v15572_v29, %v19973_v54  ;;  %v20174_v58 = vadd.f32 %v5898_v4, %v19976_v28 }
0x12e0   : > { %v5975_v2 = vpop.f32.mrf.mxu1  ;;  %v5900_v63 = vpop.f32.mrf.mxu0 }
0x12e1   : > { %v20177_v30 = vadd.f32 %v5975_v2, %v19979_v52  ;;  %v20180_v35 = vadd.f32 %v5900_v63, %v19982_v57 }
0x12e2   : > { %v15573_v36 = vpop.f32.mrf.mxu1  ;;  %v20182_v45 = vpop.f32.mrf.mxu0 }
0x12e3   : > { %v20185_v6 = vadd.f32 %v15573_v36, %v19985_v15 }
0x12e4   : > { %v5906_v46 = vpop.f32.mrf.mxu0 }
0x12e5   : > { %v20188_v54 = vadd.f32 %v5906_v46, %v19990_v16 }
0x12e6   : > { %v5908_v28 = vpop.f32.mrf.mxu0 }
0x12e7   : > { %v20191_v55 = vadd.f32 %v5908_v28, %v19993_v19 }
0x12e8   : > { %v5910_v47 = vpop.f32.mrf.mxu0 }
0x12e9   : > { %v20194_v52 = vadd.f32 %v5910_v47, %v19996_v11 }
0x12ea   : > { %v20196_v57 = vpop.f32.mrf.mxu0 }
0x12ec   : > { %v5916_v42 = vpop.f32.mrf.mxu0 }
0x12ed   : > { %v20199_v0 = vadd.f32 %v5916_v42, %v20001_v26 }
0x12ee   : > { %v5918_v15 = vpop.f32.mrf.mxu0 }
0x12ef   : > { %v20202_v27 = vadd.f32 %v5918_v15, %v20004_v13 }
0x12f0   : > { %v5920_v16 = vpop.f32.mrf.mxu0 }
0x12f1   : > { %v20205_v9 = vadd.f32 %v5920_v16, %v20007_v41 }
0x12f2   : > { %v20207_v19 = vpop.f32.mrf.mxu0 }
0x12f4   : > { %v15584_v34 = vpop.f32.mrf.mxu0 }
0x12f5   : > { %v6105_v53 = vadd.f32 %v20020_v61, %v15584_v34 }
0x12f6   : > { %v6096_v8 = vpop.f32.mrf.mxu0 }
0x12f7   : > { %v6097_v11 = vadd.f32 %v20014_v25, %v6096_v8  ;;  %v6133_v60 = vsel %vm3481_vm0, %v6105_v53, -inf }
0x12f8   : > { %v15585_v20 = vpop.f32.mrf.mxu0 }
0x12f9   : > { %v6127_v26 = vsel %vm3481_vm0, %v6097_v11, -inf  ;;  %v6108_v33 = vadd.f32 %v20033_v40, %v15585_v20 }
0x12fa   : > { %v6099_v37 = vpop.f32.mrf.mxu0  ;;  %6128 = vmax.xlane.f32.xlu0 %v6127_v26 }
0x12fb   : > { %v6100_v13 = vadd.f32 %v20027_v39, %v6099_v37  ;;  %v6136_v44 = vsel %vm3481_vm0, %v6108_v33, -inf }
0x12fc   : > { %v15588_v1 = vpop.f32.mrf.mxu0 }
0x12fd   : > { %v6130_v41 = vsel %vm3481_vm0, %v6100_v13, -inf  ;;  %v6121_v29 = vadd.f32 %v20054_v50, %v15588_v1 }
0x12fe   : > { %6131 = vmax.xlane.f32.xlu1 %v6130_v41  ;;  %6134 = vmax.xlane.f32.xlu0 %v6133_v60  ;;  %v6112_v17 = vpop.f32.mrf.mxu0 }
0x12ff   : > { %v6113_v7 = vadd.f32 %v20041_v59, %v6112_v17  ;;  %v6145_v59 = vsel %vm3481_vm0, %v6121_v29, -inf }
0x1300   : > { %v15589_v25 = vpop.f32.mrf.mxu0 }
0x1301   : > { %v6124_v61 = vadd.f32 %v20060_v5, %v15589_v25  ;;  %v6139_v4 = vsel %vm3481_vm0, %v6113_v7, -inf }
0x1302   : > { %6137 = vmax.xlane.f32.xlu0 %v6136_v44  ;;  %v6115_v62 = vpop.f32.mrf.mxu0 }
0x1303   : > { %v6116_v39 = vadd.f32 %v20048_v14, %v6115_v62  ;;  %v6148_v40 = vsel %vm3481_vm0, %v6124_v61, -inf }
0x1304   : > { %6149 = vmax.xlane.f32.xlu1 %v6148_v40 }
0x1305   : > { %v6142_v2 = vsel %vm3481_vm0, %v6116_v39, -inf }
0x1306   : > { %6140 = vmax.xlane.f32.xlu0 %v6139_v4 }
0x1308   : > { %6143 = vmax.xlane.f32.xlu1 %v6142_v2 }
0x130a   : > { %6146 = vmax.xlane.f32.xlu0 %v6145_v59 }
0x1319   : > { %6227 = vrot.lane.b32.xlu1 %v22944_v51, %s18049_s15 }
0x131d   : > { %6225 = vrot.lane.b32.xlu1 %v22947_v43, %s18049_s15 }
0x1383   : > { %v6129_v14 = vpop.xlane.xlu0 %6128 }
0x1384   : > { %v6151_v5 = vsub.f32 %v6097_v11, %v6129_v14 }
0x1386   : > { %v6159_v47 = vmul.f32 1.442695, %v6151_v5  ;;  %v16271_v5 = vld [vmem:[%s18448_s18 + $0x230] ss:$12 sps:$4 sm:$0xff]  }
0x1387   : > { %v6132_v63 = vpop.xlane.xlu1 %6131  ;;  %v6135_v36 = vpop.xlane.xlu0 %6134  ;;  %15606 = vmatprep.subr.bf16.mxu0 %v16271_v5 }
0x1388   : > { %v6153_v50 = vsub.f32 %v6105_v53, %v6135_v36  ;;  %v6152_v46 = vsub.f32 %v6100_v13, %v6132_v63  ;;  %v16275_v63 = vld [vmem:[%s18448_s18 + $0x218] ss:$12 sps:$4 sm:$0xff]   ;;  %15607 = vmatpush3.bf16.msra.mxu0 %v16271_v5 }
0x1389   : > { %15608 = vmatprep.subr.bf16.mxu0 %v16275_v63 }
0x138a   : > { %v6163_v28 = vmul.f32 1.442695, %v6153_v50  ;;  %v6161_v16 = vmul.f32 1.442695, %v6152_v46 }
0x138b   : > { %v6138_v42 = vpop.xlane.xlu0 %6137 }
0x138c   : > { %v6154_v15 = vsub.f32 %v6108_v33, %v6138_v42  ;;  %17276 = vpow2.f32 %v6163_v28  ;;  %15609 = vmatpush3.bf16.msra.mxu0 %v16275_v63 }
0x138d   : > { %17278 = vpow2.f32 %v6159_v47  ;;  %v6150_v13 = vpop.xlane.xlu1 %6149 }
0x138e   : > { %v6165_v34 = vmul.f32 1.442695, %v6154_v15  ;;  %v6158_v40 = vsub.f32 %v6124_v61, %v6150_v13 }
0x138f   : > { %v6141_v1 = vpop.xlane.xlu0 %6140 }
0x1390   : > { %17280 = vpow2.f32 %v6165_v34  ;;  %v6155_v33 = vsub.f32 %v6113_v7, %v6141_v1  ;;  %v6173_v2 = vmul.f32 1.442695, %v6158_v40 }
0x1391   : > { %17282 = vpow2.f32 %v6161_v16  ;;  %v6144_v41 = vpop.xlane.xlu1 %6143 }
0x1392   : > { %v6156_v17 = vsub.f32 %v6116_v39, %v6144_v41  ;;  %v6167_v25 = vmul.f32 1.442695, %v6155_v33 }
0x1393   : > { %v6147_v60 = vpop.xlane.xlu0 %6146 }
0x1394   : > { %v6157_v44 = vsub.f32 %v6121_v29, %v6147_v60  ;;  %v6169_v62 = vmul.f32 1.442695, %v6156_v17  ;;  %17284 = vpow2.f32 %v6167_v25  ;;  %v16268_v17 = vld [vmem:[%s18448_s18 + $0x228] ss:$12 sps:$4 sm:$0xff]  }
0x1395   : > { %v6228_v36 = vpop.permute.xlu1 %6227 }
0x1396   : > { %v6171_v4 = vmul.f32 1.442695, %v6157_v44  ;;  %17286 = vpow2.f32 %v6169_v62  ;;  %v16274_v44 = vld [vmem:[%s18448_s18 + $0x214] ss:$12 sps:$4 sm:$0xff]   ;;  %v16272_v62 = vld [vmem:[%s18448_s18 + $0x210] ss:$12 sps:$4 sm:$0xff]  }
0x1398   : > { %17288 = vpow2.f32 %v6171_v4 }
0x1399   : > { %v20229_v51 = vpop.eup %17276  ;;  %17290 = vpow2.f32 %v6173_v2  ;;  %v6226_v50 = vpop.permute.xlu1 %6225 }
0x139a   : > { %v6181_v43 = vsel %vm3481_vm0, %v20229_v51, 0.0  ;;  %v20233_v8 = vpop.eup %17278 }
0x139b   : > { %6182 = vadd.xlane.f32.xlu0 %v6181_v43  ;;  %v6175_v26 = vsel %vm3481_vm0, %v20233_v8, 0.0 }
0x139d   : > { %v20235_v11 = vpop.eup %17280 }
0x139e   : > { %v6184_v20 = vsel %vm3481_vm0, %v20235_v11, 0.0  ;;  %v20239_v53 = vpop.eup %17282 }
0x139f   : > { %6185 = vadd.xlane.f32.xlu1 %v6184_v20  ;;  %6176 = vadd.xlane.f32.xlu0 %v6175_v26  ;;  %v6178_v37 = vsel %vm3481_vm0, %v20239_v53, 0.0  ;;  %v16270_v20 = vld [vmem:[%s18448_s18 + $0x22c] ss:$12 sps:$4 sm:$0xff]  }
0x13a3   : > { %6179 = vadd.xlane.f32.xlu1 %v6178_v37 }
0x13b4   : > { %6223 = vrot.lane.b32.xlu1 %v22949_v38, %s18049_s15  ;;  %v20249_v38 = vpop.eup %17284 }
0x13b5   : > { %6229 = vrot.lane.b32.xlu0 %v19261_v24, %s18049_s15  ;;  %v20251_v24 = vpop.eup %17286  ;;  %v6187_v7 = vsel %vm3481_vm0, %v20249_v38, 0.0 }
0x13b6   : > { %v20255_v39 = vpop.eup %17288  ;;  %v6190_v61 = vsel %vm3481_vm0, %v20251_v24, 0.0 }
0x13b7   : > { %v6193_v29 = vsel %vm3481_vm0, %v20255_v39, 0.0  ;;  %v20261_v59 = vpop.eup %17290 }
0x13b8   : > { %v6196_v14 = vsel %vm3481_vm0, %v20261_v59, 0.0 }
0x13d4   : > { %6188 = vadd.xlane.f32.xlu0 %v6187_v7 }
0x13d8   : > { %6191 = vadd.xlane.f32.xlu1 %v6190_v61  ;;  %6194 = vadd.xlane.f32.xlu0 %v6193_v29 }
0x13dc   : > { %6197 = vadd.xlane.f32.xlu0 %v6196_v14 }
0x1424   : > { %v6183_v46 = vpop.xlane.xlu0 %6182 }
0x1428   : > { %v6186_v28 = vpop.xlane.xlu1 %6185  ;;  %v6177_v47 = vpop.xlane.xlu0 %6176 }
0x1429   : > { %17292 = vrcp.f32 %v6186_v28  ;;  %v16282_v28 = vld [vmem:[%s18448_s18 + $0x1e4] ss:$12 sps:$4 sm:$0xff]  }
0x142a   : > { %17294 = vrcp.f32 %v6177_v47  ;;  %v16283_v47 = vld [vmem:[%s18448_s18 + $0x1e8] ss:$12 sps:$4 sm:$0xff]  }
0x142b   : > { %17296 = vrcp.f32 %v6183_v46  ;;  %v16280_v46 = vld [vmem:[%s18448_s18 + $0x1e0] ss:$12 sps:$4 sm:$0xff]  }
0x142c   : > { %v6180_v42 = vpop.xlane.xlu1 %6179  ;;  %v6230_v15 = vpop.permute.xlu0 %6229 }
0x142d   : > { %17298 = vrcp.f32 %v6180_v42  ;;  %15590 = vmatprep.subr.bf16.mxu1 %v6230_v15 }
0x142e   : > { %15591 = vmatpush3.bf16.msra.mxu1 %v6230_v15 }
0x142f   : > { %15592 = vmatprep.subr.bf16.mxu1 %v6228_v36 }
0x1430   : > { %v6224_v34 = vpop.permute.xlu1 %6223 }
0x1432   : > { %15593 = vmatpush3.bf16.msra.mxu1 %v6228_v36 }
0x1433   : > { %15594 = vmatprep.subr.bf16.mxu1 %v6226_v50 }
0x1436   : > { %v17293_v16 = vpop.eup %17292  ;;  %15595 = vmatpush3.bf16.msra.mxu1 %v6226_v50  ;;  %v16278_v50 = vld [vmem:[%s18448_s18 + $0x1fc] ss:$12 sps:$4 sm:$0xff]  }
0x1437   : > { %v17295_v43 = vpop.eup %17294  ;;  %15596 = vmatprep.subr.bf16.mxu1 %v6224_v34  ;;  %v6210_v13 = vmul.f32 %v17293_v16, %v20235_v11 }
0x1438   : > { %v17297_v26 = vpop.eup %17296  ;;  %v6207_v1 = vmul.f32 %v17295_v43, %v20233_v8 }
0x1439   : > { %v6209_v41 = vmul.f32 %v17297_v26, %v20229_v51 }
0x143a   : > { %v17299_v37 = vpop.eup %17298  ;;  %15597 = vmatpush3.bf16.msra.mxu1 %v6224_v34 }
0x143b   : > { %v6208_v33 = vmul.f32 %v17299_v37, %v20239_v53  ;;  %6400 = vmatprep.subr.bf16.mxu1 %v16270_v20  ;;  %v6216_v25 = vpack.c.bf16 %v6210_v13, %v6209_v41  ;;  %v22962_v41 = vld [vmem:[#allocation81_spill] sm:$0xff] }
0x143d   : > { %v6215_v60 = vpack.c.bf16 %v6208_v33, %v6207_v1 }
0x143f   : > { %15598 = vmatprep.mubr.msk.bf16.mxu1 %vm3481_vm0, %v6215_v60  ;;  %v22963_v60 = vld [vmem:[#allocation60_spill] sm:$0xff] }
0x1440   : > { %15599 = vmatmul.mubr.msk.bf16.vlgmr.msra.gmra.mxu1 %vm3481_vm0, %v6216_v25  ;;  %v22964_v25 = vld [vmem:[#allocation55_spill] sm:$0xff] }
0x1441   : > { %6401 = vmatpush1.bf16.msra.mxu1 %v16268_v17  ;;  %v4377_v17 = vadd.f32 %v22963_v60, %v22962_v41  ;;  %v17354_v41 = vld [vmem:[#allocation2 + $0x10] sm:$0xff] }
0x1442   : > { %6402 = vmatprep.subr.bf16.mxu1 %v16274_v44  ;;  %v22965_v44 = vld [vmem:[#allocation63_spill] sm:$0xff] }
0x1445   : > { %6403 = vmatpush1.bf16.msra.mxu1 %v16272_v62  ;;  %v4447_v62 = vadd.f32 %v22965_v44, %v22964_v25  ;;  %v17355_v25 = vld [vmem:[#allocation2 + $0x48] sm:$0xff] }
0x1446   : > { %6404 = vmatprep.subr.bf16.mxu1 %v16278_v50 }
0x145d   : > { %v6189_v11 = vpop.xlane.xlu0 %6188 }
0x145e   : > { %17300 = vrcp.f32 %v6189_v11  ;;  %v22966_v11 = vld [vmem:[#allocation87_spill] sm:$0xff] }
0x1461   : > { %v6192_v8 = vpop.xlane.xlu1 %6191  ;;  %v6195_v53 = vpop.xlane.xlu0 %6194 }
0x1462   : > { %17302 = vrcp.f32 %v6192_v8  ;;  %v4954_v8 = vadd.f32 %v22966_v11, %v4377_v17  ;;  %v22977_v11 = vld [vmem:[#allocation89_spill] sm:$0xff] }
0x1463   : > { %17304 = vrcp.f32 %v6195_v53 }
0x1465   : > { %v6198_v51 = vpop.xlane.xlu0 %6197 }
0x1466   : > { %17306 = vrcp.f32 %v6198_v51  ;;  %v6578_v51 = vld [vmem:[%s774_s20] sm:$0x7] }
0x146b   : > { %v17301_v40 = vpop.eup %17300 }
0x146c   : > { %v6211_v2 = vmul.f32 %v17301_v40, %v20249_v38  ;;  %v16276_v38 = vld [vmem:[%s18448_s18 + $0x1f8] ss:$12 sps:$4 sm:$0xff]  }
0x146d   : > { %6405 = vmatpush1.bf16.msra.mxu1 %v16276_v38 }
0x146e   : > { %6406 = vmatprep.subr.bf16.mxu1 %v16282_v28 }
0x146f   : > { %v17303_v4 = vpop.eup %17302 }
0x1470   : > { %v6212_v7 = vmul.f32 %v17303_v4, %v20251_v24  ;;  %v17305_v61 = vpop.eup %17304  ;;  %v16279_v24 = vld [vmem:[%s18448_s18 + $0x200] ss:$12 sps:$4 sm:$0xff]  }
0x1471   : > { %v6213_v5 = vmul.f32 %v17305_v61, %v20255_v39  ;;  %15610 = vmatprep.subr.bf16.mxu0 %v16279_v24  ;;  %6407 = vmatpush1.bf16.msra.mxu1 %v16280_v46  ;;  %v20290_v39 = vpop.f32.mrf.mxu1  ;;  %v22968_v61 = vld [vmem:[#allocation79_spill] sm:$0xff] }
0x1472   : > { %v6217_v29 = vpack.c.bf16 %v6212_v7, %v6211_v2  ;;  %15611 = vmatpush3.bf16.msra.mxu0 %v16279_v24  ;;  %v22967_v2 = vld [vmem:[#allocation88_spill] sm:$0xff] }
0x1473   : > { %v17307_v14 = vpop.eup %17306  ;;  %15612 = vmatprep.subr.bf16.mxu0 %v16283_v47  ;;  %v4955_v7 = vadd.f32 %v22967_v2, %v4447_v62  ;;  %v22970_v24 = vld [vmem:[#allocation52_spill] sm:$0xff]  ;;  %v17356_v2 = vld [vmem:[#allocation2 + $0x60] sm:$0xff] }
0x1474   : > { %15602 = vmatprep.mubr.msk.bf16.mxu1 %vm3481_vm0, %v6217_v29  ;;  %v6214_v63 = vmul.f32 %v17307_v14, %v20261_v59  ;;  %v5494_v29 = vadd.f32 %v22968_v61, %v4954_v8  ;;  %v20319_v46 = vrot.slane %v6578_v51, %v22970_v24 }
0x1476   : > { %v6218_v36 = vpack.c.bf16 %v6214_v63, %v6213_v5  ;;  %15613 = vmatpush3.bf16.msra.mxu0 %v16283_v47  ;;  %v17352_v5 = vld [vmem:[#allocation2 + $0xb0] sm:$0xff]  ;;  %v22971_v47 = vld [vmem:[#allocation80_spill] sm:$0xff] }
0x1478   : > { %15603 = vmatmul.mubr.msk.bf16.gmra.mxu1 %vm3481_vm0, %v6218_v36  ;;  %v22969_v36 = vld [vmem:[#allocation54_spill] sm:$0xff] }
0x1479   : > { %6424 = vmatprep.mubr.bf16.mxu1 %v22906_v49  ;;  %v20315_v38 = vrot.slane %v6578_v51, %v22969_v36 }
0x1500   : > { %v15600_v59 = vpop.f32.mrf.mxu1 }
0x1502   : > { %v6281_v42 = vpop.f32.mrf.mxu1 }
0x1504   : > { %v15601_v15 = vpop.f32.mrf.mxu1 }
0x1505   : > { %v6313_v43 = vpack.c.bf16 %v15601_v15, %v15600_v59  ;;  %v5495_v59 = vadd.f32 %v22971_v47, %v4955_v7  ;;  %v5994_v15 = vadd.f32 %v20163_v48, %v5494_v29  ;;  %v17358_v47 = vld [vmem:[#allocation2 + $0x40] sm:$0xff] }
0x1506   : > { %v6284_v16 = vpop.f32.mrf.mxu1 }
0x1507   : > { %v6312_v34 = vpack.c.bf16 %v6284_v16, %v6281_v42  ;;  %v17353_v16 = vld [vmem:[#allocation2] sm:$0xff] }
0x1509   : > { %14187 = vmatmul.mubr.msk.bf16.vlgmr.msra.gmra.mxu1 %vm3481_vm0, %v6312_v34  ;;  %15614 = vmatprep.mubr.msk.bf16.mxu0 %vm3481_vm0, %v6312_v34 }
0x150a   : > { %15615 = vmatmul.mubr.msk.bf16.vlgmr.msra.gmra.mxu0 %vm3481_vm0, %v6313_v43  ;;  %6434 = vmatprep.mubr.bf16.mxu1 %v22906_v49 }
0x1511   : > { %14188 = vmatmul.mubr.msk.bf16.gmra.mxu1 %vm3481_vm0, %v6313_v43 }
0x1512   : > { %6444 = vmatprep.mubr.bf16.mxu1 %v22906_v49 }
0x1538   : > { %v15604_v20 = vpop.f32.mrf.mxu1 }
0x153a   : > { %v6297_v26 = vpop.f32.mrf.mxu1 }
0x153c   : > { %v15605_v37 = vpop.f32.mrf.mxu1 }
0x153d   : > { %v6315_v33 = vpack.c.bf16 %v15605_v37, %v15604_v20  ;;  %v22973_v37 = vld [vmem:[#allocation59_spill] sm:$0xff] }
0x153e   : > { %v6300_v13 = vpop.f32.mrf.mxu1 }
0x153f   : > { %v6314_v1 = vpack.c.bf16 %v6300_v13, %v6297_v26  ;;  %v22972_v26 = vld [vmem:[#allocation58_spill] sm:$0xff] }
0x1540   : > { %v4387_v13 = vadd.f32 %v22973_v37, %v22972_v26  ;;  %v17360_v37 = vld [vmem:[#allocation2 + $0x78] sm:$0xff] }
0x1541   : > { %14189 = vmatmul.mubr.msk.bf16.gmra.mxu1 %vm3481_vm0, %v6314_v1  ;;  %15618 = vmatprep.mubr.msk.bf16.mxu0 %vm3481_vm0, %v6314_v1  ;;  %v22974_v1 = vld [vmem:[#allocation53_spill] sm:$0xff] }
0x1542   : > { %15619 = vmatmul.mubr.msk.bf16.gmra.mxu0 %vm3481_vm0, %v6315_v33  ;;  %6454 = vmatprep.mubr.bf16.mxu1 %v22906_v49  ;;  %v4960_v8 = vadd.f32 %v22977_v11, %v4387_v13 }
0x1543   : > { %8778 = vmatprep.mubr.bf16.mxu0 %v22906_v49 }
0x1549   : > { %14190 = vmatmul.mubr.msk.bf16.gmra.mxu1 %vm3481_vm0, %v6315_v33  ;;  %v20329_v33 = vrot.slane %v6578_v51, %v22974_v1 }
0x15c9   : > { %v6426_v53 = vpop.f32.mrf.mxu1 }
0x15ca   : > { %v6530_v40 = vadd.f32 %v6426_v53, %v20146_v18  ;;  %v15616_v4 = vpop.f32.mrf.mxu0 }
0x15cb   : > { %v6428_v14 = vpop.f32.mrf.mxu1 }
0x15cc   : > { %v6554_v63 = vadd.f32 %v17352_v5, %v6530_v40  ;;  %v6531_v50 = vadd.f32 %v6428_v14, %v20152_v56  ;;  %v6499_v28 = vpop.f32.mrf.mxu0  ;;  %v5995_v56 = vadd.f32 %v20165_v32, %v5495_v59  ;;  %v6538_v32 = vadd.f32 %v15616_v4, %v20149_v3  ;;  %v22979_v14 = vld [vmem:[#allocation78_spill] sm:$0xff] }
0x15cd   : > { %v6532_v18 = vadd.f32 %v6499_v28, %v20155_v12  ;;  %v6430_v42 = vpop.f32.mrf.mxu1  ;;  %v5500_v5 = vadd.f32 %v22979_v14, %v4960_v8  ;;  %v22990_v14 = vld [vmem:[#allocation64_spill] sm:$0xff] }
0x15ce   : > { %v6555_v34 = vadd.f32 %v17353_v16, %v6531_v50  ;;  %v6533_v43 = vadd.f32 %v6430_v42, %v20158_v22  ;;  %v15617_v20 = vpop.f32.mrf.mxu0  ;;  %v20332_v12 = vadd.f32 %v20315_v38, %v6554_v63  ;;  %v17357_v50 = vld [vmem:[#allocation2 + $0x28] sm:$0xff] }
0x15cf   : > { %v6556_v60 = vadd.f32 %v17354_v41, %v6532_v18  ;;  %v6432_v17 = vpop.f32.mrf.mxu1  ;;  %v6000_v42 = vadd.f32 %v20182_v45, %v5500_v5  ;;  %v6541_v26 = vadd.f32 %v15617_v20, %v20161_v10 }
0x15d0   : > { %22975 = vst [vmem:[#allocation75_spill] sm:$0xff] %v20332_v12  ;;  %v20335_v48 = vadd.f32 %v20319_v46, %v6555_v34  ;;  %v6557_v22 = vadd.f32 %v17355_v25, %v6533_v43  ;;  %v6534_v44 = vadd.f32 %v6432_v17, %v5994_v15  ;;  %v6502_v62 = vpop.f32.mrf.mxu0  ;;  %v17359_v15 = vld [vmem:[#allocation2 + $0x88] sm:$0xff]  ;;  %v17361_v17 = vld [vmem:[#allocation2 + $0x90] sm:$0xff] }
0x15d1   : > { %v20340_v53 = vadd.f32 %v20329_v33, %v6556_v60  ;;  %v6535_v51 = vadd.f32 %v6502_v62, %v5995_v56  ;;  %v6436_v40 = vpop.f32.mrf.mxu1  ;;  %v6562_v16 = vadd.f32 %v17359_v15, %v6538_v32  ;;  %v17363_v62 = vld [vmem:[#allocation2 + $0x18] sm:$0xff]  ;;  %v22994_v15 = vld [vmem:[#allocation85_spill] sm:$0xff] }
0x15d2   : > { %22976 = vst [vmem:[#allocation84_spill] sm:$0xff] %v20335_v48  ;;  %v6558_v7 = vadd.f32 %v17356_v2, %v6534_v44  ;;  %v6536_v61 = vadd.f32 %v6436_v40, %v20168_v31  ;;  %v6621_v29 = vadd.f32 %v20335_v48, %v20332_v12  ;;  %v20347_v63 = vadd.f32 %v20315_v38, %v6557_v22 }
0x15d3   : > { %22978 = vst [vmem:[#allocation74_spill] sm:$0xff] %v20340_v53  ;;  %v6559_v28 = vadd.f32 %v17357_v50, %v6535_v51  ;;  %v6438_v3 = vpop.f32.mrf.mxu1  ;;  %v20370_v20 = vadd.f32 %v20329_v33, %v6562_v16  ;;  %v22991_v50 = vld [vmem:[#allocation57_spill] sm:$0xff] }
0x15d4   : > { %22980 = vst [vmem:[#allocation73_spill] sm:$0xff] %v20347_v63  ;;  %v20350_v4 = vadd.f32 %v20319_v46, %v6558_v7  ;;  %v6560_v59 = vadd.f32 %v17358_v47, %v6536_v61  ;;  %v6537_v18 = vadd.f32 %v6438_v3, %v20174_v58  ;;  %v6622_v31 = vadd.f32 %v6621_v29, %v20340_v53  ;;  %v22989_v29 = vld [vmem:[#allocation61_spill] sm:$0xff] }
0x15d5   : > { %v20356_v34 = vadd.f32 %v20329_v33, %v6559_v28  ;;  %v6440_v43 = vpop.f32.mrf.mxu1  ;;  %22985 = vst [vmem:[#allocation70_spill] sm:$0xff] %v20370_v20  ;;  %v4397_v5 = vadd.f32 %v22990_v14, %v22989_v29  ;;  %v22992_v28 = vld [vmem:[#allocation86_spill] sm:$0xff] }
0x15d6   : > { %22981 = vst [vmem:[#allocation82_spill] sm:$0xff] %v20350_v4  ;;  %v6561_v13 = vadd.f32 %v17360_v37, %v6537_v18  ;;  %v6539_v56 = vadd.f32 %v6440_v43, %v20180_v35  ;;  %6623 = vadd.xlane.f32.xlu0 %v6622_v31  ;;  %v6625_v58 = vadd.f32 %v20350_v4, %v20347_v63  ;;  %v17362_v35 = vld [vmem:[#allocation2 + $0x98] sm:$0xff]  ;;  %v22995_v37 = vld [vmem:[#allocation77_spill] sm:$0xff] }
0x15d7   : > { %22982 = vst [vmem:[#allocation72_spill] sm:$0xff] %v20356_v34  ;;  %v20363_v41 = vadd.f32 %v20315_v38, %v6560_v59  ;;  %v6442_v45 = vpop.f32.mrf.mxu1  ;;  %v6565_v44 = vadd.f32 %v17362_v35, %v6541_v26  ;;  %v4463_v3 = vadd.f32 %v22992_v28, %v22991_v50  ;;  %v22993_v59 = vld [vmem:[#allocation90_spill] sm:$0xff]  ;;  %v17368_v28 = vld [vmem:[#allocation2 + $0xa0] sm:$0xff] }
0x15d8   : > { %v20366_v60 = vadd.f32 %v20319_v46, %v6561_v13  ;;  %v6563_v25 = vadd.f32 %v17361_v17, %v6539_v56  ;;  %v6540_v22 = vadd.f32 %v6442_v45, %v6000_v42  ;;  %v6626_v10 = vadd.f32 %v6625_v58, %v20356_v34  ;;  %v17364_v56 = vld [vmem:[#allocation2 + $0x38] sm:$0xff] }
0x15d9   : > { %22983 = vst [vmem:[#allocation83_spill] sm:$0xff] %v20363_v41  ;;  %v20382_v2 = vadd.f32 %v20329_v33, %v6565_v44  ;;  %v4966_v18 = vadd.f32 %v22993_v59, %v4397_v5  ;;  %v4967_v16 = vadd.f32 %v22994_v15, %v4463_v3  ;;  %v22996_v44 = vld [vmem:[#allocation56_spill] sm:$0xff]  ;;  %v23001_v59 = vld [vmem:[#allocation91_spill] sm:$0xff] }
0x15da   : > { %22984 = vst [vmem:[#allocation71_spill] sm:$0xff] %v20366_v60  ;;  %v6564_v11 = vadd.f32 %v17363_v62, %v6540_v22  ;;  %6627 = vadd.xlane.f32.xlu1 %v6626_v10  ;;  %v6629_v8 = vadd.f32 %v20366_v60, %v20363_v41  ;;  %v20375_v32 = vadd.f32 %v20315_v38, %v6563_v25  ;;  %v17365_v22 = vld [vmem:[#allocation2 + $0x80] sm:$0xff]  ;;  %v22997_v62 = vld [vmem:[#allocation62_spill] sm:$0xff] }
0x15db   : > { %22988 = vst [vmem:[#allocation66_spill] sm:$0xff] %v20382_v2  ;;  %v5506_v13 = vadd.f32 %v22995_v37, %v4966_v18  ;;  %v5507_v25 = vadd.f32 %v20121_v23, %v4967_v16  ;;  %v17367_v23 = vld [vmem:[#allocation2 + $0x70] sm:$0xff]  ;;  %v17370_v16 = vld [vmem:[#allocation2 + $0xa8] sm:$0xff] }
0x15dc   : > { %22986 = vst [vmem:[#allocation69_spill] sm:$0xff] %v20375_v32  ;;  %v20378_v51 = vadd.f32 %v20319_v46, %v6564_v11  ;;  %v6630_v40 = vadd.f32 %v6629_v8, %v20370_v20  ;;  %v4407_v11 = vadd.f32 %v22997_v62, %v22996_v44  ;;  %v17366_v8 = vld [vmem:[#allocation2 + $0x50] sm:$0xff] }
0x15de   : > { %22987 = vst [vmem:[#allocation65_spill] sm:$0xff] %v20378_v51  ;;  %6631 = vadd.xlane.f32.xlu0 %v6630_v40  ;;  %v6633_v7 = vadd.f32 %v20378_v51, %v20375_v32 }
0x15e0   : > { %v6634_v61 = vadd.f32 %v6633_v7, %v20382_v2 }
0x15e2   : > { %6635 = vadd.xlane.f32.xlu1 %v6634_v61 }
0x1601   : > { %v6446_v47 = vpop.f32.mrf.mxu1 }
0x1602   : > { %v6542_v31 = vadd.f32 %v6446_v47, %v20188_v54  ;;  %v15620_v42 = vpop.f32.mrf.mxu0 }
0x1603   : > { %v6550_v43 = vadd.f32 %v15620_v42, %v20171_v21  ;;  %v6448_v26 = vpop.f32.mrf.mxu1  ;;  %v6006_v21 = vadd.f32 %v20196_v57, %v5506_v13  ;;  %v23003_v13 = vld [vmem:[#allocation76_spill] sm:$0xff] }
0x1604   : > { %v6566_v58 = vadd.f32 %v17364_v56, %v6542_v31  ;;  %v6543_v45 = vadd.f32 %v6448_v26, %v20191_v55  ;;  %v6515_v17 = vpop.f32.mrf.mxu0  ;;  %v6007_v55 = vadd.f32 %v20290_v39, %v5507_v25  ;;  %v4972_v39 = vadd.f32 %v23001_v59, %v4407_v11  ;;  %v17369_v31 = vld [vmem:[#allocation2 + $0x8] sm:$0xff] }
0x1605   : > { %v6574_v10 = vadd.f32 %v17365_v22, %v6550_v43  ;;  %v6544_v35 = vadd.f32 %v6515_v17, %v20177_v30  ;;  %v6450_v54 = vpop.f32.mrf.mxu1  ;;  %v17371_v17 = vld [vmem:[#allocation2 + $0x68] sm:$0xff] }
0x1606   : > { %v6567_v40 = vadd.f32 %v17366_v8, %v6543_v45  ;;  %v6545_v7 = vadd.f32 %v6450_v54, %v20194_v52  ;;  %v15621_v61 = vpop.f32.mrf.mxu0  ;;  %v20409_v50 = vadd.f32 %v20315_v38, %v6566_v58  ;;  %v5512_v56 = vadd.f32 %v23003_v13, %v4972_v39  ;;  %v17373_v8 = vld [vmem:[#allocation2 + $0x58] sm:$0xff]  ;;  %v16298_v13 = vld [vmem:[%s18462_s13 + $0x124] ss:$48 sps:$4 sm:$0xff]  }
0x1607   : > { %v20405_v29 = vadd.f32 %v20329_v33, %v6574_v10  ;;  %v6568_v14 = vadd.f32 %v17367_v23, %v6544_v35  ;;  %v6553_v30 = vadd.f32 %v15621_v61, %v20185_v6  ;;  %v6452_v5 = vpop.f32.mrf.mxu1  ;;  %v17372_v35 = vld [vmem:[#allocation2 + $0x30] sm:$0xff] }
0x1608   : > { %22999 = vst [vmem:[#allocation68_spill] sm:$0xff] %v20409_v50  ;;  %v20412_v57 = vadd.f32 %v20319_v46, %v6567_v40  ;;  %v6569_v3 = vadd.f32 %v17368_v28, %v6545_v7  ;;  %v6546_v52 = vadd.f32 %v6452_v5, %v6006_v21  ;;  %v6518_v47 = vpop.f32.mrf.mxu0  ;;  %v6012_v21 = vadd.f32 %v20207_v19, %v5512_v56  ;;  %v16296_v56 = vld [vmem:[%s18462_s13 + $0x120] ss:$48 sps:$4 sm:$0xff]  }
0x1609   : > { %22998 = vst [vmem:[#allocation67_spill] sm:$0xff] %v20405_v29  ;;  %v20416_v18 = vadd.f32 %v20329_v33, %v6568_v14  ;;  %v6577_v42 = vadd.f32 %v17369_v31, %v6553_v30  ;;  %v6547_v15 = vadd.f32 %v6518_v47, %v6007_v55  ;;  %v6456_v6 = vpop.f32.mrf.mxu1  ;;  %v16284_v31 = vld [vmem:[%s18462_s13 + $0x2a0] ss:$48 sps:$4 sm:$0xff]  }
0x160a   : > { %23000 = vst [vmem:[#allocation81_spill] sm:$0xff] %v20412_v57  ;;  %v6570_v43 = vadd.f32 %v17370_v16, %v6546_v52  ;;  %v6548_v26 = vadd.f32 %v6456_v6, %v20199_v0  ;;  %v6637_v37 = vadd.f32 %v20412_v57, %v20409_v50  ;;  %v20423_v58 = vadd.f32 %v20315_v38, %v6569_v3  ;;  %v16308_v6 = vld [vmem:[%s18462_s13 + $0x8a0] ss:$48 sps:$4 sm:$0xff]   ;;  %v16310_v16 = vld [vmem:[%s18462_s13 + $0x8a4] ss:$48 sps:$4 sm:$0xff]  }
0x160b   : > { %23002 = vst [vmem:[#allocation60_spill] sm:$0xff] %v20416_v18  ;;  %v20426_v45 = vadd.f32 %v20329_v33, %v6577_v42  ;;  %v6571_v25 = vadd.f32 %v17371_v17, %v6547_v15  ;;  %v6458_v22 = vpop.f32.mrf.mxu1  ;;  %v16286_v42 = vld [vmem:[%s18462_s13 + $0x2a4] ss:$48 sps:$4 sm:$0xff]   ;;  %8746 = vmatprep.subr.bf16.mxu0 %v16310_v16 }
0x160c   : > { %23004 = vst [vmem:[#allocation55_spill] sm:$0xff] %v20423_v58  ;;  %v20429_v10 = vadd.f32 %v20319_v46, %v6570_v43  ;;  %v6572_v54 = vadd.f32 %v17372_v35, %v6548_v26  ;;  %v6549_v0 = vadd.f32 %v6458_v22, %v20202_v27  ;;  %v6638_v44 = vadd.f32 %v6637_v37, %v20416_v18  ;;  %v16292_v15 = vld [vmem:[%s18462_s13 + $0x1e4] ss:$48 sps:$4 sm:$0xff]   ;;  %v16290_v43 = vld [vmem:[%s18462_s13 + $0x1e0] ss:$48 sps:$4 sm:$0xff]  }
0x160d   : > { %23005 = vst [vmem:[#allocation63_spill] sm:$0xff] %v20426_v45  ;;  %v20434_v62 = vadd.f32 %v20329_v33, %v6571_v25  ;;  %v6460_v11 = vpop.f32.mrf.mxu1  ;;  %v17374_v33 = vld [vmem:[#allocation2 + $0xb8] sm:$0xff]  ;;  %8673 = vmatprep.subr.bf16.mxu1 %v16286_v42  ;;  %v16295_v26 = vld [vmem:[%s18462_s13 + $0x184] ss:$48 sps:$4 sm:$0xff]   ;;  %8747 = vmatpush1.bf16.msra.mxu0 %v16308_v6 }
0x160e   : > { %23006 = vst [vmem:[#allocation87_spill] sm:$0xff] %v20429_v10  ;;  %v6573_v40 = vadd.f32 %v17373_v8, %v6549_v0  ;;  %v6551_v7 = vadd.f32 %v6460_v11, %v20205_v9  ;;  %6639 = vadd.xlane.f32.xlu0 %v6638_v44  ;;  %v6641_v61 = vadd.f32 %v20429_v10, %v20423_v58  ;;  %v17375_v9 = vld [vmem:[#allocation2 + $0x20] sm:$0xff] }
0x160f   : > { %23007 = vst [vmem:[#allocation88_spill] sm:$0xff] %v20434_v62  ;;  %v20441_v55 = vadd.f32 %v20315_v38, %v6572_v54  ;;  %v6462_v27 = vpop.f32.mrf.mxu1  ;;  %8674 = vmatpush1.bf16.msra.mxu1 %v16284_v31  ;;  %v16293_v37 = vld [vmem:[%s18462_s13 + $0x180] ss:$48 sps:$4 sm:$0xff]   ;;  %v16301_v17 = vld [vmem:[%s18462_s13 + $0xc4] ss:$48 sps:$4 sm:$0xff]  }
0x1610   : > { %v20444_v23 = vadd.f32 %v20319_v46, %v6573_v40  ;;  %v6575_v14 = vadd.f32 %v17374_v33, %v6551_v7  ;;  %v6552_v19 = vadd.f32 %v6462_v27, %v6012_v21  ;;  %v6642_v30 = vadd.f32 %v6641_v61, %v20434_v62  ;;  %v16299_v25 = vld [vmem:[%s18462_s13 + $0xc0] ss:$48 sps:$4 sm:$0xff]   ;;  %v16304_v22 = vld [vmem:[%s18462_s13 + $0x64] ss:$48 sps:$4 sm:$0xff]  }
0x1611   : > { %23008 = vst [vmem:[#allocation79_spill] sm:$0xff] %v20441_v55  ;;  %v16302_v35 = vld [vmem:[%s18462_s13 + $0x60] ss:$48 sps:$4 sm:$0xff]   ;;  %v16307_v54 = vld [vmem:[%s18462_s13 + $0x4] ss:$48 sps:$4 sm:$0xff]  }
0x1612   : > { %23009 = vst [vmem:[#allocation80_spill] sm:$0xff] %v20444_v23  ;;  %v6576_v5 = vadd.f32 %v17375_v9, %v6552_v19  ;;  %6643 = vadd.xlane.f32.xlu1 %v6642_v30  ;;  %v6645_v28 = vadd.f32 %v20444_v23, %v20441_v55  ;;  %v20450_v3 = vadd.f32 %v20315_v38, %v6575_v14  ;;  %v16289_v38 = vld [vmem:[%s18462_s13 + $0x244] ss:$48 sps:$4 sm:$0xff]   ;;  %v16305_v0 = vld [vmem:[%s18462_s13] ss:$48 sps:$4 sm:$0xff]  }
0x1613   : > { %8675 = vmatprep.subr.bf16.mxu1 %v16289_v38  ;;  %v16313_v44 = vld [vmem:[%s18462_s13 + $0x5a4] ss:$48 sps:$4 sm:$0xff]   ;;  %v16311_v11 = vld [vmem:[%s18462_s13 + $0x5a0] ss:$48 sps:$4 sm:$0xff]  }
0x1614   : > { %23010 = vst [vmem:[#allocation58_spill] sm:$0xff] %v20450_v3  ;;  %v20453_v52 = vadd.f32 %v20319_v46, %v6576_v5  ;;  %v6646_v47 = vadd.f32 %v6645_v28, %v20405_v29  ;;  %v16287_v46 = vld [vmem:[%s18462_s13 + $0x240] ss:$48 sps:$4 sm:$0xff]  }
0x1615   : > { %8676 = vmatpush1.bf16.msra.mxu1 %v16287_v46 }
0x1616   : > { %23011 = vst [vmem:[#allocation59_spill] sm:$0xff] %v20453_v52  ;;  %6647 = vadd.xlane.f32.xlu0 %v6646_v47  ;;  %v6649_v59 = vadd.f32 %v20453_v52, %v20450_v3  ;;  %8677 = vmatprep.subr.bf16.mxu1 %v16292_v15 }
0x1618   : > { %v6650_v39 = vadd.f32 %v6649_v59, %v20426_v45 }
0x1619   : > { %8678 = vmatpush1.bf16.msra.mxu1 %v16290_v43 }
0x161a   : > { %6651 = vadd.xlane.f32.xlu1 %v6650_v39  ;;  %8679 = vmatprep.subr.bf16.mxu1 %v16295_v26 }
0x161d   : > { %8680 = vmatpush1.bf16.msra.mxu1 %v16293_v37 }
0x161e   : > { %8681 = vmatprep.subr.bf16.mxu1 %v16298_v13 }
0x1621   : > { %8682 = vmatpush1.bf16.msra.mxu1 %v16296_v56 }
0x1622   : > { %8683 = vmatprep.subr.bf16.mxu1 %v16301_v17 }
0x1625   : > { %8684 = vmatpush1.bf16.msra.mxu1 %v16299_v25 }
0x1626   : > { %8685 = vmatprep.subr.bf16.mxu1 %v16304_v22 }
0x1629   : > { %8686 = vmatpush1.bf16.msra.mxu1 %v16302_v35 }
0x162a   : > { %8687 = vmatprep.subr.bf16.mxu1 %v16307_v54 }
0x162d   : > { %8688 = vmatpush1.bf16.msra.mxu1 %v16305_v0 }
0x162e   : > { %8689 = vmatprep.subr.bf16.mxu1 %v16313_v44 }
0x1631   : > { %8690 = vmatpush2.bf16.msra.mxu1 %v16311_v11 }
0x165f   : > { %v6624_v21 = vpop.xlane.xlu0 %6623 }
0x1660   : > { %v6653_v8 = vmul.f32 0.0026041667, %v6624_v21 }
0x1662   : > { %v20480_v40 = vsub.f32 %v20332_v12, %v6653_v8  ;;  %v20483_v7 = vsub.f32 %v20335_v48, %v6653_v8  ;;  %v20486_v61 = vsub.f32 %v20340_v53, %v6653_v8  ;;  %v16721_v53 = vld [vmem:[%s18471_s17 + $0xac] ss:$12 sps:$4 sm:$0xff]   ;;  %v16805_v48 = vld [vmem:[%s18471_s17 + $0xdc] ss:$12 sps:$4 sm:$0xff]  }
0x1663   : > { %v6628_v27 = vpop.xlane.xlu1 %6627 }
0x1664   : > { %v6685_v33 = vmul.f32 %v20480_v40, %v20480_v40  ;;  %v6686_v14 = vmul.f32 %v20483_v7, %v20483_v7  ;;  %v6654_v19 = vmul.f32 0.0026041667, %v6628_v27  ;;  %v6687_v30 = vmul.f32 %v20486_v61, %v20486_v61 }
0x1666   : > { %v20495_v9 = vsub.f32 %v20347_v63, %v6654_v19  ;;  %v20498_v5 = vsub.f32 %v20350_v4, %v6654_v19  ;;  %v20501_v28 = vsub.f32 %v20356_v34, %v6654_v19  ;;  %v6709_v47 = vadd.f32 %v6686_v14, %v6685_v33  ;;  %v16314_v14 = vld [vmem:[%s18462_s13 + $0x840] ss:$48 sps:$4 sm:$0xff]   ;;  %v16316_v19 = vld [vmem:[%s18462_s13 + $0x844] ss:$48 sps:$4 sm:$0xff]   ;;  %v16799_v4 = vld [vmem:[%s18471_s17 + $0xf4] ss:$12 sps:$4 sm:$0xff]  }
0x1667   : > { %v6632_v59 = vpop.xlane.xlu0 %6631  ;;  %8748 = vmatprep.subr.bf16.mxu0 %v16316_v19  ;;  %v16355_v19 = vld [vmem:[%s18462_s13 + $0x304] ss:$48 sps:$4 sm:$0xff]  }
0x1668   : > { %v6688_v39 = vmul.f32 %v20495_v9, %v20495_v9  ;;  %v6689_v31 = vmul.f32 %v20498_v5, %v20498_v5  ;;  %v6655_v42 = vmul.f32 0.0026041667, %v6632_v59  ;;  %v6710_v38 = vadd.f32 %v6709_v47, %v6687_v30  ;;  %v16317_v30 = vld [vmem:[%s18462_s13 + $0x540] ss:$48 sps:$4 sm:$0xff]   ;;  %v16319_v47 = vld [vmem:[%s18462_s13 + $0x544] ss:$48 sps:$4 sm:$0xff]   ;;  %8749 = vmatpush1.bf16.msra.mxu0 %v16314_v14 }
0x1669   : > { %v6690_v46 = vmul.f32 %v20501_v28, %v20501_v28  ;;  %8691 = vmatprep.subr.bf16.mxu1 %v16319_v47  ;;  %v16320_v59 = vld [vmem:[%s18462_s13 + $0x7e0] ss:$48 sps:$4 sm:$0xff]   ;;  %v16352_v14 = vld [vmem:[%s18462_s13 + $0x604] ss:$48 sps:$4 sm:$0xff]  }
0x166a   : > { %v20510_v15 = vsub.f32 %v20363_v41, %v6655_v42  ;;  %v20513_v6 = vsub.f32 %v20366_v60, %v6655_v42  ;;  %v20516_v16 = vsub.f32 %v20370_v20, %v6655_v42  ;;  %6711 = vadd.xlane.f32.xlu0 %v6710_v38  ;;  %v6713_v43 = vadd.f32 %v6689_v31, %v6688_v39  ;;  %v16322_v39 = vld [vmem:[%s18462_s13 + $0x7e4] ss:$48 sps:$4 sm:$0xff]   ;;  %v16323_v31 = vld [vmem:[%s18462_s13 + $0x4e0] ss:$48 sps:$4 sm:$0xff]   ;;  %v16383_v20 = vld [vmem:[%s18462_s13 + $0x8a8] ss:$48 sps:$4 sm:$0xff]  }
0x166b   : > { %v6636_v26 = vpop.xlane.xlu1 %6635  ;;  %8692 = vmatpush2.bf16.msra.mxu1 %v16317_v30  ;;  %v16325_v42 = vld [vmem:[%s18462_s13 + $0x4e4] ss:$48 sps:$4 sm:$0xff]   ;;  %8750 = vmatprep.subr.bf16.mxu0 %v16322_v39  ;;  %v16326_v38 = vld [vmem:[%s18462_s13 + $0x780] ss:$48 sps:$4 sm:$0xff]  }
0x166c   : > { %v6691_v37 = vmul.f32 %v20510_v15, %v20510_v15  ;;  %v6692_v13 = vmul.f32 %v20513_v6, %v20513_v6  ;;  %v6656_v56 = vmul.f32 0.0026041667, %v6636_v26  ;;  %v6714_v17 = vadd.f32 %v6713_v43, %v6690_v46  ;;  %8693 = vmatprep.subr.bf16.mxu1 %v16325_v42  ;;  %8751 = vmatpush1.bf16.msra.mxu0 %v16320_v59  ;;  %v16328_v46 = vld [vmem:[%s18462_s13 + $0x784] ss:$48 sps:$4 sm:$0xff]   ;;  %v16329_v43 = vld [vmem:[%s18462_s13 + $0x480] ss:$48 sps:$4 sm:$0xff]  }
0x166d   : > { %v6693_v25 = vmul.f32 %v20516_v16, %v20516_v16  ;;  %v16331_v26 = vld [vmem:[%s18462_s13 + $0x484] ss:$48 sps:$4 sm:$0xff]   ;;  %8752 = vmatprep.subr.bf16.mxu0 %v16328_v46  ;;  %v16350_v30 = vld [vmem:[%s18462_s13 + $0x600] ss:$48 sps:$4 sm:$0xff]   ;;  %v16358_v59 = vld [vmem:[%s18462_s13 + $0x2ac] ss:$48 sps:$4 sm:$0xff]  }
0x166e   : > { %v20525_v22 = vsub.f32 %v20375_v32, %v6656_v56  ;;  %v20528_v35 = vsub.f32 %v20378_v51, %v6656_v56  ;;  %v20531_v54 = vsub.f32 %v20382_v2, %v6656_v56  ;;  %6715 = vadd.xlane.f32.xlu1 %v6714_v17  ;;  %v6717_v0 = vadd.f32 %v6692_v13, %v6691_v37  ;;  %v16332_v37 = vld [vmem:[%s18462_s13 + $0x720] ss:$48 sps:$4 sm:$0xff]   ;;  %v16334_v13 = vld [vmem:[%s18462_s13 + $0x724] ss:$48 sps:$4 sm:$0xff]  }
0x166f   : > { %8694 = vmatpush2.bf16.msra.mxu1 %v16323_v31  ;;  %v16335_v56 = vld [vmem:[%s18462_s13 + $0x420] ss:$48 sps:$4 sm:$0xff]   ;;  %v16337_v17 = vld [vmem:[%s18462_s13 + $0x424] ss:$48 sps:$4 sm:$0xff]  }
0x1670   : > { %v6694_v44 = vmul.f32 %v20525_v22, %v20525_v22  ;;  %v6695_v11 = vmul.f32 %v20528_v35, %v20528_v35  ;;  %v6718_v21 = vadd.f32 %v6717_v0, %v6693_v25  ;;  %v6696_v8 = vmul.f32 %v20531_v54, %v20531_v54  ;;  %8695 = vmatprep.subr.bf16.mxu1 %v16331_v26  ;;  %v16340_v25 = vld [vmem:[%s18462_s13 + $0x6c4] ss:$48 sps:$4 sm:$0xff]   ;;  %v16353_v47 = vld [vmem:[%s18462_s13 + $0x300] ss:$48 sps:$4 sm:$0xff]  }
0x1671   : > { %8753 = vmatpush1.bf16.msra.mxu0 %v16326_v38  ;;  %v16343_v0 = vld [vmem:[%s18462_s13 + $0x3c4] ss:$48 sps:$4 sm:$0xff]   ;;  %v16791_v41 = vld [vmem:[%s18471_s17 + $0x108] ss:$12 sps:$4 sm:$0xff]  }
0x1672   : > { %6719 = vadd.xlane.f32.xlu0 %v6718_v21  ;;  %v6721_v27 = vadd.f32 %v6695_v11, %v6694_v44  ;;  %8754 = vmatprep.subr.bf16.mxu0 %v16334_v13  ;;  %v16338_v44 = vld [vmem:[%s18462_s13 + $0x6c0] ss:$48 sps:$4 sm:$0xff]   ;;  %v16346_v21 = vld [vmem:[%s18462_s13 + $0x664] ss:$48 sps:$4 sm:$0xff]  }
0x1673   : > { %8696 = vmatpush2.bf16.msra.mxu1 %v16329_v43  ;;  %v16341_v11 = vld [vmem:[%s18462_s13 + $0x3c0] ss:$48 sps:$4 sm:$0xff]  }
0x1674   : > { %v6722_v33 = vadd.f32 %v6721_v27, %v6696_v8  ;;  %8697 = vmatprep.subr.bf16.mxu1 %v16337_v17  ;;  %v16349_v8 = vld [vmem:[%s18462_s13 + $0x364] ss:$48 sps:$4 sm:$0xff]   ;;  %v16344_v27 = vld [vmem:[%s18462_s13 + $0x660] ss:$48 sps:$4 sm:$0xff]  }
0x1675   : > { %8755 = vmatpush1.bf16.msra.mxu0 %v16332_v37 }
0x1676   : > { %6723 = vadd.xlane.f32.xlu1 %v6722_v33  ;;  %8756 = vmatprep.subr.bf16.mxu0 %v16340_v25  ;;  %v16347_v33 = vld [vmem:[%s18462_s13 + $0x360] ss:$48 sps:$4 sm:$0xff]  }
0x1677   : > { %8698 = vmatpush2.bf16.msra.mxu1 %v16335_v56 }
0x1678   : > { %8699 = vmatprep.subr.bf16.mxu1 %v16343_v0 }
0x1679   : > { %8757 = vmatpush1.bf16.msra.mxu0 %v16338_v44 }
0x167a   : > { %8758 = vmatprep.subr.bf16.mxu0 %v16346_v21 }
0x167b   : > { %8700 = vmatpush2.bf16.msra.mxu1 %v16341_v11 }
0x167c   : > { %8701 = vmatprep.subr.bf16.mxu1 %v16349_v8 }
0x167d   : > { %8759 = vmatpush1.bf16.msra.mxu0 %v16344_v27 }
0x167e   : > { %8760 = vmatprep.subr.bf16.mxu0 %v16352_v14 }
0x167f   : > { %8702 = vmatpush2.bf16.msra.mxu1 %v16347_v33 }
0x1680   : > { %8703 = vmatprep.subr.bf16.mxu1 %v16355_v19 }
0x1681   : > { %8761 = vmatpush1.bf16.msra.mxu0 %v16350_v30 }
0x1682   : > { %8819 = vmatprep.subr.bf16.mxu0 %v16358_v59 }
0x1683   : > { %8704 = vmatpush2.bf16.msra.mxu1 %v16353_v47 }
0x1697   : > { %v6640_v39 = vpop.xlane.xlu0 %6639 }
0x1698   : > { %v6657_v31 = vmul.f32 0.0026041667, %v6640_v39 }
0x169a   : > { %v20569_v42 = vsub.f32 %v20409_v50, %v6657_v31  ;;  %v20572_v38 = vsub.f32 %v20412_v57, %v6657_v31  ;;  %v20575_v46 = vsub.f32 %v20416_v18, %v6657_v31 }
0x169b   : > { %v6644_v43 = vpop.xlane.xlu1 %6643 }
0x169c   : > { %v6697_v26 = vmul.f32 %v20569_v42, %v20569_v42  ;;  %v6698_v37 = vmul.f32 %v20572_v38, %v20572_v38  ;;  %v6658_v13 = vmul.f32 0.0026041667, %v6644_v43  ;;  %v6699_v56 = vmul.f32 %v20575_v46, %v20575_v46 }
0x169e   : > { %v20584_v17 = vsub.f32 %v20423_v58, %v6658_v13  ;;  %v20587_v25 = vsub.f32 %v20429_v10, %v6658_v13  ;;  %v20590_v0 = vsub.f32 %v20434_v62, %v6658_v13  ;;  %v6725_v44 = vadd.f32 %v6698_v37, %v6697_v26  ;;  %v16385_v62 = vld [vmem:[%s18462_s13 + $0x8ac] ss:$48 sps:$4 sm:$0xff]  }
0x169f   : > { %v6648_v11 = vpop.xlane.xlu0 %6647  ;;  %8892 = vmatprep.subr.bf16.mxu1 %v16385_v62 }
0x16a0   : > { %v6700_v21 = vmul.f32 %v20584_v17, %v20584_v17  ;;  %v6701_v8 = vmul.f32 %v20587_v25, %v20587_v25  ;;  %v6659_v27 = vmul.f32 0.0026041667, %v6648_v11  ;;  %v6726_v33 = vadd.f32 %v6725_v44, %v6699_v56 }
0x16a1   : > { %v6702_v14 = vmul.f32 %v20590_v0, %v20590_v0 }
0x16a2   : > { %v20599_v19 = vsub.f32 %v20441_v55, %v6659_v27  ;;  %v20602_v30 = vsub.f32 %v20444_v23, %v6659_v27  ;;  %v20605_v47 = vsub.f32 %v20405_v29, %v6659_v27  ;;  %6727 = vadd.xlane.f32.xlu0 %v6726_v33  ;;  %v6729_v59 = vadd.f32 %v6701_v8, %v6700_v21 }
0x16a3   : > { %v6652_v39 = vpop.xlane.xlu1 %6651 }
0x16a4   : > { %v6703_v31 = vmul.f32 %v20599_v19, %v20599_v19  ;;  %v6704_v43 = vmul.f32 %v20602_v30, %v20602_v30  ;;  %v6660_v26 = vmul.f32 0.0026041667, %v6652_v39  ;;  %v6730_v37 = vadd.f32 %v6729_v59, %v6702_v14 }
0x16a5   : > { %v6705_v13 = vmul.f32 %v20605_v47, %v20605_v47 }
0x16a6   : > { %v20614_v56 = vsub.f32 %v20450_v3, %v6660_v26  ;;  %v20617_v44 = vsub.f32 %v20453_v52, %v6660_v26  ;;  %v20620_v11 = vsub.f32 %v20426_v45, %v6660_v26  ;;  %6731 = vadd.xlane.f32.xlu1 %v6730_v37  ;;  %v6733_v21 = vadd.f32 %v6704_v43, %v6703_v31 }
0x16a8   : > { %v6706_v8 = vmul.f32 %v20614_v56, %v20614_v56  ;;  %v6707_v27 = vmul.f32 %v20617_v44, %v20617_v44  ;;  %v6734_v33 = vadd.f32 %v6733_v21, %v6705_v13  ;;  %v6708_v14 = vmul.f32 %v20620_v11, %v20620_v11 }
0x16aa   : > { %6735 = vadd.xlane.f32.xlu0 %v6734_v33  ;;  %v6737_v59 = vadd.f32 %v6707_v27, %v6706_v8 }
0x16ac   : > { %v6738_v39 = vadd.f32 %v6737_v59, %v6708_v14  ;;  %v6619_v14 = vld [vmem:[%s783_s7] sm:$0x7] }
0x16ad   : > { %v20632_v59 = vrot.slane %v6619_v14, %v22970_v24 }
0x16ae   : > { %6739 = vadd.xlane.f32.xlu1 %v6738_v39  ;;  %v20635_v39 = vrot.slane %v6619_v14, %v22974_v1 }
0x16f3   : > { %v6712_v26 = vpop.xlane.xlu0 %6711 }
0x16f4   : > { %v6741_v37 = vmul.f32 0.0026041667, %v6712_v26 }
0x16f6   : > { %v6749_v31 = vadd.f32 1e-05, %v6741_v37  ;;  %v20643_v37 = vrot.slane %v6619_v14, %v22969_v36 }
0x16f7   : > { %v6716_v43 = vpop.xlane.xlu1 %6715 }
0x16f8   : > { %17308 = vrsqrt.f32 %v6749_v31  ;;  %v6742_v45 = vmul.f32 0.0026041667, %v6716_v43 }
0x16fa   : > { %v6750_v29 = vadd.f32 1e-05, %v6742_v45  ;;  %v6620_v45 = vld [vmem:[%s792_s27] sm:$0x7] }
0x16fb   : > { %v6720_v18 = vpop.xlane.xlu0 %6719 }
0x16fc   : > { %17310 = vrsqrt.f32 %v6750_v29  ;;  %v6743_v13 = vmul.f32 0.0026041667, %v6720_v18 }
0x16fe   : > { %v6751_v21 = vadd.f32 1e-05, %v6743_v13  ;;  %v20647_v13 = vrot.slane %v6620_v45, %v22970_v24 }
0x16ff   : > { %v6724_v33 = vpop.xlane.xlu1 %6723 }
0x1700   : > { %17312 = vrsqrt.f32 %v6751_v21  ;;  %v6744_v8 = vmul.f32 0.0026041667, %v6724_v33  ;;  %v20651_v33 = vrot.slane %v6620_v45, %v22974_v1 }
0x1702   : > { %v6752_v27 = vadd.f32 1e-05, %v6744_v8 }
0x1704   : > { %17314 = vrsqrt.f32 %v6752_v27  ;;  %v20658_v27 = vrot.slane %v6620_v45, %v22969_v36 }
0x1705   : > { %v17309_v62 = vpop.eup %17308 }
0x1706   : > { %v6766_v29 = vmul.f32 %v17309_v62, %v20483_v7  ;;  %v6767_v18 = vmul.f32 %v17309_v62, %v20486_v61  ;;  %v6765_v26 = vmul.f32 %v17309_v62, %v20480_v40 }
0x1708   : > { %v6806_v43 = vmul.f32 %v20632_v59, %v6766_v29  ;;  %v6807_v21 = vmul.f32 %v20635_v39, %v6767_v18  ;;  %v6805_v8 = vmul.f32 %v20643_v37, %v6765_v26 }
0x1709   : > { %v17311_v31 = vpop.eup %17310 }
0x170a   : > { %v6769_v7 = vmul.f32 %v17311_v31, %v20498_v5  ;;  %v6770_v61 = vmul.f32 %v17311_v31, %v20501_v28  ;;  %v6768_v40 = vmul.f32 %v17311_v31, %v20495_v9  ;;  %v6846_v18 = vadd.f32 %v20647_v13, %v6806_v43 }
0x170b   : > { %v6847_v5 = vadd.f32 %v20651_v33, %v6807_v21 }
0x170c   : > { %v6809_v14 = vmul.f32 %v20632_v59, %v6769_v7  ;;  %v6810_v62 = vmul.f32 %v20635_v39, %v6770_v61  ;;  %v6808_v28 = vmul.f32 %v20643_v37, %v6768_v40  ;;  %v6845_v7 = vadd.f32 %v20658_v27, %v6805_v8  ;;  %v16356_v40 = vld [vmem:[%s18462_s13 + $0x2a8] ss:$48 sps:$4 sm:$0xff]  }
0x170d   : > { %v17313_v29 = vpop.eup %17312 }
0x170e   : > { %v6849_v9 = vadd.f32 %v20647_v13, %v6809_v14  ;;  %v6850_v45 = vadd.f32 %v20651_v33, %v6810_v62  ;;  %v6772_v26 = vmul.f32 %v17313_v29, %v20513_v6  ;;  %v6773_v31 = vmul.f32 %v17313_v29, %v20516_v16  ;;  %v16361_v62 = vld [vmem:[%s18462_s13 + $0x24c] ss:$48 sps:$4 sm:$0xff]  }
0x170f   : > { %v6848_v61 = vadd.f32 %v20658_v27, %v6808_v28  ;;  %v6771_v43 = vmul.f32 %v17313_v29, %v20510_v15  ;;  %v16391_v16 = vld [vmem:[%s18462_s13 + $0x84c] ss:$48 sps:$4 sm:$0xff]  }
0x1710   : > { %v20672_v2 = vpack.c.bf16 %v6849_v9, %v6846_v18  ;;  %v20674_v21 = vpack.c.bf16 %v6850_v45, %v6847_v5  ;;  %v6812_v6 = vmul.f32 %v20632_v59, %v6772_v26  ;;  %v6813_v29 = vmul.f32 %v20635_v39, %v6773_v31  ;;  %v16359_v45 = vld [vmem:[%s18462_s13 + $0x248] ss:$48 sps:$4 sm:$0xff]   ;;  %v16364_v26 = vld [vmem:[%s18462_s13 + $0x1ec] ss:$48 sps:$4 sm:$0xff]  }
0x1711   : > { %v17315_v34 = vpop.eup %17314  ;;  %v20678_v14 = vpack.c.bf16 %v6848_v61, %v6845_v7  ;;  %v6811_v5 = vmul.f32 %v20643_v37, %v6771_v43  ;;  %v16397_v31 = vld [vmem:[%s18462_s13 + $0x7ec] ss:$48 sps:$4 sm:$0xff]  }
0x1712   : > { %8705 = vmatprep.mubr.bf16.mxu1 %v20672_v2  ;;  %8779 = vmatmul.mubr.bf16.vlgmr.msra.gmra.mxu0 %v20674_v21  ;;  %v6775_v15 = vmul.f32 %v17315_v34, %v20528_v35  ;;  %v6776_v8 = vmul.f32 %v17315_v34, %v20531_v54  ;;  %v6774_v18 = vmul.f32 %v17315_v34, %v20525_v22  ;;  %v16389_v35 = vld [vmem:[%s18462_s13 + $0x848] ss:$48 sps:$4 sm:$0xff]  }
0x1713   : > { %8706 = vmatmul.mubr.bf16.vlgmr.msra.gmra.mxu1 %v20678_v14  ;;  %8788 = vmatprep.mubr.bf16.mxu0 %v22906_v49  ;;  %v6852_v34 = vadd.f32 %v20647_v13, %v6812_v6  ;;  %v6853_v7 = vadd.f32 %v20651_v33, %v6813_v29  ;;  %v16395_v6 = vld [vmem:[%s18462_s13 + $0x7e8] ss:$48 sps:$4 sm:$0xff]   ;;  %v16403_v29 = vld [vmem:[%s18462_s13 + $0x78c] ss:$48 sps:$4 sm:$0xff]  }
0x1714   : > { %v6815_v28 = vmul.f32 %v20632_v59, %v6775_v15  ;;  %v6816_v9 = vmul.f32 %v20635_v39, %v6776_v8  ;;  %8820 = vmatpush1.bf16.msra.mxu0 %v16356_v40  ;;  %8893 = vmatpush1.bf16.msra.mxu1 %v16383_v20  ;;  %v6814_v54 = vmul.f32 %v20643_v37, %v6774_v18  ;;  %v16367_v8 = vld [vmem:[%s18462_s13 + $0x18c] ss:$48 sps:$4 sm:$0xff]   ;;  %v16365_v18 = vld [vmem:[%s18462_s13 + $0x188] ss:$48 sps:$4 sm:$0xff]  }
0x1715   : > { %8821 = vmatprep.subr.bf16.mxu0 %v16361_v62  ;;  %8894 = vmatprep.subr.bf16.mxu1 %v16391_v16  ;;  %v6851_v20 = vadd.f32 %v20658_v27, %v6811_v5  ;;  %v16362_v16 = vld [vmem:[%s18462_s13 + $0x1e8] ss:$48 sps:$4 sm:$0xff]  }
0x1716   : > { %v6855_v22 = vadd.f32 %v20647_v13, %v6815_v28  ;;  %v6856_v61 = vadd.f32 %v20651_v33, %v6816_v9  ;;  %v6854_v43 = vadd.f32 %v20658_v27, %v6814_v54  ;;  %v16401_v5 = vld [vmem:[%s18462_s13 + $0x788] ss:$48 sps:$4 sm:$0xff]   ;;  %v16370_v28 = vld [vmem:[%s18462_s13 + $0x12c] ss:$48 sps:$4 sm:$0xff]  }
0x1717   : > { %v16409_v9 = vld [vmem:[%s18462_s13 + $0x72c] ss:$48 sps:$4 sm:$0xff]  }
0x1718   : > { %v20705_v40 = vpack.c.bf16 %v6855_v22, %v6852_v34  ;;  %v20707_v62 = vpack.c.bf16 %v6856_v61, %v6853_v7  ;;  %8822 = vmatpush1.bf16.msra.mxu0 %v16359_v45  ;;  %8895 = vmatpush1.bf16.msra.mxu1 %v16389_v35  ;;  %v20711_v15 = vpack.c.bf16 %v6854_v43, %v6851_v20  ;;  %v16368_v45 = vld [vmem:[%s18462_s13 + $0x128] ss:$48 sps:$4 sm:$0xff]   ;;  %v16373_v54 = vld [vmem:[%s18462_s13 + $0xcc] ss:$48 sps:$4 sm:$0xff]  }
0x1719   : > { %8823 = vmatprep.subr.bf16.mxu0 %v16364_v26  ;;  %8896 = vmatprep.subr.bf16.mxu1 %v16397_v31  ;;  %v16407_v35 = vld [vmem:[%s18462_s13 + $0x728] ss:$48 sps:$4 sm:$0xff]   ;;  %v16415_v26 = vld [vmem:[%s18462_s13 + $0x6cc] ss:$48 sps:$4 sm:$0xff]  }
0x171a   : > { %8715 = vmatprep.mubr.bf16.mxu1 %v20705_v40  ;;  %8789 = vmatmul.mubr.bf16.gmra.mxu0 %v20707_v62  ;;  %v16371_v31 = vld [vmem:[%s18462_s13 + $0xc8] ss:$48 sps:$4 sm:$0xff]   ;;  %v16376_v22 = vld [vmem:[%s18462_s13 + $0x6c] ss:$48 sps:$4 sm:$0xff]  }
0x171b   : > { %8716 = vmatmul.mubr.bf16.gmra.mxu1 %v20711_v15  ;;  %8798 = vmatprep.mubr.bf16.mxu0 %v22906_v49  ;;  %v16413_v34 = vld [vmem:[%s18462_s13 + $0x6c8] ss:$48 sps:$4 sm:$0xff]   ;;  %v16421_v7 = vld [vmem:[%s18462_s13 + $0x66c] ss:$48 sps:$4 sm:$0xff]  }
0x171c   : > { %8824 = vmatpush1.bf16.msra.mxu0 %v16362_v16  ;;  %8897 = vmatpush1.bf16.msra.mxu1 %v16395_v6  ;;  %v16374_v61 = vld [vmem:[%s18462_s13 + $0x68] ss:$48 sps:$4 sm:$0xff]   ;;  %v16379_v43 = vld [vmem:[%s18462_s13 + $0xc] ss:$48 sps:$4 sm:$0xff]  }
0x171d   : > { %8825 = vmatprep.subr.bf16.mxu0 %v16367_v8  ;;  %8898 = vmatprep.subr.bf16.mxu1 %v16403_v29  ;;  %v16419_v20 = vld [vmem:[%s18462_s13 + $0x668] ss:$48 sps:$4 sm:$0xff]   ;;  %v16427_v16 = vld [vmem:[%s18462_s13 + $0x60c] ss:$48 sps:$4 sm:$0xff]  }
0x171e   : > { %v16377_v8 = vld [vmem:[%s18462_s13 + $0x8] ss:$48 sps:$4 sm:$0xff]  }
0x171f   : > { %v16425_v29 = vld [vmem:[%s18462_s13 + $0x608] ss:$48 sps:$4 sm:$0xff]  }
0x1720   : > { %8826 = vmatpush1.bf16.msra.mxu0 %v16365_v18  ;;  %8899 = vmatpush1.bf16.msra.mxu1 %v16401_v5  ;;  %v16382_v5 = vld [vmem:[%s18462_s13 + $0x5ac] ss:$48 sps:$4 sm:$0xff]  }
0x1721   : > { %8827 = vmatprep.subr.bf16.mxu0 %v16370_v28  ;;  %8900 = vmatprep.subr.bf16.mxu1 %v16409_v9  ;;  %v16433_v28 = vld [vmem:[%s18462_s13 + $0x2b4] ss:$48 sps:$4 sm:$0xff]  }
0x1724   : > { %8828 = vmatpush1.bf16.msra.mxu0 %v16368_v45  ;;  %8901 = vmatpush1.bf16.msra.mxu1 %v16407_v35  ;;  %v16380_v35 = vld [vmem:[%s18462_s13 + $0x5a8] ss:$48 sps:$4 sm:$0xff]  }
0x1725   : > { %8829 = vmatprep.subr.bf16.mxu0 %v16373_v54  ;;  %8902 = vmatprep.subr.bf16.mxu1 %v16415_v26  ;;  %v16388_v26 = vld [vmem:[%s18462_s13 + $0x54c] ss:$48 sps:$4 sm:$0xff]  }
0x1728   : > { %8830 = vmatpush1.bf16.msra.mxu0 %v16371_v31  ;;  %8903 = vmatpush1.bf16.msra.mxu1 %v16413_v34 }
0x1729   : > { %8831 = vmatprep.subr.bf16.mxu0 %v16376_v22  ;;  %8904 = vmatprep.subr.bf16.mxu1 %v16421_v7  ;;  %v16386_v22 = vld [vmem:[%s18462_s13 + $0x548] ss:$48 sps:$4 sm:$0xff]  }
0x172b   : > { %v6728_v6 = vpop.xlane.xlu0 %6727 }
0x172c   : > { %8832 = vmatpush1.bf16.msra.mxu0 %v16374_v61  ;;  %8905 = vmatpush1.bf16.msra.mxu1 %v16419_v20  ;;  %v6745_v18 = vmul.f32 0.0026041667, %v6728_v6  ;;  %v16394_v61 = vld [vmem:[%s18462_s13 + $0x4ec] ss:$48 sps:$4 sm:$0xff]  }
0x172d   : > { %8833 = vmatprep.subr.bf16.mxu0 %v16379_v43  ;;  %8906 = vmatprep.subr.bf16.mxu1 %v16427_v16  ;;  %v16392_v16 = vld [vmem:[%s18462_s13 + $0x4e8] ss:$48 sps:$4 sm:$0xff]  }
0x172e   : > { %v6753_v9 = vadd.f32 1e-05, %v6745_v18  ;;  %v16398_v18 = vld [vmem:[%s18462_s13 + $0x488] ss:$48 sps:$4 sm:$0xff]  }
0x172f   : > { %v6732_v45 = vpop.xlane.xlu1 %6731 }
0x1730   : > { %8834 = vmatpush1.bf16.msra.mxu0 %v16377_v8  ;;  %8907 = vmatpush1.bf16.msra.mxu1 %v16425_v29  ;;  %17316 = vrsqrt.f32 %v6753_v9  ;;  %v6746_v54 = vmul.f32 0.0026041667, %v6732_v45  ;;  %v16400_v8 = vld [vmem:[%s18462_s13 + $0x48c] ss:$48 sps:$4 sm:$0xff]  }
0x1731   : > { %8835 = vmatprep.subr.bf16.mxu0 %v16382_v5  ;;  %8965 = vmatprep.subr.bf16.mxu1 %v16433_v28  ;;  %v16406_v5 = vld [vmem:[%s18462_s13 + $0x42c] ss:$48 sps:$4 sm:$0xff]  }
0x1732   : > { %v6754_v31 = vadd.f32 1e-05, %v6746_v54 }
0x1733   : > { %v6736_v34 = vpop.xlane.xlu0 %6735 }
0x1734   : > { %8836 = vmatpush2.bf16.msra.mxu0 %v16380_v35  ;;  %17318 = vrsqrt.f32 %v6754_v31  ;;  %v6747_v7 = vmul.f32 0.0026041667, %v6736_v34  ;;  %v16404_v35 = vld [vmem:[%s18462_s13 + $0x428] ss:$48 sps:$4 sm:$0xff]  }
0x1735   : > { %8837 = vmatprep.subr.bf16.mxu0 %v16388_v26  ;;  %v16412_v26 = vld [vmem:[%s18462_s13 + $0x3cc] ss:$48 sps:$4 sm:$0xff]  }
0x1736   : > { %v6755_v20 = vadd.f32 1e-05, %v6747_v7 }
0x1737   : > { %v6740_v43 = vpop.xlane.xlu1 %6739 }
0x1738   : > { %8838 = vmatpush2.bf16.msra.mxu0 %v16386_v22  ;;  %17320 = vrsqrt.f32 %v6755_v20  ;;  %v6748_v6 = vmul.f32 0.0026041667, %v6740_v43  ;;  %v16410_v20 = vld [vmem:[%s18462_s13 + $0x3c8] ss:$48 sps:$4 sm:$0xff]  }
0x1739   : > { %8839 = vmatprep.subr.bf16.mxu0 %v16394_v61 }
0x173a   : > { %v6756_v29 = vadd.f32 1e-05, %v6748_v6 }
0x173c   : > { %8840 = vmatpush2.bf16.msra.mxu0 %v16392_v16  ;;  %17322 = vrsqrt.f32 %v6756_v29  ;;  %v16418_v16 = vld [vmem:[%s18462_s13 + $0x36c] ss:$48 sps:$4 sm:$0xff]  }
0x173d   : > { %8841 = vmatprep.subr.bf16.mxu0 %v16400_v8  ;;  %v17317_v28 = vpop.eup %17316 }
0x173e   : > { %v6778_v9 = vmul.f32 %v17317_v28, %v20572_v38  ;;  %v6779_v45 = vmul.f32 %v17317_v28, %v20575_v46  ;;  %v6777_v54 = vmul.f32 %v17317_v28, %v20569_v42 }
0x1740   : > { %8842 = vmatpush2.bf16.msra.mxu0 %v16398_v18  ;;  %v6818_v34 = vmul.f32 %v20632_v59, %v6778_v9  ;;  %v6819_v22 = vmul.f32 %v20635_v39, %v6779_v45  ;;  %v6817_v46 = vmul.f32 %v20643_v37, %v6777_v54 }
0x1741   : > { %8843 = vmatprep.subr.bf16.mxu0 %v16406_v5  ;;  %v17319_v31 = vpop.eup %17318 }
0x1742   : > { %v6781_v7 = vmul.f32 %v17319_v31, %v20587_v25  ;;  %v6782_v61 = vmul.f32 %v17319_v31, %v20590_v0  ;;  %v6780_v38 = vmul.f32 %v17319_v31, %v20584_v17  ;;  %v6858_v8 = vadd.f32 %v20647_v13, %v6818_v34 }
0x1743   : > { %v6859_v25 = vadd.f32 %v20651_v33, %v6819_v22  ;;  %v6857_v28 = vadd.f32 %v20658_v27, %v6817_v46 }
0x1744   : > { %8844 = vmatpush2.bf16.msra.mxu0 %v16404_v35  ;;  %v6821_v43 = vmul.f32 %v20632_v59, %v6781_v7  ;;  %v6822_v42 = vmul.f32 %v20635_v39, %v6782_v61  ;;  %v6820_v0 = vmul.f32 %v20643_v37, %v6780_v38 }
0x1745   : > { %8845 = vmatprep.subr.bf16.mxu0 %v16412_v26  ;;  %v17321_v6 = vpop.eup %17320  ;;  %v16416_v26 = vld [vmem:[%s18462_s13 + $0x368] ss:$48 sps:$4 sm:$0xff]  }
0x1746   : > { %v6861_v17 = vadd.f32 %v20647_v13, %v6821_v43  ;;  %v6862_v29 = vadd.f32 %v20651_v33, %v6822_v42  ;;  %v6784_v18 = vmul.f32 %v17321_v6, %v20602_v30  ;;  %v6785_v5 = vmul.f32 %v17321_v6, %v20605_v47  ;;  %v16424_v47 = vld [vmem:[%s18462_s13 + $0x30c] ss:$48 sps:$4 sm:$0xff]   ;;  %v16422_v43 = vld [vmem:[%s18462_s13 + $0x308] ss:$48 sps:$4 sm:$0xff]  }
0x1747   : > { %v6860_v9 = vadd.f32 %v20658_v27, %v6820_v0  ;;  %v6783_v45 = vmul.f32 %v17321_v6, %v20599_v19  ;;  %v16439_v0 = vld [vmem:[%s18462_s13 + $0x254] ss:$48 sps:$4 sm:$0xff]  }
0x1748   : > { %8846 = vmatpush2.bf16.msra.mxu0 %v16410_v20  ;;  %v20772_v35 = vpack.c.bf16 %v6861_v17, %v6858_v8  ;;  %v20774_v54 = vpack.c.bf16 %v6862_v29, %v6859_v25  ;;  %v6824_v30 = vmul.f32 %v20632_v59, %v6784_v18  ;;  %v6825_v7 = vmul.f32 %v20635_v39, %v6785_v5  ;;  %v16434_v17 = vld [vmem:[%s18462_s13 + $0x850] ss:$48 sps:$4 sm:$0xff]   ;;  %v16442_v29 = vld [vmem:[%s18462_s13 + $0x7f4] ss:$48 sps:$4 sm:$0xff]  }
0x1749   : > { %8847 = vmatprep.subr.bf16.mxu0 %v16418_v16  ;;  %v17323_v31 = vpop.eup %17322  ;;  %v20777_v34 = vpack.c.bf16 %v6860_v9, %v6857_v28  ;;  %v6823_v38 = vmul.f32 %v20643_v37, %v6783_v45  ;;  %v16437_v18 = vld [vmem:[%s18462_s13 + $0x250] ss:$48 sps:$4 sm:$0xff]   ;;  %v16445_v5 = vld [vmem:[%s18462_s13 + $0x1f4] ss:$48 sps:$4 sm:$0xff]  }
0x174a   : > { %8725 = vmatprep.mubr.bf16.mxu1 %v20772_v35  ;;  %8799 = vmatmul.mubr.bf16.gmra.mxu0 %v20774_v54  ;;  %v6787_v19 = vmul.f32 %v17323_v31, %v20617_v44  ;;  %v6788_v22 = vmul.f32 %v17323_v31, %v20620_v11  ;;  %v6786_v61 = vmul.f32 %v17323_v31, %v20614_v56  ;;  %v16430_v11 = vld [vmem:[%s18462_s13 + $0x8b4] ss:$48 sps:$4 sm:$0xff]   ;;  %v16440_v28 = vld [vmem:[%s18462_s13 + $0x7f0] ss:$48 sps:$4 sm:$0xff]  }
0x174b   : > { %8726 = vmatmul.mubr.bf16.gmra.mxu1 %v20777_v34  ;;  %8808 = vmatprep.mubr.bf16.mxu0 %v22906_v49  ;;  %v6864_v42 = vadd.f32 %v20647_v13, %v6824_v30  ;;  %v6865_v56 = vadd.f32 %v20651_v33, %v6825_v7  ;;  %v16448_v9 = vld [vmem:[%s18462_s13 + $0x794] ss:$48 sps:$4 sm:$0xff]   ;;  %v16443_v45 = vld [vmem:[%s18462_s13 + $0x1f0] ss:$48 sps:$4 sm:$0xff]  }
0x174c   : > { %v6827_v46 = vmul.f32 %v20632_v59, %v6787_v19  ;;  %v6828_v20 = vmul.f32 %v20635_v39, %v6788_v22  ;;  %8848 = vmatpush2.bf16.msra.mxu0 %v16416_v26  ;;  %v6826_v44 = vmul.f32 %v20643_v37, %v6786_v61  ;;  %v6863_v59 = vadd.f32 %v20658_v27, %v6823_v38  ;;  %v16451_v26 = vld [vmem:[%s18462_s13 + $0x194] ss:$48 sps:$4 sm:$0xff]   ;;  %v16446_v31 = vld [vmem:[%s18462_s13 + $0x790] ss:$48 sps:$4 sm:$0xff]  }
0x174d   : > { %8849 = vmatprep.subr.bf16.mxu0 %v16424_v47  ;;  %v16454_v30 = vld [vmem:[%s18462_s13 + $0x734] ss:$48 sps:$4 sm:$0xff]   ;;  %v16449_v47 = vld [vmem:[%s18462_s13 + $0x190] ss:$48 sps:$4 sm:$0xff]  }
0x174e   : > { %v6867_v16 = vadd.f32 %v20647_v13, %v6827_v46  ;;  %v6868_v6 = vadd.f32 %v20651_v33, %v6828_v20  ;;  %v6866_v39 = vadd.f32 %v20658_v27, %v6826_v44  ;;  %v16428_v13 = vld [vmem:[%s18462_s13 + $0x8b0] ss:$48 sps:$4 sm:$0xff]   ;;  %v16436_v33 = vld [vmem:[%s18462_s13 + $0x854] ss:$48 sps:$4 sm:$0xff]  }
0x174f   : > { %v16431_v27 = vld [vmem:[%s18462_s13 + $0x2b0] ss:$48 sps:$4 sm:$0xff]   ;;  %v16457_v19 = vld [vmem:[%s18462_s13 + $0x134] ss:$48 sps:$4 sm:$0xff]  }
0x1750   : > { %v20801_v8 = vpack.c.bf16 %v6867_v16, %v6864_v42  ;;  %v20803_v37 = vpack.c.bf16 %v6868_v6, %v6865_v56  ;;  %8850 = vmatpush2.bf16.msra.mxu0 %v16422_v43  ;;  %v20805_v25 = vpack.c.bf16 %v6866_v39, %v6863_v59  ;;  %v16452_v22 = vld [vmem:[%s18462_s13 + $0x730] ss:$48 sps:$4 sm:$0xff]   ;;  %v16460_v7 = vld [vmem:[%s18462_s13 + $0x6d4] ss:$48 sps:$4 sm:$0xff]   ;;  %v16478_v59 = vld [vmem:[%s18462_s13 + $0x2bc] ss:$48 sps:$4 sm:$0xff]  }
0x1751   : > { %9038 = vmatprep.subr.bf16.mxu0 %v16430_v11  ;;  %v16455_v61 = vld [vmem:[%s18462_s13 + $0x130] ss:$48 sps:$4 sm:$0xff]   ;;  %v16463_v38 = vld [vmem:[%s18462_s13 + $0xd4] ss:$48 sps:$4 sm:$0xff]  }
0x1752   : > { %8735 = vmatprep.mubr.bf16.mxu1 %v20801_v8  ;;  %8809 = vmatmul.mubr.bf16.gmra.mxu0 %v20803_v37  ;;  %v16458_v46 = vld [vmem:[%s18462_s13 + $0x6d0] ss:$48 sps:$4 sm:$0xff]   ;;  %v16466_v20 = vld [vmem:[%s18462_s13 + $0x674] ss:$48 sps:$4 sm:$0xff]  }
0x1753   : > { %8736 = vmatmul.mubr.bf16.gmra.mxu1 %v20805_v25  ;;  %8851 = vmatprep.mubr.bf16.mxu0 %v20672_v2  ;;  %v16461_v43 = vld [vmem:[%s18462_s13 + $0xd0] ss:$48 sps:$4 sm:$0xff]   ;;  %v16469_v44 = vld [vmem:[%s18462_s13 + $0x74] ss:$48 sps:$4 sm:$0xff]  }
0x1754   : > { %8924 = vmatprep.mubr.bf16.mxu1 %v22906_v49  ;;  %v16464_v11 = vld [vmem:[%s18462_s13 + $0x670] ss:$48 sps:$4 sm:$0xff]   ;;  %v16472_v42 = vld [vmem:[%s18462_s13 + $0x614] ss:$48 sps:$4 sm:$0xff]  }
0x1755   : > { %v16467_v16 = vld [vmem:[%s18462_s13 + $0x70] ss:$48 sps:$4 sm:$0xff]   ;;  %v16475_v56 = vld [vmem:[%s18462_s13 + $0x14] ss:$48 sps:$4 sm:$0xff]  }
0x1756   : > { %v16470_v6 = vld [vmem:[%s18462_s13 + $0x610] ss:$48 sps:$4 sm:$0xff]  }
0x1757   : > { %v16473_v39 = vld [vmem:[%s18462_s13 + $0x10] ss:$48 sps:$4 sm:$0xff]  }
0x175a   : > { %8852 = vmatmul.mubr.bf16.vlgmr.msra.gmra.mxu0 %v20678_v14 }
0x175b   : > { %9039 = vmatpush1.bf16.msra.mxu0 %v16428_v13  ;;  %8861 = vmatprep.mubr.bf16.mxu0 %v20705_v40  ;;  %v16481_v13 = vld [vmem:[%s18462_s13 + $0x5b4] ss:$48 sps:$4 sm:$0xff]  }
0x175c   : > { %8925 = vmatmul.mubr.bf16.vlgmr.msra.gmra.mxu1 %v20674_v21  ;;  %9040 = vmatprep.subr.bf16.mxu0 %v16436_v33  ;;  %v16476_v33 = vld [vmem:[%s18462_s13 + $0x2b8] ss:$48 sps:$4 sm:$0xff]  }
0x175d   : > { %8966 = vmatpush1.bf16.msra.mxu1 %v16431_v27  ;;  %8934 = vmatprep.mubr.bf16.mxu1 %v22906_v49  ;;  %v16484_v27 = vld [vmem:[%s18462_s13 + $0x25c] ss:$48 sps:$4 sm:$0xff]  }
0x175e   : > { %8967 = vmatprep.subr.bf16.mxu1 %v16439_v0  ;;  %v16479_v0 = vld [vmem:[%s18462_s13 + $0x5b0] ss:$48 sps:$4 sm:$0xff]  }
0x175f   : > { %9041 = vmatpush1.bf16.msra.mxu0 %v16434_v17  ;;  %v16487_v17 = vld [vmem:[%s18462_s13 + $0x554] ss:$48 sps:$4 sm:$0xff]  }
0x1760   : > { %9042 = vmatprep.subr.bf16.mxu0 %v16442_v29  ;;  %v16482_v29 = vld [vmem:[%s18462_s13 + $0x258] ss:$48 sps:$4 sm:$0xff]  }
0x1761   : > { %8968 = vmatpush1.bf16.msra.mxu1 %v16437_v18  ;;  %v16490_v18 = vld [vmem:[%s18462_s13 + $0x1fc] ss:$48 sps:$4 sm:$0xff]  }
0x1762   : > { %8862 = vmatmul.mubr.bf16.gmra.mxu0 %v20711_v15  ;;  %8969 = vmatprep.subr.bf16.mxu1 %v16445_v5  ;;  %v16485_v5 = vld [vmem:[%s18462_s13 + $0x550] ss:$48 sps:$4 sm:$0xff]  }
0x1763   : > { %9043 = vmatpush1.bf16.msra.mxu0 %v16440_v28  ;;  %8871 = vmatprep.mubr.bf16.mxu0 %v20772_v35  ;;  %v16493_v28 = vld [vmem:[%s18462_s13 + $0x4f4] ss:$48 sps:$4 sm:$0xff]  }
0x1764   : > { %8935 = vmatmul.mubr.bf16.gmra.mxu1 %v20707_v62  ;;  %9044 = vmatprep.subr.bf16.mxu0 %v16448_v9  ;;  %v16488_v9 = vld [vmem:[%s18462_s13 + $0x1f8] ss:$48 sps:$4 sm:$0xff]  }
0x1765   : > { %8970 = vmatpush1.bf16.msra.mxu1 %v16443_v45  ;;  %8944 = vmatprep.mubr.bf16.mxu1 %v22906_v49  ;;  %v16496_v45 = vld [vmem:[%s18462_s13 + $0x19c] ss:$48 sps:$4 sm:$0xff]  }
0x1766   : > { %8971 = vmatprep.subr.bf16.mxu1 %v16451_v26  ;;  %v16491_v26 = vld [vmem:[%s18462_s13 + $0x4f0] ss:$48 sps:$4 sm:$0xff]  }
0x1767   : > { %9045 = vmatpush1.bf16.msra.mxu0 %v16446_v31  ;;  %v16499_v31 = vld [vmem:[%s18462_s13 + $0x494] ss:$48 sps:$4 sm:$0xff]  }
0x1768   : > { %9046 = vmatprep.subr.bf16.mxu0 %v16454_v30  ;;  %v16494_v30 = vld [vmem:[%s18462_s13 + $0x198] ss:$48 sps:$4 sm:$0xff]  }
0x1769   : > { %8972 = vmatpush1.bf16.msra.mxu1 %v16449_v47  ;;  %v16502_v47 = vld [vmem:[%s18462_s13 + $0x13c] ss:$48 sps:$4 sm:$0xff]  }
0x176a   : > { %8872 = vmatmul.mubr.bf16.gmra.mxu0 %v20777_v34  ;;  %8973 = vmatprep.subr.bf16.mxu1 %v16457_v19  ;;  %v16497_v19 = vld [vmem:[%s18462_s13 + $0x490] ss:$48 sps:$4 sm:$0xff]  }
0x176b   : > { %9047 = vmatpush1.bf16.msra.mxu0 %v16452_v22  ;;  %8881 = vmatprep.mubr.bf16.mxu0 %v20801_v8  ;;  %v16505_v22 = vld [vmem:[%s18462_s13 + $0x434] ss:$48 sps:$4 sm:$0xff]  }
0x176c   : > { %8945 = vmatmul.mubr.bf16.gmra.mxu1 %v20774_v54  ;;  %9048 = vmatprep.subr.bf16.mxu0 %v16460_v7  ;;  %v16500_v7 = vld [vmem:[%s18462_s13 + $0x138] ss:$48 sps:$4 sm:$0xff]  }
0x176d   : > { %8974 = vmatpush1.bf16.msra.mxu1 %v16455_v61  ;;  %8954 = vmatprep.mubr.bf16.mxu1 %v22906_v49  ;;  %v16508_v61 = vld [vmem:[%s18462_s13 + $0xdc] ss:$48 sps:$4 sm:$0xff]  }
0x176e   : > { %8975 = vmatprep.subr.bf16.mxu1 %v16463_v38  ;;  %v16503_v38 = vld [vmem:[%s18462_s13 + $0x430] ss:$48 sps:$4 sm:$0xff]  }
0x176f   : > { %9049 = vmatpush1.bf16.msra.mxu0 %v16458_v46  ;;  %v16511_v46 = vld [vmem:[%s18462_s13 + $0x3d4] ss:$48 sps:$4 sm:$0xff]  }
0x1770   : > { %9050 = vmatprep.subr.bf16.mxu0 %v16466_v20  ;;  %v16506_v20 = vld [vmem:[%s18462_s13 + $0xd8] ss:$48 sps:$4 sm:$0xff]  }
0x1771   : > { %8976 = vmatpush1.bf16.msra.mxu1 %v16461_v43  ;;  %v16514_v43 = vld [vmem:[%s18462_s13 + $0x7c] ss:$48 sps:$4 sm:$0xff]  }
0x1772   : > { %8882 = vmatmul.mubr.bf16.gmra.mxu0 %v20805_v25  ;;  %8977 = vmatprep.subr.bf16.mxu1 %v16469_v44  ;;  %v16509_v44 = vld [vmem:[%s18462_s13 + $0x3d0] ss:$48 sps:$4 sm:$0xff]  }
0x1773   : > { %9051 = vmatpush1.bf16.msra.mxu0 %v16464_v11  ;;  %9070 = vmatprep.mubr.bf16.mxu0 %v22906_v49  ;;  %v16517_v11 = vld [vmem:[%s18462_s13 + $0x374] ss:$48 sps:$4 sm:$0xff]  }
0x1774   : > { %8955 = vmatmul.mubr.bf16.gmra.mxu1 %v20803_v37  ;;  %9052 = vmatprep.subr.bf16.mxu0 %v16472_v42  ;;  %v16512_v42 = vld [vmem:[%s18462_s13 + $0x78] ss:$48 sps:$4 sm:$0xff]  }
0x1775   : > { %8978 = vmatpush1.bf16.msra.mxu1 %v16467_v16  ;;  %8997 = vmatprep.mubr.bf16.mxu1 %v20672_v2  ;;  %v16520_v16 = vld [vmem:[%s18462_s13 + $0x1c] ss:$48 sps:$4 sm:$0xff]  }
0x1776   : > { %8979 = vmatprep.subr.bf16.mxu1 %v16475_v56  ;;  %v16515_v56 = vld [vmem:[%s18462_s13 + $0x370] ss:$48 sps:$4 sm:$0xff]  }
0x1777   : > { %9053 = vmatpush1.bf16.msra.mxu0 %v16470_v6  ;;  %v16523_v6 = vld [vmem:[%s18462_s13 + $0x314] ss:$48 sps:$4 sm:$0xff]  }
0x1778   : > { %9111 = vmatprep.subr.bf16.mxu0 %v16478_v59  ;;  %v16518_v59 = vld [vmem:[%s18462_s13 + $0x18] ss:$48 sps:$4 sm:$0xff]  }
0x1779   : > { %8980 = vmatpush1.bf16.msra.mxu1 %v16473_v39  ;;  %v16526_v39 = vld [vmem:[%s18462_s13 + $0x5bc] ss:$48 sps:$4 sm:$0xff]  }
0x177a   : > { %8981 = vmatprep.subr.bf16.mxu1 %v16481_v13  ;;  %9071 = vmatmul.mubr.bf16.vlgmr.msra.gmra.mxu0 %v20674_v21  ;;  %v16521_v13 = vld [vmem:[%s18462_s13 + $0x310] ss:$48 sps:$4 sm:$0xff]  }
0x177b   : > { %9112 = vmatpush1.bf16.msra.mxu0 %v16476_v33  ;;  %9080 = vmatprep.mubr.bf16.mxu0 %v22906_v49  ;;  %v16529_v33 = vld [vmem:[%s18462_s13 + $0x8bc] ss:$48 sps:$4 sm:$0xff]  }
0x177c   : > { %9113 = vmatprep.subr.bf16.mxu0 %v16484_v27  ;;  %v16524_v27 = vld [vmem:[%s18462_s13 + $0x5b8] ss:$48 sps:$4 sm:$0xff]  }
0x177d   : > { %8982 = vmatpush2.bf16.msra.mxu1 %v16479_v0  ;;  %v16532_v0 = vld [vmem:[%s18462_s13 + $0x55c] ss:$48 sps:$4 sm:$0xff]  }
0x177e   : > { %8983 = vmatprep.subr.bf16.mxu1 %v16487_v17  ;;  %v16527_v17 = vld [vmem:[%s18462_s13 + $0x8b8] ss:$48 sps:$4 sm:$0xff]  }
0x177f   : > { %9114 = vmatpush1.bf16.msra.mxu0 %v16482_v29  ;;  %v16535_v29 = vld [vmem:[%s18462_s13 + $0x85c] ss:$48 sps:$4 sm:$0xff]  }
0x1780   : > { %9115 = vmatprep.subr.bf16.mxu0 %v16490_v18  ;;  %v16530_v18 = vld [vmem:[%s18462_s13 + $0x558] ss:$48 sps:$4 sm:$0xff]  }
0x1781   : > { %8984 = vmatpush2.bf16.msra.mxu1 %v16485_v5  ;;  %v16538_v5 = vld [vmem:[%s18462_s13 + $0x4fc] ss:$48 sps:$4 sm:$0xff]  }
0x1782   : > { %8985 = vmatprep.subr.bf16.mxu1 %v16493_v28  ;;  %9081 = vmatmul.mubr.bf16.gmra.mxu0 %v20707_v62  ;;  %v16533_v28 = vld [vmem:[%s18462_s13 + $0x858] ss:$48 sps:$4 sm:$0xff]  }
0x1783   : > { %9116 = vmatpush1.bf16.msra.mxu0 %v16488_v9  ;;  %9090 = vmatprep.mubr.bf16.mxu0 %v22906_v49  ;;  %v16541_v9 = vld [vmem:[%s18462_s13 + $0x7fc] ss:$48 sps:$4 sm:$0xff]  }
0x1784   : > { %9117 = vmatprep.subr.bf16.mxu0 %v16496_v45  ;;  %v16536_v45 = vld [vmem:[%s18462_s13 + $0x4f8] ss:$48 sps:$4 sm:$0xff]  }
0x1785   : > { %8986 = vmatpush2.bf16.msra.mxu1 %v16491_v26  ;;  %v16544_v26 = vld [vmem:[%s18462_s13 + $0x49c] ss:$48 sps:$4 sm:$0xff]  }
0x1786   : > { %8987 = vmatprep.subr.bf16.mxu1 %v16499_v31  ;;  %v16539_v31 = vld [vmem:[%s18462_s13 + $0x7f8] ss:$48 sps:$4 sm:$0xff]  }
0x1787   : > { %9118 = vmatpush1.bf16.msra.mxu0 %v16494_v30  ;;  %v16547_v30 = vld [vmem:[%s18462_s13 + $0x79c] ss:$48 sps:$4 sm:$0xff]  }
0x1788   : > { %9119 = vmatprep.subr.bf16.mxu0 %v16502_v47  ;;  %v16542_v47 = vld [vmem:[%s18462_s13 + $0x498] ss:$48 sps:$4 sm:$0xff]  }
0x1789   : > { %8988 = vmatpush2.bf16.msra.mxu1 %v16497_v19  ;;  %v16550_v19 = vld [vmem:[%s18462_s13 + $0x43c] ss:$48 sps:$4 sm:$0xff]  }
0x178a   : > { %8989 = vmatprep.subr.bf16.mxu1 %v16505_v22  ;;  %9091 = vmatmul.mubr.bf16.gmra.mxu0 %v20774_v54  ;;  %v16545_v22 = vld [vmem:[%s18462_s13 + $0x798] ss:$48 sps:$4 sm:$0xff]  }
0x178b   : > { %9120 = vmatpush1.bf16.msra.mxu0 %v16500_v7  ;;  %9100 = vmatprep.mubr.bf16.mxu0 %v22906_v49  ;;  %v16553_v7 = vld [vmem:[%s18462_s13 + $0x73c] ss:$48 sps:$4 sm:$0xff]  }
0x178c   : > { %9121 = vmatprep.subr.bf16.mxu0 %v16508_v61  ;;  %v16548_v61 = vld [vmem:[%s18462_s13 + $0x438] ss:$48 sps:$4 sm:$0xff]  }
0x178d   : > { %8990 = vmatpush2.bf16.msra.mxu1 %v16503_v38  ;;  %v16556_v38 = vld [vmem:[%s18462_s13 + $0x3dc] ss:$48 sps:$4 sm:$0xff]  }
0x178e   : > { %8991 = vmatprep.subr.bf16.mxu1 %v16511_v46  ;;  %v16551_v46 = vld [vmem:[%s18462_s13 + $0x738] ss:$48 sps:$4 sm:$0xff]  }
0x178f   : > { %9122 = vmatpush1.bf16.msra.mxu0 %v16506_v20  ;;  %v16559_v20 = vld [vmem:[%s18462_s13 + $0x6dc] ss:$48 sps:$4 sm:$0xff]  }
0x1790   : > { %9123 = vmatprep.subr.bf16.mxu0 %v16514_v43  ;;  %v16554_v43 = vld [vmem:[%s18462_s13 + $0x3d8] ss:$48 sps:$4 sm:$0xff]  }
0x1791   : > { %8992 = vmatpush2.bf16.msra.mxu1 %v16509_v44  ;;  %v16562_v44 = vld [vmem:[%s18462_s13 + $0x37c] ss:$48 sps:$4 sm:$0xff]  }
0x1792   : > { %8993 = vmatprep.subr.bf16.mxu1 %v16517_v11  ;;  %9101 = vmatmul.mubr.bf16.gmra.mxu0 %v20803_v37  ;;  %v16557_v11 = vld [vmem:[%s18462_s13 + $0x6d8] ss:$48 sps:$4 sm:$0xff]  }
0x1793   : > { %9124 = vmatpush1.bf16.msra.mxu0 %v16512_v42  ;;  %9143 = vmatprep.mubr.bf16.mxu0 %v20672_v2  ;;  %v16565_v42 = vld [vmem:[%s18462_s13 + $0x67c] ss:$48 sps:$4 sm:$0xff]  }
0x1794   : > { %9125 = vmatprep.subr.bf16.mxu0 %v16520_v16  ;;  %v16560_v16 = vld [vmem:[%s18462_s13 + $0x378] ss:$48 sps:$4 sm:$0xff]  }
0x1795   : > { %8994 = vmatpush2.bf16.msra.mxu1 %v16515_v56  ;;  %v16568_v56 = vld [vmem:[%s18462_s13 + $0x31c] ss:$48 sps:$4 sm:$0xff]  }
0x1796   : > { %8995 = vmatprep.subr.bf16.mxu1 %v16523_v6  ;;  %v16563_v6 = vld [vmem:[%s18462_s13 + $0x678] ss:$48 sps:$4 sm:$0xff]  }
0x1797   : > { %9126 = vmatpush1.bf16.msra.mxu0 %v16518_v59  ;;  %v16571_v59 = vld [vmem:[%s18462_s13 + $0x61c] ss:$48 sps:$4 sm:$0xff]  }
0x1798   : > { %9127 = vmatprep.subr.bf16.mxu0 %v16526_v39  ;;  %v16566_v39 = vld [vmem:[%s18462_s13 + $0x318] ss:$48 sps:$4 sm:$0xff]  }
0x1799   : > { %8996 = vmatpush2.bf16.msra.mxu1 %v16521_v13  ;;  %v16574_v13 = vld [vmem:[%s18462_s13 + $0x8c4] ss:$48 sps:$4 sm:$0xff]  }
0x179a   : > { %9184 = vmatprep.subr.bf16.mxu1 %v16529_v33  ;;  %v16569_v33 = vld [vmem:[%s18462_s13 + $0x618] ss:$48 sps:$4 sm:$0xff]  }
0x179b   : > { %9128 = vmatpush2.bf16.msra.mxu0 %v16524_v27  ;;  %v16577_v27 = vld [vmem:[%s18462_s13 + $0x2c4] ss:$48 sps:$4 sm:$0xff]  }
0x179c   : > { %8998 = vmatmul.mubr.bf16.vlgmr.msra.gmra.mxu1 %v20678_v14  ;;  %9129 = vmatprep.subr.bf16.mxu0 %v16532_v0  ;;  %v16572_v0 = vld [vmem:[%s18462_s13 + $0x8c0] ss:$48 sps:$4 sm:$0xff]  }
0x179d   : > { %9007 = vmatprep.mubr.bf16.mxu1 %v20705_v40  ;;  %9185 = vmatpush1.bf16.msra.mxu1 %v16527_v17  ;;  %v16580_v17 = vld [vmem:[%s18462_s13 + $0x864] ss:$48 sps:$4 sm:$0xff]  }
0x179e   : > { %9186 = vmatprep.subr.bf16.mxu1 %v16535_v29  ;;  %v16575_v29 = vld [vmem:[%s18462_s13 + $0x2c0] ss:$48 sps:$4 sm:$0xff]  }
0x179f   : > { %9130 = vmatpush2.bf16.msra.mxu0 %v16530_v18  ;;  %v16583_v18 = vld [vmem:[%s18462_s13 + $0x264] ss:$48 sps:$4 sm:$0xff]  }
0x17a0   : > { %9131 = vmatprep.subr.bf16.mxu0 %v16538_v5  ;;  %v16578_v5 = vld [vmem:[%s18462_s13 + $0x860] ss:$48 sps:$4 sm:$0xff]  }
0x17a1   : > { %9187 = vmatpush1.bf16.msra.mxu1 %v16533_v28  ;;  %v16586_v28 = vld [vmem:[%s18462_s13 + $0x804] ss:$48 sps:$4 sm:$0xff]  }
0x17a2   : > { %9188 = vmatprep.subr.bf16.mxu1 %v16541_v9  ;;  %v16581_v9 = vld [vmem:[%s18462_s13 + $0x260] ss:$48 sps:$4 sm:$0xff]  }
0x17a3   : > { %9132 = vmatpush2.bf16.msra.mxu0 %v16536_v45  ;;  %v16589_v45 = vld [vmem:[%s18462_s13 + $0x204] ss:$48 sps:$4 sm:$0xff]  }
0x17a4   : > { %9008 = vmatmul.mubr.bf16.gmra.mxu1 %v20711_v15  ;;  %9133 = vmatprep.subr.bf16.mxu0 %v16544_v26  ;;  %v16584_v26 = vld [vmem:[%s18462_s13 + $0x800] ss:$48 sps:$4 sm:$0xff]  }
0x17a5   : > { %9017 = vmatprep.mubr.bf16.mxu1 %v20772_v35  ;;  %9189 = vmatpush1.bf16.msra.mxu1 %v16539_v31  ;;  %v16592_v31 = vld [vmem:[%s18462_s13 + $0x7a4] ss:$48 sps:$4 sm:$0xff]  }
0x17a6   : > { %9190 = vmatprep.subr.bf16.mxu1 %v16547_v30  ;;  %v16587_v30 = vld [vmem:[%s18462_s13 + $0x200] ss:$48 sps:$4 sm:$0xff]  }
0x17a7   : > { %9134 = vmatpush2.bf16.msra.mxu0 %v16542_v47  ;;  %v16595_v47 = vld [vmem:[%s18462_s13 + $0x1a4] ss:$48 sps:$4 sm:$0xff]  }
0x17a8   : > { %9135 = vmatprep.subr.bf16.mxu0 %v16550_v19  ;;  %v16590_v19 = vld [vmem:[%s18462_s13 + $0x7a0] ss:$48 sps:$4 sm:$0xff]  }
0x17a9   : > { %9191 = vmatpush1.bf16.msra.mxu1 %v16545_v22  ;;  %v16598_v22 = vld [vmem:[%s18462_s13 + $0x744] ss:$48 sps:$4 sm:$0xff]  }
0x17aa   : > { %9192 = vmatprep.subr.bf16.mxu1 %v16553_v7  ;;  %v16593_v7 = vld [vmem:[%s18462_s13 + $0x1a0] ss:$48 sps:$4 sm:$0xff]  }
0x17ab   : > { %9136 = vmatpush2.bf16.msra.mxu0 %v16548_v61  ;;  %v16601_v61 = vld [vmem:[%s18462_s13 + $0x144] ss:$48 sps:$4 sm:$0xff]  }
0x17ac   : > { %9018 = vmatmul.mubr.bf16.gmra.mxu1 %v20777_v34  ;;  %9137 = vmatprep.subr.bf16.mxu0 %v16556_v38  ;;  %v16596_v38 = vld [vmem:[%s18462_s13 + $0x740] ss:$48 sps:$4 sm:$0xff]  }
0x17ad   : > { %9027 = vmatprep.mubr.bf16.mxu1 %v20801_v8  ;;  %9193 = vmatpush1.bf16.msra.mxu1 %v16551_v46  ;;  %v16604_v46 = vld [vmem:[%s18462_s13 + $0x6e4] ss:$48 sps:$4 sm:$0xff]  }
0x17ae   : > { %9194 = vmatprep.subr.bf16.mxu1 %v16559_v20  ;;  %v16599_v20 = vld [vmem:[%s18462_s13 + $0x140] ss:$48 sps:$4 sm:$0xff]  }
0x17af   : > { %9138 = vmatpush2.bf16.msra.mxu0 %v16554_v43  ;;  %v16607_v43 = vld [vmem:[%s18462_s13 + $0xe4] ss:$48 sps:$4 sm:$0xff]  }
0x17b0   : > { %9139 = vmatprep.subr.bf16.mxu0 %v16562_v44  ;;  %v16602_v44 = vld [vmem:[%s18462_s13 + $0x6e0] ss:$48 sps:$4 sm:$0xff]  }
0x17b1   : > { %9195 = vmatpush1.bf16.msra.mxu1 %v16557_v11  ;;  %v16610_v11 = vld [vmem:[%s18462_s13 + $0x684] ss:$48 sps:$4 sm:$0xff]  }
0x17b2   : > { %9196 = vmatprep.subr.bf16.mxu1 %v16565_v42  ;;  %v20974_v42 = vld [vmem:[%s18469_s1] sm:$0xff] }
0x17b3   : > { %9140 = vmatpush2.bf16.msra.mxu0 %v16560_v16  ;;  %v16605_v16 = vld [vmem:[%s18462_s13 + $0xe0] ss:$48 sps:$4 sm:$0xff]  }
0x17b4   : > { %9028 = vmatmul.mubr.bf16.gmra.mxu1 %v20805_v25  ;;  %9141 = vmatprep.subr.bf16.mxu0 %v16568_v56  ;;  %v16613_v56 = vld [vmem:[%s18462_s13 + $0x84] ss:$48 sps:$4 sm:$0xff]  }
0x17b5   : > { %9197 = vmatpush1.bf16.msra.mxu1 %v16563_v6  ;;  %9216 = vmatprep.mubr.bf16.mxu1 %v22906_v49  ;;  %v16608_v6 = vld [vmem:[%s18462_s13 + $0x680] ss:$48 sps:$4 sm:$0xff]  }
0x17b6   : > { %9198 = vmatprep.subr.bf16.mxu1 %v16571_v59  ;;  %v20982_v59 = vrot.slane %v20974_v42, %v22969_v36 }
0x17b7   : > { %9142 = vmatpush2.bf16.msra.mxu0 %v16566_v39  ;;  %v16616_v39 = vld [vmem:[%s18462_s13 + $0x624] ss:$48 sps:$4 sm:$0xff]  }
0x17b8   : > { %9330 = vmatprep.subr.bf16.mxu0 %v16574_v13 }
0x17b9   : > { %9199 = vmatpush1.bf16.msra.mxu1 %v16569_v33  ;;  %v16611_v33 = vld [vmem:[%s18462_s13 + $0x80] ss:$48 sps:$4 sm:$0xff]  }
0x17ba   : > { %9144 = vmatmul.mubr.bf16.vlgmr.msra.gmra.mxu0 %v20678_v14  ;;  %9257 = vmatprep.subr.bf16.mxu1 %v16577_v27 }
0x17bb   : > { %9153 = vmatprep.mubr.bf16.mxu0 %v20705_v40  ;;  %9331 = vmatpush1.bf16.msra.mxu0 %v16572_v0  ;;  %v16619_v0 = vld [vmem:[%s18462_s13 + $0x24] ss:$48 sps:$4 sm:$0xff]  }
0x17bc   : > { %9217 = vmatmul.mubr.bf16.vlgmr.msra.gmra.mxu1 %v20674_v21  ;;  %9332 = vmatprep.subr.bf16.mxu0 %v16580_v17 }
0x17bd   : > { %9258 = vmatpush1.bf16.msra.mxu1 %v16575_v29  ;;  %9226 = vmatprep.mubr.bf16.mxu1 %v22906_v49 }
0x17be   : > { %9259 = vmatprep.subr.bf16.mxu1 %v16583_v18  ;;  %v16614_v18 = vld [vmem:[%s18462_s13 + $0x620] ss:$48 sps:$4 sm:$0xff]  }
0x17bf   : > { %9333 = vmatpush1.bf16.msra.mxu0 %v16578_v5 }
0x17c0   : > { %9334 = vmatprep.subr.bf16.mxu0 %v16586_v28  ;;  %v16622_v28 = vld [vmem:[%s18462_s13 + $0x2cc] ss:$48 sps:$4 sm:$0xff]  }
0x17c1   : > { %9260 = vmatpush1.bf16.msra.mxu1 %v16581_v9 }
0x17c2   : > { %9154 = vmatmul.mubr.bf16.gmra.mxu0 %v20711_v15  ;;  %9261 = vmatprep.subr.bf16.mxu1 %v16589_v45 }
0x17c3   : > { %9163 = vmatprep.mubr.bf16.mxu0 %v20772_v35  ;;  %9335 = vmatpush1.bf16.msra.mxu0 %v16584_v26  ;;  %v16617_v26 = vld [vmem:[%s18462_s13 + $0x20] ss:$48 sps:$4 sm:$0xff]  }
0x17c4   : > { %9227 = vmatmul.mubr.bf16.gmra.mxu1 %v20707_v62  ;;  %9336 = vmatprep.subr.bf16.mxu0 %v16592_v31 }
0x17c5   : > { %9262 = vmatpush1.bf16.msra.mxu1 %v16587_v30  ;;  %9236 = vmatprep.mubr.bf16.mxu1 %v22906_v49  ;;  %v16625_v30 = vld [vmem:[%s18462_s13 + $0x5c4] ss:$48 sps:$4 sm:$0xff]  }
0x17c6   : > { %9263 = vmatprep.subr.bf16.mxu1 %v16595_v47 }
0x17c7   : > { %9337 = vmatpush1.bf16.msra.mxu0 %v16590_v19 }
0x17c8   : > { %9338 = vmatprep.subr.bf16.mxu0 %v16598_v22  ;;  %v16620_v22 = vld [vmem:[%s18462_s13 + $0x2c8] ss:$48 sps:$4 sm:$0xff]  }
0x17c9   : > { %9264 = vmatpush1.bf16.msra.mxu1 %v16593_v7 }
0x17ca   : > { %9164 = vmatmul.mubr.bf16.gmra.mxu0 %v20777_v34  ;;  %9265 = vmatprep.subr.bf16.mxu1 %v16601_v61  ;;  %v16628_v61 = vld [vmem:[%s18462_s13 + $0x26c] ss:$48 sps:$4 sm:$0xff]  }
0x17cb   : > { %9173 = vmatprep.mubr.bf16.mxu0 %v20801_v8  ;;  %9339 = vmatpush1.bf16.msra.mxu0 %v16596_v38 }
0x17cc   : > { %9237 = vmatmul.mubr.bf16.gmra.mxu1 %v20774_v54  ;;  %9340 = vmatprep.subr.bf16.mxu0 %v16604_v46 }
0x17cd   : > { %9266 = vmatpush1.bf16.msra.mxu1 %v16599_v20  ;;  %9246 = vmatprep.mubr.bf16.mxu1 %v22906_v49  ;;  %v16623_v20 = vld [vmem:[%s18462_s13 + $0x5c0] ss:$48 sps:$4 sm:$0xff]  }
0x17ce   : > { %9267 = vmatprep.subr.bf16.mxu1 %v16607_v43 }
0x17cf   : > { %9341 = vmatpush1.bf16.msra.mxu0 %v16602_v44  ;;  %v16631_v44 = vld [vmem:[%s18462_s13 + $0x564] ss:$48 sps:$4 sm:$0xff]  }
0x17d0   : > { %9342 = vmatprep.subr.bf16.mxu0 %v16610_v11 }
0x17d1   : > { %9268 = vmatpush1.bf16.msra.mxu1 %v16605_v16  ;;  %v21012_v16 = vrot.slane %v20974_v42, %v22970_v24 }
0x17d2   : > { %v8780_v13 = vpop.f32.mrf.mxu0  ;;  %9174 = vmatmul.mubr.bf16.gmra.mxu0 %v20805_v25  ;;  %9269 = vmatprep.subr.bf16.mxu1 %v16613_v56 }
0x17d3   : > { %v8707_v27 = vpop.f32.mrf.mxu1  ;;  %9343 = vmatpush1.bf16.msra.mxu0 %v16608_v6  ;;  %9362 = vmatprep.mubr.bf16.mxu0 %v22906_v49 }
0x17d4   : > { %v8708_v17 = vadd.f32 %v8707_v27, %v20982_v59  ;;  %v20989_v29 = vpop.f32.mrf.mxu0  ;;  %9247 = vmatmul.mubr.bf16.gmra.mxu1 %v20803_v37  ;;  %9344 = vmatprep.subr.bf16.mxu0 %v16616_v39  ;;  %v16626_v39 = vld [vmem:[%s18462_s13 + $0x268] ss:$48 sps:$4 sm:$0xff]   ;;  %v16634_v27 = vld [vmem:[%s18462_s13 + $0x20c] ss:$48 sps:$4 sm:$0xff]  }
0x17d5   : > { %v20994_v5 = vpop.f32.mrf.mxu1  ;;  %9270 = vmatpush1.bf16.msra.mxu1 %v16611_v33  ;;  %9289 = vmatprep.mubr.bf16.mxu1 %v20672_v2 }
0x17d6   : > { %v8781_v9 = vadd.f32 %v8780_v13, %v8708_v17  ;;  %v8784_v45 = vpop.f32.mrf.mxu0  ;;  %9271 = vmatprep.subr.bf16.mxu1 %v16619_v0  ;;  %v8710_v10 = vadd.f32 %v20994_v5, %v21012_v16 }
0x17d7   : > { %v8711_v31 = vpop.f32.mrf.mxu1  ;;  %9345 = vmatpush1.bf16.msra.mxu0 %v16614_v18 }
0x17d8   : > { %v8712_v47 = vadd.f32 %v8711_v31, %v20982_v59  ;;  %v21001_v19 = vpop.f32.mrf.mxu0  ;;  %9403 = vmatprep.subr.bf16.mxu0 %v16622_v28  ;;  %v9549_v11 = vmax.f32 %v8781_v9, 0.0  ;;  %v16629_v28 = vld [vmem:[%s18462_s13 + $0x560] ss:$48 sps:$4 sm:$0xff]   ;;  %v8783_v5 = vadd.f32 %v20989_v29, %v8710_v10 }
0x17d9   : > { %v21004_v7 = vpop.f32.mrf.mxu1  ;;  %9272 = vmatpush1.bf16.msra.mxu1 %v16617_v26 }
0x17da   : > { %v8785_v38 = vadd.f32 %v8784_v45, %v8712_v47  ;;  %v8790_v46 = vpop.f32.mrf.mxu0  ;;  %9363 = vmatmul.mubr.bf16.vlgmr.msra.gmra.mxu0 %v20674_v21  ;;  %9273 = vmatprep.subr.bf16.mxu1 %v16625_v30  ;;  %v16637_v45 = vld [vmem:[%s18462_s13 + $0x504] ss:$48 sps:$4 sm:$0xff]   ;;  %v16632_v30 = vld [vmem:[%s18462_s13 + $0x208] ss:$48 sps:$4 sm:$0xff]   ;;  %v9550_v10 = vmax.f32 %v8783_v5, 0.0 }
0x17db   : > { %v8717_v43 = vpop.f32.mrf.mxu1  ;;  %9404 = vmatpush1.bf16.msra.mxu0 %v16620_v22  ;;  %9372 = vmatprep.mubr.bf16.mxu0 %v22906_v49  ;;  %v16640_v22 = vld [vmem:[%s18462_s13 + $0x1ac] ss:$48 sps:$4 sm:$0xff]  }
0x17dc   : > { %v9561_v56 = vmax.f32 %v8785_v38, 0.0  ;;  %v8718_v6 = vadd.f32 %v8717_v43, %v20982_v59  ;;  %v8792_v13 = vpop.f32.mrf.mxu0  ;;  %9405 = vmatprep.subr.bf16.mxu0 %v16628_v61  ;;  %v16635_v38 = vld [vmem:[%s18462_s13 + $0x500] ss:$48 sps:$4 sm:$0xff]  }
0x17dd   : > { %v8719_v33 = vpop.f32.mrf.mxu1  ;;  %9274 = vmatpush2.bf16.msra.mxu1 %v16623_v20 }
0x17de   : > { %v21018_v0 = vpack.c.bf16 %v9561_v56, %v9549_v11  ;;  %v8791_v17 = vadd.f32 %v8790_v46, %v8718_v6  ;;  %v8720_v18 = vadd.f32 %v8719_v33, %v21012_v16  ;;  %9275 = vmatprep.subr.bf16.mxu1 %v16631_v44  ;;  %v8794_v47 = vpop.f32.mrf.mxu0  ;;  %v16643_v46 = vld [vmem:[%s18462_s13 + $0x4a4] ss:$48 sps:$4 sm:$0xff]   ;;  %v16638_v44 = vld [vmem:[%s18462_s13 + $0x1a8] ss:$48 sps:$4 sm:$0xff]   ;;  %v16646_v11 = vld [vmem:[%s18462_s13 + $0x14c] ss:$48 sps:$4 sm:$0xff]  }
0x17df   : > { %v8721_v9 = vpop.f32.mrf.mxu1  ;;  %9406 = vmatpush1.bf16.msra.mxu0 %v16626_v39  ;;  %v16641_v6 = vld [vmem:[%s18462_s13 + $0x4a0] ss:$48 sps:$4 sm:$0xff]   ;;  %v16649_v39 = vld [vmem:[%s18462_s13 + $0x444] ss:$48 sps:$4 sm:$0xff]   ;;  %v16652_v33 = vld [vmem:[%s18462_s13 + $0xec] ss:$48 sps:$4 sm:$0xff]  }
0x17e0   : > { %23012 = vst [vmem:[#allocation89_spill] sm:$0xff] %v21018_v0  ;;  %v21023_v26 = vadd.f32 %v8792_v13, %v8720_v18  ;;  %v8722_v31 = vadd.f32 %v8721_v9, %v20982_v59  ;;  %9407 = vmatprep.subr.bf16.mxu0 %v16634_v27  ;;  %v9573_v20 = vmax.f32 %v8791_v17, 0.0  ;;  %v16644_v13 = vld [vmem:[%s18462_s13 + $0x148] ss:$48 sps:$4 sm:$0xff]   ;;  %v16647_v27 = vld [vmem:[%s18462_s13 + $0x440] ss:$48 sps:$4 sm:$0xff]  }
0x17e1   : > { %9276 = vmatpush2.bf16.msra.mxu1 %v16629_v28  ;;  %v16655_v17 = vld [vmem:[%s18462_s13 + $0x3e4] ss:$48 sps:$4 sm:$0xff]   ;;  %v16650_v18 = vld [vmem:[%s18462_s13 + $0xe8] ss:$48 sps:$4 sm:$0xff]   ;;  %v16658_v28 = vld [vmem:[%s18462_s13 + $0x8c] ss:$48 sps:$4 sm:$0xff]  }
0x17e2   : > { %v8795_v61 = vadd.f32 %v8794_v47, %v8722_v31  ;;  %9373 = vmatmul.mubr.bf16.gmra.mxu0 %v20707_v62  ;;  %9277 = vmatprep.subr.bf16.mxu1 %v16637_v45  ;;  %v16653_v9 = vld [vmem:[%s18462_s13 + $0x3e0] ss:$48 sps:$4 sm:$0xff]   ;;  %v16661_v45 = vld [vmem:[%s18462_s13 + $0x384] ss:$48 sps:$4 sm:$0xff]   ;;  %v16656_v31 = vld [vmem:[%s18462_s13 + $0x88] ss:$48 sps:$4 sm:$0xff]  }
0x17e3   : > { %9408 = vmatpush1.bf16.msra.mxu0 %v16632_v30  ;;  %9382 = vmatprep.mubr.bf16.mxu0 %v22906_v49  ;;  %v16664_v30 = vld [vmem:[%s18462_s13 + $0x2c] ss:$48 sps:$4 sm:$0xff]   ;;  %v16659_v47 = vld [vmem:[%s18462_s13 + $0x380] ss:$48 sps:$4 sm:$0xff]  }
0x17e4   : > { %v9585_v43 = vmax.f32 %v8795_v61, 0.0  ;;  %9409 = vmatprep.subr.bf16.mxu0 %v16640_v22  ;;  %v16667_v22 = vld [vmem:[%s18462_s13 + $0x324] ss:$48 sps:$4 sm:$0xff]   ;;  %v16662_v61 = vld [vmem:[%s18462_s13 + $0x28] ss:$48 sps:$4 sm:$0xff]  }
0x17e5   : > { %9278 = vmatpush2.bf16.msra.mxu1 %v16635_v38  ;;  %v16670_v38 = vld [vmem:[%s18462_s13 + $0x5cc] ss:$48 sps:$4 sm:$0xff]  }
0x17e6   : > { %v21034_v56 = vpack.c.bf16 %v9585_v43, %v9573_v20  ;;  %9279 = vmatprep.subr.bf16.mxu1 %v16643_v46  ;;  %v16665_v46 = vld [vmem:[%s18462_s13 + $0x320] ss:$48 sps:$4 sm:$0xff]   ;;  %v16673_v20 = vld [vmem:[%s18462_s13 + $0x8cc] ss:$48 sps:$4 sm:$0xff]   ;;  %v16668_v43 = vld [vmem:[%s18462_s13 + $0x5c8] ss:$48 sps:$4 sm:$0xff]  }
0x17e7   : > { %9410 = vmatpush1.bf16.msra.mxu0 %v16638_v44  ;;  %v16676_v44 = vld [vmem:[%s18462_s13 + $0x56c] ss:$48 sps:$4 sm:$0xff]  }
0x17e8   : > { %23013 = vst [vmem:[#allocation78_spill] sm:$0xff] %v21034_v56  ;;  %9411 = vmatprep.subr.bf16.mxu0 %v16646_v11  ;;  %v16671_v11 = vld [vmem:[%s18462_s13 + $0x8c8] ss:$48 sps:$4 sm:$0xff]  }
0x17e9   : > { %9280 = vmatpush2.bf16.msra.mxu1 %v16641_v6  ;;  %v16674_v6 = vld [vmem:[%s18462_s13 + $0x568] ss:$48 sps:$4 sm:$0xff]  }
0x17ea   : > { %9383 = vmatmul.mubr.bf16.gmra.mxu0 %v20774_v54  ;;  %9281 = vmatprep.subr.bf16.mxu1 %v16649_v39  ;;  %v16682_v39 = vld [vmem:[%s18462_s13 + $0x50c] ss:$48 sps:$4 sm:$0xff]  }
0x17eb   : > { %9412 = vmatpush1.bf16.msra.mxu0 %v16644_v13  ;;  %9392 = vmatprep.mubr.bf16.mxu0 %v22906_v49  ;;  %v16677_v13 = vld [vmem:[%s18462_s13 + $0x868] ss:$48 sps:$4 sm:$0xff]  }
0x17ec   : > { %9413 = vmatprep.subr.bf16.mxu0 %v16652_v33  ;;  %v16685_v33 = vld [vmem:[%s18462_s13 + $0x80c] ss:$48 sps:$4 sm:$0xff]  }
0x17ed   : > { %9282 = vmatpush2.bf16.msra.mxu1 %v16647_v27  ;;  %v16680_v27 = vld [vmem:[%s18462_s13 + $0x508] ss:$48 sps:$4 sm:$0xff]  }
0x17ee   : > { %9283 = vmatprep.subr.bf16.mxu1 %v16655_v17  ;;  %v16688_v17 = vld [vmem:[%s18462_s13 + $0x4ac] ss:$48 sps:$4 sm:$0xff]  }
0x17ef   : > { %9414 = vmatpush1.bf16.msra.mxu0 %v16650_v18  ;;  %v16683_v18 = vld [vmem:[%s18462_s13 + $0x808] ss:$48 sps:$4 sm:$0xff]  }
0x17f0   : > { %9415 = vmatprep.subr.bf16.mxu0 %v16658_v28  ;;  %v16691_v28 = vld [vmem:[%s18462_s13 + $0x7ac] ss:$48 sps:$4 sm:$0xff]  }
0x17f1   : > { %9284 = vmatpush2.bf16.msra.mxu1 %v16653_v9  ;;  %v16686_v9 = vld [vmem:[%s18462_s13 + $0x4a8] ss:$48 sps:$4 sm:$0xff]  }
0x17f2   : > { %9393 = vmatmul.mubr.bf16.gmra.mxu0 %v20803_v37  ;;  %9285 = vmatprep.subr.bf16.mxu1 %v16661_v45  ;;  %v16694_v45 = vld [vmem:[%s18462_s13 + $0x44c] ss:$48 sps:$4 sm:$0xff]  }
0x17f3   : > { %9416 = vmatpush1.bf16.msra.mxu0 %v16656_v31  ;;  %9435 = vmatprep.mubr.bf16.mxu0 %v20672_v2  ;;  %v16679_v2 = vld [vmem:[%s18462_s13 + $0x86c] ss:$48 sps:$4 sm:$0xff]   ;;  %v16689_v31 = vld [vmem:[%s18462_s13 + $0x7a8] ss:$48 sps:$4 sm:$0xff]  }
0x17f4   : > { %9417 = vmatprep.subr.bf16.mxu0 %v16664_v30  ;;  %v16697_v30 = vld [vmem:[%s18462_s13 + $0x74c] ss:$48 sps:$4 sm:$0xff]  }
0x17f5   : > { %9286 = vmatpush2.bf16.msra.mxu1 %v16659_v47  ;;  %v16692_v47 = vld [vmem:[%s18462_s13 + $0x448] ss:$48 sps:$4 sm:$0xff]  }
0x17f6   : > { %9287 = vmatprep.subr.bf16.mxu1 %v16667_v22  ;;  %v21079_v22 = vpop.f32.mrf.mxu0 }
0x17f7   : > { %9418 = vmatpush1.bf16.msra.mxu0 %v16662_v61  ;;  %v16700_v61 = vld [vmem:[%s18462_s13 + $0x3ec] ss:$48 sps:$4 sm:$0xff]  }
0x17f8   : > { %9419 = vmatprep.subr.bf16.mxu0 %v16670_v38  ;;  %v21082_v38 = vpop.f32.mrf.mxu1 }
0x17f9   : > { %9288 = vmatpush2.bf16.msra.mxu1 %v16665_v46  ;;  %v16695_v46 = vld [vmem:[%s18462_s13 + $0x748] ss:$48 sps:$4 sm:$0xff]  }
0x17fa   : > { %9476 = vmatprep.subr.bf16.mxu1 %v16673_v20 }
0x17fb   : > { %9420 = vmatpush2.bf16.msra.mxu0 %v16668_v43  ;;  %v16703_v43 = vld [vmem:[%s18462_s13 + $0x6ec] ss:$48 sps:$4 sm:$0xff]  }
0x17fc   : > { %9290 = vmatmul.mubr.bf16.vlgmr.msra.gmra.mxu1 %v20678_v14  ;;  %9421 = vmatprep.subr.bf16.mxu0 %v16676_v44 }
0x17fd   : > { %9299 = vmatprep.mubr.bf16.mxu1 %v20705_v40  ;;  %9477 = vmatpush1.bf16.msra.mxu1 %v16671_v11  ;;  %v16698_v11 = vld [vmem:[%s18462_s13 + $0x3e8] ss:$48 sps:$4 sm:$0xff]  }
0x17fe   : > { %9478 = vmatprep.subr.bf16.mxu1 %v16679_v2 }
0x17ff   : > { %9422 = vmatpush2.bf16.msra.mxu0 %v16674_v6 }
0x1800   : > { %9423 = vmatprep.subr.bf16.mxu0 %v16682_v39  ;;  %v16706_v39 = vld [vmem:[%s18462_s13 + $0x38c] ss:$48 sps:$4 sm:$0xff]  }
0x1801   : > { %9479 = vmatpush1.bf16.msra.mxu1 %v16677_v13 }
0x1802   : > { %9480 = vmatprep.subr.bf16.mxu1 %v16685_v33  ;;  %v16701_v33 = vld [vmem:[%s18462_s13 + $0x6e8] ss:$48 sps:$4 sm:$0xff]  }
0x1803   : > { %9424 = vmatpush2.bf16.msra.mxu0 %v16680_v27 }
0x1804   : > { %9300 = vmatmul.mubr.bf16.gmra.mxu1 %v20711_v15  ;;  %9425 = vmatprep.subr.bf16.mxu0 %v16688_v17 }
0x1805   : > { %9309 = vmatprep.mubr.bf16.mxu1 %v20772_v35  ;;  %9481 = vmatpush1.bf16.msra.mxu1 %v16683_v18 }
0x1806   : > { %9482 = vmatprep.subr.bf16.mxu1 %v16691_v28  ;;  %v16709_v28 = vld [vmem:[%s18462_s13 + $0x68c] ss:$48 sps:$4 sm:$0xff]  }
0x1807   : > { %9426 = vmatpush2.bf16.msra.mxu0 %v16686_v9 }
0x1808   : > { %9427 = vmatprep.subr.bf16.mxu0 %v16694_v45  ;;  %v16704_v45 = vld [vmem:[%s18462_s13 + $0x388] ss:$48 sps:$4 sm:$0xff]  }
0x1809   : > { %9483 = vmatpush1.bf16.msra.mxu1 %v16689_v31 }
0x180a   : > { %v8800_v20 = vpop.f32.mrf.mxu0  ;;  %9484 = vmatprep.subr.bf16.mxu1 %v16697_v30 }
0x180b   : > { %9428 = vmatpush2.bf16.msra.mxu0 %v16692_v47  ;;  %v8727_v44 = vpop.f32.mrf.mxu1 }
0x180c   : > { %9310 = vmatmul.mubr.bf16.gmra.mxu1 %v20777_v34  ;;  %v8728_v2 = vadd.f32 %v8727_v44, %v20982_v59  ;;  %v8802_v6 = vpop.f32.mrf.mxu0  ;;  %9429 = vmatprep.subr.bf16.mxu0 %v16700_v61  ;;  %v16712_v61 = vld [vmem:[%s18462_s13 + $0x32c] ss:$48 sps:$4 sm:$0xff]  }
0x180d   : > { %9319 = vmatprep.mubr.bf16.mxu1 %v20801_v8  ;;  %9485 = vmatpush1.bf16.msra.mxu1 %v16695_v46  ;;  %v8729_v13 = vpop.f32.mrf.mxu1 }
0x180e   : > { %v8801_v27 = vadd.f32 %v8800_v20, %v8728_v2  ;;  %v8730_v17 = vadd.f32 %v8729_v13, %v21012_v16  ;;  %v8804_v18 = vpop.f32.mrf.mxu0  ;;  %9486 = vmatprep.subr.bf16.mxu1 %v16703_v43  ;;  %v16707_v20 = vld [vmem:[%s18462_s13 + $0x688] ss:$48 sps:$4 sm:$0xff]  }
0x180f   : > { %9430 = vmatpush2.bf16.msra.mxu0 %v16698_v11  ;;  %v8731_v9 = vpop.f32.mrf.mxu1  ;;  %v16715_v11 = vld [vmem:[%s18462_s13 + $0x62c] ss:$48 sps:$4 sm:$0xff]  }
0x1810   : > { %v21095_v31 = vadd.f32 %v8802_v6, %v8730_v17  ;;  %v8732_v30 = vadd.f32 %v8731_v9, %v20982_v59  ;;  %v21098_v47 = vpop.f32.mrf.mxu0  ;;  %9431 = vmatprep.subr.bf16.mxu0 %v16706_v39  ;;  %v16710_v6 = vld [vmem:[%s18462_s13 + $0x328] ss:$48 sps:$4 sm:$0xff]   ;;  %v9597_v13 = vmax.f32 %v8801_v27, 0.0  ;;  %v16718_v9 = vld [vmem:[%s18471_s17 + $0x22c] ss:$12 sps:$4 sm:$0xff]  }
0x1811   : > { %9487 = vmatpush1.bf16.msra.mxu1 %v16701_v33  ;;  %v21101_v46 = vpop.f32.mrf.mxu1 }
0x1812   : > { %v8805_v43 = vadd.f32 %v8804_v18, %v8732_v30  ;;  %v8810_v44 = vpop.f32.mrf.mxu0  ;;  %9488 = vmatprep.subr.bf16.mxu1 %v16709_v28  ;;  %v16713_v30 = vld [vmem:[%s18462_s13 + $0x628] ss:$48 sps:$4 sm:$0xff]  }
0x1813   : > { %9432 = vmatpush2.bf16.msra.mxu0 %v16704_v45  ;;  %v8737_v2 = vpop.f32.mrf.mxu1 }
0x1814   : > { %v9609_v17 = vmax.f32 %v8805_v43, 0.0  ;;  %9320 = vmatmul.mubr.bf16.gmra.mxu1 %v20805_v25  ;;  %v8738_v39 = vadd.f32 %v8737_v2, %v20982_v59  ;;  %v8812_v33 = vpop.f32.mrf.mxu0  ;;  %9433 = vmatprep.subr.bf16.mxu0 %v16712_v61  ;;  %v16716_v61 = vld [vmem:[%s18471_s17 + $0x228] ss:$12 sps:$4 sm:$0xff]  }
0x1815   : > { %9489 = vmatpush1.bf16.msra.mxu1 %v16707_v20  ;;  %v8739_v18 = vpop.f32.mrf.mxu1  ;;  %9508 = vmatprep.mubr.bf16.mxu1 %v22906_v49 }
0x1816   : > { %v21111_v28 = vpack.c.bf16 %v9609_v17, %v9597_v13  ;;  %v8811_v27 = vadd.f32 %v8810_v44, %v8738_v39  ;;  %v8740_v45 = vadd.f32 %v8739_v18, %v21012_v16  ;;  %v8814_v43 = vpop.f32.mrf.mxu0  ;;  %9490 = vmatprep.subr.bf16.mxu1 %v16715_v11  ;;  %v16724_v13 = vld [vmem:[%s18471_s17 + $0x214] ss:$12 sps:$4 sm:$0xff]  }
0x1817   : > { %9434 = vmatpush2.bf16.msra.mxu0 %v16710_v6  ;;  %v8741_v2 = vpop.f32.mrf.mxu1  ;;  %v16719_v17 = vld [vmem:[%s18471_s17 + $0xa8] ss:$12 sps:$4 sm:$0xff]  }
0x1818   : > { %23014 = vst [vmem:[#allocation61_spill] sm:$0xff] %v21111_v28  ;;  %v21116_v20 = vadd.f32 %v8812_v33, %v8740_v45  ;;  %v8742_v52 = vadd.f32 %v8741_v2, %v20982_v59  ;;  %v21119_v3 = vpop.f32.mrf.mxu0  ;;  %11703 = vmatprep.subr.bf16.mxu0 %v16718_v9  ;;  %v16727_v39 = vld [vmem:[%s18471_s17 + $0x94] ss:$12 sps:$4 sm:$0xff]   ;;  %v16722_v59 = vld [vmem:[%s18471_s17 + $0x210] ss:$12 sps:$4 sm:$0xff]   ;;  %v9621_v33 = vmax.f32 %v8811_v27, 0.0 }
0x1819   : > { %9491 = vmatpush1.bf16.msra.mxu1 %v16713_v30  ;;  %v21122_v44 = vpop.f32.mrf.mxu1  ;;  %v16733_v45 = vld [vmem:[%s18471_s17 + $0x7c] ss:$12 sps:$4 sm:$0xff]   ;;  %v16728_v2 = vld [vmem:[%s18471_s17 + $0x1f8] ss:$12 sps:$4 sm:$0xff]  }
0x181a   : > { %v8815_v11 = vadd.f32 %v8814_v43, %v8742_v52  ;;  %9436 = vmatmul.mubr.bf16.vlgmr.msra.gmra.mxu0 %v20678_v14  ;;  %v21126_v6 = vpop.f32.mrf.mxu0  ;;  %11630 = vmatprep.subr.bf16.mxu1 %v16721_v53  ;;  %v16730_v14 = vld [vmem:[%s18471_s17 + $0x1fc] ss:$12 sps:$4 sm:$0xff]  }
0x181b   : > { %9445 = vmatprep.mubr.bf16.mxu0 %v20705_v40  ;;  %11704 = vmatpush1.bf16.msra.mxu0 %v16716_v61  ;;  %v16725_v53 = vld [vmem:[%s18471_s17 + $0x90] ss:$12 sps:$4 sm:$0xff]  }
0x181c   : > { %v9633_v9 = vmax.f32 %v8815_v11, 0.0  ;;  %9509 = vmatmul.mubr.bf16.vlgmr.msra.gmra.mxu1 %v20674_v21  ;;  %v21132_v18 = vpop.f32.mrf.mxu1  ;;  %v8855_v52 = vpop.f32.mrf.mxu0  ;;  %11705 = vmatprep.subr.bf16.mxu0 %v16724_v13  ;;  %v23016_v21 = vld [vmem:[#allocation51_spill] sm:$0xff] }
0x181d   : > { %11631 = vmatpush1.bf16.msra.mxu1 %v16719_v17  ;;  %9518 = vmatprep.mubr.bf16.mxu1 %v22906_v49  ;;  %v21143_v43 = vsub.s32 3, %v23016_v21  ;;  %v16736_v13 = vld [vmem:[%s18471_s17 + $0x1e4] ss:$12 sps:$4 sm:$0xff]  }
0x181e   : > { %v21137_v40 = vpack.c.bf16 %v9633_v9, %v9621_v33  ;;  %v8928_v30 = vpop.f32.mrf.mxu1  ;;  %v21139_v27 = vpop.f32.mrf.mxu0  ;;  %11632 = vmatprep.subr.bf16.mxu1 %v16727_v39  ;;  %v16731_v17 = vld [vmem:[%s18471_s17 + $0x78] ss:$12 sps:$4 sm:$0xff]   ;;  %v16734_v9 = vld [vmem:[%s18471_s17 + $0x1e0] ss:$12 sps:$4 sm:$0xff]  }
0x181f   : > { %23017 = vst [vmem:[#allocation57_spill] sm:$0xff] %v21143_v43  ;;  %11706 = vmatpush1.bf16.msra.mxu0 %v16722_v59  ;;  %v16739_v39 = vld [vmem:[%s18471_s17 + $0x64] ss:$12 sps:$4 sm:$0xff]   ;;  %v21156_v59 = vrot.slane %v20974_v42, %v21143_v43 }
0x1820   : > { %23015 = vst [vmem:[#allocation64_spill] sm:$0xff] %v21137_v40  ;;  %v8859_v61 = vpop.f32.mrf.mxu0  ;;  %11707 = vmatprep.subr.bf16.mxu0 %v16730_v14  ;;  %v21148_v11 = vpop.f32.mrf.mxu1 }
0x1821   : > { %11633 = vmatpush1.bf16.msra.mxu1 %v16725_v53  ;;  %v8860_v53 = vadd.f32 %v8859_v61, %v21156_v59 }
0x1822   : > { %9446 = vmatmul.mubr.bf16.gmra.mxu0 %v20711_v15  ;;  %v21151_v33 = vpop.f32.mrf.mxu0  ;;  %11634 = vmatprep.subr.bf16.mxu1 %v16733_v45  ;;  %v16742_v15 = vld [vmem:[%s18471_s17 + $0x1cc] ss:$12 sps:$4 sm:$0xff]   ;;  %v8932_v23 = vpop.f32.mrf.mxu1 }
0x1823   : > { %9455 = vmatprep.mubr.bf16.mxu0 %v20772_v35  ;;  %11708 = vmatpush1.bf16.msra.mxu0 %v16728_v2  ;;  %v16737_v45 = vld [vmem:[%s18471_s17 + $0x60] ss:$12 sps:$4 sm:$0xff]   ;;  %v8856_v2 = vadd.f32 %v8855_v52, %v21156_v59  ;;  %v8933_v58 = vadd.f32 %v8932_v23, %v8860_v53 }
0x1824   : > { %9519 = vmatmul.mubr.bf16.gmra.mxu1 %v20707_v62  ;;  %v21161_v14 = vpop.f32.mrf.mxu0  ;;  %11709 = vmatprep.subr.bf16.mxu0 %v16736_v13  ;;  %v16745_v35 = vld [vmem:[%s18471_s17 + $0x4c] ss:$12 sps:$4 sm:$0xff]   ;;  %v8714_v62 = vadd.f32 %v21004_v7, %v21012_v16  ;;  %v16740_v13 = vld [vmem:[%s18471_s17 + $0x1c8] ss:$12 sps:$4 sm:$0xff]  }
0x1825   : > { %11635 = vmatpush1.bf16.msra.mxu1 %v16731_v17  ;;  %9528 = vmatprep.mubr.bf16.mxu1 %v22906_v49  ;;  %v16748_v17 = vld [vmem:[%s18471_s17 + $0x1b4] ss:$12 sps:$4 sm:$0xff]   ;;  %v8929_v57 = vadd.f32 %v8928_v30, %v8856_v2  ;;  %v9564_v53 = vmax.f32 %v8933_v58, 0.0  ;;  %v21194_v30 = vpop.f32.mrf.mxu1  ;;  %v16760_v58 = vld [vmem:[%s18471_s17 + $0x184] ss:$12 sps:$4 sm:$0xff]  }
0x1826   : > { %v21167_v55 = vpop.f32.mrf.mxu0  ;;  %11636 = vmatprep.subr.bf16.mxu1 %v16739_v39  ;;  %v16743_v39 = vld [vmem:[%s18471_s17 + $0x48] ss:$12 sps:$4 sm:$0xff]  }
0x1827   : > { %11710 = vmatpush1.bf16.msra.mxu0 %v16734_v9  ;;  %v16751_v52 = vld [vmem:[%s18471_s17 + $0x34] ss:$12 sps:$4 sm:$0xff]   ;;  %v8787_v9 = vadd.f32 %v21001_v19, %v8714_v62  ;;  %v16749_v19 = vld [vmem:[%s18471_s17 + $0x30] ss:$12 sps:$4 sm:$0xff]   ;;  %v16752_v62 = vld [vmem:[%s18471_s17 + $0x198] ss:$12 sps:$4 sm:$0xff]  }
0x1828   : > { %v21174_v61 = vpop.f32.mrf.mxu0  ;;  %11711 = vmatprep.subr.bf16.mxu0 %v16742_v15  ;;  %v16746_v15 = vld [vmem:[%s18471_s17 + $0x1b0] ss:$12 sps:$4 sm:$0xff]  }
0x1829   : > { %11637 = vmatpush1.bf16.msra.mxu1 %v16737_v45  ;;  %v9562_v45 = vmax.f32 %v8787_v9, 0.0 }
0x182a   : > { %9456 = vmatmul.mubr.bf16.gmra.mxu0 %v20777_v34  ;;  %v21181_v7 = vpop.f32.mrf.mxu0  ;;  %11638 = vmatprep.subr.bf16.mxu1 %v16745_v35  ;;  %v16754_v34 = vld [vmem:[%s18471_s17 + $0x19c] ss:$12 sps:$4 sm:$0xff]   ;;  %v9552_v35 = vmax.f32 %v8929_v57, 0.0  ;;  %v16763_v57 = vld [vmem:[%s18471_s17 + $0x4] ss:$12 sps:$4 sm:$0xff]  }
0x182b   : > { %9465 = vmatprep.mubr.bf16.mxu0 %v20801_v8  ;;  %11712 = vmatpush1.bf16.msra.mxu0 %v16740_v13  ;;  %v21206_v13 = vpop.f32.mrf.mxu1 }
0x182c   : > { %9529 = vmatmul.mubr.bf16.gmra.mxu1 %v20774_v54  ;;  %v21188_v23 = vpop.f32.mrf.mxu0  ;;  %11713 = vmatprep.subr.bf16.mxu0 %v16748_v17  ;;  %v16757_v54 = vld [vmem:[%s18471_s17 + $0x1c] ss:$12 sps:$4 sm:$0xff]   ;;  %v21204_v29 = vpack.c.bf16 %v9564_v53, %v9552_v35  ;;  %v16769_v53 = vld [vmem:[%s18471_s17 + $0x16c] ss:$12 sps:$4 sm:$0xff]  }
0x182d   : > { %11639 = vmatpush1.bf16.msra.mxu1 %v16743_v39  ;;  %9538 = vmatprep.mubr.bf16.mxu1 %v22906_v49  ;;  %v16755_v49 = vld [vmem:[%s18471_s17 + $0x18] ss:$12 sps:$4 sm:$0xff]   ;;  %v21213_v39 = vpack.c.bf16 %v9562_v45, %v9550_v10  ;;  %v16767_v45 = vld [vmem:[%s18471_s17 + $0x168] ss:$12 sps:$4 sm:$0xff]  }
0x182e   : > { %v21196_v8 = vpop.f32.mrf.mxu0  ;;  %11640 = vmatprep.subr.bf16.mxu1 %v16751_v52  ;;  %23018 = vst [vmem:[#allocation86_spill] sm:$0xff] %v21204_v29  ;;  %v16758_v52 = vld [vmem:[%s18471_s17 + $0x180] ss:$12 sps:$4 sm:$0xff]  }
0x182f   : > { %11714 = vmatpush1.bf16.msra.mxu0 %v16746_v15  ;;  %23019 = vst [vmem:[#allocation90_spill] sm:$0xff] %v21213_v39  ;;  %v16761_v15 = vld [vmem:[%s18471_s17] ss:$12 sps:$4 sm:$0xff]  }
0x1830   : > { %v21200_v2 = vpop.f32.mrf.mxu0  ;;  %11715 = vmatprep.subr.bf16.mxu0 %v16754_v34  ;;  %v21222_v34 = vpop.f32.mrf.mxu1 }
0x1831   : > { %11641 = vmatpush1.bf16.msra.mxu1 %v16749_v19 }
0x1832   : > { %9466 = vmatmul.mubr.bf16.gmra.mxu0 %v20805_v25  ;;  %v21209_v17 = vpop.f32.mrf.mxu0  ;;  %11642 = vmatprep.subr.bf16.mxu1 %v16757_v54  ;;  %v16766_v25 = vld [vmem:[%s18471_s17 + $0x2ec] ss:$12 sps:$4 sm:$0xff]   ;;  %v16772_v54 = vld [vmem:[%s18471_s17 + $0x2d4] ss:$12 sps:$4 sm:$0xff]   ;;  %v21232_v35 = vpop.f32.mrf.mxu1 }
0x1833   : > { %11716 = vmatpush1.bf16.msra.mxu0 %v16752_v62  ;;  %11735 = vmatprep.mubr.bf16.mxu0 %v21204_v29  ;;  %v16775_v62 = vld [vmem:[%s18471_s17 + $0x154] ss:$12 sps:$4 sm:$0xff]   ;;  %v16803_v29 = vld [vmem:[%s18471_s17 + $0xd8] ss:$12 sps:$4 sm:$0xff]  }
0x1834   : > { %9539 = vmatmul.mubr.bf16.gmra.mxu1 %v20803_v37  ;;  %v21217_v9 = vpop.f32.mrf.mxu0  ;;  %11717 = vmatprep.subr.bf16.mxu0 %v16760_v58  ;;  %v16764_v37 = vld [vmem:[%s18471_s17 + $0x2e8] ss:$12 sps:$4 sm:$0xff]   ;;  %v16770_v58 = vld [vmem:[%s18471_s17 + $0x2d0] ss:$12 sps:$4 sm:$0xff]  }
0x1835   : > { %11643 = vmatpush1.bf16.msra.mxu1 %v16755_v49  ;;  %11662 = vmatprep.mubr.bf16.mxu1 %v21213_v39  ;;  %v16778_v49 = vld [vmem:[%s18471_s17 + $0x2bc] ss:$12 sps:$4 sm:$0xff]  }
0x1836   : > { %v21224_v5 = vpop.f32.mrf.mxu0  ;;  %11644 = vmatprep.subr.bf16.mxu1 %v16763_v57  ;;  %v16773_v57 = vld [vmem:[%s18471_s17 + $0x150] ss:$12 sps:$4 sm:$0xff]  }
0x1837   : > { %11718 = vmatpush1.bf16.msra.mxu0 %v16758_v52  ;;  %v21240_v52 = vpop.f32.mrf.mxu1 }
0x1838   : > { %v21228_v19 = vpop.f32.mrf.mxu0  ;;  %11719 = vmatprep.subr.bf16.mxu0 %v16766_v25  ;;  %v16781_v25 = vld [vmem:[%s18471_s17 + $0x13c] ss:$12 sps:$4 sm:$0xff]  }
0x1839   : > { %11645 = vmatpush1.bf16.msra.mxu1 %v16761_v15  ;;  %v16776_v15 = vld [vmem:[%s18471_s17 + $0x2b8] ss:$12 sps:$4 sm:$0xff]   ;;  %v21248_v50 = vpop.f32.mrf.mxu1 }
0x183a   : > { %11646 = vmatprep.subr.bf16.mxu1 %v16769_v53  ;;  %v21236_v10 = vpop.f32.mrf.mxu0 }
0x183b   : > { %11720 = vmatpush2.bf16.msra.mxu0 %v16764_v37  ;;  %v16784_v37 = vld [vmem:[%s18471_s17 + $0x2a4] ss:$12 sps:$4 sm:$0xff]   ;;  %v21256_v32 = vpop.f32.mrf.mxu1 }
0x183c   : > { %11721 = vmatprep.subr.bf16.mxu0 %v16772_v54  ;;  %v21244_v53 = vpop.f32.mrf.mxu0  ;;  %v16779_v54 = vld [vmem:[%s18471_s17 + $0x138] ss:$12 sps:$4 sm:$0xff]  }
0x183d   : > { %11647 = vmatpush2.bf16.msra.mxu1 %v16767_v45  ;;  %v16787_v45 = vld [vmem:[%s18471_s17 + $0x124] ss:$12 sps:$4 sm:$0xff]  }
0x183e   : > { %11648 = vmatprep.subr.bf16.mxu1 %v16775_v62  ;;  %v16782_v62 = vld [vmem:[%s18471_s17 + $0x2a0] ss:$12 sps:$4 sm:$0xff]   ;;  %v21252_v51 = vpop.f32.mrf.mxu0 }
0x183f   : > { %11722 = vmatpush2.bf16.msra.mxu0 %v16770_v58  ;;  %v16790_v58 = vld [vmem:[%s18471_s17 + $0x28c] ss:$12 sps:$4 sm:$0xff]  }
0x1840   : > { %11723 = vmatprep.subr.bf16.mxu0 %v16778_v49  ;;  %v16785_v49 = vld [vmem:[%s18471_s17 + $0x120] ss:$12 sps:$4 sm:$0xff]   ;;  %v21260_v60 = vpop.f32.mrf.mxu0 }
0x1841   : > { %11649 = vmatpush2.bf16.msra.mxu1 %v16773_v57  ;;  %v16793_v57 = vld [vmem:[%s18471_s17 + $0x10c] ss:$12 sps:$4 sm:$0xff]  }
0x1842   : > { %11650 = vmatprep.subr.bf16.mxu1 %v16781_v25  ;;  %v16788_v25 = vld [vmem:[%s18471_s17 + $0x288] ss:$12 sps:$4 sm:$0xff]   ;;  %v21272_v63 = vpop.f32.mrf.mxu0 }
0x1843   : > { %11724 = vmatpush2.bf16.msra.mxu0 %v16776_v15  ;;  %v16796_v15 = vld [vmem:[%s18471_s17 + $0x274] ss:$12 sps:$4 sm:$0xff]  }
0x1844   : > { %11725 = vmatprep.subr.bf16.mxu0 %v16784_v37  ;;  %v21266_v37 = vrot.slane %v20974_v42, %v22974_v1  ;;  %v16797_v42 = vld [vmem:[%s18471_s17 + $0xf0] ss:$12 sps:$4 sm:$0xff]   ;;  %v21289_v12 = vpop.f32.mrf.mxu0 }
0x1845   : > { %11651 = vmatpush2.bf16.msra.mxu1 %v16779_v54  ;;  %v8952_v54 = vpop.f32.mrf.mxu1 }
0x1846   : > { %11652 = vmatprep.subr.bf16.mxu1 %v16787_v45  ;;  %v16794_v45 = vld [vmem:[%s18471_s17 + $0x270] ss:$12 sps:$4 sm:$0xff]  }
0x1847   : > { %11726 = vmatpush2.bf16.msra.mxu0 %v16782_v62  ;;  %v8858_v62 = vadd.f32 %v21139_v27, %v21266_v37  ;;  %v8724_v27 = vadd.f32 %v21082_v38, %v21012_v16 }
0x1848   : > { %11727 = vmatprep.subr.bf16.mxu0 %v16790_v58  ;;  %v16802_v58 = vld [vmem:[%s18471_s17 + $0x25c] ss:$12 sps:$4 sm:$0xff]  }
0x1849   : > { %11653 = vmatpush2.bf16.msra.mxu1 %v16785_v49  ;;  %v8870_v49 = vadd.f32 %v21174_v61, %v21156_v59  ;;  %v16800_v61 = vld [vmem:[%s18471_s17 + $0x258] ss:$12 sps:$4 sm:$0xff]  }
0x184a   : > { %11654 = vmatprep.subr.bf16.mxu1 %v16793_v57  ;;  %v8854_v57 = vadd.f32 %v21126_v6, %v21266_v37  ;;  %v16808_v6 = vld [vmem:[%s18471_s17 + $0x244] ss:$12 sps:$4 sm:$0xff]  }
0x184b   : > { %11728 = vmatpush2.bf16.msra.mxu0 %v16788_v25  ;;  %v21280_v25 = vpop.f32.mrf.mxu1 }
0x184c   : > { %11729 = vmatprep.subr.bf16.mxu0 %v16796_v15  ;;  %v8866_v15 = vadd.f32 %v21161_v14, %v21156_v59  ;;  %v8927_v39 = vadd.f32 %v21132_v18, %v8854_v57  ;;  %v16811_v14 = vld [vmem:[%s18471_s17 + $0xc4] ss:$12 sps:$4 sm:$0xff]   ;;  %v16814_v18 = vld [vmem:[%s18471_s17 + $0x52c] ss:$12 sps:$4 sm:$0xff]   ;;  %v8864_v57 = vadd.f32 %v21151_v33, %v21266_v37 }
0x184d   : > { %11655 = vmatpush2.bf16.msra.mxu1 %v16791_v41  ;;  %v8931_v41 = vadd.f32 %v21148_v11, %v8858_v62  ;;  %v21295_v38 = vpop.f32.mrf.mxu1  ;;  %v16806_v62 = vld [vmem:[%s18471_s17 + $0x240] ss:$12 sps:$4 sm:$0xff]  }
0x184e   : > { %11656 = vmatprep.subr.bf16.mxu1 %v16799_v4  ;;  %v8943_v4 = vadd.f32 %v21232_v35, %v8870_v49  ;;  %v8939_v11 = vadd.f32 %v21206_v13, %v8866_v15  ;;  %v8868_v35 = vadd.f32 %v21167_v55, %v21266_v37  ;;  %v21303_v49 = vpop.f32.mrf.mxu0  ;;  %v9551_v13 = vmax.f32 %v8927_v39, 0.0  ;;  %v16817_v55 = vld [vmem:[%s18471_s17 + $0x3ac] ss:$12 sps:$4 sm:$0xff]  }
0x184f   : > { %11730 = vmatpush2.bf16.msra.mxu0 %v16794_v45  ;;  %v8797_v45 = vadd.f32 %v21079_v22, %v8724_v27  ;;  %v16809_v22 = vld [vmem:[%s18471_s17 + $0xc0] ss:$12 sps:$4 sm:$0xff]   ;;  %v21311_v27 = vpop.f32.mrf.mxu1 }
0x1850   : > { %11731 = vmatprep.subr.bf16.mxu0 %v16802_v58  ;;  %v9563_v58 = vmax.f32 %v8931_v41, 0.0  ;;  %v9576_v41 = vmax.f32 %v8939_v11, 0.0  ;;  %v8941_v33 = vadd.f32 %v21222_v34, %v8868_v35  ;;  %v16815_v11 = vld [vmem:[%s18471_s17 + $0x3a8] ss:$12 sps:$4 sm:$0xff]  }
0x1851   : > { %11657 = vmatpush2.bf16.msra.mxu1 %v16797_v42  ;;  %v9588_v42 = vmax.f32 %v8943_v4, 0.0  ;;  %v9586_v15 = vmax.f32 %v8797_v45, 0.0  ;;  %v16820_v4 = vld [vmem:[%s18471_s17 + $0x514] ss:$12 sps:$4 sm:$0xff]  }
0x1852   : > { %11658 = vmatprep.subr.bf16.mxu1 %v16805_v48  ;;  %v8880_v48 = vadd.f32 %v21200_v2, %v21156_v59  ;;  %v8876_v2 = vadd.f32 %v21188_v23, %v21156_v59  ;;  %v21319_v39 = vpack.c.bf16 %v9563_v58, %v9551_v13  ;;  %v8937_v23 = vadd.f32 %v21194_v30, %v8864_v57  ;;  %v16823_v34 = vld [vmem:[%s18471_s17 + $0x394] ss:$12 sps:$4 sm:$0xff]   ;;  %v16821_v13 = vld [vmem:[%s18471_s17 + $0x390] ss:$12 sps:$4 sm:$0xff]  }
0x1853   : > { %11732 = vmatpush2.bf16.msra.mxu0 %v16800_v61  ;;  %v8734_v61 = vadd.f32 %v21101_v46, %v21012_v16  ;;  %v21326_v46 = vpack.c.bf16 %v9588_v42, %v9576_v41  ;;  %v8878_v30 = vadd.f32 %v21196_v8, %v21266_v37  ;;  %v8874_v8 = vadd.f32 %v21181_v7, %v21266_v37 }
0x1854   : > { %11733 = vmatprep.subr.bf16.mxu0 %v16808_v6  ;;  %23020 = vst [vmem:[#allocation85_spill] sm:$0xff] %v21319_v39  ;;  %v21322_v6 = vpop.f32.mrf.mxu0  ;;  %v8953_v45 = vadd.f32 %v8952_v54, %v8880_v48  ;;  %v8949_v35 = vadd.f32 %v21248_v50, %v8876_v2  ;;  %v16818_v54 = vld [vmem:[%s18471_s17 + $0x510] ss:$12 sps:$4 sm:$0xff]   ;;  %v9575_v57 = vmax.f32 %v8937_v23, 0.0  ;;  %v8744_v41 = vadd.f32 %v21122_v44, %v21012_v16 }
0x1855   : > { %11659 = vmatpush2.bf16.msra.mxu1 %v16803_v29  ;;  %v16812_v29 = vld [vmem:[%s18471_s17 + $0x528] ss:$12 sps:$4 sm:$0xff]   ;;  %23021 = vst [vmem:[#allocation77_spill] sm:$0xff] %v21326_v46  ;;  %v8807_v58 = vadd.f32 %v21098_v47, %v8734_v61  ;;  %v9598_v16 = vmax.f32 %v21095_v31, 0.0  ;;  %v8947_v23 = vadd.f32 %v21240_v52, %v8874_v8  ;;  %v8888_v52 = vadd.f32 %v21224_v5, %v21266_v37  ;;  %v16833_v5 = vld [vmem:[%s18471_s17 + $0x360] ss:$12 sps:$4 sm:$0xff]  }
0x1856   : > { %11660 = vmatprep.subr.bf16.mxu1 %v16811_v14  ;;  %v9574_v14 = vmax.f32 %v21023_v26, 0.0  ;;  %v21340_v42 = vpop.f32.mrf.mxu0  ;;  %v16826_v50 = vld [vmem:[%s18471_s17 + $0x4fc] ss:$12 sps:$4 sm:$0xff]   ;;  %v9612_v47 = vmax.f32 %v8953_v45, 0.0  ;;  %v9600_v2 = vmax.f32 %v8949_v35, 0.0 }
0x1857   : > { %11734 = vmatpush2.bf16.msra.mxu0 %v16806_v62  ;;  %v8962_v62 = vpop.f32.mrf.mxu1  ;;  %v9610_v61 = vmax.f32 %v8807_v58, 0.0  ;;  %v16832_v45 = vld [vmem:[%s18471_s17 + $0x4e4] ss:$12 sps:$4 sm:$0xff]   ;;  %v8817_v58 = vadd.f32 %v21119_v3, %v8744_v41  ;;  %v16830_v35 = vld [vmem:[%s18471_s17 + $0x4e0] ss:$12 sps:$4 sm:$0xff]  }
0x1858   : > { %11849 = vmatprep.subr.bf16.mxu0 %v16814_v18  ;;  %v21335_v26 = vpack.c.bf16 %v9586_v15, %v9574_v14  ;;  %v9587_v18 = vmax.f32 %v8941_v33, 0.0  ;;  %v16829_v15 = vld [vmem:[%s18471_s17 + $0x37c] ss:$12 sps:$4 sm:$0xff]   ;;  %v21361_v7 = vpop.f32.mrf.mxu0  ;;  %v16838_v3 = vld [vmem:[%s18471_s17 + $0x4cc] ss:$12 sps:$4 sm:$0xff]  }
0x1859   : > { %11661 = vmatpush2.bf16.msra.mxu1 %v16809_v22  ;;  %v8890_v22 = vadd.f32 %v21228_v19, %v21156_v59  ;;  %v8886_v19 = vadd.f32 %v21217_v9, %v21156_v59  ;;  %v21368_v59 = vpack.c.bf16 %v9612_v47, %v9600_v2  ;;  %v16827_v9 = vld [vmem:[%s18471_s17 + $0x378] ss:$12 sps:$4 sm:$0xff]   ;;  %v16836_v2 = vld [vmem:[%s18471_s17 + $0x4c8] ss:$12 sps:$4 sm:$0xff]  }
0x185a   : > { %11736 = vmatmul.mubr.bf16.vlgmr.msra.gmra.mxu0 %v21319_v39  ;;  %11776 = vmatprep.subr.bf16.mxu1 %v16817_v55  ;;  %23022 = vst [vmem:[#allocation56_spill] sm:$0xff] %v21335_v26  ;;  %v21358_v33 = vpack.c.bf16 %v9587_v18, %v9575_v57  ;;  %v21382_v18 = vpop.f32.mrf.mxu0  ;;  %v16841_v8 = vld [vmem:[%s18471_s17 + $0x34c] ss:$12 sps:$4 sm:$0xff]   ;;  %v16887_v39 = vld [vmem:[%s18471_s17 + $0x408] ss:$12 sps:$4 sm:$0xff]  }
0x185b   : > { %11745 = vmatprep.mubr.bf16.mxu0 %v21326_v46  ;;  %11850 = vmatpush1.bf16.msra.mxu0 %v16812_v29  ;;  %v16824_v29 = vld [vmem:[%s18471_s17 + $0x4f8] ss:$12 sps:$4 sm:$0xff]   ;;  %v8963_v44 = vadd.f32 %v8962_v62, %v8890_v22  ;;  %23024 = vst [vmem:[#allocation91_spill] sm:$0xff] %v21368_v59  ;;  %v8959_v31 = vadd.f32 %v21295_v38, %v8886_v19  ;;  %v9599_v22 = vmax.f32 %v8947_v23, 0.0 }
0x185c   : > { %v21342_v48 = vpop.f32.mrf.mxu1  ;;  %11663 = vmatmul.mubr.bf16.vlgmr.msra.gmra.mxu1 %v21018_v0  ;;  %11851 = vmatprep.subr.bf16.mxu0 %v16820_v4  ;;  %23023 = vst [vmem:[#allocation62_spill] sm:$0xff] %v21358_v33  ;;  %v8951_v4 = vadd.f32 %v21256_v32, %v8878_v30  ;;  %v16835_v32 = vld [vmem:[%s18471_s17 + $0x364] ss:$12 sps:$4 sm:$0xff]   ;;  %v21377_v62 = vpack.c.bf16 %v9610_v61, %v9598_v16 }
0x185d   : > { %11672 = vmatprep.mubr.bf16.mxu1 %v21335_v26  ;;  %11777 = vmatpush1.bf16.msra.mxu1 %v16815_v11  ;;  %v7195_v11 = vsub.s32 5, %v23016_v21  ;;  %v9636_v38 = vmax.f32 %v8963_v44, 0.0  ;;  %v9624_v61 = vmax.f32 %v8959_v31, 0.0  ;;  %v16850_v31 = vld [vmem:[%s18471_s17 + $0x49c] ss:$12 sps:$4 sm:$0xff]  }
0x185e   : > { %v9001_v55 = vpop.f32.mrf.mxu1  ;;  %11778 = vmatprep.subr.bf16.mxu1 %v16823_v34  ;;  %23025 = vst [vmem:[#allocation76_spill] sm:$0xff] %v21377_v62  ;;  %v16893_v26 = vld [vmem:[%s18471_s17 + $0x3f0] ss:$12 sps:$4 sm:$0xff]  }
0x185f   : > { %11852 = vmatpush1.bf16.msra.mxu0 %v16818_v54  ;;  %v9611_v54 = vmax.f32 %v8951_v4, 0.0  ;;  %v21406_v4 = vpop.f32.mrf.mxu0  ;;  %v21413_v44 = vpack.c.bf16 %v9636_v38, %v9624_v61  ;;  %v16851_v61 = vld [vmem:[%s18471_s17 + $0x318] ss:$12 sps:$4 sm:$0xff]  }
0x1860   : > { %v21363_v14 = vpop.f32.mrf.mxu1  ;;  %11853 = vmatprep.subr.bf16.mxu0 %v16826_v50  ;;  %v21389_v50 = vld [vmem:[%s18469_s1] sm:$0xff] }
0x1861   : > { %11779 = vmatpush1.bf16.msra.mxu1 %v16821_v13  ;;  %v21392_v47 = vrot.slane %v21389_v50, %v7195_v11  ;;  %v8884_v13 = vadd.f32 %v21209_v17, %v21266_v37  ;;  %v21403_v19 = vpack.c.bf16 %v9611_v54, %v9599_v22  ;;  %v16844_v17 = vld [vmem:[%s18471_s17 + $0x4b4] ss:$12 sps:$4 sm:$0xff]   ;;  %v9622_v37 = vmax.f32 %v21116_v20, 0.0  ;;  %23027 = vst [vmem:[#allocation92_spill] sm:$0xff] %v21413_v44 }
0x1862   : > { %v9005_v34 = vpop.f32.mrf.mxu1  ;;  %11746 = vmatmul.mubr.bf16.gmra.mxu0 %v21358_v33  ;;  %11780 = vmatprep.subr.bf16.mxu1 %v16829_v15  ;;  %v9634_v15 = vmax.f32 %v8817_v58, 0.0  ;;  %v16839_v11 = vld [vmem:[%s18471_s17 + $0x348] ss:$12 sps:$4 sm:$0xff]   ;;  %v21426_v58 = vpop.f32.mrf.mxu0  ;;  %v16878_v33 = vld [vmem:[%s18471_s17 + $0x5a0] ss:$12 sps:$4 sm:$0xff]  }
0x1863   : > { %11755 = vmatprep.mubr.bf16.mxu0 %v21368_v59  ;;  %11854 = vmatpush1.bf16.msra.mxu0 %v16824_v29  ;;  %v9006_v41 = vadd.f32 %v9005_v34, %v21392_v47  ;;  %23026 = vst [vmem:[#allocation51_spill] sm:$0xff] %v21403_v19  ;;  %v8961_v29 = vadd.f32 %v21311_v27, %v8888_v52  ;;  %v16847_v27 = vld [vmem:[%s18471_s17 + $0x334] ss:$12 sps:$4 sm:$0xff]   ;;  %23029 = vst [vmem:[#allocation94_spill] sm:$0xff] %v21426_v58 }
0x1864   : > { %v21384_v30 = vpop.f32.mrf.mxu1  ;;  %11673 = vmatmul.mubr.bf16.gmra.mxu1 %v21034_v56  ;;  %11855 = vmatprep.subr.bf16.mxu0 %v16832_v45  ;;  %v9002_v16 = vadd.f32 %v9001_v55, %v21392_v47  ;;  %v21423_v20 = vpack.c.bf16 %v9634_v15, %v9622_v37  ;;  %v16842_v55 = vld [vmem:[%s18471_s17 + $0x4b0] ss:$12 sps:$4 sm:$0xff]   ;;  %v16902_v58 = vld [vmem:[%s18471_s17 + $0x540] ss:$12 sps:$4 sm:$0xff]  }
0x1865   : > { %11682 = vmatprep.mubr.bf16.mxu1 %v21377_v62  ;;  %11781 = vmatpush1.bf16.msra.mxu1 %v16827_v9  ;;  %v8957_v9 = vadd.f32 %v21280_v25, %v8884_v13  ;;  %v9079_v34 = vadd.f32 %v21260_v60, %v9006_v41  ;;  %v21441_v13 = vpop.f32.mrf.mxu0 }
0x1866   : > { %v21398_v57 = vpop.f32.mrf.mxu1  ;;  %11782 = vmatprep.subr.bf16.mxu1 %v16835_v32  ;;  %23028 = vst [vmem:[#allocation93_spill] sm:$0xff] %v21423_v20  ;;  %v9635_v32 = vmax.f32 %v8961_v29, 0.0  ;;  %v9075_v60 = vadd.f32 %v21244_v53, %v9002_v16 }
0x1867   : > { %11856 = vmatpush1.bf16.msra.mxu0 %v16830_v35  ;;  %v16845_v35 = vld [vmem:[%s18471_s17 + $0x330] ss:$12 sps:$4 sm:$0xff]   ;;  %v9623_v54 = vmax.f32 %v8957_v9, 0.0  ;;  %v9566_v38 = vmax.f32 %v9079_v34, 0.0  ;;  %v21454_v37 = vpop.f32.mrf.mxu0  ;;  %v16857_v9 = vld [vmem:[%s18471_s17 + $0x300] ss:$12 sps:$4 sm:$0xff]   ;;  %v9012_v43 = vadd.f32 %v21398_v57, %v21392_v47 }
0x1868   : > { %v21408_v45 = vpop.f32.mrf.mxu1  ;;  %11857 = vmatprep.subr.bf16.mxu0 %v16838_v3  ;;  %v16853_v3 = vld [vmem:[%s18471_s17 + $0x31c] ss:$12 sps:$4 sm:$0xff]   ;;  %v9554_v15 = vmax.f32 %v9075_v60, 0.0 }
0x1869   : > { %11783 = vmatpush1.bf16.msra.mxu1 %v16833_v5  ;;  %v16848_v5 = vld [vmem:[%s18471_s17 + $0x498] ss:$12 sps:$4 sm:$0xff]   ;;  %v21439_v22 = vpack.c.bf16 %v9635_v32, %v9623_v54  ;;  %v16860_v32 = vld [vmem:[%s18471_s17 + $0x5e8] ss:$12 sps:$4 sm:$0xff]  }
0x186a   : > { %v21417_v23 = vpop.f32.mrf.mxu1  ;;  %11756 = vmatmul.mubr.bf16.gmra.mxu0 %v21403_v19  ;;  %11784 = vmatprep.subr.bf16.mxu1 %v16841_v8  ;;  %v16856_v8 = vld [vmem:[%s18471_s17 + $0x484] ss:$12 sps:$4 sm:$0xff]   ;;  %v21451_v29 = vpack.c.bf16 %v9566_v38, %v9554_v15  ;;  %v16863_v54 = vld [vmem:[%s18471_s17 + $0x468] ss:$12 sps:$4 sm:$0xff]  }
0x186b   : > { %11765 = vmatprep.mubr.bf16.mxu0 %v21413_v44  ;;  %11858 = vmatpush1.bf16.msra.mxu0 %v16836_v2  ;;  %23030 = vst [vmem:[#allocation95_spill] sm:$0xff] %v21439_v22  ;;  %v16859_v2 = vld [vmem:[%s18471_s17 + $0x304] ss:$12 sps:$4 sm:$0xff]  }
0x186c   : > { %v21428_v25 = vpop.f32.mrf.mxu1  ;;  %11683 = vmatmul.mubr.bf16.gmra.mxu1 %v21111_v28  ;;  %11859 = vmatprep.subr.bf16.mxu0 %v16844_v17  ;;  %23031 = vst [vmem:[#allocation96_spill] sm:$0xff] %v21451_v29  ;;  %v16854_v17 = vld [vmem:[%s18471_s17 + $0x480] ss:$12 sps:$4 sm:$0xff]   ;;  %v16866_v15 = vld [vmem:[%s18471_s17 + $0x5d0] ss:$12 sps:$4 sm:$0xff]   ;;  %v7199_v28 = vsub.s32 6, %v23016_v21 }
0x186d   : > { %11692 = vmatprep.mubr.bf16.mxu1 %v21423_v20  ;;  %11785 = vmatpush1.bf16.msra.mxu1 %v16839_v11  ;;  %v16862_v11 = vld [vmem:[%s18471_s17 + $0x5ec] ss:$12 sps:$4 sm:$0xff]  }
0x186e   : > { %v21435_v52 = vpop.f32.mrf.mxu1  ;;  %11786 = vmatprep.subr.bf16.mxu1 %v16847_v27  ;;  %v7203_v27 = vsub.s32 7, %v23016_v21 }
0x186f   : > { %11860 = vmatpush1.bf16.msra.mxu0 %v16842_v55  ;;  %v16865_v55 = vld [vmem:[%s18471_s17 + $0x46c] ss:$12 sps:$4 sm:$0xff]  }
0x1870   : > { %v21443_v53 = vpop.f32.mrf.mxu1  ;;  %11861 = vmatprep.subr.bf16.mxu0 %v16850_v31  ;;  %v21467_v31 = vpop.f32.mrf.mxu0 }
0x1871   : > { %11787 = vmatpush1.bf16.msra.mxu1 %v16845_v35  ;;  %v16868_v35 = vld [vmem:[%s18471_s17 + $0x5d4] ss:$12 sps:$4 sm:$0xff]  }
0x1872   : > { %v21447_v41 = vpop.f32.mrf.mxu1  ;;  %11766 = vmatmul.mubr.bf16.gmra.mxu0 %v21439_v22  ;;  %11788 = vmatprep.subr.bf16.mxu1 %v16853_v3  ;;  %v21474_v3 = vrot.slane %v21389_v50, %v7203_v27 }
0x1873   : > { %11862 = vmatpush1.bf16.msra.mxu0 %v16848_v5 }
0x1874   : > { %v21456_v16 = vpop.f32.mrf.mxu1  ;;  %11693 = vmatmul.mubr.bf16.gmra.mxu1 %v21137_v40  ;;  %11863 = vmatprep.subr.bf16.mxu0 %v16856_v8  ;;  %v16871_v8 = vld [vmem:[%s18471_s17 + $0x454] ss:$12 sps:$4 sm:$0xff]  }
0x1875   : > { %11789 = vmatpush1.bf16.msra.mxu1 %v16851_v61  ;;  %11808 = vmatprep.mubr.bf16.mxu1 %v21451_v29 }
0x1876   : > { %v21463_v34 = vpop.f32.mrf.mxu1  ;;  %11790 = vmatprep.subr.bf16.mxu1 %v16859_v2 }
0x1877   : > { %11864 = vmatpush1.bf16.msra.mxu0 %v16854_v17  ;;  %v16874_v17 = vld [vmem:[%s18471_s17 + $0x5bc] ss:$12 sps:$4 sm:$0xff]  }
0x1878   : > { %v21469_v60 = vpop.f32.mrf.mxu1  ;;  %11865 = vmatprep.subr.bf16.mxu0 %v16862_v11 }
0x1879   : > { %11791 = vmatpush1.bf16.msra.mxu1 %v16857_v9  ;;  %v16869_v9 = vld [vmem:[%s18471_s17 + $0x450] ss:$12 sps:$4 sm:$0xff]  }
0x187a   : > { %v21476_v38 = vpop.f32.mrf.mxu1  ;;  %v21478_v5 = vpop.f32.mrf.mxu0  ;;  %11792 = vmatprep.subr.bf16.mxu1 %v16865_v55  ;;  %v16877_v55 = vld [vmem:[%s18471_s17 + $0x43c] ss:$12 sps:$4 sm:$0xff]  }
0x187b   : > { %11866 = vmatpush2.bf16.msra.mxu0 %v16860_v32  ;;  %v16872_v32 = vld [vmem:[%s18471_s17 + $0x5b8] ss:$12 sps:$4 sm:$0xff]  }
0x187c   : > { %v21482_v61 = vpop.f32.mrf.mxu1  ;;  %v9147_v2 = vpop.f32.mrf.mxu0  ;;  %11867 = vmatprep.subr.bf16.mxu0 %v16868_v35  ;;  %v16880_v35 = vld [vmem:[%s18471_s17 + $0x5a4] ss:$12 sps:$4 sm:$0xff]  }
0x187d   : > { %v9148_v11 = vadd.f32 %v9147_v2, %v21474_v3  ;;  %11793 = vmatpush2.bf16.msra.mxu1 %v16863_v54  ;;  %v16875_v54 = vld [vmem:[%s18471_s17 + $0x438] ss:$12 sps:$4 sm:$0xff]  }
0x187e   : > { %v9220_v27 = vpop.f32.mrf.mxu1  ;;  %v9149_v22 = vpop.f32.mrf.mxu0  ;;  %11794 = vmatprep.subr.bf16.mxu1 %v16871_v8  ;;  %v16883_v8 = vld [vmem:[%s18471_s17 + $0x424] ss:$12 sps:$4 sm:$0xff]  }
0x187f   : > { %11868 = vmatpush2.bf16.msra.mxu0 %v16866_v15  ;;  %v9221_v29 = vadd.f32 %v9220_v27, %v9148_v11  ;;  %v16886_v11 = vld [vmem:[%s18471_s17 + $0x58c] ss:$12 sps:$4 sm:$0xff]  }
0x1880   : > { %v21489_v44 = vpop.f32.mrf.mxu1  ;;  %v9151_v19 = vpop.f32.mrf.mxu0  ;;  %11869 = vmatprep.subr.bf16.mxu0 %v16874_v17 }
0x1881   : > { %v9152_v2 = vadd.f32 %v9151_v19, %v21474_v3  ;;  %11795 = vmatpush2.bf16.msra.mxu1 %v16869_v9  ;;  %v9556_v27 = vmax.f32 %v9221_v29, 0.0  ;;  %v16881_v9 = vld [vmem:[%s18471_s17 + $0x420] ss:$12 sps:$4 sm:$0xff]  }
0x1882   : > { %v9224_v40 = vpop.f32.mrf.mxu1  ;;  %v21494_v59 = vpop.f32.mrf.mxu0  ;;  %11796 = vmatprep.subr.bf16.mxu1 %v16877_v55 }
0x1883   : > { %v9225_v15 = vadd.f32 %v9224_v40, %v9152_v2  ;;  %11870 = vmatpush2.bf16.msra.mxu0 %v16872_v32  ;;  %v16889_v40 = vld [vmem:[%s18471_s17 + $0x40c] ss:$12 sps:$4 sm:$0xff]   ;;  %v16884_v2 = vld [vmem:[%s18471_s17 + $0x588] ss:$12 sps:$4 sm:$0xff]  }
0x1884   : > { %v21498_v20 = vpop.f32.mrf.mxu1  ;;  %v9157_v17 = vpop.f32.mrf.mxu0  ;;  %11871 = vmatprep.subr.bf16.mxu0 %v16880_v35  ;;  %v7191_v35 = vsub.s32 4, %v23016_v21  ;;  %v16890_v21 = vld [vmem:[%s18471_s17 + $0x570] ss:$12 sps:$4 sm:$0xff]  }
0x1885   : > { %v9568_v19 = vmax.f32 %v9225_v15, 0.0  ;;  %11797 = vmatpush2.bf16.msra.mxu1 %v16875_v54  ;;  %v16892_v54 = vld [vmem:[%s18471_s17 + $0x574] ss:$12 sps:$4 sm:$0xff]  }
0x1886   : > { %v9230_v55 = vpop.f32.mrf.mxu1  ;;  %v9159_v46 = vpop.f32.mrf.mxu0  ;;  %11798 = vmatprep.subr.bf16.mxu1 %v16883_v8  ;;  %v21514_v8 = vrot.slane %v21389_v50, %v7199_v28  ;;  %v16898_v28 = vld [vmem:[%s18471_s17 + $0x55c] ss:$12 sps:$4 sm:$0xff]  }
0x1887   : > { %11872 = vmatpush2.bf16.msra.mxu0 %v16878_v33  ;;  %v21504_v32 = vpack.c.bf16 %v9568_v19, %v9556_v27  ;;  %v16895_v19 = vld [vmem:[%s18471_s17 + $0x3f4] ss:$12 sps:$4 sm:$0xff]  }
0x1888   : > { %v21508_v29 = vpop.f32.mrf.mxu1  ;;  %v9161_v15 = vpop.f32.mrf.mxu0  ;;  %11873 = vmatprep.subr.bf16.mxu0 %v16886_v11  ;;  %v21521_v11 = vrot.slane %v21389_v50, %v7191_v35  ;;  %v9146_v50 = vadd.f32 %v21478_v5, %v21514_v8  ;;  %v16901_v35 = vld [vmem:[%s18471_s17 + $0x3dc] ss:$12 sps:$4 sm:$0xff]   ;;  %v9160_v57 = vadd.f32 %v9159_v46, %v21514_v8 }
0x1889   : > { %23032 = vst [vmem:[#allocation97_spill] sm:$0xff] %v21504_v32  ;;  %11799 = vmatpush2.bf16.msra.mxu1 %v16881_v9  ;;  %11881 = vmatprep.mubr.bf16.mxu0 %v21504_v32  ;;  %v9150_v9 = vadd.f32 %v9149_v22, %v21514_v8  ;;  %v9162_v56 = vadd.f32 %v9161_v15, %v21474_v3  ;;  %v16896_v15 = vld [vmem:[%s18471_s17 + $0x558] ss:$12 sps:$4 sm:$0xff]  }
0x188a   : > { %v9234_v33 = vpop.f32.mrf.mxu1  ;;  %v21516_v27 = vpop.f32.mrf.mxu0  ;;  %11800 = vmatprep.subr.bf16.mxu1 %v16889_v40  ;;  %v9004_v40 = vadd.f32 %v21363_v14, %v21521_v11  ;;  %v9000_v14 = vadd.f32 %v21342_v48, %v21521_v11  ;;  %v9219_v36 = vadd.f32 %v21482_v61, %v9146_v50 }
0x188b   : > { %11874 = vmatpush2.bf16.msra.mxu0 %v16884_v2  ;;  %v9223_v5 = vadd.f32 %v21489_v44, %v9150_v9  ;;  %v16907_v44 = vld [vmem:[%s18471_s17 + $0x3c4] ss:$12 sps:$4 sm:$0xff]  }
0x188c   : > { %v21524_v62 = vpop.f32.mrf.mxu1  ;;  %v9167_v32 = vpop.f32.mrf.mxu0  ;;  %11875 = vmatprep.subr.bf16.mxu0 %v16892_v54  ;;  %v9016_v54 = vadd.f32 %v21417_v23, %v21392_v47  ;;  %v9235_v23 = vadd.f32 %v9234_v33, %v9162_v56  ;;  %v9073_v56 = vadd.f32 %v21236_v10, %v9000_v14  ;;  %v16922_v33 = vld [vmem:[%s18471_s17 + $0x82c] ss:$12 sps:$4 sm:$0xff]   ;;  %v9014_v10 = vadd.f32 %v21408_v45, %v21521_v11 }
0x188d   : > { %11801 = vmatpush2.bf16.msra.mxu1 %v16887_v39  ;;  %v9158_v39 = vadd.f32 %v9157_v17, %v21474_v3  ;;  %v16899_v17 = vld [vmem:[%s18471_s17 + $0x3d8] ss:$12 sps:$4 sm:$0xff]   ;;  %v9555_v46 = vmax.f32 %v9219_v36, 0.0  ;;  %v16920_v36 = vld [vmem:[%s18471_s17 + $0x828] ss:$12 sps:$4 sm:$0xff]  }
0x188e   : > { %v21533_v2 = vpop.f32.mrf.mxu1  ;;  %v21535_v22 = vpop.f32.mrf.mxu0  ;;  %11802 = vmatprep.subr.bf16.mxu1 %v16895_v19  ;;  %v16904_v19 = vld [vmem:[%s18471_s17 + $0x544] ss:$12 sps:$4 sm:$0xff]   ;;  %v9089_v9 = vadd.f32 %v21322_v6, %v9016_v54  ;;  %v9592_v50 = vmax.f32 %v9235_v23, 0.0  ;;  %v9156_v54 = vadd.f32 %v21494_v59, %v21514_v8  ;;  %v9553_v45 = vmax.f32 %v9073_v56, 0.0 }
0x188f   : > { %11876 = vmatpush2.bf16.msra.mxu0 %v16890_v21  ;;  %v9077_v21 = vadd.f32 %v21252_v51, %v9004_v40  ;;  %v9085_v40 = vadd.f32 %v21289_v12, %v9012_v43  ;;  %v16910_v12 = vld [vmem:[%s18471_s17 + $0x6ac] ss:$12 sps:$4 sm:$0xff]   ;;  %v9010_v59 = vadd.f32 %v21384_v30, %v21521_v11  ;;  %v9233_v23 = vadd.f32 %v21508_v29, %v9160_v57 }
0x1890   : > { %v21545_v0 = vpop.f32.mrf.mxu1  ;;  %v9171_v1 = vpop.f32.mrf.mxu0  ;;  %11877 = vmatprep.subr.bf16.mxu0 %v16898_v28  ;;  %v9231_v28 = vadd.f32 %v9230_v55, %v9158_v39  ;;  %v16905_v55 = vld [vmem:[%s18471_s17 + $0x3c0] ss:$12 sps:$4 sm:$0xff]   ;;  %v9590_v43 = vmax.f32 %v9089_v9, 0.0  ;;  %v9087_v30 = vadd.f32 %v21303_v49, %v9014_v10  ;;  %v9229_v29 = vadd.f32 %v21498_v20, %v9156_v54  ;;  %v16926_v49 = vld [vmem:[%s18471_s17 + $0x810] ss:$12 sps:$4 sm:$0xff]  }
0x1891   : > { %11803 = vmatpush2.bf16.msra.mxu1 %v16893_v26  ;;  %v9567_v26 = vmax.f32 %v9223_v5, 0.0  ;;  %v9172_v6 = vadd.f32 %v9171_v1, %v21474_v3  ;;  %v9026_v1 = vadd.f32 %v21447_v41, %v21392_v47  ;;  %v9168_v5 = vadd.f32 %v9167_v32, %v21474_v3  ;;  %v16908_v32 = vld [vmem:[%s18471_s17 + $0x6a8] ss:$12 sps:$4 sm:$0xff]  }
0x1892   : > { %v9244_v48 = vpop.f32.mrf.mxu1  ;;  %v21553_v24 = vpop.f32.mrf.mxu0  ;;  %11804 = vmatprep.subr.bf16.mxu1 %v16901_v35  ;;  %v9565_v35 = vmax.f32 %v9077_v21, 0.0  ;;  %v9580_v14 = vmax.f32 %v9231_v28, 0.0  ;;  %v16928_v21 = vld [vmem:[%s18471_s17 + $0x814] ss:$12 sps:$4 sm:$0xff]   ;;  %v9022_v41 = vadd.f32 %v21435_v52, %v21392_v47  ;;  %v9083_v20 = vadd.f32 %v21272_v63, %v9010_v59  ;;  %v16911_v63 = vld [vmem:[%s18471_s17 + $0x690] ss:$12 sps:$4 sm:$0xff]  }
0x1893   : > { %11878 = vmatpush2.bf16.msra.mxu0 %v16896_v15  ;;  %v9245_v9 = vadd.f32 %v9244_v48, %v9172_v6  ;;  %v9099_v52 = vadd.f32 %v21406_v4, %v9026_v1  ;;  %v9241_v48 = vadd.f32 %v21533_v2, %v9168_v5  ;;  %v16934_v4 = vld [vmem:[%s18471_s17 + $0x7fc] ss:$12 sps:$4 sm:$0xff]   ;;  %v9579_v10 = vmax.f32 %v9229_v29, 0.0  ;;  %v16932_v5 = vld [vmem:[%s18471_s17 + $0x7f8] ss:$12 sps:$4 sm:$0xff]  }
0x1894   : > { %v21560_v51 = vpop.f32.mrf.mxu1  ;;  %v21562_v61 = vpop.f32.mrf.mxu0  ;;  %11879 = vmatprep.subr.bf16.mxu0 %v16904_v19  ;;  %v21583_v19 = vpack.c.bf16 %v9567_v26, %v9555_v46  ;;  %v21592_v28 = vpack.c.bf16 %v9565_v35, %v9553_v45  ;;  %v16913_v26 = vld [vmem:[%s18471_s17 + $0x694] ss:$12 sps:$4 sm:$0xff]   ;;  %v9095_v2 = vadd.f32 %v21361_v7, %v9022_v41  ;;  %v9589_v35 = vmax.f32 %v9087_v30, 0.0  ;;  %v16916_v7 = vld [vmem:[%s18471_s17 + $0x67c] ss:$12 sps:$4 sm:$0xff]  }
0x1895   : > { %11805 = vmatpush2.bf16.msra.mxu1 %v16899_v17  ;;  %v9616_v6 = vmax.f32 %v9245_v9, 0.0  ;;  %v9166_v46 = vadd.f32 %v21516_v27, %v21514_v8  ;;  %v9604_v1 = vmax.f32 %v9241_v48, 0.0  ;;  %v16919_v41 = vld [vmem:[%s18471_s17 + $0x664] ss:$12 sps:$4 sm:$0xff]   ;;  %v9034_v48 = vadd.f32 %v21469_v60, %v21521_v11 }
0x1896   : > { %v21572_v39 = vpop.f32.mrf.mxu1  ;;  %v21574_v15 = vpop.f32.mrf.mxu0  ;;  %11806 = vmatprep.subr.bf16.mxu1 %v16907_v44  ;;  %v9578_v44 = vmax.f32 %v9085_v40, 0.0  ;;  %v9170_v40 = vadd.f32 %v21535_v22, %v21514_v8  ;;  %v9024_v22 = vadd.f32 %v21443_v53, %v21521_v11  ;;  %v9577_v53 = vmax.f32 %v9083_v20, 0.0  ;;  %v16925_v20 = vld [vmem:[%s18471_s17 + $0x64c] ss:$12 sps:$4 sm:$0xff]  }
0x1897   : > { %11880 = vmatpush2.bf16.msra.mxu0 %v16902_v58  ;;  %v21589_v58 = vpack.c.bf16 %v9592_v50, %v9580_v14  ;;  %v9178_v14 = vadd.f32 %v21562_v61, %v21474_v3  ;;  %v21637_v61 = vpack.c.bf16 %v9616_v6, %v9604_v1 }
0x1898   : > { %v9181_v17 = vpop.f32.mrf.mxu0  ;;  %11995 = vmatprep.subr.bf16.mxu0 %v16922_v33  ;;  %v21596_v56 = vpop.f32.mrf.mxu1  ;;  %v21603_v57 = vpack.c.bf16 %v9590_v43, %v9578_v44  ;;  %v9591_v33 = vmax.f32 %v9233_v23, 0.0  ;;  %v9036_v43 = vadd.f32 %v21476_v38, %v21392_v47  ;;  %v9243_v45 = vadd.f32 %v21545_v0, %v9170_v40  ;;  %v16940_v38 = vld [vmem:[%s18471_s17 + $0x7e4] ss:$12 sps:$4 sm:$0xff]  }
0x1899   : > { %11807 = vmatpush2.bf16.msra.mxu1 %v16905_v55  ;;  %v9182_v55 = vadd.f32 %v9181_v17, %v21474_v3  ;;  %v9602_v23 = vmax.f32 %v9095_v2, 0.0  ;;  %v9032_v17 = vadd.f32 %v21463_v34, %v21392_v47  ;;  %v9097_v44 = vadd.f32 %v21382_v18, %v9024_v22 }
0x189a   : > { %11882 = vmatmul.mubr.bf16.vlgmr.msra.gmra.mxu0 %v21583_v19  ;;  %11922 = vmatprep.subr.bf16.mxu1 %v16910_v12  ;;  %v21609_v50 = vpop.f32.mrf.mxu0  ;;  %v9254_v54 = vpop.f32.mrf.mxu1  ;;  %v9614_v12 = vmax.f32 %v9099_v52, 0.0  ;;  %v21629_v27 = vpack.c.bf16 %v9591_v33, %v9579_v10  ;;  %v9239_v0 = vadd.f32 %v21524_v62, %v9166_v46  ;;  %v9109_v9 = vadd.f32 %v21467_v31, %v9036_v43  ;;  %v16946_v31 = vld [vmem:[%s18471_s17 + $0x7cc] ss:$12 sps:$4 sm:$0xff]   ;;  %v16950_v46 = vld [vmem:[%s18471_s17 + $0x7b0] ss:$12 sps:$4 sm:$0xff]  }
0x189b   : > { %11891 = vmatprep.mubr.bf16.mxu0 %v21589_v58  ;;  %11996 = vmatpush1.bf16.msra.mxu0 %v16920_v36  ;;  %v9020_v36 = vadd.f32 %v21428_v25, %v21521_v11  ;;  %v9255_v3 = vadd.f32 %v9254_v54, %v9182_v55  ;;  %v21640_v25 = vpack.c.bf16 %v9589_v35, %v9577_v53  ;;  %v9615_v30 = vmax.f32 %v9243_v45, 0.0  ;;  %v16917_v52 = vld [vmem:[%s18471_s17 + $0x660] ss:$12 sps:$4 sm:$0xff]   ;;  %v16923_v35 = vld [vmem:[%s18471_s17 + $0x648] ss:$12 sps:$4 sm:$0xff]  }
0x189c   : > { %11809 = vmatmul.mubr.bf16.vlgmr.msra.gmra.mxu1 %v21592_v28  ;;  %11997 = vmatprep.subr.bf16.mxu0 %v16928_v21  ;;  %v21632_v59 = vpop.f32.mrf.mxu0  ;;  %v16914_v21 = vld [vmem:[%s18471_s17 + $0x678] ss:$12 sps:$4 sm:$0xff]   ;;  %v9251_v47 = vadd.f32 %v21572_v39, %v9178_v14  ;;  %v21649_v34 = vpack.c.bf16 %v9614_v12, %v9602_v23  ;;  %v9180_v62 = vadd.f32 %v21574_v15, %v21514_v8  ;;  %v9603_v15 = vmax.f32 %v9239_v0, 0.0 }
0x189d   : > { %11818 = vmatprep.mubr.bf16.mxu1 %v21603_v57  ;;  %11923 = vmatpush1.bf16.msra.mxu1 %v16908_v32  ;;  %v16938_v32 = vld [vmem:[%s18471_s17 + $0x7e0] ss:$12 sps:$4 sm:$0xff]   ;;  %v9093_v18 = vadd.f32 %v21340_v42, %v9020_v36  ;;  %v9105_v39 = vadd.f32 %v21441_v13, %v9032_v17  ;;  %v9613_v42 = vmax.f32 %v9097_v44, 0.0  ;;  %v9638_v33 = vmax.f32 %v9109_v9, 0.0  ;;  %v16944_v13 = vld [vmem:[%s18471_s17 + $0x7c8] ss:$12 sps:$4 sm:$0xff]  }
0x189e   : > { %11924 = vmatprep.subr.bf16.mxu1 %v16913_v26  ;;  %v21655_v29 = vpop.f32.mrf.mxu0  ;;  %v9640_v26 = vmax.f32 %v9255_v3, 0.0  ;;  %v9628_v40 = vmax.f32 %v9251_v47, 0.0  ;;  %v9030_v2 = vadd.f32 %v21456_v16, %v21521_v11  ;;  %v21670_v6 = vpack.c.bf16 %v9615_v30, %v9603_v15  ;;  %v16931_v11 = vld [vmem:[%s18471_s17 + $0x634] ss:$12 sps:$4 sm:$0xff]   ;;  %v16956_v53 = vld [vmem:[%s18471_s17 + $0x798] ss:$12 sps:$4 sm:$0xff]  }
0x189f   : > { %11998 = vmatpush1.bf16.msra.mxu0 %v16926_v49  ;;  %v9176_v49 = vadd.f32 %v21553_v24, %v21514_v8  ;;  %v9253_v60 = vadd.f32 %v21596_v56, %v9180_v62  ;;  %v16952_v24 = vld [vmem:[%s18471_s17 + $0x7b4] ss:$12 sps:$4 sm:$0xff]   ;;  %v9626_v8 = vmax.f32 %v9105_v39, 0.0  ;;  %v9107_v10 = vadd.f32 %v21454_v37, %v9034_v48  ;;  %v16958_v37 = vld [vmem:[%s18471_s17 + $0x79c] ss:$12 sps:$4 sm:$0xff]  }
0x18a0   : > { %11999 = vmatprep.subr.bf16.mxu0 %v16934_v4  ;;  %v9601_v4 = vmax.f32 %v9093_v18, 0.0  ;;  %v21673_v55 = vpop.f32.mrf.mxu0  ;;  %v23033_v54 = vld [vmem:[#allocation94_spill] sm:$0xff]  ;;  %v16949_v47 = vld [vmem:[%s18471_s17 + $0x76c] ss:$12 sps:$4 sm:$0xff]  }
0x18a1   : > { %11925 = vmatpush1.bf16.msra.mxu1 %v16911_v63  ;;  %v21676_v63 = vpack.c.bf16 %v9640_v26, %v9628_v40  ;;  %v9249_v16 = vadd.f32 %v21560_v51, %v9176_v49  ;;  %v21686_v56 = vpack.c.bf16 %v9638_v33, %v9626_v8  ;;  %v9639_v12 = vmax.f32 %v9253_v60, 0.0  ;;  %v16929_v51 = vld [vmem:[%s18471_s17 + $0x630] ss:$12 sps:$4 sm:$0xff]   ;;  %v16935_v17 = vld [vmem:[%s18471_s17 + $0x618] ss:$12 sps:$4 sm:$0xff]  }
0x18a2   : > { %11892 = vmatmul.mubr.bf16.gmra.mxu0 %v21629_v27  ;;  %11926 = vmatprep.subr.bf16.mxu1 %v16916_v7  ;;  %v21679_v22 = vpack.c.bf16 %v9613_v42, %v9601_v4  ;;  %v9103_v7 = vadd.f32 %v23033_v54, %v9030_v2  ;;  %v21690_v43 = vpop.f32.mrf.mxu0  ;;  %v9637_v1 = vmax.f32 %v9107_v10, 0.0  ;;  %v16964_v23 = vld [vmem:[%s18471_s17 + $0x784] ss:$12 sps:$4 sm:$0xff]   ;;  %v16962_v44 = vld [vmem:[%s18471_s17 + $0x780] ss:$12 sps:$4 sm:$0xff]  }
0x18a3   : > { %11901 = vmatprep.mubr.bf16.mxu0 %v21637_v61  ;;  %12000 = vmatpush1.bf16.msra.mxu0 %v16932_v5  ;;  %v9627_v14 = vmax.f32 %v9249_v16, 0.0  ;;  %v16937_v5 = vld [vmem:[%s18471_s17 + $0x61c] ss:$12 sps:$4 sm:$0xff]   ;;  %v16941_v9 = vld [vmem:[%s18471_s17 + $0x600] ss:$12 sps:$4 sm:$0xff]   ;;  %v23034_v26 = vld [vmem:[#allocation52_spill] sm:$0xff] }
0x18a4   : > { %11819 = vmatmul.mubr.bf16.gmra.mxu1 %v21640_v25  ;;  %12001 = vmatprep.subr.bf16.mxu0 %v16940_v38  ;;  %v9625_v36 = vmax.f32 %v9103_v7, 0.0  ;;  %v21700_v38 = vpop.f32.mrf.mxu0  ;;  %v16976_v30 = vld [vmem:[%s18471_s17 + $0x8d4] ss:$12 sps:$4 sm:$0xff]   ;;  %v16974_v42 = vld [vmem:[%s18471_s17 + $0x8d0] ss:$12 sps:$4 sm:$0xff]  }
0x18a5   : > { %11828 = vmatprep.mubr.bf16.mxu1 %v21649_v34  ;;  %11927 = vmatpush1.bf16.msra.mxu1 %v16914_v21  ;;  %v21698_v45 = vpack.c.bf16 %v9639_v12, %v9627_v14  ;;  %v16943_v21 = vld [vmem:[%s18471_s17 + $0x604] ss:$12 sps:$4 sm:$0xff]   ;;  %v16947_v62 = vld [vmem:[%s18471_s17 + $0x768] ss:$12 sps:$4 sm:$0xff]   ;;  %v16994_v12 = vld [vmem:[%s18471_s17 + $0x88c] ss:$12 sps:$4 sm:$0xff]  }
0x18a6   : > { %11928 = vmatprep.subr.bf16.mxu1 %v16919_v41  ;;  %v21704_v3 = vpack.c.bf16 %v9637_v1, %v9625_v36  ;;  %v21709_v0 = vpop.f32.mrf.mxu0  ;;  %v16970_v41 = vld [vmem:[%s18471_s17 + $0x8ec] ss:$12 sps:$4 sm:$0xff]   ;;  %v16955_v39 = vld [vmem:[%s18471_s17 + $0x754] ss:$12 sps:$4 sm:$0xff]   ;;  %v16982_v49 = vld [vmem:[%s18471_s17 + $0x8bc] ss:$12 sps:$4 sm:$0xff]  }
0x18a7   : > { %12002 = vmatpush1.bf16.msra.mxu0 %v16938_v32  ;;  %v16968_v32 = vld [vmem:[%s18471_s17 + $0x8e8] ss:$12 sps:$4 sm:$0xff]   ;;  %v16980_v4 = vld [vmem:[%s18471_s17 + $0x8b8] ss:$12 sps:$4 sm:$0xff]  }
0x18a8   : > { %12003 = vmatprep.subr.bf16.mxu0 %v16946_v31  ;;  %v21716_v18 = vpop.f32.mrf.mxu0  ;;  %v21721_v31 = vld [vmem:[%s18469_s1 + $0x8] sm:$0xf]  ;;  %v16959_v8 = vld [vmem:[%s18471_s17 + $0x738] ss:$12 sps:$4 sm:$0xff]  }
0x18a9   : > { %11929 = vmatpush1.bf16.msra.mxu1 %v16917_v52  ;;  %v21726_v52 = vrot.slane %v21721_v31, %v23034_v26  ;;  %v16961_v40 = vld [vmem:[%s18471_s17 + $0x73c] ss:$12 sps:$4 sm:$0xff]   ;;  %v16967_v10 = vld [vmem:[%s18471_s17 + $0x724] ss:$12 sps:$4 sm:$0xff]  }
0x18aa   : > { %11902 = vmatmul.mubr.bf16.gmra.mxu0 %v21670_v6  ;;  %11930 = vmatprep.subr.bf16.mxu1 %v16925_v20  ;;  %v21729_v48 = vpop.f32.mrf.mxu0  ;;  %v16953_v20 = vld [vmem:[%s18471_s17 + $0x750] ss:$12 sps:$4 sm:$0xff]  }
0x18ab   : > { %11911 = vmatprep.mubr.bf16.mxu0 %v21676_v63  ;;  %12004 = vmatpush1.bf16.msra.mxu0 %v16944_v13 }
0x18ac   : > { %11829 = vmatmul.mubr.bf16.gmra.mxu1 %v21679_v22  ;;  %12005 = vmatprep.subr.bf16.mxu0 %v16952_v24  ;;  %v21738_v2 = vpop.f32.mrf.mxu0  ;;  %v16988_v24 = vld [vmem:[%s18471_s17 + $0x8a4] ss:$12 sps:$4 sm:$0xff]  }
0x18ad   : > { %11838 = vmatprep.mubr.bf16.mxu1 %v21686_v56  ;;  %11931 = vmatpush1.bf16.msra.mxu1 %v16923_v35 }
0x18ae   : > { %11932 = vmatprep.subr.bf16.mxu1 %v16931_v11  ;;  %v21746_v54 = vpop.f32.mrf.mxu0 }
0x18af   : > { %12006 = vmatpush1.bf16.msra.mxu0 %v16950_v46  ;;  %v16986_v46 = vld [vmem:[%s18471_s17 + $0x8a0] ss:$12 sps:$4 sm:$0xff]  }
0x18b0   : > { %12007 = vmatprep.subr.bf16.mxu0 %v16958_v37  ;;  %v21755_v36 = vpop.f32.mrf.mxu0 }
0x18b1   : > { %11933 = vmatpush1.bf16.msra.mxu1 %v16929_v51  ;;  %v16965_v51 = vld [vmem:[%s18471_s17 + $0x720] ss:$12 sps:$4 sm:$0xff]  }
0x18b2   : > { %11912 = vmatmul.mubr.bf16.gmra.mxu0 %v21698_v45  ;;  %11934 = vmatprep.subr.bf16.mxu1 %v16937_v5 }
0x18b3   : > { %12008 = vmatpush1.bf16.msra.mxu0 %v16956_v53  ;;  %v16992_v53 = vld [vmem:[%s18471_s17 + $0x888] ss:$12 sps:$4 sm:$0xff]  }
0x18b4   : > { %11839 = vmatmul.mubr.bf16.gmra.mxu1 %v21704_v3  ;;  %12009 = vmatprep.subr.bf16.mxu0 %v16964_v23 }
0x18b5   : > { %11935 = vmatpush1.bf16.msra.mxu1 %v16935_v17  ;;  %v16999_v17 = vld [vmem:[%s18471_s17 + $0x874] ss:$12 sps:$4 sm:$0xff]  }
0x18b6   : > { %11936 = vmatprep.subr.bf16.mxu1 %v16943_v21  ;;  %v16971_v21 = vld [vmem:[%s18471_s17 + $0x708] ss:$12 sps:$4 sm:$0xff]  }
0x18b7   : > { %12010 = vmatpush1.bf16.msra.mxu0 %v16962_v44 }
0x18b8   : > { %12011 = vmatprep.subr.bf16.mxu0 %v16970_v41  ;;  %v16979_v41 = vld [vmem:[%s18471_s17 + $0x6f4] ss:$12 sps:$4 sm:$0xff]  }
0x18b9   : > { %11937 = vmatpush1.bf16.msra.mxu1 %v16941_v9  ;;  %v16997_v9 = vld [vmem:[%s18471_s17 + $0x870] ss:$12 sps:$4 sm:$0xff]  }
0x18ba   : > { %11938 = vmatprep.subr.bf16.mxu1 %v16949_v47  ;;  %v21764_v47 = vpop.f32.mrf.mxu0 }
0x18bb   : > { %12012 = vmatpush2.bf16.msra.mxu0 %v16968_v32  ;;  %v23035_v32 = vld [vmem:[#allocation54_spill] sm:$0xff] }
0x18bc   : > { %v21731_v15 = vpop.f32.mrf.mxu1  ;;  %12013 = vmatprep.subr.bf16.mxu0 %v16976_v30  ;;  %v21768_v30 = vrot.slane %v21721_v31, %v23035_v32 }
0x18bd   : > { %11939 = vmatpush2.bf16.msra.mxu1 %v16947_v62 }
0x18be   : > { %v9293_v33 = vpop.f32.mrf.mxu1  ;;  %11940 = vmatprep.subr.bf16.mxu1 %v16955_v39  ;;  %v17004_v39 = vld [vmem:[%s18471_s17 + $0x85c] ss:$12 sps:$4 sm:$0xff]  }
0x18bf   : > { %v9294_v13 = vadd.f32 %v9293_v33, %v21726_v52  ;;  %12014 = vmatpush2.bf16.msra.mxu0 %v16974_v42  ;;  %v16977_v42 = vld [vmem:[%s18471_s17 + $0x6f0] ss:$12 sps:$4 sm:$0xff]  }
0x18c0   : > { %v9295_v60 = vpop.f32.mrf.mxu1  ;;  %12015 = vmatprep.subr.bf16.mxu0 %v16982_v49  ;;  %v16985_v33 = vld [vmem:[%s18471_s17 + $0x6dc] ss:$12 sps:$4 sm:$0xff]  }
0x18c1   : > { %11941 = vmatpush2.bf16.msra.mxu1 %v16953_v20  ;;  %v9367_v16 = vadd.f32 %v21632_v59, %v9294_v13  ;;  %v16973_v59 = vld [vmem:[%s18471_s17 + $0x70c] ss:$12 sps:$4 sm:$0xff]   ;;  %v9296_v49 = vadd.f32 %v9295_v60, %v21768_v30 }
0x18c2   : > { %v9297_v35 = vpop.f32.mrf.mxu1  ;;  %11942 = vmatprep.subr.bf16.mxu1 %v16961_v40  ;;  %v17002_v13 = vld [vmem:[%s18471_s17 + $0x858] ss:$12 sps:$4 sm:$0xff]  }
0x18c3   : > { %v9298_v11 = vadd.f32 %v9297_v35, %v21726_v52  ;;  %12016 = vmatpush2.bf16.msra.mxu0 %v16980_v4  ;;  %v9558_v14 = vmax.f32 %v9367_v16, 0.0  ;;  %v21778_v4 = vpop.f32.mrf.mxu0  ;;  %v17009_v35 = vld [vmem:[%s18471_s17 + $0x844] ss:$12 sps:$4 sm:$0xff]   ;;  %v9369_v16 = vadd.f32 %v21655_v29, %v9296_v49  ;;  %v16989_v29 = vld [vmem:[%s18471_s17 + $0x6c0] ss:$12 sps:$4 sm:$0xff]  }
0x18c4   : > { %v21748_v7 = vpop.f32.mrf.mxu1  ;;  %12017 = vmatprep.subr.bf16.mxu0 %v16988_v24  ;;  %v9292_v24 = vadd.f32 %v21731_v15, %v21768_v30 }
0x18c5   : > { %v9371_v37 = vadd.f32 %v21673_v55, %v9298_v11  ;;  %11943 = vmatpush2.bf16.msra.mxu1 %v16959_v8  ;;  %v21789_v15 = vpop.f32.mrf.mxu0 }
0x18c6   : > { %v9303_v1 = vpop.f32.mrf.mxu1  ;;  %11944 = vmatprep.subr.bf16.mxu1 %v16967_v10  ;;  %v16983_v10 = vld [vmem:[%s18471_s17 + $0x6d8] ss:$12 sps:$4 sm:$0xff]  }
0x18c7   : > { %v9570_v5 = vmax.f32 %v9371_v37, 0.0  ;;  %12018 = vmatpush2.bf16.msra.mxu0 %v16986_v46  ;;  %v9304_v60 = vadd.f32 %v9303_v1, %v21726_v52  ;;  %v16991_v46 = vld [vmem:[%s18471_s17 + $0x6c4] ss:$12 sps:$4 sm:$0xff]   ;;  %v17007_v37 = vld [vmem:[%s18471_s17 + $0x840] ss:$12 sps:$4 sm:$0xff]  }
0x18c8   : > { %v9305_v23 = vpop.f32.mrf.mxu1  ;;  %12019 = vmatprep.subr.bf16.mxu0 %v16994_v12  ;;  %v17012_v1 = vld [vmem:[%s18471_s17 + $0x2f0] ss:$12 sps:$4 sm:$0xff]  }
0x18c9   : > { %11945 = vmatpush2.bf16.msra.mxu1 %v16965_v51  ;;  %v21758_v55 = vpack.c.bf16 %v9570_v5, %v9558_v14  ;;  %v9365_v51 = vadd.f32 %v21609_v50, %v9292_v24  ;;  %v9377_v14 = vadd.f32 %v21700_v38, %v9304_v60  ;;  %v9569_v5 = vmax.f32 %v9369_v16, 0.0  ;;  %v9400_v50 = vpop.f32.mrf.mxu0 }
0x18ca   : > { %v9307_v44 = vpop.f32.mrf.mxu1  ;;  %11946 = vmatprep.subr.bf16.mxu1 %v16973_v59 }
0x18cb   : > { %11954 = vmatprep.mubr.bf16.mxu1 %v21758_v55  ;;  %12020 = vmatpush2.bf16.msra.mxu0 %v16992_v53  ;;  %v9308_v40 = vadd.f32 %v9307_v44, %v21726_v52  ;;  %v9306_v53 = vadd.f32 %v9305_v23, %v21768_v30 }
0x18cc   : > { %v21770_v62 = vpop.f32.mrf.mxu1  ;;  %12021 = vmatprep.subr.bf16.mxu0 %v16999_v17 }
0x18cd   : > { %11947 = vmatpush2.bf16.msra.mxu1 %v16971_v21  ;;  %v9381_v12 = vadd.f32 %v21716_v18, %v9308_v40  ;;  %v16995_v18 = vld [vmem:[%s18471_s17 + $0x170] ss:$12 sps:$4 sm:$0xff]  }
0x18ce   : > { %v9313_v20 = vpop.f32.mrf.mxu1  ;;  %11948 = vmatprep.subr.bf16.mxu1 %v16979_v41  ;;  %v9557_v41 = vmax.f32 %v9365_v51, 0.0 }
0x18cf   : > { %12022 = vmatpush2.bf16.msra.mxu0 %v16997_v9  ;;  %v9594_v21 = vmax.f32 %v9381_v12, 0.0  ;;  %v9302_v9 = vadd.f32 %v21748_v7, %v21768_v30  ;;  %v9314_v23 = vadd.f32 %v9313_v20, %v21726_v52 }
0x18d0   : > { %v9315_v8 = vpop.f32.mrf.mxu1  ;;  %12023 = vmatprep.subr.bf16.mxu0 %v17004_v39  ;;  %v9582_v39 = vmax.f32 %v9377_v14, 0.0  ;;  %v21810_v40 = vpack.c.bf16 %v9569_v5, %v9557_v41 }
0x18d1   : > { %11949 = vmatpush2.bf16.msra.mxu1 %v16977_v42  ;;  %v23036_v42 = vld [vmem:[#allocation57_spill] sm:$0xff]  ;;  %v9387_v12 = vadd.f32 %v21738_v2, %v9314_v23 }
0x18d2   : > { %v9317_v11 = vpop.f32.mrf.mxu1  ;;  %11950 = vmatprep.subr.bf16.mxu1 %v16985_v33  ;;  %v21807_v49 = vrot.slane %v21721_v31, %v23036_v42  ;;  %v16996_v33 = vld [vmem:[%s18471_s17 + $0xb0] ss:$12 sps:$4 sm:$0xff]   ;;  %v21819_v16 = vpack.c.bf16 %v9594_v21, %v9582_v39  ;;  %v17006_v42 = vld [vmem:[%s18471_s17 + $0x80] ss:$12 sps:$4 sm:$0xff]  }
0x18d3   : > { %12024 = vmatpush2.bf16.msra.mxu0 %v17002_v13  ;;  %v9318_v44 = vadd.f32 %v9317_v11, %v21726_v52  ;;  %v9379_v13 = vadd.f32 %v21709_v0, %v9306_v53  ;;  %v9375_v11 = vadd.f32 %v21690_v43, %v9302_v9 }
0x18d4   : > { %v21792_v59 = vpop.f32.mrf.mxu1  ;;  %12025 = vmatprep.subr.bf16.mxu0 %v17009_v35  ;;  %v23037_v35 = vld [vmem:[#allocation53_spill] sm:$0xff] }
0x18d5   : > { %11951 = vmatpush2.bf16.msra.mxu1 %v16983_v10  ;;  %v21815_v7 = vrot.slane %v21721_v31, %v23037_v35  ;;  %v17000_v10 = vld [vmem:[%s18471_s17 + $0x158] ss:$12 sps:$4 sm:$0xff]   ;;  %v9391_v20 = vadd.f32 %v21755_v36, %v9318_v44  ;;  %v9593_v51 = vmax.f32 %v9379_v13, 0.0  ;;  %v9316_v36 = vadd.f32 %v9315_v8, %v21768_v30 }
0x18d6   : > { %v9323_v17 = vpop.f32.mrf.mxu1  ;;  %11952 = vmatprep.subr.bf16.mxu1 %v16991_v46  ;;  %v17001_v31 = vld [vmem:[%s18471_s17 + $0x98] ss:$12 sps:$4 sm:$0xff]   ;;  %v9581_v2 = vmax.f32 %v9375_v11, 0.0  ;;  %v9606_v8 = vmax.f32 %v9387_v12, 0.0 }
0x18d7   : > { %12026 = vmatpush2.bf16.msra.mxu0 %v17007_v37  ;;  %v9618_v5 = vmax.f32 %v9391_v20, 0.0  ;;  %v9324_v9 = vadd.f32 %v9323_v17, %v21726_v52  ;;  %v9389_v13 = vadd.f32 %v21746_v54, %v9316_v36  ;;  %v17010_v20 = vld [vmem:[%s18471_s17 + $0x128] ss:$12 sps:$4 sm:$0xff]  }
0x18d8   : > { %v21802_v38 = vpop.f32.mrf.mxu1  ;;  %15110 = vmatprep.subr.bf16.mxu0 %v17012_v1 }
0x18d9   : > { %11953 = vmatpush2.bf16.msra.mxu1 %v16989_v29  ;;  %v17005_v29 = vld [vmem:[%s18471_s17 + $0x140] ss:$12 sps:$4 sm:$0xff]   ;;  %v21841_v12 = vpack.c.bf16 %v9618_v5, %v9606_v8  ;;  %v9397_v54 = vadd.f32 %v21778_v4, %v9324_v9  ;;  %v17013_v4 = vld [vmem:[%s18471_s17 + $0x110] ss:$12 sps:$4 sm:$0xff]  }
0x18da   : > { %v9327_v24 = vpop.f32.mrf.mxu1  ;;  %v9437_v60 = vpop.f32.mrf.mxu0  ;;  %15070 = vmatprep.subr.bf16.mxu1 %v16995_v18  ;;  %v9312_v18 = vadd.f32 %v21770_v62, %v21768_v30 }
0x18db   : > { %v9438_v1 = vadd.f32 %v9437_v60, %v21815_v7  ;;  %v9328_v53 = vadd.f32 %v9327_v24, %v21726_v52 }
0x18dc   : > { %v9510_v46 = vpop.f32.mrf.mxu1  ;;  %11955 = vmatmul.mubr.bf16.vlgmr.msra.gmra.mxu1 %v21810_v40  ;;  %v9439_v0 = vpop.f32.mrf.mxu0  ;;  %v9385_v52 = vadd.f32 %v21729_v48, %v9312_v18  ;;  %v9326_v48 = vadd.f32 %v21802_v38, %v21768_v30 }
0x18dd   : > { %v9440_v37 = vadd.f32 %v9439_v0, %v21807_v49  ;;  %11964 = vmatprep.mubr.bf16.mxu1 %v21819_v16  ;;  %15071 = vmatpush3.bf16.msra.mxu1 %v16996_v33  ;;  %v21837_v33 = vpack.c.bf16 %v9593_v51, %v9581_v2  ;;  %v9511_v24 = vadd.f32 %v9510_v46, %v9438_v1  ;;  %v9617_v1 = vmax.f32 %v9389_v13, 0.0 }
0x18de   : > { %v9512_v14 = vpop.f32.mrf.mxu1  ;;  %v9441_v43 = vpop.f32.mrf.mxu0  ;;  %15072 = vmatprep.subr.bf16.mxu1 %v17000_v10  ;;  %v9401_v11 = vadd.f32 %v9400_v50, %v9328_v53  ;;  %v17011_v50 = vld [vmem:[%s18471_s17 + $0x68] ss:$12 sps:$4 sm:$0xff]  }
0x18df   : > { %v9442_v21 = vadd.f32 %v9441_v43, %v21815_v7  ;;  %v9513_v39 = vadd.f32 %v9512_v14, %v9440_v37  ;;  %v9559_v14 = vmax.f32 %v9511_v24, 0.0 }
0x18e0   : > { %v9514_v44 = vpop.f32.mrf.mxu1  ;;  %v9443_v41 = vpop.f32.mrf.mxu0  ;;  %v9642_v53 = vmax.f32 %v9401_v11, 0.0  ;;  %v17017_v11 = vld [vmem:[%s18471_s17 + $0xf8] ss:$12 sps:$4 sm:$0xff]  }
0x18e1   : > { %v9444_v23 = vadd.f32 %v9443_v41, %v21807_v49  ;;  %15073 = vmatpush3.bf16.msra.mxu1 %v17001_v31  ;;  %v9515_v60 = vadd.f32 %v9514_v44, %v9442_v21  ;;  %v9560_v46 = vmax.f32 %v9513_v39, 0.0  ;;  %v17014_v21 = vld [vmem:[%s18471_s17 + $0x230] ss:$12 sps:$4 sm:$0xff]   ;;  %v9605_v44 = vmax.f32 %v9385_v52, 0.0  ;;  %v17016_v39 = vld [vmem:[%s18471_s17 + $0x2d8] ss:$12 sps:$4 sm:$0xff]  }
0x18e2   : > { %v9516_v62 = vpop.f32.mrf.mxu1  ;;  %v9447_v10 = vpop.f32.mrf.mxu0  ;;  %15074 = vmatprep.subr.bf16.mxu1 %v17005_v29  ;;  %v9322_v41 = vadd.f32 %v21792_v59, %v21768_v30  ;;  %v9399_v30 = vadd.f32 %v21789_v15, %v9326_v48 }
0x18e3   : > { %v9517_v0 = vadd.f32 %v9516_v62, %v9444_v23  ;;  %v9571_v17 = vmax.f32 %v9515_v60, 0.0  ;;  %v9448_v43 = vadd.f32 %v9447_v10, %v21815_v7  ;;  %v9630_v23 = vmax.f32 %v9397_v54, 0.0  ;;  %v17015_v60 = vld [vmem:[%s18471_s17 + $0x50] ss:$12 sps:$4 sm:$0xff]  }
0x18e4   : > { %v9520_v37 = vpop.f32.mrf.mxu1  ;;  %11965 = vmatmul.mubr.bf16.gmra.mxu1 %v21837_v33  ;;  %v9449_v31 = vpop.f32.mrf.mxu0  ;;  %v21865_v62 = vpack.c.bf16 %v9617_v1, %v9605_v44  ;;  %v17019_v1 = vld [vmem:[%s18471_s17 + $0x38] ss:$12 sps:$4 sm:$0xff]   ;;  %v9641_v48 = vmax.f32 %v9399_v30, 0.0 }
0x18e5   : > { %v9572_v51 = vmax.f32 %v9517_v0, 0.0  ;;  %v9450_v36 = vadd.f32 %v9449_v31, %v21807_v49  ;;  %11974 = vmatprep.mubr.bf16.mxu1 %v21841_v12  ;;  %15075 = vmatpush3.bf16.msra.mxu1 %v17006_v42  ;;  %v21859_v38 = vpack.c.bf16 %v9571_v17, %v9559_v14  ;;  %v9521_v59 = vadd.f32 %v9520_v37, %v9448_v43  ;;  %v17018_v17 = vld [vmem:[%s18471_s17 + $0x218] ss:$12 sps:$4 sm:$0xff]   ;;  %v17020_v37 = vld [vmem:[%s18471_s17 + $0x2c0] ss:$12 sps:$4 sm:$0xff]  }
0x18e6   : > { %v9522_v29 = vpop.f32.mrf.mxu1  ;;  %v9451_v5 = vpop.f32.mrf.mxu0  ;;  %15076 = vmatprep.subr.bf16.mxu1 %v17010_v20  ;;  %v21870_v52 = vpack.c.bf16 %v9642_v53, %v9630_v23  ;;  %v9395_v31 = vadd.f32 %v21764_v47, %v9322_v41 }
0x18e7   : > { %v9452_v2 = vadd.f32 %v9451_v5, %v21815_v7  ;;  %v21854_v18 = vpack.c.bf16 %v9572_v51, %v9560_v46  ;;  %v9523_v42 = vadd.f32 %v9522_v29, %v9450_v36  ;;  %v9583_v47 = vmax.f32 %v9521_v59, 0.0  ;;  %v17021_v5 = vld [vmem:[%s18471_s17 + $0xe0] ss:$12 sps:$4 sm:$0xff]  }
0x18e8   : > { %v9524_v8 = vpop.f32.mrf.mxu1  ;;  %v9453_v9 = vpop.f32.mrf.mxu0 }
0x18e9   : > { %v9525_v13 = vadd.f32 %v9524_v8, %v9452_v2  ;;  %v9454_v24 = vadd.f32 %v9453_v9, %v21807_v49  ;;  %15077 = vmatpush3.bf16.msra.mxu1 %v17011_v50  ;;  %12027 = vmatprep.mubr.bf16.mxu0 %v21854_v18  ;;  %v9584_v51 = vmax.f32 %v9523_v42, 0.0  ;;  %v17022_v2 = vld [vmem:[%s18471_s17 + $0x200] ss:$12 sps:$4 sm:$0xff]   ;;  %v17024_v9 = vld [vmem:[%s18471_s17 + $0x2a8] ss:$12 sps:$4 sm:$0xff]  }
0x18ea   : > { %v9526_v10 = vpop.f32.mrf.mxu1  ;;  %v9457_v20 = vpop.f32.mrf.mxu0  ;;  %12028 = vmatmul.mubr.bf16.vlgmr.msra.gmra.mxu0 %v21859_v38  ;;  %15078 = vmatprep.subr.bf16.mxu1 %v17013_v4 }
0x18eb   : > { %v9527_v0 = vadd.f32 %v9526_v10, %v9454_v24  ;;  %15111 = vmatpush3.bf16.msra.mxu0 %v17014_v21  ;;  %v9595_v54 = vmax.f32 %v9525_v13, 0.0  ;;  %v9458_v14 = vadd.f32 %v9457_v20, %v21815_v7  ;;  %v9629_v21 = vmax.f32 %v9395_v31, 0.0  ;;  %v17023_v13 = vld [vmem:[%s18471_s17 + $0x20] ss:$12 sps:$4 sm:$0xff]   ;;  %v17025_v10 = vld [vmem:[%s18471_s17 + $0xc8] ss:$12 sps:$4 sm:$0xff]  }
0x18ec   : > { %v9530_v46 = vpop.f32.mrf.mxu1  ;;  %11975 = vmatmul.mubr.bf16.gmra.mxu1 %v21865_v62  ;;  %v9459_v15 = vpop.f32.mrf.mxu0  ;;  %15112 = vmatprep.subr.bf16.mxu0 %v17016_v39 }
0x18ed   : > { %v9596_v36 = vmax.f32 %v9527_v0, 0.0  ;;  %v9460_v50 = vadd.f32 %v9459_v15, %v21807_v49  ;;  %11984 = vmatprep.mubr.bf16.mxu1 %v21870_v52  ;;  %15079 = vmatpush3.bf16.msra.mxu1 %v17015_v60  ;;  %v21885_v44 = vpack.c.bf16 %v9595_v54, %v9583_v47  ;;  %v21891_v24 = vpack.c.bf16 %v9641_v48, %v9629_v21  ;;  %v17028_v54 = vld [vmem:[%s18471_s17 + $0x290] ss:$12 sps:$4 sm:$0xff]  }
0x18ee   : > { %v9532_v43 = vpop.f32.mrf.mxu1  ;;  %v9461_v29 = vpop.f32.mrf.mxu0  ;;  %15080 = vmatprep.subr.bf16.mxu1 %v17017_v11  ;;  %v9531_v60 = vadd.f32 %v9530_v46, %v9458_v14  ;;  %v17026_v11 = vld [vmem:[%s18471_s17 + $0x1e8] ss:$12 sps:$4 sm:$0xff]   ;;  %v17030_v14 = vld [vmem:[%s18471_s17 + $0x470] ss:$12 sps:$4 sm:$0xff]  }
0x18ef   : > { %v21881_v4 = vpack.c.bf16 %v9596_v36, %v9584_v51  ;;  %v9462_v53 = vadd.f32 %v9461_v29, %v21815_v7  ;;  %15113 = vmatpush3.bf16.msra.mxu0 %v17018_v17  ;;  %v9533_v39 = vadd.f32 %v9532_v43, %v9460_v50  ;;  %v23038_v51 = vld [vmem:[#allocation90_spill] sm:$0xff] }
0x18f0   : > { %v9534_v41 = vpop.f32.mrf.mxu1  ;;  %v9463_v8 = vpop.f32.mrf.mxu0  ;;  %15114 = vmatprep.subr.bf16.mxu0 %v17020_v37  ;;  %v17027_v36 = vld [vmem:[%s18471_s17 + $0x8] ss:$12 sps:$4 sm:$0xff]   ;;  %v9607_v50 = vmax.f32 %v9531_v60, 0.0 }
0x18f1   : > { %v9535_v23 = vadd.f32 %v9534_v41, %v9462_v53  ;;  %v9464_v42 = vadd.f32 %v9463_v8, %v21807_v49  ;;  %15081 = vmatpush3.bf16.msra.mxu1 %v17019_v1  ;;  %12037 = vmatprep.mubr.bf16.mxu0 %v21881_v4  ;;  %v9608_v46 = vmax.f32 %v9533_v39, 0.0  ;;  %v17032_v41 = vld [vmem:[%s18471_s17 + $0x278] ss:$12 sps:$4 sm:$0xff]  }
0x18f2   : > { %v9536_v30 = vpop.f32.mrf.mxu1  ;;  %v9467_v59 = vpop.f32.mrf.mxu0  ;;  %12038 = vmatmul.mubr.bf16.gmra.mxu0 %v21885_v44  ;;  %15082 = vmatprep.subr.bf16.mxu1 %v17021_v5  ;;  %v17029_v5 = vld [vmem:[%s18471_s17 + $0x1d0] ss:$12 sps:$4 sm:$0xff]  }
0x18f3   : > { %v9537_v20 = vadd.f32 %v9536_v30, %v9464_v42  ;;  %15115 = vmatpush3.bf16.msra.mxu0 %v17022_v2  ;;  %v9619_v0 = vmax.f32 %v9535_v23, 0.0  ;;  %v9468_v1 = vadd.f32 %v9467_v59, %v21815_v7  ;;  %v17031_v23 = vld [vmem:[%s18471_s17 + $0x3b0] ss:$12 sps:$4 sm:$0xff]   ;;  %v17033_v30 = vld [vmem:[%s18471_s17 + $0x1b8] ss:$12 sps:$4 sm:$0xff]  }
0x18f4   : > { %v9540_v17 = vpop.f32.mrf.mxu1  ;;  %11985 = vmatmul.mubr.bf16.gmra.mxu1 %v21891_v24  ;;  %v9469_v31 = vpop.f32.mrf.mxu0  ;;  %15116 = vmatprep.subr.bf16.mxu0 %v17024_v9 }
0x18f5   : > { %v9620_v15 = vmax.f32 %v9537_v20, 0.0  ;;  %v9470_v37 = vadd.f32 %v9469_v31, %v21807_v49  ;;  %15083 = vmatpush3.bf16.msra.mxu1 %v17023_v13  ;;  %12100 = vmatprep.mubr.bf16.mxu1 %v23038_v51  ;;  %v21907_v53 = vpack.c.bf16 %v9619_v0, %v9607_v50  ;;  %v17034_v13 = vld [vmem:[%s18471_s17 + $0x458] ss:$12 sps:$4 sm:$0xff]   ;;  %v17040_v51 = vld [vmem:[%s18471_s17 + $0x248] ss:$12 sps:$4 sm:$0xff]  }
0x18f6   : > { %v9542_v48 = vpop.f32.mrf.mxu1  ;;  %v9471_v47 = vpop.f32.mrf.mxu0  ;;  %15084 = vmatprep.subr.bf16.mxu1 %v17025_v10  ;;  %v23039_v10 = vld [vmem:[#allocation89_spill] sm:$0xff]  ;;  %v23040_v0 = vld [vmem:[#allocation56_spill] sm:$0xff] }
0x18f7   : > { %v21903_v43 = vpack.c.bf16 %v9620_v15, %v9608_v46  ;;  %v9472_v29 = vadd.f32 %v9471_v47, %v21815_v7  ;;  %15117 = vmatpush3.bf16.msra.mxu0 %v17026_v11  ;;  %v9543_v8 = vadd.f32 %v9542_v48, %v9470_v37  ;;  %v9541_v7 = vadd.f32 %v9540_v17, %v9468_v1  ;;  %v17035_v17 = vld [vmem:[%s18471_s17 + $0x398] ss:$12 sps:$4 sm:$0xff]   ;;  %v17037_v15 = vld [vmem:[%s18471_s17 + $0x1a0] ss:$12 sps:$4 sm:$0xff]   ;;  %v17042_v50 = vld [vmem:[%s18471_s17 + $0x428] ss:$12 sps:$4 sm:$0xff]  }
0x18f8   : > { %v9544_v2 = vpop.f32.mrf.mxu1  ;;  %v9473_v21 = vpop.f32.mrf.mxu0  ;;  %15118 = vmatprep.subr.bf16.mxu0 %v17028_v54  ;;  %v17038_v54 = vld [vmem:[%s18471_s17 + $0x440] ss:$12 sps:$4 sm:$0xff]   ;;  %v17041_v48 = vld [vmem:[%s18471_s17 + $0x188] ss:$12 sps:$4 sm:$0xff]  }
0x18f9   : > { %v9545_v9 = vadd.f32 %v9544_v2, %v9472_v29  ;;  %v9474_v39 = vadd.f32 %v9473_v21, %v21807_v49  ;;  %15085 = vmatpush3.bf16.msra.mxu1 %v17027_v36  ;;  %12047 = vmatprep.mubr.bf16.mxu0 %v21903_v43  ;;  %v17036_v49 = vld [vmem:[%s18471_s17 + $0x260] ss:$12 sps:$4 sm:$0xff]   ;;  %v9632_v20 = vmax.f32 %v9543_v8, 0.0  ;;  %v9631_v31 = vmax.f32 %v9541_v7, 0.0  ;;  %v23043_v29 = vld [vmem:[#allocation76_spill] sm:$0xff] }
0x18fa   : > { %v9546_v42 = vpop.f32.mrf.mxu1  ;;  %12048 = vmatmul.mubr.bf16.gmra.mxu0 %v21907_v53  ;;  %15150 = vmatprep.subr.bf16.mxu1 %v17030_v14  ;;  %v17039_v36 = vld [vmem:[%s18471_s17 + $0x380] ss:$12 sps:$4 sm:$0xff]   ;;  %v17044_v14 = vld [vmem:[%s18471_s17 + $0x5f0] ss:$12 sps:$4 sm:$0xff]   ;;  %v17050_v7 = vld [vmem:[%s18471_s17 + $0x518] ss:$12 sps:$4 sm:$0xff]  }
0x18fb   : > { %v9547_v60 = vadd.f32 %v9546_v42, %v9474_v39  ;;  %15119 = vmatpush3.bf16.msra.mxu0 %v17029_v5  ;;  %v9643_v59 = vmax.f32 %v9545_v9, 0.0  ;;  %v23041_v1 = vld [vmem:[#allocation86_spill] sm:$0xff]  ;;  %v17045_v2 = vld [vmem:[%s18471_s17 + $0x410] ss:$12 sps:$4 sm:$0xff]  }
0x18fc   : > { %12101 = vmatmul.mubr.bf16.vlgmr.msra.gmra.mxu1 %v23039_v10  ;;  %15120 = vmatprep.subr.bf16.mxu0 %v17032_v41  ;;  %v23042_v47 = vld [vmem:[#allocation78_spill] sm:$0xff]  ;;  %v17046_v21 = vld [vmem:[%s18471_s17 + $0x530] ss:$12 sps:$4 sm:$0xff]  }
0x18fd   : > { %v9644_v11 = vmax.f32 %v9547_v60, 0.0  ;;  %12108 = vmatprep.mubr.bf16.mxu1 %v23040_v0  ;;  %15151 = vmatpush3.bf16.msra.mxu1 %v17031_v23  ;;  %v21924_v37 = vpack.c.bf16 %v9643_v59, %v9631_v31  ;;  %v17043_v5 = vld [vmem:[%s18471_s17 + $0x368] ss:$12 sps:$4 sm:$0xff]   ;;  %v17048_v41 = vld [vmem:[%s18471_s17 + $0x5d8] ss:$12 sps:$4 sm:$0xff]  }
0x18fe   : > { %15152 = vmatprep.subr.bf16.mxu1 %v17034_v13  ;;  %v17047_v8 = vld [vmem:[%s18471_s17 + $0x350] ss:$12 sps:$4 sm:$0xff]   ;;  %v17049_v39 = vld [vmem:[%s18471_s17 + $0x3f8] ss:$12 sps:$4 sm:$0xff]   ;;  %v17052_v13 = vld [vmem:[%s18471_s17 + $0x5c0] ss:$12 sps:$4 sm:$0xff]  }
0x18ff   : > { %v21921_v46 = vpack.c.bf16 %v9644_v11, %v9632_v20  ;;  %15121 = vmatpush3.bf16.msra.mxu0 %v17033_v30  ;;  %v23044_v9 = vld [vmem:[#allocation85_spill] sm:$0xff]  ;;  %v23048_v11 = vld [vmem:[#allocation62_spill] sm:$0xff] }
0x1900   : > { %15122 = vmatprep.subr.bf16.mxu0 %v17036_v49  ;;  %v23045_v23 = vld [vmem:[#allocation77_spill] sm:$0xff]  ;;  %v17056_v49 = vld [vmem:[%s18471_s17 + $0x5a8] ss:$12 sps:$4 sm:$0xff]  }
0x1901   : > { %15153 = vmatpush3.bf16.msra.mxu1 %v17035_v17  ;;  %12057 = vmatprep.mubr.bf16.mxu0 %v21921_v46  ;;  %v23046_v42 = vld [vmem:[#allocation61_spill] sm:$0xff]  ;;  %v17057_v0 = vld [vmem:[%s18471_s17 + $0x3c8] ss:$12 sps:$4 sm:$0xff]  }
0x1902   : > { %12058 = vmatmul.mubr.bf16.gmra.mxu0 %v21924_v37  ;;  %15154 = vmatprep.subr.bf16.mxu1 %v17038_v54  ;;  %v23047_v60 = vld [vmem:[#allocation93_spill] sm:$0xff]  ;;  %v23049_v17 = vld [vmem:[#allocation91_spill] sm:$0xff]  ;;  %v23050_v54 = vld [vmem:[#allocation64_spill] sm:$0xff] }
0x1903   : > { %15123 = vmatpush3.bf16.msra.mxu0 %v17037_v15  ;;  %12165 = vmatprep.mubr.bf16.mxu0 %v23041_v1  ;;  %v17051_v30 = vld [vmem:[%s18471_s17 + $0x338] ss:$12 sps:$4 sm:$0xff]   ;;  %v17053_v59 = vld [vmem:[%s18471_s17 + $0x3e0] ss:$12 sps:$4 sm:$0xff]   ;;  %v17058_v31 = vld [vmem:[%s18471_s17 + $0x4e8] ss:$12 sps:$4 sm:$0xff]  }
0x1904   : > { %12109 = vmatmul.mubr.bf16.gmra.mxu1 %v23042_v47  ;;  %15124 = vmatprep.subr.bf16.mxu0 %v17040_v51  ;;  %v17054_v10 = vld [vmem:[%s18471_s17 + $0x500] ss:$12 sps:$4 sm:$0xff]   ;;  %v17060_v15 = vld [vmem:[%s18471_s17 + $0x590] ss:$12 sps:$4 sm:$0xff]  }
0x1905   : > { %12116 = vmatprep.mubr.bf16.mxu1 %v23043_v29  ;;  %15155 = vmatpush3.bf16.msra.mxu1 %v17039_v36  ;;  %v17055_v20 = vld [vmem:[%s18471_s17 + $0x320] ss:$12 sps:$4 sm:$0xff]   ;;  %v23051_v51 = vld [vmem:[#allocation96_spill] sm:$0xff] }
0x1906   : > { %15156 = vmatprep.subr.bf16.mxu1 %v17042_v50  ;;  %v17059_v36 = vld [vmem:[%s18471_s17 + $0x308] ss:$12 sps:$4 sm:$0xff]   ;;  %v17062_v50 = vld [vmem:[%s18471_s17 + $0x770] ss:$12 sps:$4 sm:$0xff]   ;;  %v17066_v29 = vld [vmem:[%s18471_s17 + $0x758] ss:$12 sps:$4 sm:$0xff]  }
0x1907   : > { %15125 = vmatpush3.bf16.msra.mxu0 %v17041_v48  ;;  %v17061_v1 = vld [vmem:[%s18471_s17 + $0x4d0] ss:$12 sps:$4 sm:$0xff]   ;;  %v17064_v48 = vld [vmem:[%s18471_s17 + $0x578] ss:$12 sps:$4 sm:$0xff]  }
0x1908   : > { %15190 = vmatprep.subr.bf16.mxu0 %v17044_v14  ;;  %v17063_v47 = vld [vmem:[%s18471_s17 + $0x6b0] ss:$12 sps:$4 sm:$0xff]  }
0x1909   : > { %15157 = vmatpush3.bf16.msra.mxu1 %v17043_v5  ;;  %v23052_v14 = vld [vmem:[#allocation51_spill] sm:$0xff]  ;;  %v23053_v5 = vld [vmem:[#allocation92_spill] sm:$0xff] }
0x190a   : > { %12166 = vmatmul.mubr.bf16.vlgmr.msra.gmra.mxu0 %v23044_v9  ;;  %15158 = vmatprep.subr.bf16.mxu1 %v17045_v2  ;;  %v17065_v2 = vld [vmem:[%s18471_s17 + $0x4b8] ss:$12 sps:$4 sm:$0xff]   ;;  %v17069_v9 = vld [vmem:[%s18471_s17 + $0x4a0] ss:$12 sps:$4 sm:$0xff]  }
0x190b   : > { %12173 = vmatprep.mubr.bf16.mxu0 %v23045_v23  ;;  %15191 = vmatpush3.bf16.msra.mxu0 %v17046_v21  ;;  %v17068_v21 = vld [vmem:[%s18471_s17 + $0x560] ss:$12 sps:$4 sm:$0xff]   ;;  %v17072_v23 = vld [vmem:[%s18471_s17 + $0x548] ss:$12 sps:$4 sm:$0xff]  }
0x190c   : > { %12117 = vmatmul.mubr.bf16.gmra.mxu1 %v23046_v42  ;;  %15192 = vmatprep.subr.bf16.mxu0 %v17048_v41  ;;  %v17067_v41 = vld [vmem:[%s18471_s17 + $0x698] ss:$12 sps:$4 sm:$0xff]  }
0x190d   : > { %12124 = vmatprep.mubr.bf16.mxu1 %v23047_v60  ;;  %15159 = vmatpush3.bf16.msra.mxu1 %v17047_v8  ;;  %v17070_v8 = vld [vmem:[%s18471_s17 + $0x740] ss:$12 sps:$4 sm:$0xff]  }
0x190e   : > { %15160 = vmatprep.subr.bf16.mxu1 %v17049_v39  ;;  %v23055_v42 = vld [vmem:[#allocation97_spill] sm:$0xff] }
0x190f   : > { %15193 = vmatpush3.bf16.msra.mxu0 %v17050_v7  ;;  %v23054_v7 = vld [vmem:[#allocation95_spill] sm:$0xff] }
0x1910   : > { %15194 = vmatprep.subr.bf16.mxu0 %v17052_v13  ;;  %v17073_v13 = vld [vmem:[%s18471_s17 + $0x488] ss:$12 sps:$4 sm:$0xff]  }
0x1911   : > { %15161 = vmatpush3.bf16.msra.mxu1 %v17051_v30  ;;  %v17076_v30 = vld [vmem:[%s18471_s17 + $0x8f0] ss:$12 sps:$4 sm:$0xff]  }
0x1912   : > { %12174 = vmatmul.mubr.bf16.gmra.mxu0 %v23048_v11  ;;  %15162 = vmatprep.subr.bf16.mxu1 %v17053_v59  ;;  %v17075_v59 = vld [vmem:[%s18471_s17 + $0x668] ss:$12 sps:$4 sm:$0xff]   ;;  %v17080_v11 = vld [vmem:[%s18471_s17 + $0x8d8] ss:$12 sps:$4 sm:$0xff]  }
0x1913   : > { %12181 = vmatprep.mubr.bf16.mxu0 %v23049_v17  ;;  %15195 = vmatpush3.bf16.msra.mxu0 %v17054_v10  ;;  %v17077_v10 = vld [vmem:[%s18471_s17 + $0x710] ss:$12 sps:$4 sm:$0xff]  }
0x1914   : > { %12125 = vmatmul.mubr.bf16.gmra.mxu1 %v23050_v54  ;;  %15196 = vmatprep.subr.bf16.mxu0 %v17056_v49  ;;  %v17078_v49 = vld [vmem:[%s18471_s17 + $0x830] ss:$12 sps:$4 sm:$0xff]  }
0x1915   : > { %15163 = vmatpush3.bf16.msra.mxu1 %v17055_v20  ;;  %12230 = vmatprep.mubr.bf16.mxu1 %v23051_v51 }
0x1916   : > { %15164 = vmatprep.subr.bf16.mxu1 %v17057_v0  ;;  %v17082_v0 = vld [vmem:[%s18471_s17 + $0x818] ss:$12 sps:$4 sm:$0xff]  }
0x1917   : > { %15197 = vmatpush3.bf16.msra.mxu0 %v17058_v31  ;;  %v17084_v31 = vld [vmem:[%s18471_s17 + $0x8c0] ss:$12 sps:$4 sm:$0xff]  }
0x1918   : > { %15198 = vmatprep.subr.bf16.mxu0 %v17060_v15  ;;  %v17086_v15 = vld [vmem:[%s18471_s17 + $0x800] ss:$12 sps:$4 sm:$0xff]  }
0x1919   : > { %15165 = vmatpush3.bf16.msra.mxu1 %v17059_v36  ;;  %v17088_v36 = vld [vmem:[%s18471_s17 + $0x8a8] ss:$12 sps:$4 sm:$0xff]  }
0x191a   : > { %12182 = vmatmul.mubr.bf16.gmra.mxu0 %v23052_v14  ;;  %15230 = vmatprep.subr.bf16.mxu1 %v17062_v50  ;;  %v22005_v54 = vpop.f32.mrf.mxu0  ;;  %v17091_v14 = vld [vmem:[%s18471_s17 + $0x608] ss:$12 sps:$4 sm:$0xff]  }
0x191b   : > { %12189 = vmatprep.mubr.bf16.mxu0 %v23053_v5  ;;  %15199 = vmatpush3.bf16.msra.mxu0 %v17061_v1  ;;  %v17090_v1 = vld [vmem:[%s18471_s17 + $0x7e8] ss:$12 sps:$4 sm:$0xff]   ;;  %v17094_v5 = vld [vmem:[%s18471_s17 + $0x878] ss:$12 sps:$4 sm:$0xff]  }
0x191c   : > { %12231 = vmatmul.mubr.bf16.vlgmr.msra.gmra.mxu1 %v21592_v28  ;;  %15200 = vmatprep.subr.bf16.mxu0 %v17064_v48  ;;  %v21975_v39 = vpop.f32.mrf.mxu1  ;;  %v17071_v28 = vld [vmem:[%s18471_s17 + $0x680] ss:$12 sps:$4 sm:$0xff]   ;;  %v22013_v50 = vpop.f32.mrf.mxu0 }
0x191d   : > { %12238 = vmatprep.mubr.bf16.mxu1 %v21603_v57  ;;  %15231 = vmatpush3.bf16.msra.mxu1 %v17063_v47  ;;  %v17074_v57 = vld [vmem:[%s18471_s17 + $0x728] ss:$12 sps:$4 sm:$0xff]   ;;  %v17092_v47 = vld [vmem:[%s18471_s17 + $0x890] ss:$12 sps:$4 sm:$0xff]  }
0x191e   : > { %15232 = vmatprep.subr.bf16.mxu1 %v17066_v29  ;;  %v21983_v60 = vpop.f32.mrf.mxu1 }
0x191f   : > { %15201 = vmatpush3.bf16.msra.mxu0 %v17065_v2 }
0x1920   : > { %15202 = vmatprep.subr.bf16.mxu0 %v17068_v21  ;;  %v21991_v20 = vpop.f32.mrf.mxu1  ;;  %v17096_v21 = vld [vmem:[%s18471_s17 + $0x860] ss:$12 sps:$4 sm:$0xff]  }
0x1921   : > { %15233 = vmatpush3.bf16.msra.mxu1 %v17067_v41 }
0x1922   : > { %12190 = vmatmul.mubr.bf16.gmra.mxu0 %v23054_v7  ;;  %15234 = vmatprep.subr.bf16.mxu1 %v17070_v8  ;;  %v21999_v17 = vpop.f32.mrf.mxu1 }
0x1923   : > { %15203 = vmatpush3.bf16.msra.mxu0 %v17069_v9  ;;  %12295 = vmatprep.mubr.bf16.mxu0 %v23055_v42 }
0x1924   : > { %12239 = vmatmul.mubr.bf16.gmra.mxu1 %v21640_v25  ;;  %15204 = vmatprep.subr.bf16.mxu0 %v17072_v23  ;;  %v17079_v25 = vld [vmem:[%s18471_s17 + $0x650] ss:$12 sps:$4 sm:$0xff]   ;;  %v22009_v51 = vpop.f32.mrf.mxu1 }
0x1925   : > { %12246 = vmatprep.mubr.bf16.mxu1 %v21649_v34  ;;  %15235 = vmatpush3.bf16.msra.mxu1 %v17071_v28  ;;  %v17081_v34 = vld [vmem:[%s18471_s17 + $0x6f8] ss:$12 sps:$4 sm:$0xff]  }
0x1926   : > { %15236 = vmatprep.subr.bf16.mxu1 %v17074_v57  ;;  %v22019_v48 = vpop.f32.mrf.mxu1 }
0x1927   : > { %15205 = vmatpush3.bf16.msra.mxu0 %v17073_v13 }
0x1928   : > { %15270 = vmatprep.subr.bf16.mxu0 %v17076_v30  ;;  %v22028_v29 = vpop.f32.mrf.mxu1 }
0x1929   : > { %15237 = vmatpush3.bf16.msra.mxu1 %v17075_v59 }
0x192a   : > { %12296 = vmatmul.mubr.bf16.vlgmr.msra.gmra.mxu0 %v21583_v19  ;;  %15238 = vmatprep.subr.bf16.mxu1 %v17077_v10  ;;  %v17083_v19 = vld [vmem:[%s18471_s17 + $0x638] ss:$12 sps:$4 sm:$0xff]   ;;  %v22036_v2 = vpop.f32.mrf.mxu1 }
0x192b   : > { %12303 = vmatprep.mubr.bf16.mxu0 %v21589_v58  ;;  %15271 = vmatpush3.bf16.msra.mxu0 %v17078_v49  ;;  %v17085_v58 = vld [vmem:[%s18471_s17 + $0x6e0] ss:$12 sps:$4 sm:$0xff]  }
0x192c   : > { %12247 = vmatmul.mubr.bf16.gmra.mxu1 %v21679_v22  ;;  %15272 = vmatprep.subr.bf16.mxu0 %v17080_v11  ;;  %v17087_v22 = vld [vmem:[%s18471_s17 + $0x620] ss:$12 sps:$4 sm:$0xff]   ;;  %v22044_v8 = vpop.f32.mrf.mxu1 }
0x192d   : > { %12254 = vmatprep.mubr.bf16.mxu1 %v21686_v56  ;;  %15239 = vmatpush3.bf16.msra.mxu1 %v17079_v25  ;;  %v17089_v56 = vld [vmem:[%s18471_s17 + $0x6c8] ss:$12 sps:$4 sm:$0xff]  }
0x192e   : > { %15240 = vmatprep.subr.bf16.mxu1 %v17081_v34 }
0x192f   : > { %15273 = vmatpush3.bf16.msra.mxu0 %v17082_v0 }
0x1930   : > { %15274 = vmatprep.subr.bf16.mxu0 %v17084_v31 }
0x1931   : > { %15241 = vmatpush3.bf16.msra.mxu1 %v17083_v19 }
0x1932   : > { %12304 = vmatmul.mubr.bf16.gmra.mxu0 %v21629_v27  ;;  %15242 = vmatprep.subr.bf16.mxu1 %v17085_v58  ;;  %v22025_v27 = vpop.f32.mrf.mxu0 }
0x1933   : > { %12311 = vmatprep.mubr.bf16.mxu0 %v21637_v61  ;;  %15275 = vmatpush3.bf16.msra.mxu0 %v17086_v15  ;;  %v17093_v61 = vld [vmem:[%s18471_s17 + $0x7d0] ss:$12 sps:$4 sm:$0xff]  }
0x1934   : > { %12255 = vmatmul.mubr.bf16.gmra.mxu1 %v21704_v3  ;;  %15276 = vmatprep.subr.bf16.mxu0 %v17088_v36  ;;  %v22031_v3 = vpop.f32.mrf.mxu0 }
0x1935   : > { %15243 = vmatpush3.bf16.msra.mxu1 %v17087_v22  ;;  %12360 = vmatprep.mubr.bf16.mxu1 %v21758_v55  ;;  %v17095_v55 = vld [vmem:[%s18471_s17 + $0x7b8] ss:$12 sps:$4 sm:$0xff]  }
0x1936   : > { %15244 = vmatprep.subr.bf16.mxu1 %v17089_v56  ;;  %v22041_v41 = vpop.f32.mrf.mxu0 }
0x1937   : > { %15277 = vmatpush3.bf16.msra.mxu0 %v17090_v1 }
0x1938   : > { %15278 = vmatprep.subr.bf16.mxu0 %v17092_v47  ;;  %v22047_v9 = vpop.f32.mrf.mxu0 }
0x1939   : > { %15245 = vmatpush3.bf16.msra.mxu1 %v17091_v14 }
0x193a   : > { %12312 = vmatmul.mubr.bf16.gmra.mxu0 %v21670_v6  ;;  %15622 = vmatprep.subr.bf16.mxu1 %v17076_v30  ;;  %v17097_v6 = vld [vmem:[%s18471_s17 + $0x7a0] ss:$12 sps:$4 sm:$0xff]   ;;  %v22056_v23 = vpop.f32.mrf.mxu0 }
0x193b   : > { %12319 = vmatprep.mubr.bf16.mxu0 %v21676_v63  ;;  %15279 = vmatpush3.bf16.msra.mxu0 %v17093_v61  ;;  %v17098_v63 = vld [vmem:[%s18471_s17 + $0x848] ss:$12 sps:$4 sm:$0xff]  }
0x193c   : > { %12361 = vmatmul.mubr.bf16.vlgmr.msra.gmra.mxu1 %v21810_v40  ;;  %15280 = vmatprep.subr.bf16.mxu0 %v17094_v5  ;;  %v17099_v40 = vld [vmem:[%s18471_s17 + $0x788] ss:$12 sps:$4 sm:$0xff]  }
0x193d   : > { %12368 = vmatprep.mubr.bf16.mxu1 %v21819_v16  ;;  %15630 = vmatpush3.bf16.msra.mxu1 %v17078_v49  ;;  %v22052_v16 = vpop.f32.mrf.mxu1 }
0x193e   : > { %15623 = vmatprep.subr.bf16.mxu1 %v17080_v11 }
0x193f   : > { %15281 = vmatpush3.bf16.msra.mxu0 %v17095_v55  ;;  %v22058_v28 = vpop.f32.mrf.mxu1 }
0x1940   : > { %15282 = vmatprep.subr.bf16.mxu0 %v17096_v21 }
0x1941   : > { %15631 = vmatpush3.bf16.msra.mxu1 %v17082_v0 }
0x1942   : > { %12320 = vmatmul.mubr.bf16.gmra.mxu0 %v21698_v45  ;;  %15624 = vmatprep.subr.bf16.mxu1 %v17084_v31  ;;  %v22060_v45 = vpop.f32.mrf.mxu0 }
0x1943   : > { %15283 = vmatpush3.bf16.msra.mxu0 %v17097_v6  ;;  %12425 = vmatprep.mubr.bf16.mxu0 %v21854_v18  ;;  %v22064_v18 = vpop.f32.mrf.mxu1 }
0x1944   : > { %12369 = vmatmul.mubr.bf16.gmra.mxu1 %v21837_v33  ;;  %15284 = vmatprep.subr.bf16.mxu0 %v17098_v63  ;;  %v22068_v33 = vpop.f32.mrf.mxu0 }
0x1945   : > { %12376 = vmatprep.mubr.bf16.mxu1 %v21841_v12  ;;  %15632 = vmatpush3.bf16.msra.mxu1 %v17086_v15  ;;  %v22070_v12 = vpop.f32.mrf.mxu1 }
0x1946   : > { %15625 = vmatprep.subr.bf16.mxu1 %v17088_v36  ;;  %v22072_v7 = vpop.f32.mrf.mxu0 }
0x1947   : > { %15285 = vmatpush3.bf16.msra.mxu0 %v17099_v40 }
0x1949   : > { %15633 = vmatpush3.bf16.msra.mxu1 %v17090_v1 }
0x194a   : > { %12426 = vmatmul.mubr.bf16.vlgmr.msra.gmra.mxu0 %v21859_v38  ;;  %15626 = vmatprep.subr.bf16.mxu1 %v17092_v47  ;;  %v22076_v38 = vpop.f32.mrf.mxu1 }
0x194b   : > { %12433 = vmatprep.mubr.bf16.mxu0 %v21881_v4 }
0x194c   : > { %12377 = vmatmul.mubr.bf16.gmra.mxu1 %v21865_v62  ;;  %v22080_v62 = vpop.f32.mrf.mxu0 }
0x194d   : > { %12384 = vmatprep.mubr.bf16.mxu1 %v21870_v52  ;;  %15634 = vmatpush3.bf16.msra.mxu1 %v17093_v61  ;;  %v22082_v52 = vpop.f32.mrf.mxu1 }
0x194e   : > { %15627 = vmatprep.subr.bf16.mxu1 %v17094_v5  ;;  %v22084_v4 = vpop.f32.mrf.mxu0 }
0x1951   : > { %15635 = vmatpush3.bf16.msra.mxu1 %v17095_v55 }
0x1952   : > { %12434 = vmatmul.mubr.bf16.gmra.mxu0 %v21885_v44  ;;  %15628 = vmatprep.subr.bf16.mxu1 %v17096_v21  ;;  %v22087_v44 = vpop.f32.mrf.mxu1  ;;  %v22134_v21 = vld [vmem:[%s828_s22] sm:$0x7] }
0x1953   : > { %12441 = vmatprep.mubr.bf16.mxu0 %v21903_v43  ;;  %23056 = vst [vmem:[#allocation94_spill] sm:$0xff] %v22087_v44  ;;  %v22090_v43 = vpop.f32.mrf.mxu0  ;;  %23066 = vst [vmem:[#allocation93_spill] sm:$0xff] %v22134_v21 }
0x1954   : > { %12385 = vmatmul.mubr.bf16.gmra.mxu1 %v21891_v24  ;;  %23057 = vst [vmem:[#allocation90_spill] sm:$0xff] %v22090_v43 }
0x1955   : > { %15636 = vmatpush3.bf16.msra.mxu1 %v17097_v6  ;;  %12449 = vmatprep.mubr.bf16.mxu1 %v21921_v46  ;;  %v22092_v57 = vpop.f32.mrf.mxu0 }
0x1956   : > { %15629 = vmatprep.subr.bf16.mxu1 %v17098_v63  ;;  %23058 = vst [vmem:[#allocation89_spill] sm:$0xff] %v22092_v57 }
0x1957   : > { %v22094_v42 = vpop.f32.mrf.mxu0 }
0x1958   : > { %23059 = vst [vmem:[#allocation56_spill] sm:$0xff] %v22094_v42 }
0x1959   : > { %15637 = vmatpush3.bf16.msra.mxu1 %v17099_v40  ;;  %v22096_v30 = vpop.f32.mrf.mxu0  ;;  %v22142_v40 = vrot.slane %v22134_v21, %v23035_v32 }
0x195a   : > { %12442 = vmatmul.mubr.bf16.gmra.mxu0 %v21907_v53  ;;  %23060 = vst [vmem:[#allocation86_spill] sm:$0xff] %v22096_v30  ;;  %v22148_v30 = vrot.slane %v22134_v21, %v23034_v26 }
0x195b   : > { %v11883_v10 = vpop.f32.mrf.mxu0 }
0x195c   : > { %12450 = vmatmul.mubr.bf16.vlgmr.msra.gmra.mxu1 %v21924_v37  ;;  %v11810_v24 = vpop.f32.mrf.mxu1  ;;  %v11671_v21 = vadd.f32 %v21999_v17, %v22148_v30 }
0x195d   : > { %v11885_v11 = vpop.f32.mrf.mxu0 }
0x195e   : > { %v11812_v46 = vpop.f32.mrf.mxu1  ;;  %v11744_v43 = vadd.f32 %v22031_v3, %v11671_v21 }
0x195f   : > { %v11887_v25 = vpop.f32.mrf.mxu0 }
0x1960   : > { %v11814_v13 = vpop.f32.mrf.mxu1 }
0x1961   : > { %v22102_v37 = vpop.f32.mrf.mxu0 }
0x1962   : > { %v11816_v59 = vpop.f32.mrf.mxu1 }
0x1963   : > { %v22106_v31 = vpop.f32.mrf.mxu0 }
0x1964   : > { %v11820_v49 = vpop.f32.mrf.mxu1 }
0x1965   : > { %v22110_v58 = vpop.f32.mrf.mxu0 }
0x1966   : > { %v22098_v53 = vpop.f32.mrf.mxu1 }
0x1967   : > { %v22114_v36 = vpop.f32.mrf.mxu0 }
0x1968   : > { %v22100_v34 = vpop.f32.mrf.mxu1 }
0x1969   : > { %v22118_v56 = vpop.f32.mrf.mxu0 }
0x196a   : > { %v22104_v0 = vpop.f32.mrf.mxu1 }
0x196b   : > { %v22122_v47 = vpop.f32.mrf.mxu0 }
0x196c   : > { %v22108_v19 = vpop.f32.mrf.mxu1 }
0x196d   : > { %v22126_v61 = vpop.f32.mrf.mxu0 }
0x196e   : > { %v22112_v15 = vpop.f32.mrf.mxu1  ;;  %23063 = vst [vmem:[#allocation85_spill] sm:$0xff] %v22126_v61 }
0x196f   : > { %v22130_v55 = vpop.f32.mrf.mxu0 }
0x1970   : > { %v22116_v22 = vpop.f32.mrf.mxu1  ;;  %23065 = vst [vmem:[#allocation61_spill] sm:$0xff] %v22130_v55  ;;  %v11665_v55 = vadd.f32 %v21975_v39, %v22142_v40  ;;  %v11675_v39 = vadd.f32 %v22009_v51, %v22142_v40 }
0x1971   : > { %v22138_v63 = vpop.f32.mrf.mxu0 }
0x1972   : > { %v22120_v1 = vpop.f32.mrf.mxu1  ;;  %23068 = vst [vmem:[#allocation91_spill] sm:$0xff] %v22138_v63 }
0x1973   : > { %23061 = vst [vmem:[#allocation78_spill] sm:$0xff] %v22120_v1  ;;  %v22150_v42 = vpop.f32.mrf.mxu0 }
0x1974   : > { %v22124_v14 = vpop.f32.mrf.mxu1  ;;  %23070 = vst [vmem:[#allocation96_spill] sm:$0xff] %v22150_v42 }
0x1975   : > { %23062 = vst [vmem:[#allocation76_spill] sm:$0xff] %v22124_v14  ;;  %v22156_v63 = vpop.f32.mrf.mxu0  ;;  %v11738_v14 = vadd.f32 %v22005_v54, %v11665_v55 }
0x1976   : > { %v22128_v5 = vpop.f32.mrf.mxu1  ;;  %23071 = vst [vmem:[#allocation51_spill] sm:$0xff] %v22156_v63 }
0x1977   : > { %23064 = vst [vmem:[#allocation77_spill] sm:$0xff] %v22128_v5  ;;  %v11811_v42 = vadd.f32 %v11810_v24, %v11738_v14  ;;  %v22166_v1 = vpop.f32.mrf.mxu0  ;;  %v11748_v24 = vadd.f32 %v22041_v41, %v11675_v39 }
0x1978   : > { %v22136_v6 = vpop.f32.mrf.mxu1 }
0x1979   : > { %23067 = vst [vmem:[#allocation62_spill] sm:$0xff] %v22136_v6  ;;  %v11667_v6 = vadd.f32 %v21983_v60, %v22148_v30  ;;  %v11884_v17 = vadd.f32 %v11883_v10, %v11811_v42  ;;  %v22175_v51 = vpop.f32.mrf.mxu0 }
0x197a   : > { %v22144_v35 = vpop.f32.mrf.mxu1 }
0x197b   : > { %23069 = vst [vmem:[#allocation64_spill] sm:$0xff] %v22144_v35  ;;  %v11669_v35 = vadd.f32 %v21991_v20, %v22142_v40  ;;  %v11740_v44 = vadd.f32 %v22013_v50, %v11667_v6  ;;  %v11677_v20 = vadd.f32 %v22019_v48, %v22148_v30  ;;  %v11679_v50 = vadd.f32 %v22028_v29, %v22142_v40 }
0x197c   : > { %v11817_v6 = vadd.f32 %v11816_v59, %v11744_v43  ;;  %v11821_v48 = vadd.f32 %v11820_v49, %v11748_v24  ;;  %v11685_v29 = vadd.f32 %v22044_v8, %v22142_v40  ;;  %v23072_v49 = vld [vmem:[#allocation75_spill] sm:$0xff] }
0x197d   : > { %v11813_v63 = vadd.f32 %v11812_v46, %v11740_v44  ;;  %v11742_v61 = vadd.f32 %v22025_v27, %v11669_v35  ;;  %v11681_v35 = vadd.f32 %v22036_v2, %v22148_v30  ;;  %v11750_v27 = vadd.f32 %v22047_v9, %v11677_v20 }
0x197e   : > { %v11752_v43 = vadd.f32 %v22056_v23, %v11679_v50  ;;  %v11890_v2 = vadd.f32 %v22102_v37, %v11817_v6  ;;  %v11894_v8 = vadd.f32 %v22106_v31, %v11821_v48 }
0x197f   : > { %v11815_v55 = vadd.f32 %v11814_v13, %v11742_v61  ;;  %v11886_v46 = vadd.f32 %v11885_v11, %v11813_v63  ;;  %v11823_v41 = vadd.f32 %v22098_v53, %v11750_v27 }
0x1980   : > { %v11825_v23 = vadd.f32 %v22100_v34, %v11752_v43  ;;  %v23076_v34 = vld [vmem:[#allocation73_spill] sm:$0xff] }
0x1981   : > { %v11888_v10 = vadd.f32 %v11887_v25, %v11815_v55  ;;  %v11754_v25 = vadd.f32 %v22060_v45, %v11681_v35  ;;  %v11689_v55 = vadd.f32 %v22058_v28, %v22142_v40  ;;  %v11896_v45 = vadd.f32 %v22110_v58, %v11823_v41 }
0x1982   : > { %v11898_v48 = vadd.f32 %v22114_v36, %v11825_v23  ;;  %v23080_v36 = vld [vmem:[#allocation83_spill] sm:$0xff]  ;;  %v11697_v41 = vadd.f32 %v22076_v38, %v22148_v30 }
0x1983   : > { %v11827_v50 = vadd.f32 %v22104_v0, %v11754_v25  ;;  %v23078_v0 = vld [vmem:[#allocation82_spill] sm:$0xff] }
0x199c   : > { %v11956_v5 = vpop.f32.mrf.mxu1 }
0x199d   : > { %v11957_v44 = vadd.f32 %v11956_v5, %v11884_v17 }
0x199e   : > { %v11958_v57 = vpop.f32.mrf.mxu1 }
0x199f   : > { %v11959_v42 = vadd.f32 %v11958_v57, %v11886_v46  ;;  %v11687_v57 = vadd.f32 %v22052_v16, %v22148_v30  ;;  %v11758_v16 = vadd.f32 %v22068_v33, %v11685_v29 }
0x19a0   : > { %v11960_v32 = vpop.f32.mrf.mxu1 }
0x19a1   : > { %v11961_v5 = vadd.f32 %v11960_v32, %v11888_v10  ;;  %v23074_v32 = vld [vmem:[#allocation84_spill] sm:$0xff]  ;;  %v11831_v28 = vadd.f32 %v22108_v19, %v11758_v16  ;;  %v11760_v33 = vadd.f32 %v22072_v7, %v11687_v57  ;;  %v11762_v19 = vadd.f32 %v22080_v62, %v11689_v55  ;;  %v23085_v57 = vld [vmem:[#allocation85_spill] sm:$0xff] }
0x19a2   : > { %v11962_v26 = vpop.f32.mrf.mxu1  ;;  %v23090_v55 = vld [vmem:[#allocation76_spill] sm:$0xff] }
0x19a3   : > { %v11963_v39 = vadd.f32 %v11962_v26, %v11890_v2 }
0x19a4   : > { %v11966_v60 = vpop.f32.mrf.mxu1 }
0x19a5   : > { %v11967_v24 = vadd.f32 %v11966_v60, %v11894_v8  ;;  %v23086_v8 = vld [vmem:[#allocation78_spill] sm:$0xff] }
0x19a6   : > { %v11968_v54 = vpop.f32.mrf.mxu1 }
0x19a7   : > { %v11969_v35 = vadd.f32 %v11968_v54, %v11896_v45  ;;  %v11900_v54 = vadd.f32 %v22118_v56, %v11827_v50  ;;  %v23082_v56 = vld [vmem:[#allocation71_spill] sm:$0xff] }
0x19a8   : > { %v11970_v14 = vpop.f32.mrf.mxu1 }
0x19a9   : > { %v11971_v10 = vadd.f32 %v11970_v14, %v11898_v48 }
0x19aa   : > { %v11972_v13 = vpop.f32.mrf.mxu1  ;;  %v12029_v3 = vpop.f32.mrf.mxu0 }
0x19ab   : > { %v12030_v61 = vadd.f32 %v12029_v3, %v11957_v44  ;;  %v11691_v44 = vadd.f32 %v22064_v18, %v22148_v30  ;;  %v11695_v3 = vadd.f32 %v22070_v12, %v22142_v40  ;;  %v11833_v18 = vadd.f32 %v22112_v15, %v11760_v33 }
0x19ac   : > { %v11976_v59 = vpop.f32.mrf.mxu1  ;;  %v12031_v11 = vpop.f32.mrf.mxu0  ;;  %v11904_v15 = vadd.f32 %v22122_v47, %v11831_v28  ;;  %v11973_v14 = vadd.f32 %v11972_v13, %v11900_v54  ;;  %v23095_v28 = vld [vmem:[#allocation77_spill] sm:$0xff]  ;;  %v23101_v54 = vld [vmem:[#allocation86_spill] sm:$0xff] }
0x19ad   : > { %v22186_v21 = vadd.f32 %v12030_v61, %v23072_v49  ;;  %v12032_v9 = vadd.f32 %v12031_v11, %v11959_v42  ;;  %v11764_v12 = vadd.f32 %v22084_v4, %v11691_v44  ;;  %v11835_v11 = vadd.f32 %v22116_v22, %v11762_v19  ;;  %v23087_v22 = vld [vmem:[#allocation69_spill] sm:$0xff] }
0x19ae   : > { %v11978_v63 = vpop.f32.mrf.mxu1  ;;  %v12033_v53 = vpop.f32.mrf.mxu0  ;;  %v11699_v49 = vadd.f32 %v22082_v52, %v22142_v40  ;;  %v11906_v4 = vadd.f32 %v23085_v57, %v11833_v18  ;;  %v11977_v23 = vadd.f32 %v11976_v59, %v11904_v15  ;;  %v23091_v40 = vld [vmem:[#allocation89_spill] sm:$0xff]  ;;  %v23106_v57 = vld [vmem:[#allocation64_spill] sm:$0xff] }
0x19af   : > { %23073 = vst [vmem:[#allocation92_spill] sm:$0xff] %v22186_v21  ;;  %12482 = vst [vmem:[#allocation2 + $0xb0] sm:$0xff] %v22186_v21  ;;  %v22195_v37 = vadd.f32 %v12032_v9, %v23074_v32  ;;  %v12034_v20 = vadd.f32 %v12033_v53, %v11961_v5  ;;  %v23084_v9 = vld [vmem:[#allocation90_spill] sm:$0xff]  ;;  %v11837_v53 = vadd.f32 %v23086_v8, %v11764_v12  ;;  %v23093_v59 = vld [vmem:[#allocation65_spill] sm:$0xff] }
0x19b0   : > { %v11980_v17 = vpop.f32.mrf.mxu1  ;;  %v12035_v31 = vpop.f32.mrf.mxu0  ;;  %v11768_v38 = vadd.f32 %v23084_v9, %v11695_v3  ;;  %v23089_v32 = vld [vmem:[#allocation94_spill] sm:$0xff]  ;;  %v11770_v16 = vadd.f32 %v23091_v40, %v11697_v41  ;;  %v11979_v50 = vadd.f32 %v11978_v63, %v11906_v4  ;;  %v23098_v63 = vld [vmem:[#allocation68_spill] sm:$0xff]  ;;  %v23107_v8 = vld [vmem:[#allocation55_spill] sm:$0xff] }
0x19b1   : > { %23075 = vst [vmem:[#allocation95_spill] sm:$0xff] %v22195_v37  ;;  %12483 = vst [vmem:[#allocation2] sm:$0xff] %v22195_v37  ;;  %v22204_v26 = vadd.f32 %v12034_v20, %v23076_v34  ;;  %v12036_v6 = vadd.f32 %v12035_v31, %v11963_v39  ;;  %v11701_v20 = vadd.f32 %v23089_v32, %v22148_v30 }
0x19b2   : > { %v11982_v46 = vpop.f32.mrf.mxu1  ;;  %v12039_v58 = vpop.f32.mrf.mxu0  ;;  %v11841_v52 = vadd.f32 %v23090_v55, %v11768_v38  ;;  %v11843_v33 = vadd.f32 %v23095_v28, %v11770_v16  ;;  %v23113_v28 = vld [vmem:[#allocation80_spill] sm:$0xff] }
0x19b3   : > { %23077 = vst [vmem:[#allocation97_spill] sm:$0xff] %v22204_v26  ;;  %12485 = vst [vmem:[#allocation2 + $0x48] sm:$0xff] %v22204_v26  ;;  %v22213_v60 = vadd.f32 %v12036_v6, %v23078_v0  ;;  %v12040_v27 = vadd.f32 %v12039_v58, %v11967_v24  ;;  %v23092_v24 = vld [vmem:[#allocation61_spill] sm:$0xff]  ;;  %v23096_v58 = vld [vmem:[#allocation56_spill] sm:$0xff] }
0x19b4   : > { %v11986_v42 = vpop.f32.mrf.mxu1  ;;  %v12041_v7 = vpop.f32.mrf.mxu0  ;;  %v11908_v34 = vadd.f32 %v23092_v24, %v11835_v11  ;;  %v23111_v24 = vld [vmem:[#allocation79_spill] sm:$0xff] }
0x19b5   : > { %23079 = vst [vmem:[#allocation75_spill] sm:$0xff] %v22213_v60  ;;  %12486 = vst [vmem:[#allocation2 + $0x60] sm:$0xff] %v22213_v60  ;;  %v22222_v61 = vadd.f32 %v12040_v27, %v23080_v36  ;;  %v12042_v29 = vadd.f32 %v12041_v7, %v11969_v35  ;;  %v11772_v35 = vadd.f32 %v23096_v58, %v11699_v49  ;;  %v23097_v27 = vld [vmem:[#allocation91_spill] sm:$0xff]  ;;  %v23100_v7 = vld [vmem:[#allocation62_spill] sm:$0xff] }
0x19b6   : > { %v11988_v43 = vpop.f32.mrf.mxu1  ;;  %v12043_v62 = vpop.f32.mrf.mxu0  ;;  %v11981_v0 = vadd.f32 %v11980_v17, %v11908_v34  ;;  %v11910_v3 = vadd.f32 %v23097_v27, %v11837_v53  ;;  %v11774_v36 = vadd.f32 %v23101_v54, %v11701_v20  ;;  %v23103_v17 = vld [vmem:[#allocation81_spill] sm:$0xff]  ;;  %v23109_v20 = vld [vmem:[#allocation87_spill] sm:$0xff] }
0x19b7   : > { %23081 = vst [vmem:[#allocation84_spill] sm:$0xff] %v22222_v61  ;;  %12488 = vst [vmem:[#allocation2 + $0x40] sm:$0xff] %v22222_v61  ;;  %v22231_v5 = vadd.f32 %v12042_v29, %v23082_v56  ;;  %v12044_v2 = vadd.f32 %v12043_v62, %v11971_v10  ;;  %v11845_v10 = vadd.f32 %v23100_v7, %v11772_v35  ;;  %v23102_v29 = vld [vmem:[#allocation96_spill] sm:$0xff]  ;;  %v23128_v61 = vld [vmem:[#allocation53_spill] sm:$0xff] }
0x19b8   : > { %v11990_v25 = vpop.f32.mrf.mxu1  ;;  %v12045_v47 = vpop.f32.mrf.mxu0  ;;  %v11914_v41 = vadd.f32 %v23102_v29, %v11841_v52  ;;  %v11983_v62 = vadd.f32 %v11982_v46, %v11910_v3  ;;  %v11847_v4 = vadd.f32 %v23106_v57, %v11774_v36 }
0x19b9   : > { %23083 = vst [vmem:[#allocation73_spill] sm:$0xff] %v22231_v5  ;;  %12489 = vst [vmem:[#allocation2 + $0x78] sm:$0xff] %v22231_v5  ;;  %v22240_v13 = vadd.f32 %v12044_v2, %v23087_v22  ;;  %v12046_v39 = vadd.f32 %v12045_v47, %v11973_v14  ;;  %v23105_v2 = vld [vmem:[#allocation51_spill] sm:$0xff] }
0x19ba   : > { %v11992_v45 = vpop.f32.mrf.mxu1  ;;  %v12049_v31 = vpop.f32.mrf.mxu0  ;;  %v11916_v49 = vadd.f32 %v23105_v2, %v11843_v33  ;;  %v11987_v47 = vadd.f32 %v11986_v42, %v11914_v41 }
0x19bb   : > { %23088 = vst [vmem:[#allocation82_spill] sm:$0xff] %v22240_v13  ;;  %12491 = vst [vmem:[#allocation2 + $0x90] sm:$0xff] %v22240_v13  ;;  %v22249_v6 = vadd.f32 %v12046_v39, %v23093_v59  ;;  %v12050_v44 = vadd.f32 %v12049_v31, %v11977_v23  ;;  %v11918_v23 = vadd.f32 %v22166_v1, %v11845_v10 }
0x19bc   : > { %v15086_v30 = vpop.f32.mrf.mxu1  ;;  %v12051_v48 = vpop.f32.mrf.mxu0  ;;  %v11989_v32 = vadd.f32 %v11988_v43, %v11916_v49 }
0x19bd   : > { %23094 = vst [vmem:[#allocation83_spill] sm:$0xff] %v22249_v6  ;;  %12492 = vst [vmem:[#allocation2 + $0x18] sm:$0xff] %v22249_v6  ;;  %v22256_v18 = vadd.f32 %v12050_v44, %v23098_v63  ;;  %v12052_v19 = vadd.f32 %v12051_v48, %v11979_v50  ;;  %v11991_v31 = vadd.f32 %v11990_v25, %v11918_v23  ;;  %v23129_v6 = vld [vmem:[#allocation93_spill] sm:$0xff] }
0x19be   : > { %v15087_v12 = vpop.f32.mrf.mxu1  ;;  %v12053_v15 = vpop.f32.mrf.mxu0  ;;  %v11920_v50 = vadd.f32 %v22175_v51, %v11847_v4  ;;  %v23115_v51 = vld [vmem:[#allocation58_spill] sm:$0xff]  ;;  %v22376_v5 = vrot.slane %v23129_v6, %v23128_v61 }
0x19bf   : > { %23099 = vst [vmem:[#allocation71_spill] sm:$0xff] %v22256_v18  ;;  %12494 = vst [vmem:[#allocation2 + $0x38] sm:$0xff] %v22256_v18  ;;  %v22263_v11 = vadd.f32 %v12052_v19, %v23103_v17  ;;  %v22265_v14 = vadd.f32 %v15087_v12, %v15086_v30  ;;  %v12054_v56 = vadd.f32 %v12053_v15, %v11981_v0 }
0x19c0   : > { %v15089_v9 = vpop.f32.mrf.mxu1  ;;  %v12055_v38 = vpop.f32.mrf.mxu0  ;;  %v11993_v44 = vadd.f32 %v11992_v45, %v11920_v50  ;;  %v23117_v45 = vld [vmem:[#allocation59_spill] sm:$0xff] }
0x19c1   : > { %23104 = vst [vmem:[#allocation90_spill] sm:$0xff] %v22263_v11  ;;  %12495 = vst [vmem:[#allocation2 + $0x50] sm:$0xff] %v22263_v11  ;;  %v22271_v53 = vadd.f32 %v12054_v56, %v23107_v8  ;;  %v12056_v46 = vadd.f32 %v12055_v38, %v11983_v62 }
0x19c2   : > { %v15090_v22 = vpop.f32.mrf.mxu1  ;;  %v12059_v39 = vpop.f32.mrf.mxu0 }
0x19c3   : > { %23108 = vst [vmem:[#allocation85_spill] sm:$0xff] %v22271_v53  ;;  %12497 = vst [vmem:[#allocation2 + $0xa0] sm:$0xff] %v22271_v53  ;;  %v22276_v55 = vadd.f32 %v12056_v46, %v23109_v20  ;;  %v22278_v52 = vadd.f32 %v15090_v22, %v15089_v9  ;;  %v12060_v40 = vadd.f32 %v12059_v39, %v11987_v47 }
0x19c4   : > { %v15092_v42 = vpop.f32.mrf.mxu1  ;;  %v12061_v16 = vpop.f32.mrf.mxu0 }
0x19c5   : > { %23110 = vst [vmem:[#allocation78_spill] sm:$0xff] %v22276_v55  ;;  %12498 = vst [vmem:[#allocation2 + $0xa8] sm:$0xff] %v22276_v55  ;;  %v22283_v1 = vadd.f32 %v12060_v40, %v23111_v24  ;;  %v12062_v34 = vadd.f32 %v12061_v16, %v11989_v32 }
0x19c6   : > { %v15093_v43 = vpop.f32.mrf.mxu1  ;;  %v12063_v59 = vpop.f32.mrf.mxu0 }
0x19c7   : > { %23112 = vst [vmem:[#allocation69_spill] sm:$0xff] %v22283_v1  ;;  %12500 = vst [vmem:[#allocation2 + $0x30] sm:$0xff] %v22283_v1  ;;  %v22287_v33 = vadd.f32 %v12062_v34, %v23113_v28  ;;  %v22289_v58 = vadd.f32 %v15093_v43, %v15092_v42  ;;  %v12064_v35 = vadd.f32 %v12063_v59, %v11991_v31 }
0x19c8   : > { %v15095_v25 = vpop.f32.mrf.mxu1  ;;  %v12065_v30 = vpop.f32.mrf.mxu0 }
0x19c9   : > { %23114 = vst [vmem:[#allocation94_spill] sm:$0xff] %v22287_v33  ;;  %12501 = vst [vmem:[#allocation2 + $0x58] sm:$0xff] %v22287_v33  ;;  %v22293_v48 = vadd.f32 %v12064_v35, %v23115_v51  ;;  %v12066_v0 = vadd.f32 %v12065_v30, %v11993_v44 }
0x19ca   : > { %v15096_v27 = vpop.f32.mrf.mxu1  ;;  %v22295_v3 = vpop.f32.mrf.mxu0 }
0x19cb   : > { %23116 = vst [vmem:[#allocation76_spill] sm:$0xff] %v22293_v48  ;;  %12503 = vst [vmem:[#allocation2 + $0xb8] sm:$0xff] %v22293_v48  ;;  %v22299_v63 = vadd.f32 %v12066_v0, %v23117_v45  ;;  %v22301_v19 = vadd.f32 %v15096_v27, %v15095_v25 }
0x19cc   : > { %v15098_v7 = vpop.f32.mrf.mxu1  ;;  %v15127_v10 = vpop.f32.mrf.mxu0 }
0x19cd   : > { %23118 = vst [vmem:[#allocation89_spill] sm:$0xff] %v22299_v63  ;;  %12504 = vst [vmem:[#allocation2 + $0x20] sm:$0xff] %v22299_v63  ;;  %v15128_v60 = vadd.f32 %v15127_v10, %v22295_v3  ;;  %v12106_v3 = vadd.f32 %v22278_v52, %v22376_v5 }
0x19ce   : > { %v15099_v54 = vpop.f32.mrf.mxu1  ;;  %v22304_v36 = vpop.f32.mrf.mxu0 }
0x19cf   : > { %v22306_v29 = vadd.f32 %v15099_v54, %v15098_v7 }
0x19d0   : > { %v15101_v41 = vpop.f32.mrf.mxu1  ;;  %v15130_v12 = vpop.f32.mrf.mxu0 }
0x19d2   : > { %v15102_v15 = vpop.f32.mrf.mxu1  ;;  %v22308_v62 = vpop.f32.mrf.mxu0 }
0x19d3   : > { %v22310_v17 = vadd.f32 %v15102_v15, %v15101_v41 }
0x19d4   : > { %v22312_v56 = vpop.f32.mrf.mxu1  ;;  %v22314_v2 = vpop.f32.mrf.mxu0 }
0x19d6   : > { %v22316_v49 = vpop.f32.mrf.mxu1  ;;  %v22318_v9 = vpop.f32.mrf.mxu0 }
0x19d8   : > { %v22320_v38 = vpop.f32.mrf.mxu1  ;;  %v22322_v57 = vpop.f32.mrf.mxu0 }
0x19da   : > { %v22324_v4 = vpop.f32.mrf.mxu1  ;;  %v22326_v47 = vpop.f32.mrf.mxu0 }
0x19dc   : > { %v15166_v8 = vpop.f32.mrf.mxu1  ;;  %v22328_v46 = vpop.f32.mrf.mxu0 }
0x19de   : > { %v15167_v23 = vpop.f32.mrf.mxu1  ;;  %v22330_v22 = vpop.f32.mrf.mxu0 }
0x19e0   : > { %v15169_v39 = vpop.f32.mrf.mxu1  ;;  %v22332_v32 = vpop.f32.mrf.mxu0 }
0x19e2   : > { %v15170_v20 = vpop.f32.mrf.mxu1  ;;  %v22334_v40 = vpop.f32.mrf.mxu0 }
0x19e4   : > { %v15172_v42 = vpop.f32.mrf.mxu1  ;;  %v22336_v16 = vpop.f32.mrf.mxu0 }
0x19e6   : > { %v15173_v31 = vpop.f32.mrf.mxu1  ;;  %v22338_v50 = vpop.f32.mrf.mxu0 }
0x19e7   : > { %23119 = vst [vmem:[#allocation61_spill] sm:$0xff] %v22338_v50 }
0x19e8   : > { %v22340_v24 = vpop.f32.mrf.mxu1  ;;  %v22342_v34 = vpop.f32.mrf.mxu0 }
0x19e9   : > { %23120 = vst [vmem:[#allocation65_spill] sm:$0xff] %v22342_v34  ;;  %v15131_v34 = vadd.f32 %v15130_v12, %v22304_v36  ;;  %v12111_v36 = vadd.f32 %v22289_v58, %v22376_v5  ;;  %v15174_v12 = vadd.f32 %v15173_v31, %v15172_v42  ;;  %v15106_v58 = vadd.f32 %v22316_v49, %v22312_v56 }
0x19ea   : > { %v22344_v43 = vpop.f32.mrf.mxu1  ;;  %v15206_v59 = vpop.f32.mrf.mxu0  ;;  %v15109_v56 = vadd.f32 %v22324_v4, %v22320_v38  ;;  %v15140_v49 = vadd.f32 %v22328_v46, %v22326_v47 }
0x19eb   : > { %v12127_v38 = vadd.f32 %v15106_v58, %v22376_v5 }
0x19ec   : > { %v22346_v44 = vpop.f32.mrf.mxu1  ;;  %v15207_v28 = vpop.f32.mrf.mxu0 }
0x19ed   : > { %v15208_v61 = vadd.f32 %v15207_v28, %v15206_v59 }
0x19ee   : > { %v22348_v35 = vpop.f32.mrf.mxu1  ;;  %v15209_v25 = vpop.f32.mrf.mxu0 }
0x19ef   : > { %v15180_v47 = vadd.f32 %v22348_v35, %v22346_v44 }
0x19f0   : > { %v22350_v30 = vpop.f32.mrf.mxu1  ;;  %v15210_v51 = vpop.f32.mrf.mxu0 }
0x19f1   : > { %23121 = vst [vmem:[#allocation77_spill] sm:$0xff] %v22350_v30 }
0x19f2   : > { %v22352_v0 = vpop.f32.mrf.mxu1  ;;  %v15212_v27 = vpop.f32.mrf.mxu0 }
0x19f3   : > { %23122 = vst [vmem:[#allocation56_spill] sm:$0xff] %v22352_v0  ;;  %v15168_v0 = vadd.f32 %v15167_v23, %v15166_v8 }
0x19f4   : > { %v22354_v45 = vpop.f32.mrf.mxu1  ;;  %v15213_v7 = vpop.f32.mrf.mxu0 }
0x19f6   : > { %v22356_v54 = vpop.f32.mrf.mxu1  ;;  %v22358_v41 = vpop.f32.mrf.mxu0 }
0x19f8   : > { %v22360_v15 = vpop.f32.mrf.mxu1  ;;  %v22362_v48 = vpop.f32.mrf.mxu0 }
0x19f9   : > { %23123 = vst [vmem:[#allocation91_spill] sm:$0xff] %v22360_v15  ;;  %v12103_v15 = vadd.f32 %v22265_v14, %v22376_v5  ;;  %v15134_v14 = vadd.f32 %v22314_v2, %v22308_v62 }
0x19fa   : > { %v22364_v1 = vpop.f32.mrf.mxu1  ;;  %v22366_v63 = vpop.f32.mrf.mxu0 }
0x19fb   : > { %23124 = vst [vmem:[#allocation68_spill] sm:$0xff] %v22364_v1 }
0x19fc   : > { %v15246_v33 = vpop.f32.mrf.mxu1  ;;  %v22368_v53 = vpop.f32.mrf.mxu0 }
0x19fd   : > { %23125 = vst [vmem:[#allocation62_spill] sm:$0xff] %v22368_v53  ;;  %v12171_v53 = vadd.f32 %v15131_v34, %v12106_v3  ;;  %v15186_v3 = vadd.f32 %v22356_v54, %v22354_v45 }
0x19fe   : > { %v15247_v18 = vpop.f32.mrf.mxu1  ;;  %v22370_v55 = vpop.f32.mrf.mxu0 }
0x19ff   : > { %23126 = vst [vmem:[#allocation86_spill] sm:$0xff] %v22370_v55 }
0x1a00   : > { %v15249_v11 = vpop.f32.mrf.mxu1  ;;  %v22372_v13 = vpop.f32.mrf.mxu0 }
0x1a01   : > { %23127 = vst [vmem:[#allocation96_spill] sm:$0xff] %v22372_v13  ;;  %v12168_v13 = vadd.f32 %v15128_v60, %v12103_v15  ;;  %v15211_v60 = vadd.f32 %v15210_v51, %v15209_v25  ;;  %v12114_v25 = vadd.f32 %v22301_v19, %v22376_v5 }
0x1a02   : > { %v15250_v26 = vpop.f32.mrf.mxu1  ;;  %v22378_v21 = vpop.f32.mrf.mxu0  ;;  %v23145_v58 = vld [vmem:[#allocation68_spill] sm:$0xff] }
0x1a03   : > { %23130 = vst [vmem:[#allocation81_spill] sm:$0xff] %v22378_v21  ;;  %v12233_v10 = vadd.f32 %v15168_v0, %v12168_v13  ;;  %v15171_v21 = vadd.f32 %v15170_v20, %v15169_v39  ;;  %v15251_v52 = vadd.f32 %v15250_v26, %v15249_v11  ;;  %v12176_v39 = vadd.f32 %v15134_v14, %v12111_v36  ;;  %v23138_v36 = vld [vmem:[#allocation65_spill] sm:$0xff] }
0x1a04   : > { %v15252_v37 = vpop.f32.mrf.mxu1  ;;  %v22381_v1 = vpop.f32.mrf.mxu0  ;;  %v15214_v20 = vadd.f32 %v15213_v7, %v15212_v27 }
0x1a05   : > { %23131 = vst [vmem:[#allocation51_spill] sm:$0xff] %v22381_v1  ;;  %v15248_v1 = vadd.f32 %v15247_v18, %v15246_v33  ;;  %v12236_v15 = vadd.f32 %v15171_v21, %v12171_v53  ;;  %v15137_v18 = vadd.f32 %v22322_v57, %v22318_v9  ;;  %v12241_v42 = vadd.f32 %v15174_v12, %v12176_v39  ;;  %v23134_v9 = vld [vmem:[#allocation74_spill] sm:$0xff] }
0x1a06   : > { %v15253_v55 = vpop.f32.mrf.mxu1  ;;  %v22385_v30 = vpop.f32.mrf.mxu0  ;;  %v15177_v21 = vadd.f32 %v22344_v43, %v22340_v24 }
0x1a07   : > { %23132 = vst [vmem:[#allocation64_spill] sm:$0xff] %v22385_v30  ;;  %v12298_v30 = vadd.f32 %v15208_v61, %v12233_v10  ;;  %v12301_v2 = vadd.f32 %v15211_v60, %v12236_v15  ;;  %v12179_v19 = vadd.f32 %v15137_v18, %v12114_v25  ;;  %v23137_v60 = vld [vmem:[#allocation61_spill] sm:$0xff]  ;;  %v23140_v15 = vld [vmem:[#allocation56_spill] sm:$0xff]  ;;  %v23144_v25 = vld [vmem:[#allocation91_spill] sm:$0xff] }
0x1a08   : > { %v15255_v6 = vpop.f32.mrf.mxu1  ;;  %v22388_v50 = vpop.f32.mrf.mxu0 }
0x1a09   : > { %23133 = vst [vmem:[#allocation55_spill] sm:$0xff] %v22388_v50  ;;  %v12363_v50 = vadd.f32 %v15248_v1, %v12298_v30  ;;  %v12366_v53 = vadd.f32 %v15251_v52, %v12301_v2  ;;  %v15254_v1 = vadd.f32 %v15253_v55, %v15252_v37  ;;  %v15146_v30 = vadd.f32 %v22336_v16, %v22334_v40  ;;  %v23135_v16 = vld [vmem:[#allocation72_spill] sm:$0xff] }
0x1a0a   : > { %v15256_v8 = vpop.f32.mrf.mxu1  ;;  %v15286_v23 = vpop.f32.mrf.mxu0  ;;  %v12306_v37 = vadd.f32 %v15214_v20, %v12241_v42  ;;  %v15217_v55 = vadd.f32 %v22362_v48, %v22358_v41  ;;  %v12244_v4 = vadd.f32 %v15177_v21, %v12179_v19  ;;  %v12130_v41 = vadd.f32 %v15109_v56, %v22376_v5  ;;  %v23146_v21 = vld [vmem:[#allocation86_spill] sm:$0xff] }
0x1a0b   : > { %v15257_v40 = vadd.f32 %v15256_v8, %v15255_v6  ;;  %v12192_v44 = vadd.f32 %v15146_v30, %v12127_v38  ;;  %v15189_v42 = vadd.f32 %v23145_v58, %v23144_v25  ;;  %v23150_v38 = vld [vmem:[#allocation66_spill] sm:$0xff] }
0x1a0c   : > { %v15258_v59 = vpop.f32.mrf.mxu1  ;;  %v15287_v28 = vpop.f32.mrf.mxu0  ;;  %v12371_v27 = vadd.f32 %v15254_v1, %v12306_v37  ;;  %v12309_v35 = vadd.f32 %v15217_v55, %v12244_v4  ;;  %v23142_v52 = vld [vmem:[#allocation51_spill] sm:$0xff] }
0x1a0d   : > { %v15288_v13 = vadd.f32 %v15287_v28, %v15286_v23  ;;  %v23136_v23 = vld [vmem:[#allocation62_spill] sm:$0xff]  ;;  %v23139_v28 = vld [vmem:[#allocation77_spill] sm:$0xff] }
0x1a0e   : > { %v15259_v33 = vpop.f32.mrf.mxu1  ;;  %v15289_v62 = vpop.f32.mrf.mxu0  ;;  %v15220_v6 = vadd.f32 %v23136_v23, %v22366_v63  ;;  %v12374_v39 = vadd.f32 %v15257_v40, %v12309_v35 }
0x1a0f   : > { %v12428_v34 = vadd.f32 %v15288_v13, %v12363_v50  ;;  %v12119_v50 = vadd.f32 %v22306_v29, %v22376_v5  ;;  %v12122_v29 = vadd.f32 %v22310_v17, %v22376_v5  ;;  %v15143_v17 = vadd.f32 %v22332_v32, %v22330_v22  ;;  %v23141_v32 = vld [vmem:[#allocation81_spill] sm:$0xff] }
0x1a10   : > { %v22404_v26 = vpop.f32.mrf.mxu1  ;;  %v15290_v11 = vpop.f32.mrf.mxu0  ;;  %v15149_v5 = vadd.f32 %v23138_v36, %v23137_v60  ;;  %v15183_v22 = vadd.f32 %v23140_v15, %v23139_v28  ;;  %v15226_v45 = vadd.f32 %v23142_v52, %v23141_v32  ;;  %v15260_v18 = vadd.f32 %v15259_v33, %v15258_v59 }
0x1a11   : > { %v22407_v57 = vadd.f32 %v12428_v34, %v23134_v9  ;;  %v15291_v31 = vadd.f32 %v15290_v11, %v15289_v62  ;;  %v12184_v61 = vadd.f32 %v15140_v49, %v12119_v50  ;;  %v23143_v62 = vld [vmem:[#allocation70_spill] sm:$0xff]  ;;  %v12187_v20 = vadd.f32 %v15143_v17, %v12122_v29  ;;  %v23147_v11 = vld [vmem:[#allocation96_spill] sm:$0xff] }
0x1a12   : > { %v15262_v24 = vpop.f32.mrf.mxu1  ;;  %v15292_v43 = vpop.f32.mrf.mxu0  ;;  %v12257_v34 = vadd.f32 %v15186_v3, %v12192_v44  ;;  %v12195_v59 = vadd.f32 %v15149_v5, %v12130_v41  ;;  %v23148_v49 = vld [vmem:[#allocation64_spill] sm:$0xff] }
0x1a13   : > { %12484 = vst [vmem:[#allocation2 + $0x10] sm:$0xff] %v22407_v57  ;;  %v12431_v51 = vadd.f32 %v15291_v31, %v12366_v53  ;;  %v12249_v12 = vadd.f32 %v15180_v47, %v12184_v61  ;;  %v15223_v53 = vadd.f32 %v23147_v11, %v23146_v21  ;;  %v12252_v33 = vadd.f32 %v15183_v22, %v12187_v20  ;;  %v23151_v44 = vld [vmem:[#allocation60_spill] sm:$0xff]  ;;  %v23154_v22 = vld [vmem:[#allocation63_spill] sm:$0xff] }
0x1a14   : > { %v15264_v46 = vpop.f32.mrf.mxu1  ;;  %v15293_v0 = vpop.f32.mrf.mxu0  ;;  %v12322_v56 = vadd.f32 %v15226_v45, %v12257_v34  ;;  %v15263_v29 = vadd.f32 %v15262_v24, %v22404_v26 }
0x1a15   : > { %v22426_v7 = vadd.f32 %v12431_v51, %v23135_v16  ;;  %v15294_v48 = vadd.f32 %v15293_v0, %v15292_v43  ;;  %v12314_v31 = vadd.f32 %v15220_v6, %v12249_v12  ;;  %v23149_v43 = vld [vmem:[#allocation55_spill] sm:$0xff]  ;;  %v12260_v0 = vadd.f32 %v15189_v42, %v12195_v59  ;;  %v23153_v12 = vld [vmem:[#allocation88_spill] sm:$0xff] }
0x1a16   : > { %v15265_v10 = vpop.f32.mrf.mxu1  ;;  %v15295_v14 = vpop.f32.mrf.mxu0  ;;  %v15229_v30 = vadd.f32 %v23149_v43, %v23148_v49 }
0x1a17   : > { %12487 = vst [vmem:[#allocation2 + $0x28] sm:$0xff] %v22426_v7  ;;  %v12436_v8 = vadd.f32 %v15294_v48, %v12371_v27  ;;  %v15266_v50 = vadd.f32 %v15265_v10, %v15264_v46  ;;  %v12379_v51 = vadd.f32 %v15260_v18, %v12314_v31  ;;  %v12317_v27 = vadd.f32 %v15223_v53, %v12252_v33 }
0x1a18   : > { %v15267_v54 = vpop.f32.mrf.mxu1  ;;  %v15296_v13 = vpop.f32.mrf.mxu0  ;;  %v12325_v17 = vadd.f32 %v15229_v30, %v12260_v0 }
0x1a19   : > { %v22443_v2 = vadd.f32 %v12436_v8, %v23143_v62  ;;  %v15297_v63 = vadd.f32 %v15296_v13, %v15295_v14  ;;  %v12387_v16 = vadd.f32 %v15266_v50, %v12322_v56  ;;  %v12382_v14 = vadd.f32 %v15263_v29, %v12317_v27  ;;  %v23152_v8 = vld [vmem:[#allocation67_spill] sm:$0xff] }
0x1a1a   : > { %v15268_v1 = vpop.f32.mrf.mxu1  ;;  %v15298_v9 = vpop.f32.mrf.mxu0 }
0x1a1b   : > { %12490 = vst [vmem:[#allocation2 + $0x88] sm:$0xff] %v22443_v2  ;;  %v12439_v19 = vadd.f32 %v15297_v63, %v12374_v39  ;;  %v15269_v48 = vadd.f32 %v15268_v1, %v15267_v54 }
0x1a1c   : > { %v15304_v37 = vpop.f32.mrf.mxu1  ;;  %v15299_v55 = vpop.f32.mrf.mxu0 }
0x1a1d   : > { %v22454_v4 = vadd.f32 %v12439_v19, %v23150_v38  ;;  %v15300_v47 = vadd.f32 %v15299_v55, %v15298_v9  ;;  %v12390_v6 = vadd.f32 %v15269_v48, %v12325_v17 }
0x1a1e   : > { %v15305_v40 = vpop.f32.mrf.mxu1  ;;  %v15301_v46 = vpop.f32.mrf.mxu0 }
0x1a1f   : > { %12493 = vst [vmem:[#allocation2 + $0x98] sm:$0xff] %v22454_v4  ;;  %v12444_v41 = vadd.f32 %v15300_v47, %v12379_v51  ;;  %v15306_v61 = vadd.f32 %v15305_v40, %v15304_v37 }
0x1a20   : > { %v15307_v3 = vpop.f32.mrf.mxu1  ;;  %v15302_v10 = vpop.f32.mrf.mxu0 }
0x1a21   : > { %v22458_v26 = vadd.f32 %v12444_v41, %v23151_v44  ;;  %v12452_v24 = vadd.f32 %v15306_v61, %v12387_v16  ;;  %v15303_v35 = vadd.f32 %v15302_v10, %v15301_v46 }
0x1a22   : > { %v15308_v23 = vpop.f32.mrf.mxu1 }
0x1a23   : > { %12496 = vst [vmem:[#allocation2 + $0x70] sm:$0xff] %v22458_v26  ;;  %v22462_v60 = vadd.f32 %v12452_v24, %v23152_v8  ;;  %v12447_v36 = vadd.f32 %v15303_v35, %v12382_v14  ;;  %v15309_v5 = vadd.f32 %v15308_v23, %v15307_v3 }
0x1a25   : > { %12502 = vst [vmem:[#allocation2 + $0x80] sm:$0xff] %v22462_v60  ;;  %v22466_v28 = vadd.f32 %v12447_v36, %v23153_v12  ;;  %v12455_v15 = vadd.f32 %v15309_v5, %v12390_v6  ;;  %12509 = sbr.rel (%p14771_p9) target bundleno = 7026 (0x1b72), region = 140 }
0x1a27   : > { %12499 = vst [vmem:[#allocation2 + $0x68] sm:$0xff] %v22466_v28  ;;  %v22470_v32 = vadd.f32 %v12455_v15, %v23154_v22 }
0x1a29   : > { %12505 = vst [vmem:[#allocation2 + $0x8] sm:$0xff] %v22470_v32 }
0x1a2a   : > { %v17377_v52 = vld [vmem:[#allocation21 + $0xe4] ss:$16 sps:$4 sm:$0xff]   ;;  %v18050_v18 = vmov 0   ;;  %v17381_v62 = vld [vmem:[#allocation21 + $0xe0] ss:$16 sps:$4 sm:$0xff]   ;;  %v22482_v48 = vpack.c.bf16 %v22426_v7, %v22407_v57  ;;  %v22488_v35 = vpack.c.bf16 %v22454_v4, %v22443_v2  ;;  %v22494_v15 = vpack.c.bf16 %v22466_v28, %v22458_v26 }
0x1a2b   : > { %v23156_v45 = vld [vmem:[#allocation95_spill] sm:$0xff]  ;;  %13225 = vmatprep.mubr.bf16.mxu1 %v18050_v18  ;;  %13120 = vmatprep.subr.bf16.mxu0 %v17377_v52  ;;  %v17382_v63 = vld [vmem:[#allocation21 + $0x2e0] ss:$16 sps:$4 sm:$0xff]   ;;  %v17429_v16 = vld [vmem:[#allocation21 + $0xec] ss:$16 sps:$4 sm:$0xff]  }
0x1a2c   : > { %v23157_v54 = vld [vmem:[#allocation75_spill] sm:$0xff]  ;;  %13121 = vmatpush1.bf16.msra.mxu0 %v17381_v62  ;;  %v17387_v25 = vld [vmem:[#allocation21 + $0xc0] ss:$16 sps:$4 sm:$0xff]   ;;  %v17435_v3 = vld [vmem:[#allocation21 + $0xcc] ss:$16 sps:$4 sm:$0xff]  }
0x1a2d   : > { %v22476_v13 = vpack.c.bf16 %v23157_v54, %v23156_v45  ;;  %v17379_v39 = vld [vmem:[#allocation21 + $0x2e4] ss:$16 sps:$4 sm:$0xff]   ;;  %v17388_v58 = vld [vmem:[#allocation21 + $0x2c0] ss:$16 sps:$4 sm:$0xff]   ;;  %v17427_v41 = vld [vmem:[#allocation21 + $0xe8] ss:$16 sps:$4 sm:$0xff]  }
0x1a2e   : > { %13193 = vmatprep.subr.bf16.mxu1 %v17379_v39  ;;  %v17383_v20 = vld [vmem:[#allocation21 + $0xc4] ss:$16 sps:$4 sm:$0xff]   ;;  %v17393_v11 = vld [vmem:[#allocation21 + $0xa0] ss:$16 sps:$4 sm:$0xff]   ;;  %v17433_v10 = vld [vmem:[#allocation21 + $0xc8] ss:$16 sps:$4 sm:$0xff]  }
0x1a2f   : > { %13152 = vmatprep.mubr.bf16.mxu0 %v22476_v13  ;;  %13194 = vmatpush1.bf16.msra.mxu1 %v17382_v63  ;;  %v17385_v34 = vld [vmem:[#allocation21 + $0x2c4] ss:$16 sps:$4 sm:$0xff]   ;;  %v17394_v53 = vld [vmem:[#allocation21 + $0x2a0] ss:$16 sps:$4 sm:$0xff]   ;;  %v17441_v24 = vld [vmem:[#allocation21 + $0xac] ss:$16 sps:$4 sm:$0xff]   ;;  %v22500_v63 = vpack.c.bf16 %v22470_v32, %v22462_v60 }
0x1a30   : > { %13122 = vmatprep.subr.bf16.mxu0 %v17383_v20  ;;  %13195 = vmatprep.subr.bf16.mxu1 %v17385_v34  ;;  %v17389_v42 = vld [vmem:[#allocation21 + $0xa4] ss:$16 sps:$4 sm:$0xff]   ;;  %v17399_v31 = vld [vmem:[#allocation21 + $0x80] ss:$16 sps:$4 sm:$0xff]   ;;  %v17439_v57 = vld [vmem:[#allocation21 + $0xa8] ss:$16 sps:$4 sm:$0xff]  }
0x1a31   : > { %v17391_v21 = vld [vmem:[#allocation21 + $0x2a4] ss:$16 sps:$4 sm:$0xff]   ;;  %13123 = vmatpush1.bf16.msra.mxu0 %v17387_v25  ;;  %v17400_v50 = vld [vmem:[#allocation21 + $0x280] ss:$16 sps:$4 sm:$0xff]   ;;  %v17447_v6 = vld [vmem:[#allocation21 + $0x8c] ss:$16 sps:$4 sm:$0xff]  }
0x1a32   : > { %v17395_v1 = vld [vmem:[#allocation21 + $0x84] ss:$16 sps:$4 sm:$0xff]   ;;  %13124 = vmatprep.subr.bf16.mxu0 %v17389_v42  ;;  %v17405_v33 = vld [vmem:[#allocation21 + $0x60] ss:$16 sps:$4 sm:$0xff]   ;;  %v17445_v8 = vld [vmem:[#allocation21 + $0x88] ss:$16 sps:$4 sm:$0xff]  }
0x1a33   : > { %13196 = vmatpush1.bf16.msra.mxu1 %v17388_v58  ;;  %v17397_v9 = vld [vmem:[#allocation21 + $0x284] ss:$16 sps:$4 sm:$0xff]   ;;  %v17406_v56 = vld [vmem:[#allocation21 + $0x260] ss:$16 sps:$4 sm:$0xff]   ;;  %v17453_v12 = vld [vmem:[#allocation21 + $0x6c] ss:$16 sps:$4 sm:$0xff]  }
0x1a34   : > { %13197 = vmatprep.subr.bf16.mxu1 %v17391_v21  ;;  %v17401_v19 = vld [vmem:[#allocation21 + $0x64] ss:$16 sps:$4 sm:$0xff]   ;;  %v17411_v30 = vld [vmem:[#allocation21 + $0x40] ss:$16 sps:$4 sm:$0xff]   ;;  %v17451_v2 = vld [vmem:[#allocation21 + $0x68] ss:$16 sps:$4 sm:$0xff]  }
0x1a35   : > { %13125 = vmatpush1.bf16.msra.mxu0 %v17393_v11  ;;  %v17403_v59 = vld [vmem:[#allocation21 + $0x264] ss:$16 sps:$4 sm:$0xff]   ;;  %v17412_v37 = vld [vmem:[#allocation21 + $0x240] ss:$16 sps:$4 sm:$0xff]   ;;  %v17459_v52 = vld [vmem:[#allocation21 + $0x4c] ss:$16 sps:$4 sm:$0xff]  }
0x1a36   : > { %13126 = vmatprep.subr.bf16.mxu0 %v17395_v1  ;;  %v17407_v49 = vld [vmem:[#allocation21 + $0x44] ss:$16 sps:$4 sm:$0xff]   ;;  %v17417_v29 = vld [vmem:[#allocation21 + $0x20] ss:$16 sps:$4 sm:$0xff]   ;;  %v17457_v45 = vld [vmem:[#allocation21 + $0x48] ss:$16 sps:$4 sm:$0xff]  }
0x1a37   : > { %13198 = vmatpush1.bf16.msra.mxu1 %v17394_v53  ;;  %v17409_v43 = vld [vmem:[#allocation21 + $0x244] ss:$16 sps:$4 sm:$0xff]   ;;  %v17418_v38 = vld [vmem:[#allocation21 + $0x220] ss:$16 sps:$4 sm:$0xff]   ;;  %v17465_v62 = vld [vmem:[#allocation21 + $0x2c] ss:$16 sps:$4 sm:$0xff]  }
0x1a38   : > { %13199 = vmatprep.subr.bf16.mxu1 %v17397_v9  ;;  %v17413_v55 = vld [vmem:[#allocation21 + $0x24] ss:$16 sps:$4 sm:$0xff]   ;;  %v17423_v27 = vld [vmem:[#allocation21] ss:$16 sps:$4 sm:$0xff]   ;;  %v17463_v26 = vld [vmem:[#allocation21 + $0x28] ss:$16 sps:$4 sm:$0xff]  }
0x1a39   : > { %13127 = vmatpush1.bf16.msra.mxu0 %v17399_v31  ;;  %v17415_v51 = vld [vmem:[#allocation21 + $0x224] ss:$16 sps:$4 sm:$0xff]   ;;  %v17424_v40 = vld [vmem:[#allocation21 + $0x200] ss:$16 sps:$4 sm:$0xff]   ;;  %v17471_v34 = vld [vmem:[#allocation21 + $0xc] ss:$16 sps:$4 sm:$0xff]  }
0x1a3a   : > { %13128 = vmatprep.subr.bf16.mxu0 %v17401_v19  ;;  %v17419_v47 = vld [vmem:[#allocation21 + $0x4] ss:$16 sps:$4 sm:$0xff]   ;;  %v17430_v61 = vld [vmem:[#allocation21 + $0x1e0] ss:$16 sps:$4 sm:$0xff]   ;;  %v17469_v25 = vld [vmem:[#allocation21 + $0x8] ss:$16 sps:$4 sm:$0xff]  }
0x1a3b   : > { %13200 = vmatpush1.bf16.msra.mxu1 %v17400_v50  ;;  %v17421_v0 = vld [vmem:[#allocation21 + $0x204] ss:$16 sps:$4 sm:$0xff]   ;;  %v17436_v14 = vld [vmem:[#allocation21 + $0x1c0] ss:$16 sps:$4 sm:$0xff]   ;;  %v17475_v42 = vld [vmem:[#allocation21 + $0x1ec] ss:$16 sps:$4 sm:$0xff]  }
0x1a3c   : > { %13201 = vmatprep.subr.bf16.mxu1 %v17403_v59  ;;  %v17425_v46 = vld [vmem:[#allocation21 + $0x1e4] ss:$16 sps:$4 sm:$0xff]   ;;  %v17442_v7 = vld [vmem:[#allocation21 + $0x1a0] ss:$16 sps:$4 sm:$0xff]   ;;  %v17478_v21 = vld [vmem:[#allocation21 + $0x2ec] ss:$16 sps:$4 sm:$0xff]  }
0x1a3d   : > { %13129 = vmatpush1.bf16.msra.mxu0 %v17405_v33  ;;  %v17431_v17 = vld [vmem:[#allocation21 + $0x1c4] ss:$16 sps:$4 sm:$0xff]   ;;  %v17448_v36 = vld [vmem:[#allocation21 + $0x180] ss:$16 sps:$4 sm:$0xff]   ;;  %v17473_v53 = vld [vmem:[#allocation21 + $0x1e8] ss:$16 sps:$4 sm:$0xff]  }
0x1a3e   : > { %13130 = vmatprep.subr.bf16.mxu0 %v17407_v49  ;;  %v17437_v44 = vld [vmem:[#allocation21 + $0x1a4] ss:$16 sps:$4 sm:$0xff]   ;;  %v17454_v4 = vld [vmem:[#allocation21 + $0x160] ss:$16 sps:$4 sm:$0xff]   ;;  %v17476_v1 = vld [vmem:[#allocation21 + $0x2e8] ss:$16 sps:$4 sm:$0xff]  }
0x1a3f   : > { %13202 = vmatpush1.bf16.msra.mxu1 %v17406_v56  ;;  %v17443_v23 = vld [vmem:[#allocation21 + $0x184] ss:$16 sps:$4 sm:$0xff]   ;;  %v17460_v54 = vld [vmem:[#allocation21 + $0x140] ss:$16 sps:$4 sm:$0xff]   ;;  %v17481_v9 = vld [vmem:[#allocation21 + $0x1cc] ss:$16 sps:$4 sm:$0xff]  }
0x1a40   : > { %13203 = vmatprep.subr.bf16.mxu1 %v17409_v43  ;;  %v17449_v5 = vld [vmem:[#allocation21 + $0x164] ss:$16 sps:$4 sm:$0xff]   ;;  %v17466_v28 = vld [vmem:[#allocation21 + $0x120] ss:$16 sps:$4 sm:$0xff]   ;;  %v17484_v31 = vld [vmem:[#allocation21 + $0x2cc] ss:$16 sps:$4 sm:$0xff]  }
0x1a41   : > { %13131 = vmatpush1.bf16.msra.mxu0 %v17411_v30  ;;  %v17455_v22 = vld [vmem:[#allocation21 + $0x144] ss:$16 sps:$4 sm:$0xff]   ;;  %v17472_v58 = vld [vmem:[#allocation21 + $0x100] ss:$16 sps:$4 sm:$0xff]   ;;  %v17482_v33 = vld [vmem:[#allocation21 + $0x2c8] ss:$16 sps:$4 sm:$0xff]  }
0x1a42   : > { %13132 = vmatprep.subr.bf16.mxu0 %v17413_v55  ;;  %v17461_v39 = vld [vmem:[#allocation21 + $0x124] ss:$16 sps:$4 sm:$0xff]   ;;  %v23158_v60 = vld [vmem:[#allocation92_spill] sm:$0xff]  ;;  %v23163_v30 = vld [vmem:[#allocation82_spill] sm:$0xff] }
0x1a43   : > { %13204 = vmatpush1.bf16.msra.mxu1 %v17412_v37  ;;  %v17467_v20 = vld [vmem:[#allocation21 + $0x104] ss:$16 sps:$4 sm:$0xff]   ;;  %v17487_v56 = vld [vmem:[#allocation21 + $0x1ac] ss:$16 sps:$4 sm:$0xff]   ;;  %v17485_v55 = vld [vmem:[#allocation21 + $0x1a8] ss:$16 sps:$4 sm:$0xff]  }
0x1a44   : > { %13205 = vmatprep.subr.bf16.mxu1 %v17415_v51  ;;  %v23159_v32 = vld [vmem:[#allocation97_spill] sm:$0xff]  ;;  %v23161_v19 = vld [vmem:[#allocation83_spill] sm:$0xff]  ;;  %v17490_v49 = vld [vmem:[#allocation21 + $0x2ac] ss:$16 sps:$4 sm:$0xff]  }
0x1a45   : > { %13133 = vmatpush1.bf16.msra.mxu0 %v17417_v29  ;;  %v22506_v11 = vpack.c.bf16 %v23159_v32, %v23158_v60  ;;  %v23160_v50 = vld [vmem:[#allocation73_spill] sm:$0xff]  ;;  %v23162_v43 = vld [vmem:[#allocation84_spill] sm:$0xff] }
0x1a46   : > { %13134 = vmatprep.subr.bf16.mxu0 %v17419_v47  ;;  %v22510_v59 = vpack.c.bf16 %v23161_v19, %v23160_v50  ;;  %v12513_v37 = vpack.c.bf16 %v23163_v30, %v23162_v43  ;;  %v17488_v51 = vld [vmem:[#allocation21 + $0x2a8] ss:$16 sps:$4 sm:$0xff]   ;;  %v17493_v29 = vld [vmem:[#allocation21 + $0x18c] ss:$16 sps:$4 sm:$0xff]  }
0x1a47   : > { %13206 = vmatpush1.bf16.msra.mxu1 %v17418_v38  ;;  %v17496_v38 = vld [vmem:[#allocation21 + $0x28c] ss:$16 sps:$4 sm:$0xff]  }
0x1a48   : > { %13207 = vmatprep.subr.bf16.mxu1 %v17421_v0  ;;  %v23164_v47 = vld [vmem:[#allocation90_spill] sm:$0xff] }
0x1a49   : > { %13135 = vmatpush1.bf16.msra.mxu0 %v17423_v27  ;;  %v23165_v0 = vld [vmem:[#allocation78_spill] sm:$0xff] }
0x1a4a   : > { %13136 = vmatprep.subr.bf16.mxu0 %v17425_v46  ;;  %v12517_v27 = vpack.c.bf16 %v23165_v0, %v23164_v47  ;;  %v17494_v46 = vld [vmem:[#allocation21 + $0x288] ss:$16 sps:$4 sm:$0xff]  }
0x1a4b   : > { %13208 = vmatpush1.bf16.msra.mxu1 %v17424_v40  ;;  %v17491_v40 = vld [vmem:[#allocation21 + $0x188] ss:$16 sps:$4 sm:$0xff]  }
0x1a4c   : > { %13266 = vmatprep.subr.bf16.mxu1 %v17429_v16  ;;  %v17499_v16 = vld [vmem:[#allocation21 + $0x16c] ss:$16 sps:$4 sm:$0xff]  }
0x1a4d   : > { %13137 = vmatpush2.bf16.msra.mxu0 %v17430_v61  ;;  %v23166_v61 = vld [vmem:[#allocation71_spill] sm:$0xff] }
0x1a4e   : > { %13226 = vmatmul.mubr.bf16.vlgmr.msra.gmra.mxu1 %v22482_v48  ;;  %13138 = vmatprep.subr.bf16.mxu0 %v17431_v17  ;;  %v23167_v17 = vld [vmem:[#allocation85_spill] sm:$0xff] }
0x1a4f   : > { %13267 = vmatpush1.bf16.msra.mxu1 %v17427_v41  ;;  %13235 = vmatprep.mubr.bf16.mxu1 %v18050_v18  ;;  %v17502_v41 = vld [vmem:[#allocation21 + $0x26c] ss:$16 sps:$4 sm:$0xff]  }
0x1a50   : > { %13268 = vmatprep.subr.bf16.mxu1 %v17435_v3  ;;  %v12516_v3 = vpack.c.bf16 %v23167_v17, %v23166_v61 }
0x1a51   : > { %13139 = vmatpush2.bf16.msra.mxu0 %v17436_v14  ;;  %v17500_v14 = vld [vmem:[#allocation21 + $0x268] ss:$16 sps:$4 sm:$0xff]  }
0x1a52   : > { %13140 = vmatprep.subr.bf16.mxu0 %v17437_v44  ;;  %v17505_v44 = vld [vmem:[#allocation21 + $0x14c] ss:$16 sps:$4 sm:$0xff]  }
0x1a53   : > { %13269 = vmatpush1.bf16.msra.mxu1 %v17433_v10  ;;  %v17497_v10 = vld [vmem:[#allocation21 + $0x168] ss:$16 sps:$4 sm:$0xff]  }
0x1a54   : > { %13270 = vmatprep.subr.bf16.mxu1 %v17441_v24  ;;  %v17508_v24 = vld [vmem:[#allocation21 + $0x24c] ss:$16 sps:$4 sm:$0xff]  }
0x1a55   : > { %13141 = vmatpush2.bf16.msra.mxu0 %v17442_v7  ;;  %v23169_v7 = vld [vmem:[#allocation89_spill] sm:$0xff] }
0x1a56   : > { %13236 = vmatmul.mubr.bf16.gmra.mxu1 %v22488_v35  ;;  %13142 = vmatprep.subr.bf16.mxu0 %v17443_v23 }
0x1a57   : > { %13271 = vmatpush1.bf16.msra.mxu1 %v17439_v57  ;;  %13245 = vmatprep.mubr.bf16.mxu1 %v18050_v18  ;;  %v23168_v57 = vld [vmem:[#allocation94_spill] sm:$0xff] }
0x1a58   : > { %13272 = vmatprep.subr.bf16.mxu1 %v17447_v6  ;;  %v12520_v23 = vpack.c.bf16 %v23169_v7, %v23168_v57  ;;  %v17503_v6 = vld [vmem:[#allocation21 + $0x148] ss:$16 sps:$4 sm:$0xff]  }
0x1a59   : > { %13143 = vmatpush2.bf16.msra.mxu0 %v17448_v36  ;;  %v17511_v36 = vld [vmem:[#allocation21 + $0x12c] ss:$16 sps:$4 sm:$0xff]  }
0x1a5a   : > { %13144 = vmatprep.subr.bf16.mxu0 %v17449_v5  ;;  %v17514_v5 = vld [vmem:[#allocation21 + $0x22c] ss:$16 sps:$4 sm:$0xff]  }
0x1a5b   : > { %13273 = vmatpush1.bf16.msra.mxu1 %v17445_v8  ;;  %v17506_v8 = vld [vmem:[#allocation21 + $0x248] ss:$16 sps:$4 sm:$0xff]  }
0x1a5c   : > { %13274 = vmatprep.subr.bf16.mxu1 %v17453_v12  ;;  %v23170_v12 = vld [vmem:[#allocation69_spill] sm:$0xff] }
0x1a5d   : > { %13145 = vmatpush2.bf16.msra.mxu0 %v17454_v4 }
0x1a5e   : > { %13246 = vmatmul.mubr.bf16.gmra.mxu1 %v22494_v15  ;;  %13146 = vmatprep.subr.bf16.mxu0 %v17455_v22  ;;  %v17509_v22 = vld [vmem:[#allocation21 + $0x128] ss:$16 sps:$4 sm:$0xff]  }
0x1a5f   : > { %13275 = vmatpush1.bf16.msra.mxu1 %v17451_v2  ;;  %13255 = vmatprep.mubr.bf16.mxu1 %v18050_v18  ;;  %v23171_v2 = vld [vmem:[#allocation76_spill] sm:$0xff] }
0x1a60   : > { %13276 = vmatprep.subr.bf16.mxu1 %v17459_v52  ;;  %v12519_v4 = vpack.c.bf16 %v23171_v2, %v23170_v12  ;;  %v17512_v52 = vld [vmem:[#allocation21 + $0x228] ss:$16 sps:$4 sm:$0xff]  }
0x1a61   : > { %13147 = vmatpush2.bf16.msra.mxu0 %v17460_v54  ;;  %v17520_v54 = vld [vmem:[#allocation21 + $0x20c] ss:$16 sps:$4 sm:$0xff]  }
0x1a62   : > { %13148 = vmatprep.subr.bf16.mxu0 %v17461_v39  ;;  %v17515_v39 = vld [vmem:[#allocation21 + $0x108] ss:$16 sps:$4 sm:$0xff]  }
0x1a63   : > { %13277 = vmatpush1.bf16.msra.mxu1 %v17457_v45  ;;  %v17517_v45 = vld [vmem:[#allocation21 + $0x10c] ss:$16 sps:$4 sm:$0xff]  }
0x1a64   : > { %13278 = vmatprep.subr.bf16.mxu1 %v17465_v62  ;;  %v17518_v62 = vld [vmem:[#allocation21 + $0x208] ss:$16 sps:$4 sm:$0xff]  }
0x1a65   : > { %13149 = vmatpush2.bf16.msra.mxu0 %v17466_v28 }
0x1a66   : > { %13256 = vmatmul.mubr.bf16.gmra.mxu1 %v22500_v63  ;;  %13150 = vmatprep.subr.bf16.mxu0 %v17467_v20 }
0x1a67   : > { %13279 = vmatpush1.bf16.msra.mxu1 %v17463_v26  ;;  %13298 = vmatprep.mubr.bf16.mxu1 %v22476_v13  ;;  %v17479_v13 = vld [vmem:[#allocation21 + $0x1c8] ss:$16 sps:$4 sm:$0xff]  }
0x1a68   : > { %13280 = vmatprep.subr.bf16.mxu1 %v17471_v34 }
0x1a69   : > { %13151 = vmatpush2.bf16.msra.mxu0 %v17472_v58 }
0x1a6a   : > { %13339 = vmatprep.subr.bf16.mxu0 %v17478_v21 }
0x1a6b   : > { %13281 = vmatpush1.bf16.msra.mxu1 %v17469_v25 }
0x1a6c   : > { %13282 = vmatprep.subr.bf16.mxu1 %v17475_v42  ;;  %13153 = vmatmul.mubr.bf16.vlgmr.msra.gmra.mxu0 %v22506_v11  ;;  %v23172_v42 = vld [vmem:[#allocation54_spill] sm:$0xff] }
0x1a6d   : > { %13340 = vmatpush1.bf16.msra.mxu0 %v17476_v1  ;;  %13162 = vmatprep.mubr.bf16.mxu0 %v22510_v59 }
0x1a6e   : > { %13341 = vmatprep.subr.bf16.mxu0 %v17484_v31 }
0x1a6f   : > { %13283 = vmatpush2.bf16.msra.mxu1 %v17473_v53 }
0x1a70   : > { %13284 = vmatprep.subr.bf16.mxu1 %v17481_v9 }
0x1a71   : > { %13342 = vmatpush1.bf16.msra.mxu0 %v17482_v33 }
0x1a72   : > { %13343 = vmatprep.subr.bf16.mxu0 %v17490_v49 }
0x1a73   : > { %13285 = vmatpush2.bf16.msra.mxu1 %v17479_v13 }
0x1a74   : > { %13286 = vmatprep.subr.bf16.mxu1 %v17487_v56  ;;  %13163 = vmatmul.mubr.bf16.gmra.mxu0 %v12513_v37 }
0x1a75   : > { %13344 = vmatpush1.bf16.msra.mxu0 %v17488_v51  ;;  %13172 = vmatprep.mubr.bf16.mxu0 %v12517_v27 }
0x1a76   : > { %13345 = vmatprep.subr.bf16.mxu0 %v17496_v38 }
0x1a77   : > { %13287 = vmatpush2.bf16.msra.mxu1 %v17485_v55 }
0x1a78   : > { %13288 = vmatprep.subr.bf16.mxu1 %v17493_v29 }
0x1a79   : > { %13346 = vmatpush1.bf16.msra.mxu0 %v17494_v46 }
0x1a7a   : > { %13347 = vmatprep.subr.bf16.mxu0 %v17502_v41 }
0x1a7b   : > { %13289 = vmatpush2.bf16.msra.mxu1 %v17491_v40 }
0x1a7c   : > { %13290 = vmatprep.subr.bf16.mxu1 %v17499_v16  ;;  %13173 = vmatmul.mubr.bf16.gmra.mxu0 %v12516_v3 }
0x1a7d   : > { %13348 = vmatpush1.bf16.msra.mxu0 %v17500_v14  ;;  %13182 = vmatprep.mubr.bf16.mxu0 %v12520_v23 }
0x1a7e   : > { %13349 = vmatprep.subr.bf16.mxu0 %v17508_v24 }
0x1a7f   : > { %13291 = vmatpush2.bf16.msra.mxu1 %v17497_v10 }
0x1a80   : > { %13292 = vmatprep.subr.bf16.mxu1 %v17505_v44 }
0x1a81   : > { %13350 = vmatpush1.bf16.msra.mxu0 %v17506_v8 }
0x1a82   : > { %13351 = vmatprep.subr.bf16.mxu0 %v17514_v5 }
0x1a83   : > { %13293 = vmatpush2.bf16.msra.mxu1 %v17503_v6 }
0x1a84   : > { %13294 = vmatprep.subr.bf16.mxu1 %v17511_v36  ;;  %13183 = vmatmul.mubr.bf16.gmra.mxu0 %v12519_v4 }
0x1a85   : > { %13352 = vmatpush1.bf16.msra.mxu0 %v17512_v52  ;;  %13371 = vmatprep.mubr.bf16.mxu0 %v18050_v18 }
0x1a86   : > { %13353 = vmatprep.subr.bf16.mxu0 %v17520_v54 }
0x1a87   : > { %13295 = vmatpush2.bf16.msra.mxu1 %v17509_v22 }
0x1a88   : > { %13296 = vmatprep.subr.bf16.mxu1 %v17517_v45 }
0x1a89   : > { %13354 = vmatpush1.bf16.msra.mxu0 %v17518_v62 }
0x1a8b   : > { %13297 = vmatpush2.bf16.msra.mxu1 %v17515_v39 }
0x1a8c   : > { %13372 = vmatmul.mubr.bf16.vlgmr.msra.gmra.mxu0 %v22482_v48 }
0x1a8d   : > { %13381 = vmatprep.mubr.bf16.mxu0 %v18050_v18 }
0x1a8e   : > { %13299 = vmatmul.mubr.bf16.vlgmr.msra.gmra.mxu1 %v22506_v11 }
0x1a8f   : > { %13308 = vmatprep.mubr.bf16.mxu1 %v22510_v59 }
0x1a94   : > { %13382 = vmatmul.mubr.bf16.gmra.mxu0 %v22488_v35  ;;  %v22534_v35 = vld [vmem:[#allocation23] sm:$0xf] }
0x1a95   : > { %13391 = vmatprep.mubr.bf16.mxu0 %v18050_v18 }
0x1a96   : > { %13309 = vmatmul.mubr.bf16.gmra.mxu1 %v12513_v37 }
0x1a97   : > { %13318 = vmatprep.mubr.bf16.mxu1 %v12517_v27 }
0x1a9c   : > { %13392 = vmatmul.mubr.bf16.gmra.mxu0 %v22494_v15  ;;  %v22538_v15 = vrot.slane %v22534_v35, %v23172_v42 }
0x1a9d   : > { %13401 = vmatprep.mubr.bf16.mxu0 %v18050_v18  ;;  %v23173_v18 = vld [vmem:[#allocation52_spill] sm:$0xff] }
0x1a9e   : > { %13319 = vmatmul.mubr.bf16.gmra.mxu1 %v12516_v3  ;;  %v22542_v60 = vrot.slane %v22534_v35, %v23173_v18 }
0x1a9f   : > { %13328 = vmatprep.mubr.bf16.mxu1 %v12520_v23 }
0x1aa4   : > { %13402 = vmatmul.mubr.bf16.gmra.mxu0 %v22500_v63 }
0x1aa6   : > { %13329 = vmatmul.mubr.bf16.gmra.mxu1 %v12519_v4 }
0x1b0e   : > { %v13227_v48 = vpop.f32.mrf.mxu1 }
0x1b10   : > { %v13229_v26 = vpop.f32.mrf.mxu1 }
0x1b12   : > { %v13231_v28 = vpop.f32.mrf.mxu1 }
0x1b14   : > { %v13233_v20 = vpop.f32.mrf.mxu1 }
0x1b16   : > { %v13237_v34 = vpop.f32.mrf.mxu1 }
0x1b18   : > { %v13239_v25 = vpop.f32.mrf.mxu1 }
0x1b1a   : > { %v13241_v58 = vpop.f32.mrf.mxu1 }
0x1b1c   : > { %v13243_v21 = vpop.f32.mrf.mxu1 }
0x1b1e   : > { %v13247_v53 = vpop.f32.mrf.mxu1 }
0x1b20   : > { %v13249_v13 = vpop.f32.mrf.mxu1 }
0x1b22   : > { %v13251_v55 = vpop.f32.mrf.mxu1 }
0x1b24   : > { %v13253_v40 = vpop.f32.mrf.mxu1 }
0x1b26   : > { %v13257_v10 = vpop.f32.mrf.mxu1 }
0x1b28   : > { %v13259_v23 = vpop.f32.mrf.mxu1 }
0x1b2a   : > { %v13261_v4 = vpop.f32.mrf.mxu1 }
0x1b2c   : > { %v13154_v63 = vpop.f32.mrf.mxu0 }
0x1b2d   : > { %v13155_v32 = vadd.f32 %v13154_v63, %v22538_v15 }
0x1b2e   : > { %v13156_v11 = vpop.f32.mrf.mxu0 }
0x1b2f   : > { %v13228_v1 = vadd.f32 %v13227_v48, %v13155_v32  ;;  %v13157_v9 = vadd.f32 %v13156_v11, %v22542_v60  ;;  %v23174_v48 = vld [vmem:[#allocation53_spill] sm:$0xff] }
0x1b30   : > { %v13158_v31 = vpop.f32.mrf.mxu0 }
0x1b31   : > { %13412 = vst [vmem:[%s18492_s28] sm:$0xff] %v13228_v1  ;;  %v13230_v50 = vadd.f32 %v13229_v26, %v13157_v9  ;;  %v13159_v19 = vadd.f32 %v13158_v31, %v22538_v15  ;;  %v22574_v26 = vrot.slane %v22534_v35, %v23174_v48 }
0x1b32   : > { %v13160_v59 = vpop.f32.mrf.mxu0 }
0x1b33   : > { %13413 = vst [vmem:[%s18492_s28 + $0x8] sm:$0xff] %v13230_v50  ;;  %v13232_v33 = vadd.f32 %v13231_v28, %v13159_v19  ;;  %v13161_v56 = vadd.f32 %v13160_v59, %v22542_v60  ;;  %v13263_v28 = vpop.f32.mrf.mxu1 }
0x1b34   : > { %v13164_v49 = vpop.f32.mrf.mxu0 }
0x1b35   : > { %13416 = vst [vmem:[%s18492_s28 + $0x20] sm:$0xff] %v13232_v33  ;;  %v13234_v43 = vadd.f32 %v13233_v20, %v13161_v56  ;;  %v13165_v30 = vadd.f32 %v13164_v49, %v22538_v15 }
0x1b36   : > { %v13166_v37 = vpop.f32.mrf.mxu0 }
0x1b37   : > { %13417 = vst [vmem:[%s18492_s28 + $0x28] sm:$0xff] %v13234_v43  ;;  %v13238_v51 = vadd.f32 %v13237_v34, %v13165_v30  ;;  %v13167_v29 = vadd.f32 %v13166_v37, %v22542_v60 }
0x1b38   : > { %v13168_v38 = vpop.f32.mrf.mxu0 }
0x1b39   : > { %13420 = vst [vmem:[%s18492_s28 + $0x40] sm:$0xff] %v13238_v51  ;;  %v13240_v47 = vadd.f32 %v13239_v25, %v13167_v29  ;;  %v13169_v0 = vadd.f32 %v13168_v38, %v22538_v15 }
0x1b3a   : > { %v13170_v27 = vpop.f32.mrf.mxu0 }
0x1b3b   : > { %13421 = vst [vmem:[%s18492_s28 + $0x48] sm:$0xff] %v13240_v47  ;;  %v13242_v46 = vadd.f32 %v13241_v58, %v13169_v0  ;;  %v13171_v16 = vadd.f32 %v13170_v27, %v22542_v60  ;;  %v23175_v58 = vld [vmem:[#allocation57_spill] sm:$0xff] }
0x1b3c   : > { %v13174_v41 = vpop.f32.mrf.mxu0  ;;  %v22580_v42 = vrot.slane %v22534_v35, %v23175_v58 }
0x1b3d   : > { %13424 = vst [vmem:[%s18492_s28 + $0x60] sm:$0xff] %v13242_v46  ;;  %v13244_v61 = vadd.f32 %v13243_v21, %v13171_v16  ;;  %v13175_v17 = vadd.f32 %v13174_v41, %v22538_v15 }
0x1b3e   : > { %v13176_v3 = vpop.f32.mrf.mxu0 }
0x1b3f   : > { %13425 = vst [vmem:[%s18492_s28 + $0x68] sm:$0xff] %v13244_v61  ;;  %v13248_v14 = vadd.f32 %v13247_v53, %v13175_v17  ;;  %v13177_v44 = vadd.f32 %v13176_v3, %v22542_v60 }
0x1b40   : > { %v13178_v24 = vpop.f32.mrf.mxu0 }
0x1b41   : > { %13428 = vst [vmem:[%s18492_s28 + $0x80] sm:$0xff] %v13248_v14  ;;  %v13250_v57 = vadd.f32 %v13249_v13, %v13177_v44  ;;  %v13179_v7 = vadd.f32 %v13178_v24, %v22538_v15 }
0x1b42   : > { %v13180_v6 = vpop.f32.mrf.mxu0 }
0x1b43   : > { %13429 = vst [vmem:[%s18492_s28 + $0x88] sm:$0xff] %v13250_v57  ;;  %v13252_v8 = vadd.f32 %v13251_v55, %v13179_v7  ;;  %v13181_v36 = vadd.f32 %v13180_v6, %v22542_v60 }
0x1b44   : > { %v13184_v5 = vpop.f32.mrf.mxu0 }
0x1b45   : > { %13432 = vst [vmem:[%s18492_s28 + $0xa0] sm:$0xff] %v13252_v8  ;;  %v13254_v12 = vadd.f32 %v13253_v40, %v13181_v36  ;;  %v13185_v2 = vadd.f32 %v13184_v5, %v22538_v15 }
0x1b46   : > { %v13186_v22 = vpop.f32.mrf.mxu0 }
0x1b47   : > { %13433 = vst [vmem:[%s18492_s28 + $0xa8] sm:$0xff] %v13254_v12  ;;  %v13258_v52 = vadd.f32 %v13257_v10, %v13185_v2  ;;  %v13187_v45 = vadd.f32 %v13186_v22, %v22542_v60 }
0x1b48   : > { %v13188_v54 = vpop.f32.mrf.mxu0 }
0x1b49   : > { %13436 = vst [vmem:[%s18492_s28 + $0xc0] sm:$0xff] %v13258_v52  ;;  %v13260_v39 = vadd.f32 %v13259_v23, %v13187_v45  ;;  %v13189_v62 = vadd.f32 %v13188_v54, %v22538_v15 }
0x1b4a   : > { %v13190_v20 = vpop.f32.mrf.mxu0 }
0x1b4b   : > { %13437 = vst [vmem:[%s18492_s28 + $0xc8] sm:$0xff] %v13260_v39  ;;  %v13262_v34 = vadd.f32 %v13261_v4, %v13189_v62  ;;  %v13191_v25 = vadd.f32 %v13190_v20, %v22542_v60 }
0x1b4c   : > { %v13373_v18 = vpop.f32.mrf.mxu0 }
0x1b4d   : > { %13440 = vst [vmem:[%s18492_s28 + $0xe0] sm:$0xff] %v13262_v34  ;;  %v13264_v15 = vadd.f32 %v13263_v28, %v13191_v25 }
0x1b4e   : > { %v13300_v21 = vpop.f32.mrf.mxu1  ;;  %v13375_v11 = vpop.f32.mrf.mxu0 }
0x1b4f   : > { %v13301_v63 = vadd.f32 %v13300_v21, %v22574_v26  ;;  %13441 = vst [vmem:[%s18492_s28 + $0xe8] sm:$0xff] %v13264_v15 }
0x1b50   : > { %v13302_v32 = vpop.f32.mrf.mxu1  ;;  %v13377_v60 = vpop.f32.mrf.mxu0 }
0x1b51   : > { %v13374_v53 = vadd.f32 %v13373_v18, %v13301_v63  ;;  %v13303_v1 = vadd.f32 %v13302_v32, %v22580_v42 }
0x1b52   : > { %v13304_v9 = vpop.f32.mrf.mxu1  ;;  %v13379_v19 = vpop.f32.mrf.mxu0 }
0x1b53   : > { %13414 = vst [vmem:[%s18492_s28 + $0x10] sm:$0xff] %v13374_v53  ;;  %v13376_v35 = vadd.f32 %v13375_v11, %v13303_v1  ;;  %v13305_v31 = vadd.f32 %v13304_v9, %v22574_v26 }
0x1b54   : > { %v13306_v50 = vpop.f32.mrf.mxu1  ;;  %v13383_v56 = vpop.f32.mrf.mxu0 }
0x1b55   : > { %13415 = vst [vmem:[%s18492_s28 + $0x18] sm:$0xff] %v13376_v35  ;;  %v13378_v59 = vadd.f32 %v13377_v60, %v13305_v31  ;;  %v13307_v13 = vadd.f32 %v13306_v50, %v22580_v42 }
0x1b56   : > { %v13310_v33 = vpop.f32.mrf.mxu1  ;;  %v13385_v37 = vpop.f32.mrf.mxu0 }
0x1b57   : > { %13418 = vst [vmem:[%s18492_s28 + $0x30] sm:$0xff] %v13378_v59  ;;  %v13380_v49 = vadd.f32 %v13379_v19, %v13307_v13  ;;  %v13311_v43 = vadd.f32 %v13310_v33, %v22574_v26 }
0x1b58   : > { %v13312_v30 = vpop.f32.mrf.mxu1  ;;  %v13387_v38 = vpop.f32.mrf.mxu0 }
0x1b59   : > { %13419 = vst [vmem:[%s18492_s28 + $0x38] sm:$0xff] %v13380_v49  ;;  %v13384_v55 = vadd.f32 %v13383_v56, %v13311_v43  ;;  %v13313_v51 = vadd.f32 %v13312_v30, %v22580_v42 }
0x1b5a   : > { %v13314_v29 = vpop.f32.mrf.mxu1  ;;  %v13389_v40 = vpop.f32.mrf.mxu0 }
0x1b5b   : > { %13422 = vst [vmem:[%s18492_s28 + $0x50] sm:$0xff] %v13384_v55  ;;  %v13386_v47 = vadd.f32 %v13385_v37, %v13313_v51  ;;  %v13315_v0 = vadd.f32 %v13314_v29, %v22574_v26 }
0x1b5c   : > { %v13316_v27 = vpop.f32.mrf.mxu1  ;;  %v13393_v61 = vpop.f32.mrf.mxu0 }
0x1b5d   : > { %13423 = vst [vmem:[%s18492_s28 + $0x58] sm:$0xff] %v13386_v47  ;;  %v13388_v46 = vadd.f32 %v13387_v38, %v13315_v0  ;;  %v13317_v16 = vadd.f32 %v13316_v27, %v22580_v42 }
0x1b5e   : > { %v13320_v41 = vpop.f32.mrf.mxu1  ;;  %v13395_v14 = vpop.f32.mrf.mxu0 }
0x1b5f   : > { %13426 = vst [vmem:[%s18492_s28 + $0x70] sm:$0xff] %v13388_v46  ;;  %v13390_v17 = vadd.f32 %v13389_v40, %v13317_v16  ;;  %v13321_v3 = vadd.f32 %v13320_v41, %v22574_v26 }
0x1b60   : > { %v13322_v10 = vpop.f32.mrf.mxu1  ;;  %v13397_v7 = vpop.f32.mrf.mxu0 }
0x1b61   : > { %13427 = vst [vmem:[%s18492_s28 + $0x78] sm:$0xff] %v13390_v17  ;;  %v13394_v44 = vadd.f32 %v13393_v61, %v13321_v3  ;;  %v13323_v24 = vadd.f32 %v13322_v10, %v22580_v42 }
0x1b62   : > { %v13324_v57 = vpop.f32.mrf.mxu1  ;;  %v13399_v36 = vpop.f32.mrf.mxu0 }
0x1b63   : > { %13430 = vst [vmem:[%s18492_s28 + $0x90] sm:$0xff] %v13394_v44  ;;  %v13396_v23 = vadd.f32 %v13395_v14, %v13323_v24  ;;  %v13325_v6 = vadd.f32 %v13324_v57, %v22574_v26 }
0x1b64   : > { %v13326_v8 = vpop.f32.mrf.mxu1  ;;  %v13403_v4 = vpop.f32.mrf.mxu0 }
0x1b65   : > { %13431 = vst [vmem:[%s18492_s28 + $0x98] sm:$0xff] %v13396_v23  ;;  %v13398_v5 = vadd.f32 %v13397_v7, %v13325_v6  ;;  %v13327_v12 = vadd.f32 %v13326_v8, %v22580_v42 }
0x1b66   : > { %v13330_v2 = vpop.f32.mrf.mxu1  ;;  %v13405_v54 = vpop.f32.mrf.mxu0 }
0x1b67   : > { %13434 = vst [vmem:[%s18492_s28 + $0xb0] sm:$0xff] %v13398_v5  ;;  %v13400_v22 = vadd.f32 %v13399_v36, %v13327_v12  ;;  %v13331_v52 = vadd.f32 %v13330_v2, %v22574_v26 }
0x1b68   : > { %v13332_v45 = vpop.f32.mrf.mxu1  ;;  %v13407_v28 = vpop.f32.mrf.mxu0 }
0x1b69   : > { %13435 = vst [vmem:[%s18492_s28 + $0xb8] sm:$0xff] %v13400_v22  ;;  %v13404_v39 = vadd.f32 %v13403_v4, %v13331_v52  ;;  %v13333_v62 = vadd.f32 %v13332_v45, %v22580_v42 }
0x1b6a   : > { %v13334_v48 = vpop.f32.mrf.mxu1  ;;  %v13409_v18 = vpop.f32.mrf.mxu0 }
0x1b6b   : > { %13438 = vst [vmem:[%s18492_s28 + $0xd0] sm:$0xff] %v13404_v39  ;;  %v13406_v20 = vadd.f32 %v13405_v54, %v13333_v62  ;;  %v13335_v34 = vadd.f32 %v13334_v48, %v22574_v26 }
0x1b6c   : > { %v13336_v25 = vpop.f32.mrf.mxu1 }
0x1b6d   : > { %13439 = vst [vmem:[%s18492_s28 + $0xd8] sm:$0xff] %v13406_v20  ;;  %v13408_v58 = vadd.f32 %v13407_v28, %v13335_v34  ;;  %v13337_v21 = vadd.f32 %v13336_v25, %v22580_v42 }
0x1b6f   : > { %13442 = vst [vmem:[%s18492_s28 + $0xf0] sm:$0xff] %v13408_v58  ;;  %v13410_v15 = vadd.f32 %v13409_v18, %v13337_v21 }
0x1b71   : > { %13443 = vst [vmem:[%s18492_s28 + $0xf8] sm:$0xff] %v13410_v15 }
0x1b72 PF: > { %s23176_s18 = sld [smem:[#allocation39_spill]]  ;;  %s13458_s15 = sshll.u32 %s18492_s28, 4  ;;  %s22623_s15 = int_to_ptr.vmem [resolvable:$true] %s13458_s15 }
0x1b73   : > { %s23178_s7 = sld [smem:[#allocation48_spill]]  ;;  %s22627_s23 = scalar_lea.sflag [#allocation5], %s935_s21 }
0x1b74   : > { %s23179_s17 = sld [smem:[#allocation107_spill]]  ;;  %s17881_s24 = scalar_lea.vmem %s22623_s15, 4096 }
0x1b75   : > { %p17882_p0 = scmp.ne.s32.totalorder %s22623_s15, %s17881_s24  ;;  %s18051_s3 = smov [#allocation24]  }
0x1b76   : > { %s17885_s12 = sshll.u32 %s18051_s3, 4  ;;  %s17886_s12 = int_to_ptr.vmem [resolvable:$false] %s17885_s12 }
0x1b77   : > { %s17887_s5 = scalar_lea.vmem %s17886_s12, 8192  ;;  %p17888_p6 = scmp.lt.s32.totalorder %s22623_s15, %s17886_s12 }
0x1b78   : > { %s14873_s27 = sshll.u32 %s23176_s18, 12  ;;  %p17889_p7 = scmp.lt.s32.totalorder %s17887_s5, %s17881_s24 }
0x1b79   : > { %p23180_p10 = scmp.ne.s32.totalorder %s23178_s7, 0 }
0x1b7a   : > { %s22620_s22 = scalar_lea.hbm %s23179_s17, %s14873_s27  ;;  %p17890_p12 = por %p17889_p7, %p17888_p6 }
0x1b7b   : > { %p17883_p1 = pnand %p17882_p0, %p23180_p10 }
0x1b7d   : > { %p17884_p2 = pneg %p17883_p1 }
0x1b7f   : > { %p17891_p13 = pnand %p17890_p12, %p17884_p2 }
0x1b81   : > { %17894 = shalt.err (!%p17891_p13)
}
0x1b82   : > { %s17895_s21 = scalar_lea.hbm %s22620_s22, 4096  ;;  %s17899_s25 = scalar_lea.hbm %s23179_s17, 8192 }
0x1b83   : > { %p17896_p4 = scmp.ne.s32.totalorder %s22620_s22, %s17895_s21  ;;  %p17900_p3 = scmp.lt.s32.totalorder %s22620_s22, %s23179_s17 }
0x1b84   : > { %p17901_p8 = scmp.lt.s32.totalorder %s17899_s25, %s17895_s21 }
0x1b85   : > { %p17897_p5 = pnand %p17896_p4, %p23180_p10 }
0x1b86   : > { %p17902_p9 = por %p17901_p8, %p17900_p3 }
0x1b87   : > { %p17898_p11 = pneg %p17897_p5 }
0x1b89   : > { %p17903_p0 = pnand %p17902_p9, %p17898_p11 }
0x1b8b   : > { %17906 = shalt.err (!%p17903_p0)
}
0x1b8c   : > { %s18052_s0 = smov 512   ;;  %s18053_s29 = smov 32  }
0x1b8d   : > { %15720 = dma.vmem_to_hbm [thread:$0]  (%p23180_p10), %s22623_s15, 4096, %s22620_s22, %s22627_s23, %s18052_s0, %s18052_s0, %s18053_s29  }
0x1b8e PF: > { %s23181_s16 = sld [smem:[#allocation41_spill]] }
0x1b8f   : > { %s23182_s18 = sld [smem:[#allocation33_spill]] }
0x1b90   : > { %s23183_s20 = sld [smem:[#allocation49_spill]] }
0x1b94   : > { %p15772_p1 = scmp.ge.s32.totalorder %s23181_s16, 2 }
0x1b95   : > { %s13473_s27 = sand.u32 1, %s23182_s18  }
0x1b96   : > { %p23184_p2 = scmp.ne.s32.totalorder %s23183_s20, 0  ;;  %s13474_s13 = scalar_lea.sflag [#allocation5], %s13473_s27 }
0x1b98   : > { %p15764_p6 = pnand %p15772_p1, %p23184_p2 }
0x1b9a   : > { %p15765_p7 = pneg %p15764_p6 }
0x1b9c   : > { %17980 = dma.done.wait (%p15765_p7), %s13474_s13, 4096  }
0x1b9d   : > { %17982 = vsyncadd (%p15765_p7), %s13474_s13, 4294963200  ;;  %s47_s28 = sadd.s32 1, %s23181_s16   ;;  %s23185_s18 = sld [smem:[#allocation34_spill]] }
0x1b9e   : > { %p44_p12 = scmp.ge.s32.totalorder %s47_s28, 14   ;;  %s23186_s19 = sld [smem:[#allocation35_spill]] }
0x1b9f   : > { %s23187_s20 = sld [smem:[#allocation47_spill]]  ;;  %s23194_s24 = smov %s18017_s26 }
0x1ba0   : > { %s23188_s21 = sld [smem:[#allocation36_spill]] }
0x1ba1   : > { %s23189_s22 = sld [smem:[#allocation37_spill]] }
0x1ba2   : > { %s23190_s23 = sld [smem:[#allocation45_spill]] }
0x1ba3   : > { %s23191_s25 = sld [smem:[#allocation40_spill]] }
0x1ba4   : > { %s23192_s7 = sld [smem:[#allocation43_spill]] }
0x1ba5   : > { %s23193_s27 = sld [smem:[#allocation44_spill]] }
0x1ba6   :  { %46 = sbr.rel (!%p44_p12) target bundleno = 31 (0x1f), region = 264 }
0x1baa   : > { %s23195_s26 = smov %s23192_s7 }
0x1bab   :  { %13479 = vsyncpa [#allocation4], 1 }
0x1bac   :  { %13481 = vsyncpa [#allocation4 + $0x1], 1 }
0x1bad   :  { %13482 = vsyncpa [#allocation7], 1 }
0x1bae   :  { %13484 = vsyncpa [#allocation7 + $0x1], 1 }
0x1baf   :  { %13485 = vsyncpa [#allocation10], 1 }
0x1bb0   :  { %13487 = vsyncpa [#allocation10 + $0x1], 1 }
0x1bb1   :  { %13488 = vsyncpa [#allocation13], 1 }
0x1bb2   :  { %13490 = vsyncpa [#allocation13 + $0x1], 1 }
0x1bb3   :  { %13491 = vsyncpa [#allocation16], 1 }
0x1bb4   :  { %13493 = vsyncpa [#allocation16 + $0x1], 1 }
0x1bb5   :  { %13494 = vsyncpa [#allocation19], 1 }
0x1bb6   :  { %13496 = vsyncpa [#allocation19 + $0x1], 1 }
0x1bb7   :  { %13497 = vsyncpa [#allocation22], 1 }
0x1bb8   :  { %13498 = vsyncpa [#allocation5], 1 }
0x1bb9   :  { %13500 = vsyncpa [#allocation5 + $0x1], 1 }

</bundles_post_ra>
